<compile_context>
chip_gen: v7x
topology: tpu7x:2x2x1
jax: 0.10.0
libtpu: 0.0.40
codegen_flags: <defaults>
</compile_context>

<pallas_src>
import functools
import math

import jax
import jax.numpy as jnp
from jax.experimental import pallas as pl
from jax.experimental.pallas import tpu as pltpu

EXPANSION = 4
BLOCKS = (3, 4, 23, 3)          # ResNet-101 Bottleneck layout
BN_EPS = 1e-5
ACT_DTYPE = jnp.bfloat16        # activation / weight dtype at kernel boundaries


def _round_up(x, m):
    return (x + m - 1) // m * m


def _pick_tile(padded, step, cap):
    """Largest multiple of `step` that is <= cap and divides `padded`."""
    start = min(cap, padded)
    for t in range(start, 0, -step):
        if padded % t == 0:
            return t
    return step


# ---------------------------------------------------------------------------
# Batched tiled matmul kernel with fused shift / residual / ReLU epilogue.
#   out[g] = [relu]( a[g] @ w[g] [+ shift[g]] [+ residual[g]] )
# Leading axis g stacks the two backbones (or is 1 for stem / FC head).
# Builders are lru_cached per signature (layer3 has 23 identical blocks) and are
# invoked from inside the single outer jax.jit.
# ---------------------------------------------------------------------------
@functools.lru_cache(maxsize=None)
def _matmul_call(G, M, K, N, tm, tk, tn, has_shift, has_res, relu, out_dtype_name):
    out_dtype = jnp.dtype(out_dtype_name)

    def kern(*refs):
        idx = 0
        a_ref = refs[idx]; idx += 1
        w_ref = refs[idx]; idx += 1
        t_ref = refs[idx] if has_shift else None; idx += int(has_shift)
        r_ref = refs[idx] if has_res else None; idx += int(has_res)
        o_ref = refs[idx]
        acc_ref = refs[idx + 1]

        k = pl.program_id(3)

        @pl.when(k == 0)
        def _():
            acc_ref[...] = jnp.zeros_like(acc_ref)

        acc_ref[...] += jnp.dot(a_ref[...], w_ref[...],
                                preferred_element_type=jnp.float32)

        @pl.when(k == pl.num_programs(3) - 1)
        def _():
            out = acc_ref[...]
            if has_shift:
                out = out + t_ref[...]
            if has_res:
                out = out + r_ref[...].astype(jnp.float32)
            if relu:
                out = jnp.maximum(out, 0.0)
            o_ref[...] = out.astype(o_ref.dtype)

    in_specs = [
        pl.BlockSpec((None, tm, tk), lambda g, i, j, k: (g, i, k)),
        pl.BlockSpec((None, tk, tn), lambda g, i, j, k: (g, k, j)),
    ]
    if has_shift:
        in_specs.append(pl.BlockSpec((None, 1, tn), lambda g, i, j, k: (g, 0, j)))
    if has_res:
        in_specs.append(pl.BlockSpec((None, tm, tn), lambda g, i, j, k: (g, i, j)))

    return pl.pallas_call(
        kern,
        out_shape=jax.ShapeDtypeStruct((G, M, N), out_dtype),
        grid=(G, M // tm, N // tn, K // tk),
        in_specs=in_specs,
        out_specs=pl.BlockSpec((None, tm, tn), lambda g, i, j, k: (g, i, j)),
        scratch_shapes=[pltpu.VMEM((tm, tn), jnp.float32)],
        compiler_params=pltpu.CompilerParams(
            dimension_semantics=("parallel", "parallel", "parallel", "arbitrary"),
            vmem_limit_bytes=48 * 1024 * 1024),
    )


def matmul_fused(a, w, shift=None, residual=None, relu=False, out_dtype=ACT_DTYPE):
    """a: (G, M, K), w: (G, K, N), shift: (G, 1, N), residual: (G, M, N)."""
    G, M, K = a.shape
    N = w.shape[2]
    Mp = _round_up(M, 16)
    Kp = _round_up(K, 128)
    Np = _round_up(N, 128)
    tm = _pick_tile(Mp, 16, 256)
    # Bigger K/N tiles: these matmuls are launch/step-overhead bound at small M,
    # not MXU bound, so fewer grid steps is the win.
    tk = _pick_tile(Kp, 128, 2048 if Mp <= 256 else 1024)
    tn = _pick_tile(Np, 128, 512)

    a = a.astype(ACT_DTYPE)
    w = w.astype(ACT_DTYPE)
    if (Mp, Kp) != (M, K):
        a = jnp.pad(a, ((0, 0), (0, Mp - M), (0, Kp - K)))
    if (Kp, Np) != (K, N):
        w = jnp.pad(w, ((0, 0), (0, Kp - K), (0, Np - N)))

    args = [a, w]
    if shift is not None:
        t = shift.astype(jnp.float32).reshape(G, 1, N)
        if Np != N:
            t = jnp.pad(t, ((0, 0), (0, 0), (0, Np - N)))
        args.append(t)
    if residual is not None:
        r = residual.astype(ACT_DTYPE)
        if (Mp, Np) != (M, N):
            r = jnp.pad(r, ((0, 0), (0, Mp - M), (0, Np - N)))
        args.append(r)

    call = _matmul_call(G, Mp, Kp, Np, tm, tk, tn,
                        shift is not None, residual is not None, bool(relu),
                        jnp.dtype(out_dtype).name)
    y = call(*args)
    if (Mp, Np) != (M, N):
        y = y[:, :M, :N]
    return y


# ---------------------------------------------------------------------------
# Small single-block CBAM kernels.  Operands at this model's tail are tiny
# (B=2, HW=4, C=512), so a single full-array VMEM block is optimal.
# ---------------------------------------------------------------------------
@functools.lru_cache(maxsize=None)
def _global_pool_call(B, HW, C):
    """Global avg + max over spatial: (B, HW, C) -> (B, C), (B, C) in f32."""
    def kern(x_ref, avg_ref, max_ref):
        x = x_ref[...].astype(jnp.float32)
        avg_ref[...] = jnp.mean(x, axis=1)
        max_ref[...] = jnp.max(x, axis=1)

    return pl.pallas_call(
        kern,
        out_shape=(jax.ShapeDtypeStruct((B, C), jnp.float32),
                   jax.ShapeDtypeStruct((B, C), jnp.float32)),
        grid=(1,),
        in_specs=[pl.BlockSpec((B, HW, C), lambda i: (0, 0, 0))],
        out_specs=(pl.BlockSpec((B, C), lambda i: (0, 0)),
                   pl.BlockSpec((B, C), lambda i: (0, 0))),
    )


@functools.lru_cache(maxsize=None)
def _cbam_mlp_call(M, C, Hp):
    """Shared CBAM MLP (fc2(relu(fc1(.)))) on the stacked avg/max descriptors.
    M is sublane-padded (8), hidden Hp is lane-padded (128) -> fully aligned dots."""
    def kern(d_ref, f1_ref, f2_ref, o_ref):
        h = jnp.maximum(jnp.dot(d_ref[...], f1_ref[...],
                                preferred_element_type=jnp.float32), 0.0)
        o_ref[...] = jnp.dot(h, f2_ref[...], preferred_element_type=jnp.float32)

    return pl.pallas_call(
        kern,
        out_shape=jax.ShapeDtypeStruct((M, C), jnp.float32),
        grid=(1,),
        in_specs=[pl.BlockSpec((M, C), lambda i: (0, 0)),
                  pl.BlockSpec((C, Hp), lambda i: (0, 0)),
                  pl.BlockSpec((Hp, C), lambda i: (0, 0))],
        out_specs=pl.BlockSpec((M, C), lambda i: (0, 0)),
    )


@functools.lru_cache(maxsize=None)
def _channel_gate_call(B, HW, C):
    """xg = x * sigmoid(att); also emit channel mean/max of xg (fused)."""
    def kern(x_ref, att_ref, xg_ref, cavg_ref, cmax_ref):
        x = x_ref[...].astype(jnp.float32)
        gate = jax.nn.sigmoid(att_ref[...])
        xg = x * gate[:, None, :]
        xg_ref[...] = xg.astype(xg_ref.dtype)
        cavg_ref[...] = jnp.mean(xg, axis=-1, keepdims=True)
        cmax_ref[...] = jnp.max(xg, axis=-1, keepdims=True)

    return pl.pallas_call(
        kern,
        out_shape=(jax.ShapeDtypeStruct((B, HW, C), ACT_DTYPE),
                   jax.ShapeDtypeStruct((B, HW, 1), jnp.float32),
                   jax.ShapeDtypeStruct((B, HW, 1), jnp.float32)),
        grid=(1,),
        in_specs=[pl.BlockSpec((B, HW, C), lambda i: (0, 0, 0)),
                  pl.BlockSpec((B, C), lambda i: (0, 0))],
        out_specs=(pl.BlockSpec((B, HW, C), lambda i: (0, 0, 0)),
                   pl.BlockSpec((B, HW, 1), lambda i: (0, 0, 0)),
                   pl.BlockSpec((B, HW, 1), lambda i: (0, 0, 0))),
    )


@functools.lru_cache(maxsize=None)
def _spatial_gate_add_call(B, HW, C):
    """x4 = x2 + xg * sigmoid(s); also emit avgpool(x4) over spatial (fused)."""
    def kern(xg_ref, s_ref, x2_ref, x4_ref, avg_ref):
        xg = xg_ref[...].astype(jnp.float32)
        x2 = x2_ref[...].astype(jnp.float32)
        x4 = x2 + xg * jax.nn.sigmoid(s_ref[...])
        x4_ref[...] = x4
        avg_ref[...] = jnp.mean(x4, axis=1)

    return pl.pallas_call(
        kern,
        out_shape=(jax.ShapeDtypeStruct((B, HW, C), jnp.float32),
                   jax.ShapeDtypeStruct((B, C), jnp.float32)),
        grid=(1,),
        in_specs=[pl.BlockSpec((B, HW, C), lambda i: (0, 0, 0)),
                  pl.BlockSpec((B, HW, 1), lambda i: (0, 0, 0)),
                  pl.BlockSpec((B, HW, C), lambda i: (0, 0, 0))],
        out_specs=(pl.BlockSpec((B, HW, C), lambda i: (0, 0, 0)),
                   pl.BlockSpec((B, C), lambda i: (0, 0))),
    )


# ---------------------------------------------------------------------------
# XLA glue (fused inside the single outer jit): im2col, maxpool tap tree.
# 1x1 convs never go through im2col.
# ---------------------------------------------------------------------------
def im2col(x, kh, kw, stride, pad):
    B, H, W, C = x.shape
    Ho = (H + 2 * pad - kh) // stride + 1
    Wo = (W + 2 * pad - kw) // stride + 1
    if pad > 0:
        x = jnp.pad(x, ((0, 0), (pad, pad), (pad, pad), (0, 0)))
    cols = []
    for dy in range(kh):
        for dx in range(kw):
            cols.append(x[:, dy:dy + stride * (Ho - 1) + 1:stride,
                          dx:dx + stride * (Wo - 1) + 1:stride, :])
    patches = jnp.stack(cols, axis=3)              # (B, Ho, Wo, kh*kw, C)
    return patches.reshape(B * Ho * Wo, kh * kw * C), Ho, Wo


def max_pool_3x3_s2(x):
    """3x3/s2/p1 max pool as a pairwise tap-max tree (fused elementwise by XLA)."""
    B, H, W, C = x.shape
    k, s, pad = 3, 2, 1
    Ho = (H + 2 * pad - k) // s + 1
    Wo = (W + 2 * pad - k) // s + 1
    xp = jnp.pad(x, ((0, 0), (pad, pad), (pad, pad), (0, 0)),
                 constant_values=float("-inf"))
    out = None
    for dy in range(k):
        for dx in range(k):
            tap = xp[:, dy:dy + s * (Ho - 1) + 1:s, dx:dx + s * (Wo - 1) + 1:s, :]
            out = tap if out is None else jnp.maximum(out, tap)
    return out


def conv_bn(xs, w, shift, kh, kw, stride, pad, relu, residual=None,
            out_dtype=ACT_DTYPE):
    """Stacked conv for both backbones: xs (G,B,H,W,C), w (G,K,N) BN-folded,
    shift (G,1,N); optional fused residual (G,B,Ho,Wo,N) and ReLU."""
    G, B = xs.shape[0], xs.shape[1]
    if kh == 1 and kw == 1:
        if stride > 1:
            xs = xs[:, :, ::stride, ::stride, :]
        Ho, Wo = xs.shape[2], xs.shape[3]
        patches = xs.reshape(G, B * Ho * Wo, xs.shape[4])
    else:
        merged = xs.reshape(G * B, *xs.shape[2:])
        pm, Ho, Wo = im2col(merged, kh, kw, stride, pad)
        patches = pm.reshape(G, B * Ho * Wo, -1)
    res = None if residual is None else residual.reshape(G, B * Ho * Wo, -1)
    y = matmul_fused(patches, w, shift=shift, residual=res, relu=relu,
                     out_dtype=out_dtype)
    return y.reshape(G, B, Ho, Wo, w.shape[2])


# ---------------------------------------------------------------------------
# Deterministic synthetic parameter init (PyTorch weights would need the same
# (kh, kw, cin) -> row permutation on load).
# ---------------------------------------------------------------------------
def make_conv(key, kh, kw, cin, cout):
    fan_in = kh * kw * cin
    return (jax.random.normal(key, (kh * kw * cin, cout), jnp.float32)
            * math.sqrt(2.0 / fan_in))


def make_bn(key, c):
    k1, k2, k3, k4 = jax.random.split(key, 4)
    gamma = 1.0 + 0.1 * jax.random.normal(k1, (c,), jnp.float32)
    beta = 0.05 * jax.random.normal(k2, (c,), jnp.float32)
    mean = 0.05 * jax.random.normal(k3, (c,), jnp.float32)
    var = 0.9 + 0.2 * jax.random.uniform(k4, (c,), jnp.float32)
    scale = gamma / jnp.sqrt(var + BN_EPS)
    shift = beta - mean * scale
    return scale.reshape(1, c), shift.reshape(1, c)


def make_linear(key, cin, cout):
    k1, k2 = jax.random.split(key)
    bound = 1.0 / math.sqrt(cin)
    w = jax.random.uniform(k1, (cin, cout), jnp.float32, -bound, bound)
    b = jax.random.uniform(k2, (1, cout), jnp.float32, -bound, bound)
    return w, b


def make_backbone(key, in_ch=3, stem=16):
    keys = jax.random.split(key, 3)
    params = {
        'conv1_w': make_conv(keys[0], 7, 7, in_ch, stem),
        'bn1': make_bn(keys[1], stem),
    }
    stages = []
    inplanes = stem
    planes_list = [stem, stem * 2, stem * 4, stem * 8]
    stage_keys = jax.random.split(keys[2], 4)
    for s_idx, (planes, nblocks, stride) in enumerate(
            zip(planes_list, BLOCKS, (1, 2, 2, 2))):
        blocks = []
        bkeys = jax.random.split(stage_keys[s_idx], nblocks)
        for b in range(nblocks):
            bk = jax.random.split(bkeys[b], 8)
            p = {
                'w1': make_conv(bk[0], 1, 1, inplanes, planes),
                'bn1': make_bn(bk[1], planes),
                'w2': make_conv(bk[2], 3, 3, planes, planes),
                'bn2': make_bn(bk[3], planes),
                'w3': make_conv(bk[4], 1, 1, planes, planes * EXPANSION),
                'bn3': make_bn(bk[5], planes * EXPANSION),
            }
            if b == 0 and (stride != 1 or inplanes != planes * EXPANSION):
                p['wd'] = make_conv(bk[6], 1, 1, inplanes, planes * EXPANSION)
                p['bnd'] = make_bn(bk[7], planes * EXPANSION)
            blocks.append(p)
            inplanes = planes * EXPANSION
        stages.append(blocks)
    params['stages'] = stages
    return params


def make_cbam(key, c, reduction=16):
    k1, k2, k3 = jax.random.split(key, 3)
    hidden = max(c // reduction, 1)
    return {
        'fc1': make_conv(k1, 1, 1, c, hidden),     # shared MLP layer 1 (no bias)
        'fc2': make_conv(k2, 1, 1, hidden, c),     # shared MLP layer 2 (no bias)
        'sconv': make_conv(k3, 7, 7, 2, 1),        # spatial-attention 7x7 conv
    }


def make_model_params(key, num_classes, num_symptom_classes, stem=16, in_ch=3):
    k1, k2, k3, k4, k5 = jax.random.split(key, 5)
    input_dim = stem * 8 * EXPANSION
    fc1_w, fc1_b = make_linear(k4, input_dim, num_classes)
    fc2_w, fc2_b = make_linear(k5, input_dim, num_symptom_classes)
    return {
        'backbone1': make_backbone(k1, in_ch, stem),
        'backbone2': make_backbone(k2, in_ch, stem),
        'cbam': make_cbam(k3, input_dim),
        'fc1_w': fc1_w, 'fc1_b': fc1_b,
        'fc2_w': fc2_w, 'fc2_b': fc2_b,
    }


def _fold(w, bn):
    scale, shift = bn                                   # (1, c), (1, c)
    return w * scale, shift


def prepare_params(params):
    """Fold BN into conv weights and stack the two backbones' weights (2, K, N)."""
    p1, p2 = params['backbone1'], params['backbone2']
    w1, t1 = _fold(p1['conv1_w'], p1['bn1'])
    w2, t2 = _fold(p2['conv1_w'], p2['bn1'])
    prep = {
        'stem_w': jnp.concatenate([w1, w2], axis=1).astype(ACT_DTYPE)[None],
        'stem_t': jnp.concatenate([t1, t2], axis=1)[None],      # (1, 1, 2*stem)
    }
    stages = []
    for s1, s2 in zip(p1['stages'], p2['stages']):
        blocks = []
        for b1, b2 in zip(s1, s2):
            blk = {}
            for wk, bk in (('w1', 'bn1'), ('w2', 'bn2'), ('w3', 'bn3')):
                wa, ta = _fold(b1[wk], b1[bk])
                wb, tb = _fold(b2[wk], b2[bk])
                blk[wk] = jnp.stack([wa, wb], axis=0).astype(ACT_DTYPE)
                blk[wk + '_t'] = jnp.stack([ta, tb], axis=0)      # (2, 1, c)
            if 'wd' in b1:
                wa, ta = _fold(b1['wd'], b1['bnd'])
                wb, tb = _fold(b2['wd'], b2['bnd'])
                blk['wd'] = jnp.stack([wa, wb], axis=0).astype(ACT_DTYPE)
                blk['wd_t'] = jnp.stack([ta, tb], axis=0)
            blocks.append(blk)
        stages.append(blocks)
    prep['stages'] = stages

    cb = params['cbam']
    hidden = cb['fc1'].shape[1]
    hp = max(_round_up(hidden, 128), 128)                # lane-pad the MLP hidden dim
    prep['cbam_fc1'] = jnp.pad(cb['fc1'], ((0, 0), (0, hp - hidden))).astype(jnp.float32)
    prep['cbam_fc2'] = jnp.pad(cb['fc2'], ((0, hp - hidden), (0, 0))).astype(jnp.float32)
    prep['cbam_sconv'] = cb['sconv'].astype(jnp.float32)          # (98, 1)

    prep['fc_w'] = jnp.concatenate([params['fc1_w'], params['fc2_w']], axis=1)[None]
    prep['fc_b'] = jnp.concatenate([params['fc1_b'], params['fc2_b']], axis=1)[None]
    return prep


# ---------------------------------------------------------------------------
# Forward passes (stacked Bottleneck / dual Backbone / CBAM / ResNet_CSRA).
# ---------------------------------------------------------------------------
def bottleneck_forward(xs, blk, stride):
    out = conv_bn(xs, blk['w1'], blk['w1_t'], 1, 1, 1, 0, True)
    out = conv_bn(out, blk['w2'], blk['w2_t'], 3, 3, stride, 1, True)
    if 'wd' in blk:
        identity = conv_bn(xs, blk['wd'], blk['wd_t'], 1, 1, stride, 0, False)
    else:
        identity = xs
    # w3 1x1 conv with fused BN-shift + residual add + ReLU epilogue.
    return conv_bn(out, blk['w3'], blk['w3_t'], 1, 1, 1, 0, True, residual=identity)


def backbones_forward(x, prep):
    """Both backbones; the stem conv + maxpool run once on concatenated channels,
    then all stages run on the (2, B, H, W, C)-stacked activations."""
    B = x.shape[0]
    patches, Ho, Wo = im2col(x, 7, 7, 2, 3)
    y = matmul_fused(patches[None], prep['stem_w'], shift=prep['stem_t'],
                     relu=True)[0]
    y = y.reshape(B, Ho, Wo, -1)
    y = max_pool_3x3_s2(y)
    c = y.shape[-1] // 2
    xs = jnp.stack([y[..., :c], y[..., c:]], axis=0)     # (2, B, H, W, stem)

    for stage_blocks, stage_stride in zip(prep['stages'], (1, 2, 2, 2)):
        for b_idx, blk in enumerate(stage_blocks):
            xs = bottleneck_forward(xs, blk, stage_stride if b_idx == 0 else 1)
    return xs[0], xs[1]


def _forward_impl(x_nchw, prep, nc, ns):
    x = jnp.transpose(x_nchw, (0, 2, 3, 1)).astype(ACT_DTYPE)     # NCHW -> NHWC
    x1, x2 = backbones_forward(x, prep)
    B, H, W, C = x1.shape
    HW = H * W
    x1f = x1.reshape(B, HW, C)
    x2f = x2.reshape(B, HW, C)

    # CBAM channel attention.  avg == avgpool1(x1) and is reused for logit1.
    avg, mx = _global_pool_call(B, HW, C)(x1f)
    desc = jnp.concatenate([avg, mx], axis=0)                     # (2B, C)
    Md = _round_up(2 * B, 8)
    desc = jnp.pad(desc, ((0, Md - 2 * B), (0, 0)))
    Hp = prep['cbam_fc1'].shape[1]
    att_both = _cbam_mlp_call(Md, C, Hp)(desc, prep['cbam_fc1'], prep['cbam_fc2'])
    att = att_both[:B] + att_both[B:2 * B]                        # MLP(avg)+MLP(max)
    xg, c_avg, c_max = _channel_gate_call(B, HW, C)(x1f, att)

    # CBAM spatial attention: 7x7 conv on (B,H,W,2) is only B*HW*98 MACs -> XLA glue.
    comp = jnp.concatenate([c_avg, c_max], axis=-1).reshape(B, H, W, 2)
    sp, _, _ = im2col(comp, 7, 7, 1, 3)
    s = jnp.dot(sp, prep['cbam_sconv']).reshape(B, HW, 1)

    # Spatial gate + (x2 + x3) residual + avgpool2 fused.
    x4f, x4_avg = _spatial_gate_add_call(B, HW, C)(xg, s, x2f)

    # Both FC heads as one lane-padded matmul on stacked pooled descriptors.
    head_in = jnp.concatenate([avg, x4_avg], axis=0)              # (2B, C)
    logits = matmul_fused(head_in[None], prep['fc_w'], shift=prep['fc_b'],
                          relu=False, out_dtype=jnp.float32)[0]
    logit1 = logits[:B, :nc]
    logit2 = logits[B:, nc:nc + ns]

    x1_nchw = jnp.transpose(x1, (0, 3, 1, 2)).astype(jnp.float32)
    x2_nchw = jnp.transpose(x2, (0, 3, 1, 2)).astype(jnp.float32)
    x4_nchw = jnp.transpose(x4f.reshape(B, H, W, C), (0, 3, 1, 2))
    return logit1, logit2, x1_nchw, x2_nchw, x4_nchw


_forward_jit = jax.jit(_forward_impl, static_argnums=(2, 3))   # single dispatch


def resnet_csra_forward(x_nchw, prep, nc, ns, flag):
    logit1, logit2, x1, x2, x4 = _forward_jit(x_nchw, prep, nc, ns)
    if flag:  # forward_train
        logit = jnp.hstack((logit1, logit2))
        return logit1, logit2, logit, x1, x2
    else:     # forward_test
        return logit2, logit1, x4


if __name__ == "__main__":
    key = jax.random.PRNGKey(0)
    kp, kx = jax.random.split(key)

    # num_heads / lam are constructor args of ResNet_CSRA but unused by forward().
    NUM_CLASSES, NUM_SYMPTOM = 5, 7
    STEM = 16                                   # scaled ResNet-101 width -> input_dim=512
    INPUT_DIM = STEM * 8 * EXPANSION
    params = make_model_params(kp, NUM_CLASSES, NUM_SYMPTOM, stem=STEM)
    prep = prepare_params(params)

    x = jax.random.normal(kx, (2, 3, 64, 64), jnp.float32)        # NCHW like PyTorch

    train_out = resnet_csra_forward(x, prep, NUM_CLASSES, NUM_SYMPTOM, flag=True)
    test_out = resnet_csra_forward(x, prep, NUM_CLASSES, NUM_SYMPTOM, flag=False)
    jax.block_until_ready(train_out)
    jax.block_until_ready(test_out)

    logit1, logit2, logit, x1, x2 = train_out
    assert logit1.shape == (2, NUM_CLASSES)
    assert logit2.shape == (2, NUM_SYMPTOM)
    assert logit.shape == (2, NUM_CLASSES + NUM_SYMPTOM)
    assert x1.shape == (2, INPUT_DIM, 2, 2)
    assert x2.shape == (2, INPUT_DIM, 2, 2)
    assert test_out[2].shape == (2, INPUT_DIM, 2, 2)
    assert all(bool(jnp.all(jnp.isfinite(o))) for o in (logit1, logit2, logit))
    print("KERNEL_OK")
</pallas_src>

<mosaic_0001>
module attributes {stable_mosaic.version = 11 : i64} {
  func.func @kern(%arg0: i32, %arg1: i32, %arg2: i32, %arg3: i32, %arg4: memref<1x256x256xbf16, #tpu.memory_space<vmem>>, %arg5: memref<1x256x128xbf16, #tpu.memory_space<vmem>>, %arg6: memref<1x1x128xf32, #tpu.memory_space<vmem>>, %arg7: memref<1x256x128xbf16, #tpu.memory_space<vmem>>, %arg8: memref<256x128xf32, #tpu.memory_space<vmem>>) attributes {dimension_semantics = [#tpu.dimension_semantics<parallel>, #tpu.dimension_semantics<parallel>, #tpu.dimension_semantics<parallel>, #tpu.dimension_semantics<arbitrary>], iteration_bounds = array<i64: 1, 8, 1, 1>, scalar_prefetch = 0 : i64, scratch_operands = 1 : i64, tpu.core_type = #tpu.core_type<tc>, window_params = [{transform_indices = @transform_0, window_bounds = array<i64: 1, 256, 256>}, {transform_indices = @transform_1, window_bounds = array<i64: 1, 256, 128>}, {transform_indices = @transform_2, window_bounds = array<i64: 1, 1, 128>}, {transform_indices = @transform_3, window_bounds = array<i64: 1, 256, 128>}]} {
    %c0_i32 = arith.constant 0 : i32
    %0 = arith.cmpi eq, %arg3, %c0_i32 : i32
    %1 = arith.extui %0 : i1 to i32
    %c0_i32_0 = arith.constant 0 : i32
    %2 = arith.cmpi ne, %1, %c0_i32_0 : i32
    scf.if %2 {
      %cst_12 = arith.constant 0.000000e+00 : f32
      %14 = vector.broadcast %cst_12 : f32 to vector<256x128xf32>
      %c0_13 = arith.constant 0 : index
      %c0_14 = arith.constant 0 : index
      %15 = vector.load %arg8[%c0_13, %c0_14] : memref<256x128xf32, #tpu.memory_space<vmem>>, vector<256x128xf32>
      tpu.vector_store %arg8[%c0_13, %c0_14], %14 {strides = array<i32>} : memref<256x128xf32, #tpu.memory_space<vmem>>, vector<256x128xf32>,
    } else {
    }
    %c0 = arith.constant 0 : index
    %c0_1 = arith.constant 0 : index
    %3 = vector.load %arg8[%c0, %c0_1] : memref<256x128xf32, #tpu.memory_space<vmem>>, vector<256x128xf32>
    %c0_2 = arith.constant 0 : index
    %c0_3 = arith.constant 0 : index
    %c0_4 = arith.constant 0 : index
    %4 = vector.load %arg4[%c0_2, %c0_3, %c0_4] : memref<1x256x256xbf16, #tpu.memory_space<vmem>>, vector<1x256x256xbf16>
    %5 = vector.shape_cast %4 : vector<1x256x256xbf16> to vector<256x256xbf16>
    %c0_5 = arith.constant 0 : index
    %c0_6 = arith.constant 0 : index
    %c0_7 = arith.constant 0 : index
    %6 = vector.load %arg5[%c0_5, %c0_6, %c0_7] : memref<1x256x128xbf16, #tpu.memory_space<vmem>>, vector<1x256x128xbf16>
    %7 = vector.shape_cast %6 : vector<1x256x128xbf16> to vector<256x128xbf16>
    %cst = arith.constant dense<0.000000e+00> : vector<256x128xf32>
    %8 = tpu.matmul %5, %7, %cst {dimension_numbers = #tpu.dot_dimension_numbers<[1], [0], [0], [1], [0, 0, 1, 1], [], []>} : vector<256x256xbf16>, vector<256x128xbf16>, vector<256x128xf32> -> vector<256x128xf32>
    %9 = arith.addf %3, %8 : vector<256x128xf32>
    %c0_8 = arith.constant 0 : index
    %c0_9 = arith.constant 0 : index
    %10 = vector.load %arg8[%c0_8, %c0_9] : memref<256x128xf32, #tpu.memory_space<vmem>>, vector<256x128xf32>
    tpu.vector_store %arg8[%c0_8, %c0_9], %9 {strides = array<i32>} : memref<256x128xf32, #tpu.memory_space<vmem>>, vector<256x128xf32>,
    %c0_i32_10 = arith.constant 0 : i32
    %11 = arith.cmpi eq, %arg3, %c0_i32_10 : i32
    %12 = arith.extui %11 : i1 to i32
    %c0_i32_11 = arith.constant 0 : i32
    %13 = arith.cmpi ne, %12, %c0_i32_11 : i32
    scf.if %13 {
      %c0_12 = arith.constant 0 : index
      %c0_13 = arith.constant 0 : index
      %14 = vector.load %arg8[%c0_12, %c0_13] : memref<256x128xf32, #tpu.memory_space<vmem>>, vector<256x128xf32>
      %c0_14 = arith.constant 0 : index
      %c0_15 = arith.constant 0 : index
      %c0_16 = arith.constant 0 : index
      %15 = vector.load %arg6[%c0_14, %c0_15, %c0_16] : memref<1x1x128xf32, #tpu.memory_space<vmem>>, vector<1x1x128xf32>
      %16 = vector.shape_cast %15 : vector<1x1x128xf32> to vector<1x128xf32>
      %17 = vector.broadcast %16 : vector<1x128xf32> to vector<256x128xf32>
      %18 = arith.addf %14, %17 : vector<256x128xf32>
      %cst_17 = arith.constant 0.000000e+00 : f32
      %19 = vector.broadcast %cst_17 : f32 to vector<256x128xf32>
      %20 = arith.maximumf %18, %19 : vector<256x128xf32>
      %21 = arith.truncf %20 : vector<256x128xf32> to vector<256x128xbf16>
      %c0_18 = arith.constant 0 : index
      %c0_19 = arith.constant 0 : index
      %c0_20 = arith.constant 0 : index
      %22 = vector.load %arg7[%c0_18, %c0_19, %c0_20] : memref<1x256x128xbf16, #tpu.memory_space<vmem>>, vector<1x256x128xbf16>
      %23 = vector.shape_cast %22 : vector<1x256x128xbf16> to vector<256x128xbf16>
      %24 = vector.shape_cast %21 : vector<256x128xbf16> to vector<1x256x128xbf16>
      tpu.vector_store %arg7[%c0_18, %c0_19, %c0_20], %24 {strides = array<i32>} : memref<1x256x128xbf16, #tpu.memory_space<vmem>>, vector<1x256x128xbf16>,
    } else {
    }
    return
  }
  func.func @transform_0(%arg0: i32, %arg1: i32, %arg2: i32, %arg3: i32) -> (i32, i32, i32) {
    %c0_i32 = arith.constant 0 : i32
    return %arg0, %arg1, %arg3 : i32, i32, i32
  }
  func.func @transform_1(%arg0: i32, %arg1: i32, %arg2: i32, %arg3: i32) -> (i32, i32, i32) {
    %c0_i32 = arith.constant 0 : i32
    return %arg0, %arg3, %arg2 : i32, i32, i32
  }
  func.func @transform_2(%arg0: i32, %arg1: i32, %arg2: i32, %arg3: i32) -> (i32, i32, i32) {
    %c0_i32 = arith.constant 0 : i32
    %c0_i32_0 = arith.constant 0 : i32
    return %arg0, %c0_i32, %arg2 : i32, i32, i32
  }
  func.func @transform_3(%arg0: i32, %arg1: i32, %arg2: i32, %arg3: i32) -> (i32, i32, i32) {
    %c0_i32 = arith.constant 0 : i32
    return %arg0, %arg1, %arg2 : i32, i32, i32
  }
}

module attributes {stable_mosaic.version = 11 : i64} {
  func.func @kern(%arg0: i32, %arg1: i32, %arg2: i32, %arg3: i32, %arg4: memref<1x256x128xbf16, #tpu.memory_space<vmem>>, %arg5: memref<1x128x128xbf16, #tpu.memory_space<vmem>>, %arg6: memref<1x1x128xf32, #tpu.memory_space<vmem>>, %arg7: memref<1x256x128xbf16, #tpu.memory_space<vmem>>, %arg8: memref<256x128xf32, #tpu.memory_space<vmem>>) attributes {dimension_semantics = [#tpu.dimension_semantics<parallel>, #tpu.dimension_semantics<parallel>, #tpu.dimension_semantics<parallel>, #tpu.dimension_semantics<arbitrary>], iteration_bounds = array<i64: 2, 2, 1, 1>, scalar_prefetch = 0 : i64, scratch_operands = 1 : i64, tpu.core_type = #tpu.core_type<tc>, window_params = [{transform_indices = @transform_0, window_bounds = array<i64: 1, 256, 128>}, {transform_indices = @transform_1, window_bounds = array<i64: 1, 128, 128>}, {transform_indices = @transform_2, window_bounds = array<i64: 1, 1, 128>}, {transform_indices = @transform_3, window_bounds = array<i64: 1, 256, 128>}]} {
    %c0_i32 = arith.constant 0 : i32
    %0 = arith.cmpi eq, %arg3, %c0_i32 : i32
    %1 = arith.extui %0 : i1 to i32
    %c0_i32_0 = arith.constant 0 : i32
    %2 = arith.cmpi ne, %1, %c0_i32_0 : i32
    scf.if %2 {
      %cst_12 = arith.constant 0.000000e+00 : f32
      %14 = vector.broadcast %cst_12 : f32 to vector<256x128xf32>
      %c0_13 = arith.constant 0 : index
      %c0_14 = arith.constant 0 : index
      %15 = vector.load %arg8[%c0_13, %c0_14] : memref<256x128xf32, #tpu.memory_space<vmem>>, vector<256x128xf32>
      tpu.vector_store %arg8[%c0_13, %c0_14], %14 {strides = array<i32>} : memref<256x128xf32, #tpu.memory_space<vmem>>, vector<256x128xf32>,
    } else {
    }
    %c0 = arith.constant 0 : index
    %c0_1 = arith.constant 0 : index
    %3 = vector.load %arg8[%c0, %c0_1] : memref<256x128xf32, #tpu.memory_space<vmem>>, vector<256x128xf32>
    %c0_2 = arith.constant 0 : index
    %c0_3 = arith.constant 0 : index
    %c0_4 = arith.constant 0 : index
    %4 = vector.load %arg4[%c0_2, %c0_3, %c0_4] : memref<1x256x128xbf16, #tpu.memory_space<vmem>>, vector<1x256x128xbf16>
    %5 = vector.shape_cast %4 : vector<1x256x128xbf16> to vector<256x128xbf16>
    %c0_5 = arith.constant 0 : index
    %c0_6 = arith.constant 0 : index
    %c0_7 = arith.constant 0 : index
    %6 = vector.load %arg5[%c0_5, %c0_6, %c0_7] : memref<1x128x128xbf16, #tpu.memory_space<vmem>>, vector<1x128x128xbf16>
    %7 = vector.shape_cast %6 : vector<1x128x128xbf16> to vector<128x128xbf16>
    %cst = arith.constant dense<0.000000e+00> : vector<256x128xf32>
    %8 = tpu.matmul %5, %7, %cst {dimension_numbers = #tpu.dot_dimension_numbers<[1], [0], [0], [1], [0, 0, 1, 1], [], []>} : vector<256x128xbf16>, vector<128x128xbf16>, vector<256x128xf32> -> vector<256x128xf32>
    %9 = arith.addf %3, %8 : vector<256x128xf32>
    %c0_8 = arith.constant 0 : index
    %c0_9 = arith.constant 0 : index
    %10 = vector.load %arg8[%c0_8, %c0_9] : memref<256x128xf32, #tpu.memory_space<vmem>>, vector<256x128xf32>
    tpu.vector_store %arg8[%c0_8, %c0_9], %9 {strides = array<i32>} : memref<256x128xf32, #tpu.memory_space<vmem>>, vector<256x128xf32>,
    %c0_i32_10 = arith.constant 0 : i32
    %11 = arith.cmpi eq, %arg3, %c0_i32_10 : i32
    %12 = arith.extui %11 : i1 to i32
    %c0_i32_11 = arith.constant 0 : i32
    %13 = arith.cmpi ne, %12, %c0_i32_11 : i32
    scf.if %13 {
      %c0_12 = arith.constant 0 : index
      %c0_13 = arith.constant 0 : index
      %14 = vector.load %arg8[%c0_12, %c0_13] : memref<256x128xf32, #tpu.memory_space<vmem>>, vector<256x128xf32>
      %c0_14 = arith.constant 0 : index
      %c0_15 = arith.constant 0 : index
      %c0_16 = arith.constant 0 : index
      %15 = vector.load %arg6[%c0_14, %c0_15, %c0_16] : memref<1x1x128xf32, #tpu.memory_space<vmem>>, vector<1x1x128xf32>
      %16 = vector.shape_cast %15 : vector<1x1x128xf32> to vector<1x128xf32>
      %17 = vector.broadcast %16 : vector<1x128xf32> to vector<256x128xf32>
      %18 = arith.addf %14, %17 : vector<256x128xf32>
      %cst_17 = arith.constant 0.000000e+00 : f32
      %19 = vector.broadcast %cst_17 : f32 to vector<256x128xf32>
      %20 = arith.maximumf %18, %19 : vector<256x128xf32>
      %21 = arith.truncf %20 : vector<256x128xf32> to vector<256x128xbf16>
      %c0_18 = arith.constant 0 : index
      %c0_19 = arith.constant 0 : index
      %c0_20 = arith.constant 0 : index
      %22 = vector.load %arg7[%c0_18, %c0_19, %c0_20] : memref<1x256x128xbf16, #tpu.memory_space<vmem>>, vector<1x256x128xbf16>
      %23 = vector.shape_cast %22 : vector<1x256x128xbf16> to vector<256x128xbf16>
      %24 = vector.shape_cast %21 : vector<256x128xbf16> to vector<1x256x128xbf16>
      tpu.vector_store %arg7[%c0_18, %c0_19, %c0_20], %24 {strides = array<i32>} : memref<1x256x128xbf16, #tpu.memory_space<vmem>>, vector<1x256x128xbf16>,
    } else {
    }
    return
  }
  func.func @transform_0(%arg0: i32, %arg1: i32, %arg2: i32, %arg3: i32) -> (i32, i32, i32) {
    %c0_i32 = arith.constant 0 : i32
    return %arg0, %arg1, %arg3 : i32, i32, i32
  }
  func.func @transform_1(%arg0: i32, %arg1: i32, %arg2: i32, %arg3: i32) -> (i32, i32, i32) {
    %c0_i32 = arith.constant 0 : i32
    return %arg0, %arg3, %arg2 : i32, i32, i32
  }
  func.func @transform_2(%arg0: i32, %arg1: i32, %arg2: i32, %arg3: i32) -> (i32, i32, i32) {
    %c0_i32 = arith.constant 0 : i32
    %c0_i32_0 = arith.constant 0 : i32
    return %arg0, %c0_i32, %arg2 : i32, i32, i32
  }
  func.func @transform_3(%arg0: i32, %arg1: i32, %arg2: i32, %arg3: i32) -> (i32, i32, i32) {
    %c0_i32 = arith.constant 0 : i32
    return %arg0, %arg1, %arg2 : i32, i32, i32
  }
}

module attributes {stable_mosaic.version = 11 : i64} {
  func.func @kern(%arg0: i32, %arg1: i32, %arg2: i32, %arg3: i32, %arg4: memref<1x256x256xbf16, #tpu.memory_space<vmem>>, %arg5: memref<1x256x128xbf16, #tpu.memory_space<vmem>>, %arg6: memref<1x1x128xf32, #tpu.memory_space<vmem>>, %arg7: memref<1x256x128xbf16, #tpu.memory_space<vmem>>, %arg8: memref<256x128xf32, #tpu.memory_space<vmem>>) attributes {dimension_semantics = [#tpu.dimension_semantics<parallel>, #tpu.dimension_semantics<parallel>, #tpu.dimension_semantics<parallel>, #tpu.dimension_semantics<arbitrary>], iteration_bounds = array<i64: 2, 2, 1, 1>, scalar_prefetch = 0 : i64, scratch_operands = 1 : i64, tpu.core_type = #tpu.core_type<tc>, window_params = [{transform_indices = @transform_0, window_bounds = array<i64: 1, 256, 256>}, {transform_indices = @transform_1, window_bounds = array<i64: 1, 256, 128>}, {transform_indices = @transform_2, window_bounds = array<i64: 1, 1, 128>}, {transform_indices = @transform_3, window_bounds = array<i64: 1, 256, 128>}]} {
    %c0_i32 = arith.constant 0 : i32
    %0 = arith.cmpi eq, %arg3, %c0_i32 : i32
    %1 = arith.extui %0 : i1 to i32
    %c0_i32_0 = arith.constant 0 : i32
    %2 = arith.cmpi ne, %1, %c0_i32_0 : i32
    scf.if %2 {
      %cst_12 = arith.constant 0.000000e+00 : f32
      %14 = vector.broadcast %cst_12 : f32 to vector<256x128xf32>
      %c0_13 = arith.constant 0 : index
      %c0_14 = arith.constant 0 : index
      %15 = vector.load %arg8[%c0_13, %c0_14] : memref<256x128xf32, #tpu.memory_space<vmem>>, vector<256x128xf32>
      tpu.vector_store %arg8[%c0_13, %c0_14], %14 {strides = array<i32>} : memref<256x128xf32, #tpu.memory_space<vmem>>, vector<256x128xf32>,
    } else {
    }
    %c0 = arith.constant 0 : index
    %c0_1 = arith.constant 0 : index
    %3 = vector.load %arg8[%c0, %c0_1] : memref<256x128xf32, #tpu.memory_space<vmem>>, vector<256x128xf32>
    %c0_2 = arith.constant 0 : index
    %c0_3 = arith.constant 0 : index
    %c0_4 = arith.constant 0 : index
    %4 = vector.load %arg4[%c0_2, %c0_3, %c0_4] : memref<1x256x256xbf16, #tpu.memory_space<vmem>>, vector<1x256x256xbf16>
    %5 = vector.shape_cast %4 : vector<1x256x256xbf16> to vector<256x256xbf16>
    %c0_5 = arith.constant 0 : index
    %c0_6 = arith.constant 0 : index
    %c0_7 = arith.constant 0 : index
    %6 = vector.load %arg5[%c0_5, %c0_6, %c0_7] : memref<1x256x128xbf16, #tpu.memory_space<vmem>>, vector<1x256x128xbf16>
    %7 = vector.shape_cast %6 : vector<1x256x128xbf16> to vector<256x128xbf16>
    %cst = arith.constant dense<0.000000e+00> : vector<256x128xf32>
    %8 = tpu.matmul %5, %7, %cst {dimension_numbers = #tpu.dot_dimension_numbers<[1], [0], [0], [1], [0, 0, 1, 1], [], []>} : vector<256x256xbf16>, vector<256x128xbf16>, vector<256x128xf32> -> vector<256x128xf32>
    %9 = arith.addf %3, %8 : vector<256x128xf32>
    %c0_8 = arith.constant 0 : index
    %c0_9 = arith.constant 0 : index
    %10 = vector.load %arg8[%c0_8, %c0_9] : memref<256x128xf32, #tpu.memory_space<vmem>>, vector<256x128xf32>
    tpu.vector_store %arg8[%c0_8, %c0_9], %9 {strides = array<i32>} : memref<256x128xf32, #tpu.memory_space<vmem>>, vector<256x128xf32>,
    %c0_i32_10 = arith.constant 0 : i32
    %11 = arith.cmpi eq, %arg3, %c0_i32_10 : i32
    %12 = arith.extui %11 : i1 to i32
    %c0_i32_11 = arith.constant 0 : i32
    %13 = arith.cmpi ne, %12, %c0_i32_11 : i32
    scf.if %13 {
      %c0_12 = arith.constant 0 : index
      %c0_13 = arith.constant 0 : index
      %14 = vector.load %arg8[%c0_12, %c0_13] : memref<256x128xf32, #tpu.memory_space<vmem>>, vector<256x128xf32>
      %c0_14 = arith.constant 0 : index
      %c0_15 = arith.constant 0 : index
      %c0_16 = arith.constant 0 : index
      %15 = vector.load %arg6[%c0_14, %c0_15, %c0_16] : memref<1x1x128xf32, #tpu.memory_space<vmem>>, vector<1x1x128xf32>
      %16 = vector.shape_cast %15 : vector<1x1x128xf32> to vector<1x128xf32>
      %17 = vector.broadcast %16 : vector<1x128xf32> to vector<256x128xf32>
      %18 = arith.addf %14, %17 : vector<256x128xf32>
      %cst_17 = arith.constant 0.000000e+00 : f32
      %19 = vector.broadcast %cst_17 : f32 to vector<256x128xf32>
      %20 = arith.maximumf %18, %19 : vector<256x128xf32>
      %21 = arith.truncf %20 : vector<256x128xf32> to vector<256x128xbf16>
      %c0_18 = arith.constant 0 : index
      %c0_19 = arith.constant 0 : index
      %c0_20 = arith.constant 0 : index
      %22 = vector.load %arg7[%c0_18, %c0_19, %c0_20] : memref<1x256x128xbf16, #tpu.memory_space<vmem>>, vector<1x256x128xbf16>
      %23 = vector.shape_cast %22 : vector<1x256x128xbf16> to vector<256x128xbf16>
      %24 = vector.shape_cast %21 : vector<256x128xbf16> to vector<1x256x128xbf16>
      tpu.vector_store %arg7[%c0_18, %c0_19, %c0_20], %24 {strides = array<i32>} : memref<1x256x128xbf16, #tpu.memory_space<vmem>>, vector<1x256x128xbf16>,
    } else {
    }
    return
  }
  func.func @transform_0(%arg0: i32, %arg1: i32, %arg2: i32, %arg3: i32) -> (i32, i32, i32) {
    %c0_i32 = arith.constant 0 : i32
    return %arg0, %arg1, %arg3 : i32, i32, i32
  }
  func.func @transform_1(%arg0: i32, %arg1: i32, %arg2: i32, %arg3: i32) -> (i32, i32, i32) {
    %c0_i32 = arith.constant 0 : i32
    return %arg0, %arg3, %arg2 : i32, i32, i32
  }
  func.func @transform_2(%arg0: i32, %arg1: i32, %arg2: i32, %arg3: i32) -> (i32, i32, i32) {
    %c0_i32 = arith.constant 0 : i32
    %c0_i32_0 = arith.constant 0 : i32
    return %arg0, %c0_i32, %arg2 : i32, i32, i32
  }
  func.func @transform_3(%arg0: i32, %arg1: i32, %arg2: i32, %arg3: i32) -> (i32, i32, i32) {
    %c0_i32 = arith.constant 0 : i32
    return %arg0, %arg1, %arg2 : i32, i32, i32
  }
}

module attributes {stable_mosaic.version = 11 : i64} {
  func.func @kern(%arg0: i32, %arg1: i32, %arg2: i32, %arg3: i32, %arg4: memref<1x256x128xbf16, #tpu.memory_space<vmem>>, %arg5: memref<1x128x128xbf16, #tpu.memory_space<vmem>>, %arg6: memref<1x1x128xf32, #tpu.memory_space<vmem>>, %arg7: memref<1x256x128xbf16, #tpu.memory_space<vmem>>, %arg8: memref<256x128xf32, #tpu.memory_space<vmem>>) attributes {dimension_semantics = [#tpu.dimension_semantics<parallel>, #tpu.dimension_semantics<parallel>, #tpu.dimension_semantics<parallel>, #tpu.dimension_semantics<arbitrary>], iteration_bounds = array<i64: 2, 2, 1, 1>, scalar_prefetch = 0 : i64, scratch_operands = 1 : i64, tpu.core_type = #tpu.core_type<tc>, window_params = [{transform_indices = @transform_0, window_bounds = array<i64: 1, 256, 128>}, {transform_indices = @transform_1, window_bounds = array<i64: 1, 128, 128>}, {transform_indices = @transform_2, window_bounds = array<i64: 1, 1, 128>}, {transform_indices = @transform_3, window_bounds = array<i64: 1, 256, 128>}]} {
    %c0_i32 = arith.constant 0 : i32
    %0 = arith.cmpi eq, %arg3, %c0_i32 : i32
    %1 = arith.extui %0 : i1 to i32
    %c0_i32_0 = arith.constant 0 : i32
    %2 = arith.cmpi ne, %1, %c0_i32_0 : i32
    scf.if %2 {
      %cst_12 = arith.constant 0.000000e+00 : f32
      %14 = vector.broadcast %cst_12 : f32 to vector<256x128xf32>
      %c0_13 = arith.constant 0 : index
      %c0_14 = arith.constant 0 : index
      %15 = vector.load %arg8[%c0_13, %c0_14] : memref<256x128xf32, #tpu.memory_space<vmem>>, vector<256x128xf32>
      tpu.vector_store %arg8[%c0_13, %c0_14], %14 {strides = array<i32>} : memref<256x128xf32, #tpu.memory_space<vmem>>, vector<256x128xf32>,
    } else {
    }
    %c0 = arith.constant 0 : index
    %c0_1 = arith.constant 0 : index
    %3 = vector.load %arg8[%c0, %c0_1] : memref<256x128xf32, #tpu.memory_space<vmem>>, vector<256x128xf32>
    %c0_2 = arith.constant 0 : index
    %c0_3 = arith.constant 0 : index
    %c0_4 = arith.constant 0 : index
    %4 = vector.load %arg4[%c0_2, %c0_3, %c0_4] : memref<1x256x128xbf16, #tpu.memory_space<vmem>>, vector<1x256x128xbf16>
    %5 = vector.shape_cast %4 : vector<1x256x128xbf16> to vector<256x128xbf16>
    %c0_5 = arith.constant 0 : index
    %c0_6 = arith.constant 0 : index
    %c0_7 = arith.constant 0 : index
    %6 = vector.load %arg5[%c0_5, %c0_6, %c0_7] : memref<1x128x128xbf16, #tpu.memory_space<vmem>>, vector<1x128x128xbf16>
    %7 = vector.shape_cast %6 : vector<1x128x128xbf16> to vector<128x128xbf16>
    %cst = arith.constant dense<0.000000e+00> : vector<256x128xf32>
    %8 = tpu.matmul %5, %7, %cst {dimension_numbers = #tpu.dot_dimension_numbers<[1], [0], [0], [1], [0, 0, 1, 1], [], []>} : vector<256x128xbf16>, vector<128x128xbf16>, vector<256x128xf32> -> vector<256x128xf32>
    %9 = arith.addf %3, %8 : vector<256x128xf32>
    %c0_8 = arith.constant 0 : index
    %c0_9 = arith.constant 0 : index
    %10 = vector.load %arg8[%c0_8, %c0_9] : memref<256x128xf32, #tpu.memory_space<vmem>>, vector<256x128xf32>
    tpu.vector_store %arg8[%c0_8, %c0_9], %9 {strides = array<i32>} : memref<256x128xf32, #tpu.memory_space<vmem>>, vector<256x128xf32>,
    %c0_i32_10 = arith.constant 0 : i32
    %11 = arith.cmpi eq, %arg3, %c0_i32_10 : i32
    %12 = arith.extui %11 : i1 to i32
    %c0_i32_11 = arith.constant 0 : i32
    %13 = arith.cmpi ne, %12, %c0_i32_11 : i32
    scf.if %13 {
      %c0_12 = arith.constant 0 : index
      %c0_13 = arith.constant 0 : index
      %14 = vector.load %arg8[%c0_12, %c0_13] : memref<256x128xf32, #tpu.memory_space<vmem>>, vector<256x128xf32>
      %c0_14 = arith.constant 0 : index
      %c0_15 = arith.constant 0 : index
      %c0_16 = arith.constant 0 : index
      %15 = vector.load %arg6[%c0_14, %c0_15, %c0_16] : memref<1x1x128xf32, #tpu.memory_space<vmem>>, vector<1x1x128xf32>
      %16 = vector.shape_cast %15 : vector<1x1x128xf32> to vector<1x128xf32>
      %17 = vector.broadcast %16 : vector<1x128xf32> to vector<256x128xf32>
      %18 = arith.addf %14, %17 : vector<256x128xf32>
      %19 = arith.truncf %18 : vector<256x128xf32> to vector<256x128xbf16>
      %c0_17 = arith.constant 0 : index
      %c0_18 = arith.constant 0 : index
      %c0_19 = arith.constant 0 : index
      %20 = vector.load %arg7[%c0_17, %c0_18, %c0_19] : memref<1x256x128xbf16, #tpu.memory_space<vmem>>, vector<1x256x128xbf16>
      %21 = vector.shape_cast %20 : vector<1x256x128xbf16> to vector<256x128xbf16>
      %22 = vector.shape_cast %19 : vector<256x128xbf16> to vector<1x256x128xbf16>
      tpu.vector_store %arg7[%c0_17, %c0_18, %c0_19], %22 {strides = array<i32>} : memref<1x256x128xbf16, #tpu.memory_space<vmem>>, vector<1x256x128xbf16>,
    } else {
    }
    return
  }
  func.func @transform_0(%arg0: i32, %arg1: i32, %arg2: i32, %arg3: i32) -> (i32, i32, i32) {
    %c0_i32 = arith.constant 0 : i32
    return %arg0, %arg1, %arg3 : i32, i32, i32
  }
  func.func @transform_1(%arg0: i32, %arg1: i32, %arg2: i32, %arg3: i32) -> (i32, i32, i32) {
    %c0_i32 = arith.constant 0 : i32
    return %arg0, %arg3, %arg2 : i32, i32, i32
  }
  func.func @transform_2(%arg0: i32, %arg1: i32, %arg2: i32, %arg3: i32) -> (i32, i32, i32) {
    %c0_i32 = arith.constant 0 : i32
    %c0_i32_0 = arith.constant 0 : i32
    return %arg0, %c0_i32, %arg2 : i32, i32, i32
  }
  func.func @transform_3(%arg0: i32, %arg1: i32, %arg2: i32, %arg3: i32) -> (i32, i32, i32) {
    %c0_i32 = arith.constant 0 : i32
    return %arg0, %arg1, %arg2 : i32, i32, i32
  }
}

module attributes {stable_mosaic.version = 11 : i64} {
  func.func @kern(%arg0: i32, %arg1: i32, %arg2: i32, %arg3: i32, %arg4: memref<1x256x128xbf16, #tpu.memory_space<vmem>>, %arg5: memref<1x128x128xbf16, #tpu.memory_space<vmem>>, %arg6: memref<1x1x128xf32, #tpu.memory_space<vmem>>, %arg7: memref<1x256x128xbf16, #tpu.memory_space<vmem>>, %arg8: memref<1x256x128xbf16, #tpu.memory_space<vmem>>, %arg9: memref<256x128xf32, #tpu.memory_space<vmem>>) attributes {dimension_semantics = [#tpu.dimension_semantics<parallel>, #tpu.dimension_semantics<parallel>, #tpu.dimension_semantics<parallel>, #tpu.dimension_semantics<arbitrary>], iteration_bounds = array<i64: 2, 2, 1, 1>, scalar_prefetch = 0 : i64, scratch_operands = 1 : i64, tpu.core_type = #tpu.core_type<tc>, window_params = [{transform_indices = @transform_0, window_bounds = array<i64: 1, 256, 128>}, {transform_indices = @transform_1, window_bounds = array<i64: 1, 128, 128>}, {transform_indices = @transform_2, window_bounds = array<i64: 1, 1, 128>}, {transform_indices = @transform_3, window_bounds = array<i64: 1, 256, 128>}, {transform_indices = @transform_4, window_bounds = array<i64: 1, 256, 128>}]} {
    %c0_i32 = arith.constant 0 : i32
    %0 = arith.cmpi eq, %arg3, %c0_i32 : i32
    %1 = arith.extui %0 : i1 to i32
    %c0_i32_0 = arith.constant 0 : i32
    %2 = arith.cmpi ne, %1, %c0_i32_0 : i32
    scf.if %2 {
      %cst_12 = arith.constant 0.000000e+00 : f32
      %14 = vector.broadcast %cst_12 : f32 to vector<256x128xf32>
      %c0_13 = arith.constant 0 : index
      %c0_14 = arith.constant 0 : index
      %15 = vector.load %arg9[%c0_13, %c0_14] : memref<256x128xf32, #tpu.memory_space<vmem>>, vector<256x128xf32>
      tpu.vector_store %arg9[%c0_13, %c0_14], %14 {strides = array<i32>} : memref<256x128xf32, #tpu.memory_space<vmem>>, vector<256x128xf32>,
    } else {
    }
    %c0 = arith.constant 0 : index
    %c0_1 = arith.constant 0 : index
    %3 = vector.load %arg9[%c0, %c0_1] : memref<256x128xf32, #tpu.memory_space<vmem>>, vector<256x128xf32>
    %c0_2 = arith.constant 0 : index
    %c0_3 = arith.constant 0 : index
    %c0_4 = arith.constant 0 : index
    %4 = vector.load %arg4[%c0_2, %c0_3, %c0_4] : memref<1x256x128xbf16, #tpu.memory_space<vmem>>, vector<1x256x128xbf16>
    %5 = vector.shape_cast %4 : vector<1x256x128xbf16> to vector<256x128xbf16>
    %c0_5 = arith.constant 0 : index
    %c0_6 = arith.constant 0 : index
    %c0_7 = arith.constant 0 : index
    %6 = vector.load %arg5[%c0_5, %c0_6, %c0_7] : memref<1x128x128xbf16, #tpu.memory_space<vmem>>, vector<1x128x128xbf16>
    %7 = vector.shape_cast %6 : vector<1x128x128xbf16> to vector<128x128xbf16>
    %cst = arith.constant dense<0.000000e+00> : vector<256x128xf32>
    %8 = tpu.matmul %5, %7, %cst {dimension_numbers = #tpu.dot_dimension_numbers<[1], [0], [0], [1], [0, 0, 1, 1], [], []>} : vector<256x128xbf16>, vector<128x128xbf16>, vector<256x128xf32> -> vector<256x128xf32>
    %9 = arith.addf %3, %8 : vector<256x128xf32>
    %c0_8 = arith.constant 0 : index
    %c0_9 = arith.constant 0 : index
    %10 = vector.load %arg9[%c0_8, %c0_9] : memref<256x128xf32, #tpu.memory_space<vmem>>, vector<256x128xf32>
    tpu.vector_store %arg9[%c0_8, %c0_9], %9 {strides = array<i32>} : memref<256x128xf32, #tpu.memory_space<vmem>>, vector<256x128xf32>,
    %c0_i32_10 = arith.constant 0 : i32
    %11 = arith.cmpi eq, %arg3, %c0_i32_10 : i32
    %12 = arith.extui %11 : i1 to i32
    %c0_i32_11 = arith.constant 0 : i32
    %13 = arith.cmpi ne, %12, %c0_i32_11 : i32
    scf.if %13 {
      %c0_12 = arith.constant 0 : index
      %c0_13 = arith.constant 0 : index
      %14 = vector.load %arg9[%c0_12, %c0_13] : memref<256x128xf32, #tpu.memory_space<vmem>>, vector<256x128xf32>
      %c0_14 = arith.constant 0 : index
      %c0_15 = arith.constant 0 : index
      %c0_16 = arith.constant 0 : index
      %15 = vector.load %arg6[%c0_14, %c0_15, %c0_16] : memref<1x1x128xf32, #tpu.memory_space<vmem>>, vector<1x1x128xf32>
      %16 = vector.shape_cast %15 : vector<1x1x128xf32> to vector<1x128xf32>
      %17 = vector.broadcast %16 : vector<1x128xf32> to vector<256x128xf32>
      %18 = arith.addf %14, %17 : vector<256x128xf32>
      %c0_17 = arith.constant 0 : index
      %c0_18 = arith.constant 0 : index
      %c0_19 = arith.constant 0 : index
      %19 = vector.load %arg7[%c0_17, %c0_18, %c0_19] : memref<1x256x128xbf16, #tpu.memory_space<vmem>>, vector<1x256x128xbf16>
      %20 = vector.shape_cast %19 : vector<1x256x128xbf16> to vector<256x128xbf16>
      %21 = arith.extf %20 : vector<256x128xbf16> to vector<256x128xf32>
      %22 = arith.addf %18, %21 : vector<256x128xf32>
      %cst_20 = arith.constant 0.000000e+00 : f32
      %23 = vector.broadcast %cst_20 : f32 to vector<256x128xf32>
      %24 = arith.maximumf %22, %23 : vector<256x128xf32>
      %25 = arith.truncf %24 : vector<256x128xf32> to vector<256x128xbf16>
      %c0_21 = arith.constant 0 : index
      %c0_22 = arith.constant 0 : index
      %c0_23 = arith.constant 0 : index
      %26 = vector.load %arg8[%c0_21, %c0_22, %c0_23] : memref<1x256x128xbf16, #tpu.memory_space<vmem>>, vector<1x256x128xbf16>
      %27 = vector.shape_cast %26 : vector<1x256x128xbf16> to vector<256x128xbf16>
      %28 = vector.shape_cast %25 : vector<256x128xbf16> to vector<1x256x128xbf16>
      tpu.vector_store %arg8[%c0_21, %c0_22, %c0_23], %28 {strides = array<i32>} : memref<1x256x128xbf16, #tpu.memory_space<vmem>>, vector<1x256x128xbf16>,
    } else {
    }
    return
  }
  func.func @transform_0(%arg0: i32, %arg1: i32, %arg2: i32, %arg3: i32) -> (i32, i32, i32) {
    %c0_i32 = arith.constant 0 : i32
    return %arg0, %arg1, %arg3 : i32, i32, i32
  }
  func.func @transform_1(%arg0: i32, %arg1: i32, %arg2: i32, %arg3: i32) -> (i32, i32, i32) {
    %c0_i32 = arith.constant 0 : i32
    return %arg0, %arg3, %arg2 : i32, i32, i32
  }
  func.func @transform_2(%arg0: i32, %arg1: i32, %arg2: i32, %arg3: i32) -> (i32, i32, i32) {
    %c0_i32 = arith.constant 0 : i32
    %c0_i32_0 = arith.constant 0 : i32
    return %arg0, %c0_i32, %arg2 : i32, i32, i32
  }
  func.func @transform_3(%arg0: i32, %arg1: i32, %arg2: i32, %arg3: i32) -> (i32, i32, i32) {
    %c0_i32 = arith.constant 0 : i32
    return %arg0, %arg1, %arg2 : i32, i32, i32
  }
  func.func @transform_4(%arg0: i32, %arg1: i32, %arg2: i32, %arg3: i32) -> (i32, i32, i32) {
    %c0_i32 = arith.constant 0 : i32
    return %arg0, %arg1, %arg2 : i32, i32, i32
  }
}

module attributes {stable_mosaic.version = 11 : i64} {
  func.func @kern(%arg0: i32, %arg1: i32, %arg2: i32, %arg3: i32, %arg4: memref<1x128x384xbf16, #tpu.memory_space<vmem>>, %arg5: memref<1x384x128xbf16, #tpu.memory_space<vmem>>, %arg6: memref<1x1x128xf32, #tpu.memory_space<vmem>>, %arg7: memref<1x128x128xbf16, #tpu.memory_space<vmem>>, %arg8: memref<128x128xf32, #tpu.memory_space<vmem>>) attributes {dimension_semantics = [#tpu.dimension_semantics<parallel>, #tpu.dimension_semantics<parallel>, #tpu.dimension_semantics<parallel>, #tpu.dimension_semantics<arbitrary>], iteration_bounds = array<i64: 2, 1, 1, 1>, scalar_prefetch = 0 : i64, scratch_operands = 1 : i64, tpu.core_type = #tpu.core_type<tc>, window_params = [{transform_indices = @transform_0, window_bounds = array<i64: 1, 128, 384>}, {transform_indices = @transform_1, window_bounds = array<i64: 1, 384, 128>}, {transform_indices = @transform_2, window_bounds = array<i64: 1, 1, 128>}, {transform_indices = @transform_3, window_bounds = array<i64: 1, 128, 128>}]} {
    %c0_i32 = arith.constant 0 : i32
    %0 = arith.cmpi eq, %arg3, %c0_i32 : i32
    %1 = arith.extui %0 : i1 to i32
    %c0_i32_0 = arith.constant 0 : i32
    %2 = arith.cmpi ne, %1, %c0_i32_0 : i32
    scf.if %2 {
      %cst_12 = arith.constant 0.000000e+00 : f32
      %14 = vector.broadcast %cst_12 : f32 to vector<128x128xf32>
      %c0_13 = arith.constant 0 : index
      %c0_14 = arith.constant 0 : index
      %15 = vector.load %arg8[%c0_13, %c0_14] : memref<128x128xf32, #tpu.memory_space<vmem>>, vector<128x128xf32>
      tpu.vector_store %arg8[%c0_13, %c0_14], %14 {strides = array<i32>} : memref<128x128xf32, #tpu.memory_space<vmem>>, vector<128x128xf32>,
    } else {
    }
    %c0 = arith.constant 0 : index
    %c0_1 = arith.constant 0 : index
    %3 = vector.load %arg8[%c0, %c0_1] : memref<128x128xf32, #tpu.memory_space<vmem>>, vector<128x128xf32>
    %c0_2 = arith.constant 0 : index
    %c0_3 = arith.constant 0 : index
    %c0_4 = arith.constant 0 : index
    %4 = vector.load %arg4[%c0_2, %c0_3, %c0_4] : memref<1x128x384xbf16, #tpu.memory_space<vmem>>, vector<1x128x384xbf16>
    %5 = vector.shape_cast %4 : vector<1x128x384xbf16> to vector<128x384xbf16>
    %c0_5 = arith.constant 0 : index
    %c0_6 = arith.constant 0 : index
    %c0_7 = arith.constant 0 : index
    %6 = vector.load %arg5[%c0_5, %c0_6, %c0_7] : memref<1x384x128xbf16, #tpu.memory_space<vmem>>, vector<1x384x128xbf16>
    %7 = vector.shape_cast %6 : vector<1x384x128xbf16> to vector<384x128xbf16>
    %cst = arith.constant dense<0.000000e+00> : vector<128x128xf32>
    %8 = tpu.matmul %5, %7, %cst {dimension_numbers = #tpu.dot_dimension_numbers<[1], [0], [0], [1], [0, 0, 1, 1], [], []>} : vector<128x384xbf16>, vector<384x128xbf16>, vector<128x128xf32> -> vector<128x128xf32>
    %9 = arith.addf %3, %8 : vector<128x128xf32>
    %c0_8 = arith.constant 0 : index
    %c0_9 = arith.constant 0 : index
    %10 = vector.load %arg8[%c0_8, %c0_9] : memref<128x128xf32, #tpu.memory_space<vmem>>, vector<128x128xf32>
    tpu.vector_store %arg8[%c0_8, %c0_9], %9 {strides = array<i32>} : memref<128x128xf32, #tpu.memory_space<vmem>>, vector<128x128xf32>,
    %c0_i32_10 = arith.constant 0 : i32
    %11 = arith.cmpi eq, %arg3, %c0_i32_10 : i32
    %12 = arith.extui %11 : i1 to i32
    %c0_i32_11 = arith.constant 0 : i32
    %13 = arith.cmpi ne, %12, %c0_i32_11 : i32
    scf.if %13 {
      %c0_12 = arith.constant 0 : index
      %c0_13 = arith.constant 0 : index
      %14 = vector.load %arg8[%c0_12, %c0_13] : memref<128x128xf32, #tpu.memory_space<vmem>>, vector<128x128xf32>
      %c0_14 = arith.constant 0 : index
      %c0_15 = arith.constant 0 : index
      %c0_16 = arith.constant 0 : index
      %15 = vector.load %arg6[%c0_14, %c0_15, %c0_16] : memref<1x1x128xf32, #tpu.memory_space<vmem>>, vector<1x1x128xf32>
      %16 = vector.shape_cast %15 : vector<1x1x128xf32> to vector<1x128xf32>
      %17 = vector.broadcast %16 : vector<1x128xf32> to vector<128x128xf32>
      %18 = arith.addf %14, %17 : vector<128x128xf32>
      %cst_17 = arith.constant 0.000000e+00 : f32
      %19 = vector.broadcast %cst_17 : f32 to vector<128x128xf32>
      %20 = arith.maximumf %18, %19 : vector<128x128xf32>
      %21 = arith.truncf %20 : vector<128x128xf32> to vector<128x128xbf16>
      %c0_18 = arith.constant 0 : index
      %c0_19 = arith.constant 0 : index
      %c0_20 = arith.constant 0 : index
      %22 = vector.load %arg7[%c0_18, %c0_19, %c0_20] : memref<1x128x128xbf16, #tpu.memory_space<vmem>>, vector<1x128x128xbf16>
      %23 = vector.shape_cast %22 : vector<1x128x128xbf16> to vector<128x128xbf16>
      %24 = vector.shape_cast %21 : vector<128x128xbf16> to vector<1x128x128xbf16>
      tpu.vector_store %arg7[%c0_18, %c0_19, %c0_20], %24 {strides = array<i32>} : memref<1x128x128xbf16, #tpu.memory_space<vmem>>, vector<1x128x128xbf16>,
    } else {
    }
    return
  }
  func.func @transform_0(%arg0: i32, %arg1: i32, %arg2: i32, %arg3: i32) -> (i32, i32, i32) {
    %c0_i32 = arith.constant 0 : i32
    return %arg0, %arg1, %arg3 : i32, i32, i32
  }
  func.func @transform_1(%arg0: i32, %arg1: i32, %arg2: i32, %arg3: i32) -> (i32, i32, i32) {
    %c0_i32 = arith.constant 0 : i32
    return %arg0, %arg3, %arg2 : i32, i32, i32
  }
  func.func @transform_2(%arg0: i32, %arg1: i32, %arg2: i32, %arg3: i32) -> (i32, i32, i32) {
    %c0_i32 = arith.constant 0 : i32
    %c0_i32_0 = arith.constant 0 : i32
    return %arg0, %c0_i32, %arg2 : i32, i32, i32
  }
  func.func @transform_3(%arg0: i32, %arg1: i32, %arg2: i32, %arg3: i32) -> (i32, i32, i32) {
    %c0_i32 = arith.constant 0 : i32
    return %arg0, %arg1, %arg2 : i32, i32, i32
  }
}

module attributes {stable_mosaic.version = 11 : i64} {
  func.func @kern(%arg0: i32, %arg1: i32, %arg2: i32, %arg3: i32, %arg4: memref<1x128x128xbf16, #tpu.memory_space<vmem>>, %arg5: memref<1x128x128xbf16, #tpu.memory_space<vmem>>, %arg6: memref<1x1x128xf32, #tpu.memory_space<vmem>>, %arg7: memref<1x128x128xbf16, #tpu.memory_space<vmem>>, %arg8: memref<128x128xf32, #tpu.memory_space<vmem>>) attributes {dimension_semantics = [#tpu.dimension_semantics<parallel>, #tpu.dimension_semantics<parallel>, #tpu.dimension_semantics<parallel>, #tpu.dimension_semantics<arbitrary>], iteration_bounds = array<i64: 2, 1, 1, 1>, scalar_prefetch = 0 : i64, scratch_operands = 1 : i64, tpu.core_type = #tpu.core_type<tc>, window_params = [{transform_indices = @transform_0, window_bounds = array<i64: 1, 128, 128>}, {transform_indices = @transform_1, window_bounds = array<i64: 1, 128, 128>}, {transform_indices = @transform_2, window_bounds = array<i64: 1, 1, 128>}, {transform_indices = @transform_3, window_bounds = array<i64: 1, 128, 128>}]} {
    %c0_i32 = arith.constant 0 : i32
    %0 = arith.cmpi eq, %arg3, %c0_i32 : i32
    %1 = arith.extui %0 : i1 to i32
    %c0_i32_0 = arith.constant 0 : i32
    %2 = arith.cmpi ne, %1, %c0_i32_0 : i32
    scf.if %2 {
      %cst_12 = arith.constant 0.000000e+00 : f32
      %14 = vector.broadcast %cst_12 : f32 to vector<128x128xf32>
      %c0_13 = arith.constant 0 : index
      %c0_14 = arith.constant 0 : index
      %15 = vector.load %arg8[%c0_13, %c0_14] : memref<128x128xf32, #tpu.memory_space<vmem>>, vector<128x128xf32>
      tpu.vector_store %arg8[%c0_13, %c0_14], %14 {strides = array<i32>} : memref<128x128xf32, #tpu.memory_space<vmem>>, vector<128x128xf32>,
    } else {
    }
    %c0 = arith.constant 0 : index
    %c0_1 = arith.constant 0 : index
    %3 = vector.load %arg8[%c0, %c0_1] : memref<128x128xf32, #tpu.memory_space<vmem>>, vector<128x128xf32>
    %c0_2 = arith.constant 0 : index
    %c0_3 = arith.constant 0 : index
    %c0_4 = arith.constant 0 : index
    %4 = vector.load %arg4[%c0_2, %c0_3, %c0_4] : memref<1x128x128xbf16, #tpu.memory_space<vmem>>, vector<1x128x128xbf16>
    %5 = vector.shape_cast %4 : vector<1x128x128xbf16> to vector<128x128xbf16>
    %c0_5 = arith.constant 0 : index
    %c0_6 = arith.constant 0 : index
    %c0_7 = arith.constant 0 : index
    %6 = vector.load %arg5[%c0_5, %c0_6, %c0_7] : memref<1x128x128xbf16, #tpu.memory_space<vmem>>, vector<1x128x128xbf16>
    %7 = vector.shape_cast %6 : vector<1x128x128xbf16> to vector<128x128xbf16>
    %cst = arith.constant dense<0.000000e+00> : vector<128x128xf32>
    %8 = tpu.matmul %5, %7, %cst {dimension_numbers = #tpu.dot_dimension_numbers<[1], [0], [0], [1], [0, 0, 1, 1], [], []>} : vector<128x128xbf16>, vector<128x128xbf16>, vector<128x128xf32> -> vector<128x128xf32>
    %9 = arith.addf %3, %8 : vector<128x128xf32>
    %c0_8 = arith.constant 0 : index
    %c0_9 = arith.constant 0 : index
    %10 = vector.load %arg8[%c0_8, %c0_9] : memref<128x128xf32, #tpu.memory_space<vmem>>, vector<128x128xf32>
    tpu.vector_store %arg8[%c0_8, %c0_9], %9 {strides = array<i32>} : memref<128x128xf32, #tpu.memory_space<vmem>>, vector<128x128xf32>,
    %c0_i32_10 = arith.constant 0 : i32
    %11 = arith.cmpi eq, %arg3, %c0_i32_10 : i32
    %12 = arith.extui %11 : i1 to i32
    %c0_i32_11 = arith.constant 0 : i32
    %13 = arith.cmpi ne, %12, %c0_i32_11 : i32
    scf.if %13 {
      %c0_12 = arith.constant 0 : index
      %c0_13 = arith.constant 0 : index
      %14 = vector.load %arg8[%c0_12, %c0_13] : memref<128x128xf32, #tpu.memory_space<vmem>>, vector<128x128xf32>
      %c0_14 = arith.constant 0 : index
      %c0_15 = arith.constant 0 : index
      %c0_16 = arith.constant 0 : index
      %15 = vector.load %arg6[%c0_14, %c0_15, %c0_16] : memref<1x1x128xf32, #tpu.memory_space<vmem>>, vector<1x1x128xf32>
      %16 = vector.shape_cast %15 : vector<1x1x128xf32> to vector<1x128xf32>
      %17 = vector.broadcast %16 : vector<1x128xf32> to vector<128x128xf32>
      %18 = arith.addf %14, %17 : vector<128x128xf32>
      %19 = arith.truncf %18 : vector<128x128xf32> to vector<128x128xbf16>
      %c0_17 = arith.constant 0 : index
      %c0_18 = arith.constant 0 : index
      %c0_19 = arith.constant 0 : index
      %20 = vector.load %arg7[%c0_17, %c0_18, %c0_19] : memref<1x128x128xbf16, #tpu.memory_space<vmem>>, vector<1x128x128xbf16>
      %21 = vector.shape_cast %20 : vector<1x128x128xbf16> to vector<128x128xbf16>
      %22 = vector.shape_cast %19 : vector<128x128xbf16> to vector<1x128x128xbf16>
      tpu.vector_store %arg7[%c0_17, %c0_18, %c0_19], %22 {strides = array<i32>} : memref<1x128x128xbf16, #tpu.memory_space<vmem>>, vector<1x128x128xbf16>,
    } else {
    }
    return
  }
  func.func @transform_0(%arg0: i32, %arg1: i32, %arg2: i32, %arg3: i32) -> (i32, i32, i32) {
    %c0_i32 = arith.constant 0 : i32
    return %arg0, %arg1, %arg3 : i32, i32, i32
  }
  func.func @transform_1(%arg0: i32, %arg1: i32, %arg2: i32, %arg3: i32) -> (i32, i32, i32) {
    %c0_i32 = arith.constant 0 : i32
    return %arg0, %arg3, %arg2 : i32, i32, i32
  }
  func.func @transform_2(%arg0: i32, %arg1: i32, %arg2: i32, %arg3: i32) -> (i32, i32, i32) {
    %c0_i32 = arith.constant 0 : i32
    %c0_i32_0 = arith.constant 0 : i32
    return %arg0, %c0_i32, %arg2 : i32, i32, i32
  }
  func.func @transform_3(%arg0: i32, %arg1: i32, %arg2: i32, %arg3: i32) -> (i32, i32, i32) {
    %c0_i32 = arith.constant 0 : i32
    return %arg0, %arg1, %arg2 : i32, i32, i32
  }
}

module attributes {stable_mosaic.version = 11 : i64} {
  func.func @kern(%arg0: i32, %arg1: i32, %arg2: i32, %arg3: i32, %arg4: memref<1x128x128xbf16, #tpu.memory_space<vmem>>, %arg5: memref<1x128x128xbf16, #tpu.memory_space<vmem>>, %arg6: memref<1x1x128xf32, #tpu.memory_space<vmem>>, %arg7: memref<1x128x128xbf16, #tpu.memory_space<vmem>>, %arg8: memref<1x128x128xbf16, #tpu.memory_space<vmem>>, %arg9: memref<128x128xf32, #tpu.memory_space<vmem>>) attributes {dimension_semantics = [#tpu.dimension_semantics<parallel>, #tpu.dimension_semantics<parallel>, #tpu.dimension_semantics<parallel>, #tpu.dimension_semantics<arbitrary>], iteration_bounds = array<i64: 2, 1, 1, 1>, scalar_prefetch = 0 : i64, scratch_operands = 1 : i64, tpu.core_type = #tpu.core_type<tc>, window_params = [{transform_indices = @transform_0, window_bounds = array<i64: 1, 128, 128>}, {transform_indices = @transform_1, window_bounds = array<i64: 1, 128, 128>}, {transform_indices = @transform_2, window_bounds = array<i64: 1, 1, 128>}, {transform_indices = @transform_3, window_bounds = array<i64: 1, 128, 128>}, {transform_indices = @transform_4, window_bounds = array<i64: 1, 128, 128>}]} {
    %c0_i32 = arith.constant 0 : i32
    %0 = arith.cmpi eq, %arg3, %c0_i32 : i32
    %1 = arith.extui %0 : i1 to i32
    %c0_i32_0 = arith.constant 0 : i32
    %2 = arith.cmpi ne, %1, %c0_i32_0 : i32
    scf.if %2 {
      %cst_12 = arith.constant 0.000000e+00 : f32
      %14 = vector.broadcast %cst_12 : f32 to vector<128x128xf32>
      %c0_13 = arith.constant 0 : index
      %c0_14 = arith.constant 0 : index
      %15 = vector.load %arg9[%c0_13, %c0_14] : memref<128x128xf32, #tpu.memory_space<vmem>>, vector<128x128xf32>
      tpu.vector_store %arg9[%c0_13, %c0_14], %14 {strides = array<i32>} : memref<128x128xf32, #tpu.memory_space<vmem>>, vector<128x128xf32>,
    } else {
    }
    %c0 = arith.constant 0 : index
    %c0_1 = arith.constant 0 : index
    %3 = vector.load %arg9[%c0, %c0_1] : memref<128x128xf32, #tpu.memory_space<vmem>>, vector<128x128xf32>
    %c0_2 = arith.constant 0 : index
    %c0_3 = arith.constant 0 : index
    %c0_4 = arith.constant 0 : index
    %4 = vector.load %arg4[%c0_2, %c0_3, %c0_4] : memref<1x128x128xbf16, #tpu.memory_space<vmem>>, vector<1x128x128xbf16>
    %5 = vector.shape_cast %4 : vector<1x128x128xbf16> to vector<128x128xbf16>
    %c0_5 = arith.constant 0 : index
    %c0_6 = arith.constant 0 : index
    %c0_7 = arith.constant 0 : index
    %6 = vector.load %arg5[%c0_5, %c0_6, %c0_7] : memref<1x128x128xbf16, #tpu.memory_space<vmem>>, vector<1x128x128xbf16>
    %7 = vector.shape_cast %6 : vector<1x128x128xbf16> to vector<128x128xbf16>
    %cst = arith.constant dense<0.000000e+00> : vector<128x128xf32>
    %8 = tpu.matmul %5, %7, %cst {dimension_numbers = #tpu.dot_dimension_numbers<[1], [0], [0], [1], [0, 0, 1, 1], [], []>} : vector<128x128xbf16>, vector<128x128xbf16>, vector<128x128xf32> -> vector<128x128xf32>
    %9 = arith.addf %3, %8 : vector<128x128xf32>
    %c0_8 = arith.constant 0 : index
    %c0_9 = arith.constant 0 : index
    %10 = vector.load %arg9[%c0_8, %c0_9] : memref<128x128xf32, #tpu.memory_space<vmem>>, vector<128x128xf32>
    tpu.vector_store %arg9[%c0_8, %c0_9], %9 {strides = array<i32>} : memref<128x128xf32, #tpu.memory_space<vmem>>, vector<128x128xf32>,
    %c0_i32_10 = arith.constant 0 : i32
    %11 = arith.cmpi eq, %arg3, %c0_i32_10 : i32
    %12 = arith.extui %11 : i1 to i32
    %c0_i32_11 = arith.constant 0 : i32
    %13 = arith.cmpi ne, %12, %c0_i32_11 : i32
    scf.if %13 {
      %c0_12 = arith.constant 0 : index
      %c0_13 = arith.constant 0 : index
      %14 = vector.load %arg9[%c0_12, %c0_13] : memref<128x128xf32, #tpu.memory_space<vmem>>, vector<128x128xf32>
      %c0_14 = arith.constant 0 : index
      %c0_15 = arith.constant 0 : index
      %c0_16 = arith.constant 0 : index
      %15 = vector.load %arg6[%c0_14, %c0_15, %c0_16] : memref<1x1x128xf32, #tpu.memory_space<vmem>>, vector<1x1x128xf32>
      %16 = vector.shape_cast %15 : vector<1x1x128xf32> to vector<1x128xf32>
      %17 = vector.broadcast %16 : vector<1x128xf32> to vector<128x128xf32>
      %18 = arith.addf %14, %17 : vector<128x128xf32>
      %c0_17 = arith.constant 0 : index
      %c0_18 = arith.constant 0 : index
      %c0_19 = arith.constant 0 : index
      %19 = vector.load %arg7[%c0_17, %c0_18, %c0_19] : memref<1x128x128xbf16, #tpu.memory_space<vmem>>, vector<1x128x128xbf16>
      %20 = vector.shape_cast %19 : vector<1x128x128xbf16> to vector<128x128xbf16>
      %21 = arith.extf %20 : vector<128x128xbf16> to vector<128x128xf32>
      %22 = arith.addf %18, %21 : vector<128x128xf32>
      %cst_20 = arith.constant 0.000000e+00 : f32
      %23 = vector.broadcast %cst_20 : f32 to vector<128x128xf32>
      %24 = arith.maximumf %22, %23 : vector<128x128xf32>
      %25 = arith.truncf %24 : vector<128x128xf32> to vector<128x128xbf16>
      %c0_21 = arith.constant 0 : index
      %c0_22 = arith.constant 0 : index
      %c0_23 = arith.constant 0 : index
      %26 = vector.load %arg8[%c0_21, %c0_22, %c0_23] : memref<1x128x128xbf16, #tpu.memory_space<vmem>>, vector<1x128x128xbf16>
      %27 = vector.shape_cast %26 : vector<1x128x128xbf16> to vector<128x128xbf16>
      %28 = vector.shape_cast %25 : vector<128x128xbf16> to vector<1x128x128xbf16>
      tpu.vector_store %arg8[%c0_21, %c0_22, %c0_23], %28 {strides = array<i32>} : memref<1x128x128xbf16, #tpu.memory_space<vmem>>, vector<1x128x128xbf16>,
    } else {
    }
    return
  }
  func.func @transform_0(%arg0: i32, %arg1: i32, %arg2: i32, %arg3: i32) -> (i32, i32, i32) {
    %c0_i32 = arith.constant 0 : i32
    return %arg0, %arg1, %arg3 : i32, i32, i32
  }
  func.func @transform_1(%arg0: i32, %arg1: i32, %arg2: i32, %arg3: i32) -> (i32, i32, i32) {
    %c0_i32 = arith.constant 0 : i32
    return %arg0, %arg3, %arg2 : i32, i32, i32
  }
  func.func @transform_2(%arg0: i32, %arg1: i32, %arg2: i32, %arg3: i32) -> (i32, i32, i32) {
    %c0_i32 = arith.constant 0 : i32
    %c0_i32_0 = arith.constant 0 : i32
    return %arg0, %c0_i32, %arg2 : i32, i32, i32
  }
  func.func @transform_3(%arg0: i32, %arg1: i32, %arg2: i32, %arg3: i32) -> (i32, i32, i32) {
    %c0_i32 = arith.constant 0 : i32
    return %arg0, %arg1, %arg2 : i32, i32, i32
  }
  func.func @transform_4(%arg0: i32, %arg1: i32, %arg2: i32, %arg3: i32) -> (i32, i32, i32) {
    %c0_i32 = arith.constant 0 : i32
    return %arg0, %arg1, %arg2 : i32, i32, i32
  }
}

module attributes {stable_mosaic.version = 11 : i64} {
  func.func @kern(%arg0: i32, %arg1: i32, %arg2: i32, %arg3: i32, %arg4: memref<1x128x128xbf16, #tpu.memory_space<vmem>>, %arg5: memref<1x128x128xbf16, #tpu.memory_space<vmem>>, %arg6: memref<1x1x128xf32, #tpu.memory_space<vmem>>, %arg7: memref<1x128x128xbf16, #tpu.memory_space<vmem>>, %arg8: memref<128x128xf32, #tpu.memory_space<vmem>>) attributes {dimension_semantics = [#tpu.dimension_semantics<parallel>, #tpu.dimension_semantics<parallel>, #tpu.dimension_semantics<parallel>, #tpu.dimension_semantics<arbitrary>], iteration_bounds = array<i64: 2, 1, 1, 1>, scalar_prefetch = 0 : i64, scratch_operands = 1 : i64, tpu.core_type = #tpu.core_type<tc>, window_params = [{transform_indices = @transform_0, window_bounds = array<i64: 1, 128, 128>}, {transform_indices = @transform_1, window_bounds = array<i64: 1, 128, 128>}, {transform_indices = @transform_2, window_bounds = array<i64: 1, 1, 128>}, {transform_indices = @transform_3, window_bounds = array<i64: 1, 128, 128>}]} {
    %c0_i32 = arith.constant 0 : i32
    %0 = arith.cmpi eq, %arg3, %c0_i32 : i32
    %1 = arith.extui %0 : i1 to i32
    %c0_i32_0 = arith.constant 0 : i32
    %2 = arith.cmpi ne, %1, %c0_i32_0 : i32
    scf.if %2 {
      %cst_12 = arith.constant 0.000000e+00 : f32
      %14 = vector.broadcast %cst_12 : f32 to vector<128x128xf32>
      %c0_13 = arith.constant 0 : index
      %c0_14 = arith.constant 0 : index
      %15 = vector.load %arg8[%c0_13, %c0_14] : memref<128x128xf32, #tpu.memory_space<vmem>>, vector<128x128xf32>
      tpu.vector_store %arg8[%c0_13, %c0_14], %14 {strides = array<i32>} : memref<128x128xf32, #tpu.memory_space<vmem>>, vector<128x128xf32>,
    } else {
    }
    %c0 = arith.constant 0 : index
    %c0_1 = arith.constant 0 : index
    %3 = vector.load %arg8[%c0, %c0_1] : memref<128x128xf32, #tpu.memory_space<vmem>>, vector<128x128xf32>
    %c0_2 = arith.constant 0 : index
    %c0_3 = arith.constant 0 : index
    %c0_4 = arith.constant 0 : index
    %4 = vector.load %arg4[%c0_2, %c0_3, %c0_4] : memref<1x128x128xbf16, #tpu.memory_space<vmem>>, vector<1x128x128xbf16>
    %5 = vector.shape_cast %4 : vector<1x128x128xbf16> to vector<128x128xbf16>
    %c0_5 = arith.constant 0 : index
    %c0_6 = arith.constant 0 : index
    %c0_7 = arith.constant 0 : index
    %6 = vector.load %arg5[%c0_5, %c0_6, %c0_7] : memref<1x128x128xbf16, #tpu.memory_space<vmem>>, vector<1x128x128xbf16>
    %7 = vector.shape_cast %6 : vector<1x128x128xbf16> to vector<128x128xbf16>
    %cst = arith.constant dense<0.000000e+00> : vector<128x128xf32>
    %8 = tpu.matmul %5, %7, %cst {dimension_numbers = #tpu.dot_dimension_numbers<[1], [0], [0], [1], [0, 0, 1, 1], [], []>} : vector<128x128xbf16>, vector<128x128xbf16>, vector<128x128xf32> -> vector<128x128xf32>
    %9 = arith.addf %3, %8 : vector<128x128xf32>
    %c0_8 = arith.constant 0 : index
    %c0_9 = arith.constant 0 : index
    %10 = vector.load %arg8[%c0_8, %c0_9] : memref<128x128xf32, #tpu.memory_space<vmem>>, vector<128x128xf32>
    tpu.vector_store %arg8[%c0_8, %c0_9], %9 {strides = array<i32>} : memref<128x128xf32, #tpu.memory_space<vmem>>, vector<128x128xf32>,
    %c0_i32_10 = arith.constant 0 : i32
    %11 = arith.cmpi eq, %arg3, %c0_i32_10 : i32
    %12 = arith.extui %11 : i1 to i32
    %c0_i32_11 = arith.constant 0 : i32
    %13 = arith.cmpi ne, %12, %c0_i32_11 : i32
    scf.if %13 {
      %c0_12 = arith.constant 0 : index
      %c0_13 = arith.constant 0 : index
      %14 = vector.load %arg8[%c0_12, %c0_13] : memref<128x128xf32, #tpu.memory_space<vmem>>, vector<128x128xf32>
      %c0_14 = arith.constant 0 : index
      %c0_15 = arith.constant 0 : index
      %c0_16 = arith.constant 0 : index
      %15 = vector.load %arg6[%c0_14, %c0_15, %c0_16] : memref<1x1x128xf32, #tpu.memory_space<vmem>>, vector<1x1x128xf32>
      %16 = vector.shape_cast %15 : vector<1x1x128xf32> to vector<1x128xf32>
      %17 = vector.broadcast %16 : vector<1x128xf32> to vector<128x128xf32>
      %18 = arith.addf %14, %17 : vector<128x128xf32>
      %cst_17 = arith.constant 0.000000e+00 : f32
      %19 = vector.broadcast %cst_17 : f32 to vector<128x128xf32>
      %20 = arith.maximumf %18, %19 : vector<128x128xf32>
      %21 = arith.truncf %20 : vector<128x128xf32> to vector<128x128xbf16>
      %c0_18 = arith.constant 0 : index
      %c0_19 = arith.constant 0 : index
      %c0_20 = arith.constant 0 : index
      %22 = vector.load %arg7[%c0_18, %c0_19, %c0_20] : memref<1x128x128xbf16, #tpu.memory_space<vmem>>, vector<1x128x128xbf16>
      %23 = vector.shape_cast %22 : vector<1x128x128xbf16> to vector<128x128xbf16>
      %24 = vector.shape_cast %21 : vector<128x128xbf16> to vector<1x128x128xbf16>
      tpu.vector_store %arg7[%c0_18, %c0_19, %c0_20], %24 {strides = array<i32>} : memref<1x128x128xbf16, #tpu.memory_space<vmem>>, vector<1x128x128xbf16>,
    } else {
    }
    return
  }
  func.func @transform_0(%arg0: i32, %arg1: i32, %arg2: i32, %arg3: i32) -> (i32, i32, i32) {
    %c0_i32 = arith.constant 0 : i32
    return %arg0, %arg1, %arg3 : i32, i32, i32
  }
  func.func @transform_1(%arg0: i32, %arg1: i32, %arg2: i32, %arg3: i32) -> (i32, i32, i32) {
    %c0_i32 = arith.constant 0 : i32
    return %arg0, %arg3, %arg2 : i32, i32, i32
  }
  func.func @transform_2(%arg0: i32, %arg1: i32, %arg2: i32, %arg3: i32) -> (i32, i32, i32) {
    %c0_i32 = arith.constant 0 : i32
    %c0_i32_0 = arith.constant 0 : i32
    return %arg0, %c0_i32, %arg2 : i32, i32, i32
  }
  func.func @transform_3(%arg0: i32, %arg1: i32, %arg2: i32, %arg3: i32) -> (i32, i32, i32) {
    %c0_i32 = arith.constant 0 : i32
    return %arg0, %arg1, %arg2 : i32, i32, i32
  }
}

module attributes {stable_mosaic.version = 11 : i64} {
  func.func @kern(%arg0: i32, %arg1: i32, %arg2: i32, %arg3: i32, %arg4: memref<1x32x640xbf16, #tpu.memory_space<vmem>>, %arg5: memref<1x640x128xbf16, #tpu.memory_space<vmem>>, %arg6: memref<1x1x128xf32, #tpu.memory_space<vmem>>, %arg7: memref<1x32x128xbf16, #tpu.memory_space<vmem>>, %arg8: memref<32x128xf32, #tpu.memory_space<vmem>>) attributes {dimension_semantics = [#tpu.dimension_semantics<parallel>, #tpu.dimension_semantics<parallel>, #tpu.dimension_semantics<parallel>, #tpu.dimension_semantics<arbitrary>], iteration_bounds = array<i64: 2, 1, 1, 1>, scalar_prefetch = 0 : i64, scratch_operands = 1 : i64, tpu.core_type = #tpu.core_type<tc>, window_params = [{transform_indices = @transform_0, window_bounds = array<i64: 1, 32, 640>}, {transform_indices = @transform_1, window_bounds = array<i64: 1, 640, 128>}, {transform_indices = @transform_2, window_bounds = array<i64: 1, 1, 128>}, {transform_indices = @transform_3, window_bounds = array<i64: 1, 32, 128>}]} {
    %c0_i32 = arith.constant 0 : i32
    %0 = arith.cmpi eq, %arg3, %c0_i32 : i32
    %1 = arith.extui %0 : i1 to i32
    %c0_i32_0 = arith.constant 0 : i32
    %2 = arith.cmpi ne, %1, %c0_i32_0 : i32
    scf.if %2 {
      %cst_12 = arith.constant 0.000000e+00 : f32
      %14 = vector.broadcast %cst_12 : f32 to vector<32x128xf32>
      %c0_13 = arith.constant 0 : index
      %c0_14 = arith.constant 0 : index
      %15 = vector.load %arg8[%c0_13, %c0_14] : memref<32x128xf32, #tpu.memory_space<vmem>>, vector<32x128xf32>
      tpu.vector_store %arg8[%c0_13, %c0_14], %14 {strides = array<i32>} : memref<32x128xf32, #tpu.memory_space<vmem>>, vector<32x128xf32>,
    } else {
    }
    %c0 = arith.constant 0 : index
    %c0_1 = arith.constant 0 : index
    %3 = vector.load %arg8[%c0, %c0_1] : memref<32x128xf32, #tpu.memory_space<vmem>>, vector<32x128xf32>
    %c0_2 = arith.constant 0 : index
    %c0_3 = arith.constant 0 : index
    %c0_4 = arith.constant 0 : index
    %4 = vector.load %arg4[%c0_2, %c0_3, %c0_4] : memref<1x32x640xbf16, #tpu.memory_space<vmem>>, vector<1x32x640xbf16>
    %5 = vector.shape_cast %4 : vector<1x32x640xbf16> to vector<32x640xbf16>
    %c0_5 = arith.constant 0 : index
    %c0_6 = arith.constant 0 : index
    %c0_7 = arith.constant 0 : index
    %6 = vector.load %arg5[%c0_5, %c0_6, %c0_7] : memref<1x640x128xbf16, #tpu.memory_space<vmem>>, vector<1x640x128xbf16>
    %7 = vector.shape_cast %6 : vector<1x640x128xbf16> to vector<640x128xbf16>
    %cst = arith.constant dense<0.000000e+00> : vector<32x128xf32>
    %8 = tpu.matmul %5, %7, %cst {dimension_numbers = #tpu.dot_dimension_numbers<[1], [0], [0], [1], [0, 0, 1, 1], [], []>} : vector<32x640xbf16>, vector<640x128xbf16>, vector<32x128xf32> -> vector<32x128xf32>
    %9 = arith.addf %3, %8 : vector<32x128xf32>
    %c0_8 = arith.constant 0 : index
    %c0_9 = arith.constant 0 : index
    %10 = vector.load %arg8[%c0_8, %c0_9] : memref<32x128xf32, #tpu.memory_space<vmem>>, vector<32x128xf32>
    tpu.vector_store %arg8[%c0_8, %c0_9], %9 {strides = array<i32>} : memref<32x128xf32, #tpu.memory_space<vmem>>, vector<32x128xf32>,
    %c0_i32_10 = arith.constant 0 : i32
    %11 = arith.cmpi eq, %arg3, %c0_i32_10 : i32
    %12 = arith.extui %11 : i1 to i32
    %c0_i32_11 = arith.constant 0 : i32
    %13 = arith.cmpi ne, %12, %c0_i32_11 : i32
    scf.if %13 {
      %c0_12 = arith.constant 0 : index
      %c0_13 = arith.constant 0 : index
      %14 = vector.load %arg8[%c0_12, %c0_13] : memref<32x128xf32, #tpu.memory_space<vmem>>, vector<32x128xf32>
      %c0_14 = arith.constant 0 : index
      %c0_15 = arith.constant 0 : index
      %c0_16 = arith.constant 0 : index
      %15 = vector.load %arg6[%c0_14, %c0_15, %c0_16] : memref<1x1x128xf32, #tpu.memory_space<vmem>>, vector<1x1x128xf32>
      %16 = vector.shape_cast %15 : vector<1x1x128xf32> to vector<1x128xf32>
      %17 = vector.broadcast %16 : vector<1x128xf32> to vector<32x128xf32>
      %18 = arith.addf %14, %17 : vector<32x128xf32>
      %cst_17 = arith.constant 0.000000e+00 : f32
      %19 = vector.broadcast %cst_17 : f32 to vector<32x128xf32>
      %20 = arith.maximumf %18, %19 : vector<32x128xf32>
      %21 = arith.truncf %20 : vector<32x128xf32> to vector<32x128xbf16>
      %c0_18 = arith.constant 0 : index
      %c0_19 = arith.constant 0 : index
      %c0_20 = arith.constant 0 : index
      %22 = vector.load %arg7[%c0_18, %c0_19, %c0_20] : memref<1x32x128xbf16, #tpu.memory_space<vmem>>, vector<1x32x128xbf16>
      %23 = vector.shape_cast %22 : vector<1x32x128xbf16> to vector<32x128xbf16>
      %24 = vector.shape_cast %21 : vector<32x128xbf16> to vector<1x32x128xbf16>
      tpu.vector_store %arg7[%c0_18, %c0_19, %c0_20], %24 {strides = array<i32>} : memref<1x32x128xbf16, #tpu.memory_space<vmem>>, vector<1x32x128xbf16>,
    } else {
    }
    return
  }
  func.func @transform_0(%arg0: i32, %arg1: i32, %arg2: i32, %arg3: i32) -> (i32, i32, i32) {
    %c0_i32 = arith.constant 0 : i32
    return %arg0, %arg1, %arg3 : i32, i32, i32
  }
  func.func @transform_1(%arg0: i32, %arg1: i32, %arg2: i32, %arg3: i32) -> (i32, i32, i32) {
    %c0_i32 = arith.constant 0 : i32
    return %arg0, %arg3, %arg2 : i32, i32, i32
  }
  func.func @transform_2(%arg0: i32, %arg1: i32, %arg2: i32, %arg3: i32) -> (i32, i32, i32) {
    %c0_i32 = arith.constant 0 : i32
    %c0_i32_0 = arith.constant 0 : i32
    return %arg0, %c0_i32, %arg2 : i32, i32, i32
  }
  func.func @transform_3(%arg0: i32, %arg1: i32, %arg2: i32, %arg3: i32) -> (i32, i32, i32) {
    %c0_i32 = arith.constant 0 : i32
    return %arg0, %arg1, %arg2 : i32, i32, i32
  }
}

module attributes {stable_mosaic.version = 11 : i64} {
  func.func @kern(%arg0: i32, %arg1: i32, %arg2: i32, %arg3: i32, %arg4: memref<1x32x128xbf16, #tpu.memory_space<vmem>>, %arg5: memref<1x128x256xbf16, #tpu.memory_space<vmem>>, %arg6: memref<1x1x256xf32, #tpu.memory_space<vmem>>, %arg7: memref<1x32x256xbf16, #tpu.memory_space<vmem>>, %arg8: memref<32x256xf32, #tpu.memory_space<vmem>>) attributes {dimension_semantics = [#tpu.dimension_semantics<parallel>, #tpu.dimension_semantics<parallel>, #tpu.dimension_semantics<parallel>, #tpu.dimension_semantics<arbitrary>], iteration_bounds = array<i64: 2, 1, 1, 1>, scalar_prefetch = 0 : i64, scratch_operands = 1 : i64, tpu.core_type = #tpu.core_type<tc>, window_params = [{transform_indices = @transform_0, window_bounds = array<i64: 1, 32, 128>}, {transform_indices = @transform_1, window_bounds = array<i64: 1, 128, 256>}, {transform_indices = @transform_2, window_bounds = array<i64: 1, 1, 256>}, {transform_indices = @transform_3, window_bounds = array<i64: 1, 32, 256>}]} {
    %c0_i32 = arith.constant 0 : i32
    %0 = arith.cmpi eq, %arg3, %c0_i32 : i32
    %1 = arith.extui %0 : i1 to i32
    %c0_i32_0 = arith.constant 0 : i32
    %2 = arith.cmpi ne, %1, %c0_i32_0 : i32
    scf.if %2 {
      %cst_12 = arith.constant 0.000000e+00 : f32
      %14 = vector.broadcast %cst_12 : f32 to vector<32x256xf32>
      %c0_13 = arith.constant 0 : index
      %c0_14 = arith.constant 0 : index
      %15 = vector.load %arg8[%c0_13, %c0_14] : memref<32x256xf32, #tpu.memory_space<vmem>>, vector<32x256xf32>
      tpu.vector_store %arg8[%c0_13, %c0_14], %14 {strides = array<i32>} : memref<32x256xf32, #tpu.memory_space<vmem>>, vector<32x256xf32>,
    } else {
    }
    %c0 = arith.constant 0 : index
    %c0_1 = arith.constant 0 : index
    %3 = vector.load %arg8[%c0, %c0_1] : memref<32x256xf32, #tpu.memory_space<vmem>>, vector<32x256xf32>
    %c0_2 = arith.constant 0 : index
    %c0_3 = arith.constant 0 : index
    %c0_4 = arith.constant 0 : index
    %4 = vector.load %arg4[%c0_2, %c0_3, %c0_4] : memref<1x32x128xbf16, #tpu.memory_space<vmem>>, vector<1x32x128xbf16>
    %5 = vector.shape_cast %4 : vector<1x32x128xbf16> to vector<32x128xbf16>
    %c0_5 = arith.constant 0 : index
    %c0_6 = arith.constant 0 : index
    %c0_7 = arith.constant 0 : index
    %6 = vector.load %arg5[%c0_5, %c0_6, %c0_7] : memref<1x128x256xbf16, #tpu.memory_space<vmem>>, vector<1x128x256xbf16>
    %7 = vector.shape_cast %6 : vector<1x128x256xbf16> to vector<128x256xbf16>
    %cst = arith.constant dense<0.000000e+00> : vector<32x256xf32>
    %8 = tpu.matmul %5, %7, %cst {dimension_numbers = #tpu.dot_dimension_numbers<[1], [0], [0], [1], [0, 0, 1, 1], [], []>} : vector<32x128xbf16>, vector<128x256xbf16>, vector<32x256xf32> -> vector<32x256xf32>
    %9 = arith.addf %3, %8 : vector<32x256xf32>
    %c0_8 = arith.constant 0 : index
    %c0_9 = arith.constant 0 : index
    %10 = vector.load %arg8[%c0_8, %c0_9] : memref<32x256xf32, #tpu.memory_space<vmem>>, vector<32x256xf32>
    tpu.vector_store %arg8[%c0_8, %c0_9], %9 {strides = array<i32>} : memref<32x256xf32, #tpu.memory_space<vmem>>, vector<32x256xf32>,
    %c0_i32_10 = arith.constant 0 : i32
    %11 = arith.cmpi eq, %arg3, %c0_i32_10 : i32
    %12 = arith.extui %11 : i1 to i32
    %c0_i32_11 = arith.constant 0 : i32
    %13 = arith.cmpi ne, %12, %c0_i32_11 : i32
    scf.if %13 {
      %c0_12 = arith.constant 0 : index
      %c0_13 = arith.constant 0 : index
      %14 = vector.load %arg8[%c0_12, %c0_13] : memref<32x256xf32, #tpu.memory_space<vmem>>, vector<32x256xf32>
      %c0_14 = arith.constant 0 : index
      %c0_15 = arith.constant 0 : index
      %c0_16 = arith.constant 0 : index
      %15 = vector.load %arg6[%c0_14, %c0_15, %c0_16] : memref<1x1x256xf32, #tpu.memory_space<vmem>>, vector<1x1x256xf32>
      %16 = vector.shape_cast %15 : vector<1x1x256xf32> to vector<1x256xf32>
      %17 = vector.broadcast %16 : vector<1x256xf32> to vector<32x256xf32>
      %18 = arith.addf %14, %17 : vector<32x256xf32>
      %19 = arith.truncf %18 : vector<32x256xf32> to vector<32x256xbf16>
      %c0_17 = arith.constant 0 : index
      %c0_18 = arith.constant 0 : index
      %c0_19 = arith.constant 0 : index
      %20 = vector.load %arg7[%c0_17, %c0_18, %c0_19] : memref<1x32x256xbf16, #tpu.memory_space<vmem>>, vector<1x32x256xbf16>
      %21 = vector.shape_cast %20 : vector<1x32x256xbf16> to vector<32x256xbf16>
      %22 = vector.shape_cast %19 : vector<32x256xbf16> to vector<1x32x256xbf16>
      tpu.vector_store %arg7[%c0_17, %c0_18, %c0_19], %22 {strides = array<i32>} : memref<1x32x256xbf16, #tpu.memory_space<vmem>>, vector<1x32x256xbf16>,
    } else {
    }
    return
  }
  func.func @transform_0(%arg0: i32, %arg1: i32, %arg2: i32, %arg3: i32) -> (i32, i32, i32) {
    %c0_i32 = arith.constant 0 : i32
    return %arg0, %arg1, %arg3 : i32, i32, i32
  }
  func.func @transform_1(%arg0: i32, %arg1: i32, %arg2: i32, %arg3: i32) -> (i32, i32, i32) {
    %c0_i32 = arith.constant 0 : i32
    return %arg0, %arg3, %arg2 : i32, i32, i32
  }
  func.func @transform_2(%arg0: i32, %arg1: i32, %arg2: i32, %arg3: i32) -> (i32, i32, i32) {
    %c0_i32 = arith.constant 0 : i32
    %c0_i32_0 = arith.constant 0 : i32
    return %arg0, %c0_i32, %arg2 : i32, i32, i32
  }
  func.func @transform_3(%arg0: i32, %arg1: i32, %arg2: i32, %arg3: i32) -> (i32, i32, i32) {
    %c0_i32 = arith.constant 0 : i32
    return %arg0, %arg1, %arg2 : i32, i32, i32
  }
}

module attributes {stable_mosaic.version = 11 : i64} {
  func.func @kern(%arg0: i32, %arg1: i32, %arg2: i32, %arg3: i32, %arg4: memref<1x32x128xbf16, #tpu.memory_space<vmem>>, %arg5: memref<1x128x256xbf16, #tpu.memory_space<vmem>>, %arg6: memref<1x1x256xf32, #tpu.memory_space<vmem>>, %arg7: memref<1x32x256xbf16, #tpu.memory_space<vmem>>, %arg8: memref<1x32x256xbf16, #tpu.memory_space<vmem>>, %arg9: memref<32x256xf32, #tpu.memory_space<vmem>>) attributes {dimension_semantics = [#tpu.dimension_semantics<parallel>, #tpu.dimension_semantics<parallel>, #tpu.dimension_semantics<parallel>, #tpu.dimension_semantics<arbitrary>], iteration_bounds = array<i64: 2, 1, 1, 1>, scalar_prefetch = 0 : i64, scratch_operands = 1 : i64, tpu.core_type = #tpu.core_type<tc>, window_params = [{transform_indices = @transform_0, window_bounds = array<i64: 1, 32, 128>}, {transform_indices = @transform_1, window_bounds = array<i64: 1, 128, 256>}, {transform_indices = @transform_2, window_bounds = array<i64: 1, 1, 256>}, {transform_indices = @transform_3, window_bounds = array<i64: 1, 32, 256>}, {transform_indices = @transform_4, window_bounds = array<i64: 1, 32, 256>}]} {
    %c0_i32 = arith.constant 0 : i32
    %0 = arith.cmpi eq, %arg3, %c0_i32 : i32
    %1 = arith.extui %0 : i1 to i32
    %c0_i32_0 = arith.constant 0 : i32
    %2 = arith.cmpi ne, %1, %c0_i32_0 : i32
    scf.if %2 {
      %cst_12 = arith.constant 0.000000e+00 : f32
      %14 = vector.broadcast %cst_12 : f32 to vector<32x256xf32>
      %c0_13 = arith.constant 0 : index
      %c0_14 = arith.constant 0 : index
      %15 = vector.load %arg9[%c0_13, %c0_14] : memref<32x256xf32, #tpu.memory_space<vmem>>, vector<32x256xf32>
      tpu.vector_store %arg9[%c0_13, %c0_14], %14 {strides = array<i32>} : memref<32x256xf32, #tpu.memory_space<vmem>>, vector<32x256xf32>,
    } else {
    }
    %c0 = arith.constant 0 : index
    %c0_1 = arith.constant 0 : index
    %3 = vector.load %arg9[%c0, %c0_1] : memref<32x256xf32, #tpu.memory_space<vmem>>, vector<32x256xf32>
    %c0_2 = arith.constant 0 : index
    %c0_3 = arith.constant 0 : index
    %c0_4 = arith.constant 0 : index
    %4 = vector.load %arg4[%c0_2, %c0_3, %c0_4] : memref<1x32x128xbf16, #tpu.memory_space<vmem>>, vector<1x32x128xbf16>
    %5 = vector.shape_cast %4 : vector<1x32x128xbf16> to vector<32x128xbf16>
    %c0_5 = arith.constant 0 : index
    %c0_6 = arith.constant 0 : index
    %c0_7 = arith.constant 0 : index
    %6 = vector.load %arg5[%c0_5, %c0_6, %c0_7] : memref<1x128x256xbf16, #tpu.memory_space<vmem>>, vector<1x128x256xbf16>
    %7 = vector.shape_cast %6 : vector<1x128x256xbf16> to vector<128x256xbf16>
    %cst = arith.constant dense<0.000000e+00> : vector<32x256xf32>
    %8 = tpu.matmul %5, %7, %cst {dimension_numbers = #tpu.dot_dimension_numbers<[1], [0], [0], [1], [0, 0, 1, 1], [], []>} : vector<32x128xbf16>, vector<128x256xbf16>, vector<32x256xf32> -> vector<32x256xf32>
    %9 = arith.addf %3, %8 : vector<32x256xf32>
    %c0_8 = arith.constant 0 : index
    %c0_9 = arith.constant 0 : index
    %10 = vector.load %arg9[%c0_8, %c0_9] : memref<32x256xf32, #tpu.memory_space<vmem>>, vector<32x256xf32>
    tpu.vector_store %arg9[%c0_8, %c0_9], %9 {strides = array<i32>} : memref<32x256xf32, #tpu.memory_space<vmem>>, vector<32x256xf32>,
    %c0_i32_10 = arith.constant 0 : i32
    %11 = arith.cmpi eq, %arg3, %c0_i32_10 : i32
    %12 = arith.extui %11 : i1 to i32
    %c0_i32_11 = arith.constant 0 : i32
    %13 = arith.cmpi ne, %12, %c0_i32_11 : i32
    scf.if %13 {
      %c0_12 = arith.constant 0 : index
      %c0_13 = arith.constant 0 : index
      %14 = vector.load %arg9[%c0_12, %c0_13] : memref<32x256xf32, #tpu.memory_space<vmem>>, vector<32x256xf32>
      %c0_14 = arith.constant 0 : index
      %c0_15 = arith.constant 0 : index
      %c0_16 = arith.constant 0 : index
      %15 = vector.load %arg6[%c0_14, %c0_15, %c0_16] : memref<1x1x256xf32, #tpu.memory_space<vmem>>, vector<1x1x256xf32>
      %16 = vector.shape_cast %15 : vector<1x1x256xf32> to vector<1x256xf32>
      %17 = vector.broadcast %16 : vector<1x256xf32> to vector<32x256xf32>
      %18 = arith.addf %14, %17 : vector<32x256xf32>
      %c0_17 = arith.constant 0 : index
      %c0_18 = arith.constant 0 : index
      %c0_19 = arith.constant 0 : index
      %19 = vector.load %arg7[%c0_17, %c0_18, %c0_19] : memref<1x32x256xbf16, #tpu.memory_space<vmem>>, vector<1x32x256xbf16>
      %20 = vector.shape_cast %19 : vector<1x32x256xbf16> to vector<32x256xbf16>
      %21 = arith.extf %20 : vector<32x256xbf16> to vector<32x256xf32>
      %22 = arith.addf %18, %21 : vector<32x256xf32>
      %cst_20 = arith.constant 0.000000e+00 : f32
      %23 = vector.broadcast %cst_20 : f32 to vector<32x256xf32>
      %24 = arith.maximumf %22, %23 : vector<32x256xf32>
      %25 = arith.truncf %24 : vector<32x256xf32> to vector<32x256xbf16>
      %c0_21 = arith.constant 0 : index
      %c0_22 = arith.constant 0 : index
      %c0_23 = arith.constant 0 : index
      %26 = vector.load %arg8[%c0_21, %c0_22, %c0_23] : memref<1x32x256xbf16, #tpu.memory_space<vmem>>, vector<1x32x256xbf16>
      %27 = vector.shape_cast %26 : vector<1x32x256xbf16> to vector<32x256xbf16>
      %28 = vector.shape_cast %25 : vector<32x256xbf16> to vector<1x32x256xbf16>
      tpu.vector_store %arg8[%c0_21, %c0_22, %c0_23], %28 {strides = array<i32>} : memref<1x32x256xbf16, #tpu.memory_space<vmem>>, vector<1x32x256xbf16>,
    } else {
    }
    return
  }
  func.func @transform_0(%arg0: i32, %arg1: i32, %arg2: i32, %arg3: i32) -> (i32, i32, i32) {
    %c0_i32 = arith.constant 0 : i32
    return %arg0, %arg1, %arg3 : i32, i32, i32
  }
  func.func @transform_1(%arg0: i32, %arg1: i32, %arg2: i32, %arg3: i32) -> (i32, i32, i32) {
    %c0_i32 = arith.constant 0 : i32
    return %arg0, %arg3, %arg2 : i32, i32, i32
  }
  func.func @transform_2(%arg0: i32, %arg1: i32, %arg2: i32, %arg3: i32) -> (i32, i32, i32) {
    %c0_i32 = arith.constant 0 : i32
    %c0_i32_0 = arith.constant 0 : i32
    return %arg0, %c0_i32, %arg2 : i32, i32, i32
  }
  func.func @transform_3(%arg0: i32, %arg1: i32, %arg2: i32, %arg3: i32) -> (i32, i32, i32) {
    %c0_i32 = arith.constant 0 : i32
    return %arg0, %arg1, %arg2 : i32, i32, i32
  }
  func.func @transform_4(%arg0: i32, %arg1: i32, %arg2: i32, %arg3: i32) -> (i32, i32, i32) {
    %c0_i32 = arith.constant 0 : i32
    return %arg0, %arg1, %arg2 : i32, i32, i32
  }
}

module attributes {stable_mosaic.version = 11 : i64} {
  func.func @kern(%arg0: i32, %arg1: i32, %arg2: i32, %arg3: i32, %arg4: memref<1x32x256xbf16, #tpu.memory_space<vmem>>, %arg5: memref<1x256x128xbf16, #tpu.memory_space<vmem>>, %arg6: memref<1x1x128xf32, #tpu.memory_space<vmem>>, %arg7: memref<1x32x128xbf16, #tpu.memory_space<vmem>>, %arg8: memref<32x128xf32, #tpu.memory_space<vmem>>) attributes {dimension_semantics = [#tpu.dimension_semantics<parallel>, #tpu.dimension_semantics<parallel>, #tpu.dimension_semantics<parallel>, #tpu.dimension_semantics<arbitrary>], iteration_bounds = array<i64: 2, 1, 1, 1>, scalar_prefetch = 0 : i64, scratch_operands = 1 : i64, tpu.core_type = #tpu.core_type<tc>, window_params = [{transform_indices = @transform_0, window_bounds = array<i64: 1, 32, 256>}, {transform_indices = @transform_1, window_bounds = array<i64: 1, 256, 128>}, {transform_indices = @transform_2, window_bounds = array<i64: 1, 1, 128>}, {transform_indices = @transform_3, window_bounds = array<i64: 1, 32, 128>}]} {
    %c0_i32 = arith.constant 0 : i32
    %0 = arith.cmpi eq, %arg3, %c0_i32 : i32
    %1 = arith.extui %0 : i1 to i32
    %c0_i32_0 = arith.constant 0 : i32
    %2 = arith.cmpi ne, %1, %c0_i32_0 : i32
    scf.if %2 {
      %cst_12 = arith.constant 0.000000e+00 : f32
      %14 = vector.broadcast %cst_12 : f32 to vector<32x128xf32>
      %c0_13 = arith.constant 0 : index
      %c0_14 = arith.constant 0 : index
      %15 = vector.load %arg8[%c0_13, %c0_14] : memref<32x128xf32, #tpu.memory_space<vmem>>, vector<32x128xf32>
      tpu.vector_store %arg8[%c0_13, %c0_14], %14 {strides = array<i32>} : memref<32x128xf32, #tpu.memory_space<vmem>>, vector<32x128xf32>,
    } else {
    }
    %c0 = arith.constant 0 : index
    %c0_1 = arith.constant 0 : index
    %3 = vector.load %arg8[%c0, %c0_1] : memref<32x128xf32, #tpu.memory_space<vmem>>, vector<32x128xf32>
    %c0_2 = arith.constant 0 : index
    %c0_3 = arith.constant 0 : index
    %c0_4 = arith.constant 0 : index
    %4 = vector.load %arg4[%c0_2, %c0_3, %c0_4] : memref<1x32x256xbf16, #tpu.memory_space<vmem>>, vector<1x32x256xbf16>
    %5 = vector.shape_cast %4 : vector<1x32x256xbf16> to vector<32x256xbf16>
    %c0_5 = arith.constant 0 : index
    %c0_6 = arith.constant 0 : index
    %c0_7 = arith.constant 0 : index
    %6 = vector.load %arg5[%c0_5, %c0_6, %c0_7] : memref<1x256x128xbf16, #tpu.memory_space<vmem>>, vector<1x256x128xbf16>
    %7 = vector.shape_cast %6 : vector<1x256x128xbf16> to vector<256x128xbf16>
    %cst = arith.constant dense<0.000000e+00> : vector<32x128xf32>
    %8 = tpu.matmul %5, %7, %cst {dimension_numbers = #tpu.dot_dimension_numbers<[1], [0], [0], [1], [0, 0, 1, 1], [], []>} : vector<32x256xbf16>, vector<256x128xbf16>, vector<32x128xf32> -> vector<32x128xf32>
    %9 = arith.addf %3, %8 : vector<32x128xf32>
    %c0_8 = arith.constant 0 : index
    %c0_9 = arith.constant 0 : index
    %10 = vector.load %arg8[%c0_8, %c0_9] : memref<32x128xf32, #tpu.memory_space<vmem>>, vector<32x128xf32>
    tpu.vector_store %arg8[%c0_8, %c0_9], %9 {strides = array<i32>} : memref<32x128xf32, #tpu.memory_space<vmem>>, vector<32x128xf32>,
    %c0_i32_10 = arith.constant 0 : i32
    %11 = arith.cmpi eq, %arg3, %c0_i32_10 : i32
    %12 = arith.extui %11 : i1 to i32
    %c0_i32_11 = arith.constant 0 : i32
    %13 = arith.cmpi ne, %12, %c0_i32_11 : i32
    scf.if %13 {
      %c0_12 = arith.constant 0 : index
      %c0_13 = arith.constant 0 : index
      %14 = vector.load %arg8[%c0_12, %c0_13] : memref<32x128xf32, #tpu.memory_space<vmem>>, vector<32x128xf32>
      %c0_14 = arith.constant 0 : index
      %c0_15 = arith.constant 0 : index
      %c0_16 = arith.constant 0 : index
      %15 = vector.load %arg6[%c0_14, %c0_15, %c0_16] : memref<1x1x128xf32, #tpu.memory_space<vmem>>, vector<1x1x128xf32>
      %16 = vector.shape_cast %15 : vector<1x1x128xf32> to vector<1x128xf32>
      %17 = vector.broadcast %16 : vector<1x128xf32> to vector<32x128xf32>
      %18 = arith.addf %14, %17 : vector<32x128xf32>
      %cst_17 = arith.constant 0.000000e+00 : f32
      %19 = vector.broadcast %cst_17 : f32 to vector<32x128xf32>
      %20 = arith.maximumf %18, %19 : vector<32x128xf32>
      %21 = arith.truncf %20 : vector<32x128xf32> to vector<32x128xbf16>
      %c0_18 = arith.constant 0 : index
      %c0_19 = arith.constant 0 : index
      %c0_20 = arith.constant 0 : index
      %22 = vector.load %arg7[%c0_18, %c0_19, %c0_20] : memref<1x32x128xbf16, #tpu.memory_space<vmem>>, vector<1x32x128xbf16>
      %23 = vector.shape_cast %22 : vector<1x32x128xbf16> to vector<32x128xbf16>
      %24 = vector.shape_cast %21 : vector<32x128xbf16> to vector<1x32x128xbf16>
      tpu.vector_store %arg7[%c0_18, %c0_19, %c0_20], %24 {strides = array<i32>} : memref<1x32x128xbf16, #tpu.memory_space<vmem>>, vector<1x32x128xbf16>,
    } else {
    }
    return
  }
  func.func @transform_0(%arg0: i32, %arg1: i32, %arg2: i32, %arg3: i32) -> (i32, i32, i32) {
    %c0_i32 = arith.constant 0 : i32
    return %arg0, %arg1, %arg3 : i32, i32, i32
  }
  func.func @transform_1(%arg0: i32, %arg1: i32, %arg2: i32, %arg3: i32) -> (i32, i32, i32) {
    %c0_i32 = arith.constant 0 : i32
    return %arg0, %arg3, %arg2 : i32, i32, i32
  }
  func.func @transform_2(%arg0: i32, %arg1: i32, %arg2: i32, %arg3: i32) -> (i32, i32, i32) {
    %c0_i32 = arith.constant 0 : i32
    %c0_i32_0 = arith.constant 0 : i32
    return %arg0, %c0_i32, %arg2 : i32, i32, i32
  }
  func.func @transform_3(%arg0: i32, %arg1: i32, %arg2: i32, %arg3: i32) -> (i32, i32, i32) {
    %c0_i32 = arith.constant 0 : i32
    return %arg0, %arg1, %arg2 : i32, i32, i32
  }
}

module attributes {stable_mosaic.version = 11 : i64} {
  func.func @kern(%arg0: i32, %arg1: i32, %arg2: i32, %arg3: i32, %arg4: memref<1x16x1152xbf16, #tpu.memory_space<vmem>>, %arg5: memref<1x1152x128xbf16, #tpu.memory_space<vmem>>, %arg6: memref<1x1x128xf32, #tpu.memory_space<vmem>>, %arg7: memref<1x16x128xbf16, #tpu.memory_space<vmem>>, %arg8: memref<16x128xf32, #tpu.memory_space<vmem>>) attributes {dimension_semantics = [#tpu.dimension_semantics<parallel>, #tpu.dimension_semantics<parallel>, #tpu.dimension_semantics<parallel>, #tpu.dimension_semantics<arbitrary>], iteration_bounds = array<i64: 2, 1, 1, 1>, scalar_prefetch = 0 : i64, scratch_operands = 1 : i64, tpu.core_type = #tpu.core_type<tc>, window_params = [{transform_indices = @transform_0, window_bounds = array<i64: 1, 16, 1152>}, {transform_indices = @transform_1, window_bounds = array<i64: 1, 1152, 128>}, {transform_indices = @transform_2, window_bounds = array<i64: 1, 1, 128>}, {transform_indices = @transform_3, window_bounds = array<i64: 1, 16, 128>}]} {
    %c0_i32 = arith.constant 0 : i32
    %0 = arith.cmpi eq, %arg3, %c0_i32 : i32
    %1 = arith.extui %0 : i1 to i32
    %c0_i32_0 = arith.constant 0 : i32
    %2 = arith.cmpi ne, %1, %c0_i32_0 : i32
    scf.if %2 {
      %cst_12 = arith.constant 0.000000e+00 : f32
      %14 = vector.broadcast %cst_12 : f32 to vector<16x128xf32>
      %c0_13 = arith.constant 0 : index
      %c0_14 = arith.constant 0 : index
      %15 = vector.load %arg8[%c0_13, %c0_14] : memref<16x128xf32, #tpu.memory_space<vmem>>, vector<16x128xf32>
      tpu.vector_store %arg8[%c0_13, %c0_14], %14 {strides = array<i32>} : memref<16x128xf32, #tpu.memory_space<vmem>>, vector<16x128xf32>,
    } else {
    }
    %c0 = arith.constant 0 : index
    %c0_1 = arith.constant 0 : index
    %3 = vector.load %arg8[%c0, %c0_1] : memref<16x128xf32, #tpu.memory_space<vmem>>, vector<16x128xf32>
    %c0_2 = arith.constant 0 : index
    %c0_3 = arith.constant 0 : index
    %c0_4 = arith.constant 0 : index
    %4 = vector.load %arg4[%c0_2, %c0_3, %c0_4] : memref<1x16x1152xbf16, #tpu.memory_space<vmem>>, vector<1x16x1152xbf16>
    %5 = vector.shape_cast %4 : vector<1x16x1152xbf16> to vector<16x1152xbf16>
    %c0_5 = arith.constant 0 : index
    %c0_6 = arith.constant 0 : index
    %c0_7 = arith.constant 0 : index
    %6 = vector.load %arg5[%c0_5, %c0_6, %c0_7] : memref<1x1152x128xbf16, #tpu.memory_space<vmem>>, vector<1x1152x128xbf16>
    %7 = vector.shape_cast %6 : vector<1x1152x128xbf16> to vector<1152x128xbf16>
    %cst = arith.constant dense<0.000000e+00> : vector<16x128xf32>
    %8 = tpu.matmul %5, %7, %cst {dimension_numbers = #tpu.dot_dimension_numbers<[1], [0], [0], [1], [0, 0, 1, 1], [], []>} : vector<16x1152xbf16>, vector<1152x128xbf16>, vector<16x128xf32> -> vector<16x128xf32>
    %9 = arith.addf %3, %8 : vector<16x128xf32>
    %c0_8 = arith.constant 0 : index
    %c0_9 = arith.constant 0 : index
    %10 = vector.load %arg8[%c0_8, %c0_9] : memref<16x128xf32, #tpu.memory_space<vmem>>, vector<16x128xf32>
    tpu.vector_store %arg8[%c0_8, %c0_9], %9 {strides = array<i32>} : memref<16x128xf32, #tpu.memory_space<vmem>>, vector<16x128xf32>,
    %c0_i32_10 = arith.constant 0 : i32
    %11 = arith.cmpi eq, %arg3, %c0_i32_10 : i32
    %12 = arith.extui %11 : i1 to i32
    %c0_i32_11 = arith.constant 0 : i32
    %13 = arith.cmpi ne, %12, %c0_i32_11 : i32
    scf.if %13 {
      %c0_12 = arith.constant 0 : index
      %c0_13 = arith.constant 0 : index
      %14 = vector.load %arg8[%c0_12, %c0_13] : memref<16x128xf32, #tpu.memory_space<vmem>>, vector<16x128xf32>
      %c0_14 = arith.constant 0 : index
      %c0_15 = arith.constant 0 : index
      %c0_16 = arith.constant 0 : index
      %15 = vector.load %arg6[%c0_14, %c0_15, %c0_16] : memref<1x1x128xf32, #tpu.memory_space<vmem>>, vector<1x1x128xf32>
      %16 = vector.shape_cast %15 : vector<1x1x128xf32> to vector<1x128xf32>
      %17 = vector.broadcast %16 : vector<1x128xf32> to vector<16x128xf32>
      %18 = arith.addf %14, %17 : vector<16x128xf32>
      %cst_17 = arith.constant 0.000000e+00 : f32
      %19 = vector.broadcast %cst_17 : f32 to vector<16x128xf32>
      %20 = arith.maximumf %18, %19 : vector<16x128xf32>
      %21 = arith.truncf %20 : vector<16x128xf32> to vector<16x128xbf16>
      %c0_18 = arith.constant 0 : index
      %c0_19 = arith.constant 0 : index
      %c0_20 = arith.constant 0 : index
      %22 = vector.load %arg7[%c0_18, %c0_19, %c0_20] : memref<1x16x128xbf16, #tpu.memory_space<vmem>>, vector<1x16x128xbf16>
      %23 = vector.shape_cast %22 : vector<1x16x128xbf16> to vector<16x128xbf16>
      %24 = vector.shape_cast %21 : vector<16x128xbf16> to vector<1x16x128xbf16>
      tpu.vector_store %arg7[%c0_18, %c0_19, %c0_20], %24 {strides = array<i32>} : memref<1x16x128xbf16, #tpu.memory_space<vmem>>, vector<1x16x128xbf16>,
    } else {
    }
    return
  }
  func.func @transform_0(%arg0: i32, %arg1: i32, %arg2: i32, %arg3: i32) -> (i32, i32, i32) {
    %c0_i32 = arith.constant 0 : i32
    return %arg0, %arg1, %arg3 : i32, i32, i32
  }
  func.func @transform_1(%arg0: i32, %arg1: i32, %arg2: i32, %arg3: i32) -> (i32, i32, i32) {
    %c0_i32 = arith.constant 0 : i32
    return %arg0, %arg3, %arg2 : i32, i32, i32
  }
  func.func @transform_2(%arg0: i32, %arg1: i32, %arg2: i32, %arg3: i32) -> (i32, i32, i32) {
    %c0_i32 = arith.constant 0 : i32
    %c0_i32_0 = arith.constant 0 : i32
    return %arg0, %c0_i32, %arg2 : i32, i32, i32
  }
  func.func @transform_3(%arg0: i32, %arg1: i32, %arg2: i32, %arg3: i32) -> (i32, i32, i32) {
    %c0_i32 = arith.constant 0 : i32
    return %arg0, %arg1, %arg2 : i32, i32, i32
  }
}

module attributes {stable_mosaic.version = 11 : i64} {
  func.func @kern(%arg0: i32, %arg1: i32, %arg2: i32, %arg3: i32, %arg4: memref<1x16x256xbf16, #tpu.memory_space<vmem>>, %arg5: memref<1x256x512xbf16, #tpu.memory_space<vmem>>, %arg6: memref<1x1x512xf32, #tpu.memory_space<vmem>>, %arg7: memref<1x16x512xbf16, #tpu.memory_space<vmem>>, %arg8: memref<16x512xf32, #tpu.memory_space<vmem>>) attributes {dimension_semantics = [#tpu.dimension_semantics<parallel>, #tpu.dimension_semantics<parallel>, #tpu.dimension_semantics<parallel>, #tpu.dimension_semantics<arbitrary>], iteration_bounds = array<i64: 2, 1, 1, 1>, scalar_prefetch = 0 : i64, scratch_operands = 1 : i64, tpu.core_type = #tpu.core_type<tc>, window_params = [{transform_indices = @transform_0, window_bounds = array<i64: 1, 16, 256>}, {transform_indices = @transform_1, window_bounds = array<i64: 1, 256, 512>}, {transform_indices = @transform_2, window_bounds = array<i64: 1, 1, 512>}, {transform_indices = @transform_3, window_bounds = array<i64: 1, 16, 512>}]} {
    %c0_i32 = arith.constant 0 : i32
    %0 = arith.cmpi eq, %arg3, %c0_i32 : i32
    %1 = arith.extui %0 : i1 to i32
    %c0_i32_0 = arith.constant 0 : i32
    %2 = arith.cmpi ne, %1, %c0_i32_0 : i32
    scf.if %2 {
      %cst_12 = arith.constant 0.000000e+00 : f32
      %14 = vector.broadcast %cst_12 : f32 to vector<16x512xf32>
      %c0_13 = arith.constant 0 : index
      %c0_14 = arith.constant 0 : index
      %15 = vector.load %arg8[%c0_13, %c0_14] : memref<16x512xf32, #tpu.memory_space<vmem>>, vector<16x512xf32>
      tpu.vector_store %arg8[%c0_13, %c0_14], %14 {strides = array<i32>} : memref<16x512xf32, #tpu.memory_space<vmem>>, vector<16x512xf32>,
    } else {
    }
    %c0 = arith.constant 0 : index
    %c0_1 = arith.constant 0 : index
    %3 = vector.load %arg8[%c0, %c0_1] : memref<16x512xf32, #tpu.memory_space<vmem>>, vector<16x512xf32>
    %c0_2 = arith.constant 0 : index
    %c0_3 = arith.constant 0 : index
    %c0_4 = arith.constant 0 : index
    %4 = vector.load %arg4[%c0_2, %c0_3, %c0_4] : memref<1x16x256xbf16, #tpu.memory_space<vmem>>, vector<1x16x256xbf16>
    %5 = vector.shape_cast %4 : vector<1x16x256xbf16> to vector<16x256xbf16>
    %c0_5 = arith.constant 0 : index
    %c0_6 = arith.constant 0 : index
    %c0_7 = arith.constant 0 : index
    %6 = vector.load %arg5[%c0_5, %c0_6, %c0_7] : memref<1x256x512xbf16, #tpu.memory_space<vmem>>, vector<1x256x512xbf16>
    %7 = vector.shape_cast %6 : vector<1x256x512xbf16> to vector<256x512xbf16>
    %cst = arith.constant dense<0.000000e+00> : vector<16x512xf32>
    %8 = tpu.matmul %5, %7, %cst {dimension_numbers = #tpu.dot_dimension_numbers<[1], [0], [0], [1], [0, 0, 1, 1], [], []>} : vector<16x256xbf16>, vector<256x512xbf16>, vector<16x512xf32> -> vector<16x512xf32>
    %9 = arith.addf %3, %8 : vector<16x512xf32>
    %c0_8 = arith.constant 0 : index
    %c0_9 = arith.constant 0 : index
    %10 = vector.load %arg8[%c0_8, %c0_9] : memref<16x512xf32, #tpu.memory_space<vmem>>, vector<16x512xf32>
    tpu.vector_store %arg8[%c0_8, %c0_9], %9 {strides = array<i32>} : memref<16x512xf32, #tpu.memory_space<vmem>>, vector<16x512xf32>,
    %c0_i32_10 = arith.constant 0 : i32
    %11 = arith.cmpi eq, %arg3, %c0_i32_10 : i32
    %12 = arith.extui %11 : i1 to i32
    %c0_i32_11 = arith.constant 0 : i32
    %13 = arith.cmpi ne, %12, %c0_i32_11 : i32
    scf.if %13 {
      %c0_12 = arith.constant 0 : index
      %c0_13 = arith.constant 0 : index
      %14 = vector.load %arg8[%c0_12, %c0_13] : memref<16x512xf32, #tpu.memory_space<vmem>>, vector<16x512xf32>
      %c0_14 = arith.constant 0 : index
      %c0_15 = arith.constant 0 : index
      %c0_16 = arith.constant 0 : index
      %15 = vector.load %arg6[%c0_14, %c0_15, %c0_16] : memref<1x1x512xf32, #tpu.memory_space<vmem>>, vector<1x1x512xf32>
      %16 = vector.shape_cast %15 : vector<1x1x512xf32> to vector<1x512xf32>
      %17 = vector.broadcast %16 : vector<1x512xf32> to vector<16x512xf32>
      %18 = arith.addf %14, %17 : vector<16x512xf32>
      %19 = arith.truncf %18 : vector<16x512xf32> to vector<16x512xbf16>
      %c0_17 = arith.constant 0 : index
      %c0_18 = arith.constant 0 : index
      %c0_19 = arith.constant 0 : index
      %20 = vector.load %arg7[%c0_17, %c0_18, %c0_19] : memref<1x16x512xbf16, #tpu.memory_space<vmem>>, vector<1x16x512xbf16>
      %21 = vector.shape_cast %20 : vector<1x16x512xbf16> to vector<16x512xbf16>
      %22 = vector.shape_cast %19 : vector<16x512xbf16> to vector<1x16x512xbf16>
      tpu.vector_store %arg7[%c0_17, %c0_18, %c0_19], %22 {strides = array<i32>} : memref<1x16x512xbf16, #tpu.memory_space<vmem>>, vector<1x16x512xbf16>,
    } else {
    }
    return
  }
  func.func @transform_0(%arg0: i32, %arg1: i32, %arg2: i32, %arg3: i32) -> (i32, i32, i32) {
    %c0_i32 = arith.constant 0 : i32
    return %arg0, %arg1, %arg3 : i32, i32, i32
  }
  func.func @transform_1(%arg0: i32, %arg1: i32, %arg2: i32, %arg3: i32) -> (i32, i32, i32) {
    %c0_i32 = arith.constant 0 : i32
    return %arg0, %arg3, %arg2 : i32, i32, i32
  }
  func.func @transform_2(%arg0: i32, %arg1: i32, %arg2: i32, %arg3: i32) -> (i32, i32, i32) {
    %c0_i32 = arith.constant 0 : i32
    %c0_i32_0 = arith.constant 0 : i32
    return %arg0, %c0_i32, %arg2 : i32, i32, i32
  }
  func.func @transform_3(%arg0: i32, %arg1: i32, %arg2: i32, %arg3: i32) -> (i32, i32, i32) {
    %c0_i32 = arith.constant 0 : i32
    return %arg0, %arg1, %arg2 : i32, i32, i32
  }
}

module attributes {stable_mosaic.version = 11 : i64} {
  func.func @kern(%arg0: i32, %arg1: i32, %arg2: i32, %arg3: i32, %arg4: memref<1x16x128xbf16, #tpu.memory_space<vmem>>, %arg5: memref<1x128x512xbf16, #tpu.memory_space<vmem>>, %arg6: memref<1x1x512xf32, #tpu.memory_space<vmem>>, %arg7: memref<1x16x512xbf16, #tpu.memory_space<vmem>>, %arg8: memref<1x16x512xbf16, #tpu.memory_space<vmem>>, %arg9: memref<16x512xf32, #tpu.memory_space<vmem>>) attributes {dimension_semantics = [#tpu.dimension_semantics<parallel>, #tpu.dimension_semantics<parallel>, #tpu.dimension_semantics<parallel>, #tpu.dimension_semantics<arbitrary>], iteration_bounds = array<i64: 2, 1, 1, 1>, scalar_prefetch = 0 : i64, scratch_operands = 1 : i64, tpu.core_type = #tpu.core_type<tc>, window_params = [{transform_indices = @transform_0, window_bounds = array<i64: 1, 16, 128>}, {transform_indices = @transform_1, window_bounds = array<i64: 1, 128, 512>}, {transform_indices = @transform_2, window_bounds = array<i64: 1, 1, 512>}, {transform_indices = @transform_3, window_bounds = array<i64: 1, 16, 512>}, {transform_indices = @transform_4, window_bounds = array<i64: 1, 16, 512>}]} {
    %c0_i32 = arith.constant 0 : i32
    %0 = arith.cmpi eq, %arg3, %c0_i32 : i32
    %1 = arith.extui %0 : i1 to i32
    %c0_i32_0 = arith.constant 0 : i32
    %2 = arith.cmpi ne, %1, %c0_i32_0 : i32
    scf.if %2 {
      %cst_12 = arith.constant 0.000000e+00 : f32
      %14 = vector.broadcast %cst_12 : f32 to vector<16x512xf32>
      %c0_13 = arith.constant 0 : index
      %c0_14 = arith.constant 0 : index
      %15 = vector.load %arg9[%c0_13, %c0_14] : memref<16x512xf32, #tpu.memory_space<vmem>>, vector<16x512xf32>
      tpu.vector_store %arg9[%c0_13, %c0_14], %14 {strides = array<i32>} : memref<16x512xf32, #tpu.memory_space<vmem>>, vector<16x512xf32>,
    } else {
    }
    %c0 = arith.constant 0 : index
    %c0_1 = arith.constant 0 : index
    %3 = vector.load %arg9[%c0, %c0_1] : memref<16x512xf32, #tpu.memory_space<vmem>>, vector<16x512xf32>
    %c0_2 = arith.constant 0 : index
    %c0_3 = arith.constant 0 : index
    %c0_4 = arith.constant 0 : index
    %4 = vector.load %arg4[%c0_2, %c0_3, %c0_4] : memref<1x16x128xbf16, #tpu.memory_space<vmem>>, vector<1x16x128xbf16>
    %5 = vector.shape_cast %4 : vector<1x16x128xbf16> to vector<16x128xbf16>
    %c0_5 = arith.constant 0 : index
    %c0_6 = arith.constant 0 : index
    %c0_7 = arith.constant 0 : index
    %6 = vector.load %arg5[%c0_5, %c0_6, %c0_7] : memref<1x128x512xbf16, #tpu.memory_space<vmem>>, vector<1x128x512xbf16>
    %7 = vector.shape_cast %6 : vector<1x128x512xbf16> to vector<128x512xbf16>
    %cst = arith.constant dense<0.000000e+00> : vector<16x512xf32>
    %8 = tpu.matmul %5, %7, %cst {dimension_numbers = #tpu.dot_dimension_numbers<[1], [0], [0], [1], [0, 0, 1, 1], [], []>} : vector<16x128xbf16>, vector<128x512xbf16>, vector<16x512xf32> -> vector<16x512xf32>
    %9 = arith.addf %3, %8 : vector<16x512xf32>
    %c0_8 = arith.constant 0 : index
    %c0_9 = arith.constant 0 : index
    %10 = vector.load %arg9[%c0_8, %c0_9] : memref<16x512xf32, #tpu.memory_space<vmem>>, vector<16x512xf32>
    tpu.vector_store %arg9[%c0_8, %c0_9], %9 {strides = array<i32>} : memref<16x512xf32, #tpu.memory_space<vmem>>, vector<16x512xf32>,
    %c0_i32_10 = arith.constant 0 : i32
    %11 = arith.cmpi eq, %arg3, %c0_i32_10 : i32
    %12 = arith.extui %11 : i1 to i32
    %c0_i32_11 = arith.constant 0 : i32
    %13 = arith.cmpi ne, %12, %c0_i32_11 : i32
    scf.if %13 {
      %c0_12 = arith.constant 0 : index
      %c0_13 = arith.constant 0 : index
      %14 = vector.load %arg9[%c0_12, %c0_13] : memref<16x512xf32, #tpu.memory_space<vmem>>, vector<16x512xf32>
      %c0_14 = arith.constant 0 : index
      %c0_15 = arith.constant 0 : index
      %c0_16 = arith.constant 0 : index
      %15 = vector.load %arg6[%c0_14, %c0_15, %c0_16] : memref<1x1x512xf32, #tpu.memory_space<vmem>>, vector<1x1x512xf32>
      %16 = vector.shape_cast %15 : vector<1x1x512xf32> to vector<1x512xf32>
      %17 = vector.broadcast %16 : vector<1x512xf32> to vector<16x512xf32>
      %18 = arith.addf %14, %17 : vector<16x512xf32>
      %c0_17 = arith.constant 0 : index
      %c0_18 = arith.constant 0 : index
      %c0_19 = arith.constant 0 : index
      %19 = vector.load %arg7[%c0_17, %c0_18, %c0_19] : memref<1x16x512xbf16, #tpu.memory_space<vmem>>, vector<1x16x512xbf16>
      %20 = vector.shape_cast %19 : vector<1x16x512xbf16> to vector<16x512xbf16>
      %21 = arith.extf %20 : vector<16x512xbf16> to vector<16x512xf32>
      %22 = arith.addf %18, %21 : vector<16x512xf32>
      %cst_20 = arith.constant 0.000000e+00 : f32
      %23 = vector.broadcast %cst_20 : f32 to vector<16x512xf32>
      %24 = arith.maximumf %22, %23 : vector<16x512xf32>
      %25 = arith.truncf %24 : vector<16x512xf32> to vector<16x512xbf16>
      %c0_21 = arith.constant 0 : index
      %c0_22 = arith.constant 0 : index
      %c0_23 = arith.constant 0 : index
      %26 = vector.load %arg8[%c0_21, %c0_22, %c0_23] : memref<1x16x512xbf16, #tpu.memory_space<vmem>>, vector<1x16x512xbf16>
      %27 = vector.shape_cast %26 : vector<1x16x512xbf16> to vector<16x512xbf16>
      %28 = vector.shape_cast %25 : vector<16x512xbf16> to vector<1x16x512xbf16>
      tpu.vector_store %arg8[%c0_21, %c0_22, %c0_23], %28 {strides = array<i32>} : memref<1x16x512xbf16, #tpu.memory_space<vmem>>, vector<1x16x512xbf16>,
    } else {
    }
    return
  }
  func.func @transform_0(%arg0: i32, %arg1: i32, %arg2: i32, %arg3: i32) -> (i32, i32, i32) {
    %c0_i32 = arith.constant 0 : i32
    return %arg0, %arg1, %arg3 : i32, i32, i32
  }
  func.func @transform_1(%arg0: i32, %arg1: i32, %arg2: i32, %arg3: i32) -> (i32, i32, i32) {
    %c0_i32 = arith.constant 0 : i32
    return %arg0, %arg3, %arg2 : i32, i32, i32
  }
  func.func @transform_2(%arg0: i32, %arg1: i32, %arg2: i32, %arg3: i32) -> (i32, i32, i32) {
    %c0_i32 = arith.constant 0 : i32
    %c0_i32_0 = arith.constant 0 : i32
    return %arg0, %c0_i32, %arg2 : i32, i32, i32
  }
  func.func @transform_3(%arg0: i32, %arg1: i32, %arg2: i32, %arg3: i32) -> (i32, i32, i32) {
    %c0_i32 = arith.constant 0 : i32
    return %arg0, %arg1, %arg2 : i32, i32, i32
  }
  func.func @transform_4(%arg0: i32, %arg1: i32, %arg2: i32, %arg3: i32) -> (i32, i32, i32) {
    %c0_i32 = arith.constant 0 : i32
    return %arg0, %arg1, %arg2 : i32, i32, i32
  }
}

module attributes {stable_mosaic.version = 11 : i64} {
  func.func @kern(%arg0: i32, %arg1: i32, %arg2: i32, %arg3: i32, %arg4: memref<1x16x512xbf16, #tpu.memory_space<vmem>>, %arg5: memref<1x512x128xbf16, #tpu.memory_space<vmem>>, %arg6: memref<1x1x128xf32, #tpu.memory_space<vmem>>, %arg7: memref<1x16x128xbf16, #tpu.memory_space<vmem>>, %arg8: memref<16x128xf32, #tpu.memory_space<vmem>>) attributes {dimension_semantics = [#tpu.dimension_semantics<parallel>, #tpu.dimension_semantics<parallel>, #tpu.dimension_semantics<parallel>, #tpu.dimension_semantics<arbitrary>], iteration_bounds = array<i64: 2, 1, 1, 1>, scalar_prefetch = 0 : i64, scratch_operands = 1 : i64, tpu.core_type = #tpu.core_type<tc>, window_params = [{transform_indices = @transform_0, window_bounds = array<i64: 1, 16, 512>}, {transform_indices = @transform_1, window_bounds = array<i64: 1, 512, 128>}, {transform_indices = @transform_2, window_bounds = array<i64: 1, 1, 128>}, {transform_indices = @transform_3, window_bounds = array<i64: 1, 16, 128>}]} {
    %c0_i32 = arith.constant 0 : i32
    %0 = arith.cmpi eq, %arg3, %c0_i32 : i32
    %1 = arith.extui %0 : i1 to i32
    %c0_i32_0 = arith.constant 0 : i32
    %2 = arith.cmpi ne, %1, %c0_i32_0 : i32
    scf.if %2 {
      %cst_12 = arith.constant 0.000000e+00 : f32
      %14 = vector.broadcast %cst_12 : f32 to vector<16x128xf32>
      %c0_13 = arith.constant 0 : index
      %c0_14 = arith.constant 0 : index
      %15 = vector.load %arg8[%c0_13, %c0_14] : memref<16x128xf32, #tpu.memory_space<vmem>>, vector<16x128xf32>
      tpu.vector_store %arg8[%c0_13, %c0_14], %14 {strides = array<i32>} : memref<16x128xf32, #tpu.memory_space<vmem>>, vector<16x128xf32>,
    } else {
    }
    %c0 = arith.constant 0 : index
    %c0_1 = arith.constant 0 : index
    %3 = vector.load %arg8[%c0, %c0_1] : memref<16x128xf32, #tpu.memory_space<vmem>>, vector<16x128xf32>
    %c0_2 = arith.constant 0 : index
    %c0_3 = arith.constant 0 : index
    %c0_4 = arith.constant 0 : index
    %4 = vector.load %arg4[%c0_2, %c0_3, %c0_4] : memref<1x16x512xbf16, #tpu.memory_space<vmem>>, vector<1x16x512xbf16>
    %5 = vector.shape_cast %4 : vector<1x16x512xbf16> to vector<16x512xbf16>
    %c0_5 = arith.constant 0 : index
    %c0_6 = arith.constant 0 : index
    %c0_7 = arith.constant 0 : index
    %6 = vector.load %arg5[%c0_5, %c0_6, %c0_7] : memref<1x512x128xbf16, #tpu.memory_space<vmem>>, vector<1x512x128xbf16>
    %7 = vector.shape_cast %6 : vector<1x512x128xbf16> to vector<512x128xbf16>
    %cst = arith.constant dense<0.000000e+00> : vector<16x128xf32>
    %8 = tpu.matmul %5, %7, %cst {dimension_numbers = #tpu.dot_dimension_numbers<[1], [0], [0], [1], [0, 0, 1, 1], [], []>} : vector<16x512xbf16>, vector<512x128xbf16>, vector<16x128xf32> -> vector<16x128xf32>
    %9 = arith.addf %3, %8 : vector<16x128xf32>
    %c0_8 = arith.constant 0 : index
    %c0_9 = arith.constant 0 : index
    %10 = vector.load %arg8[%c0_8, %c0_9] : memref<16x128xf32, #tpu.memory_space<vmem>>, vector<16x128xf32>
    tpu.vector_store %arg8[%c0_8, %c0_9], %9 {strides = array<i32>} : memref<16x128xf32, #tpu.memory_space<vmem>>, vector<16x128xf32>,
    %c0_i32_10 = arith.constant 0 : i32
    %11 = arith.cmpi eq, %arg3, %c0_i32_10 : i32
    %12 = arith.extui %11 : i1 to i32
    %c0_i32_11 = arith.constant 0 : i32
    %13 = arith.cmpi ne, %12, %c0_i32_11 : i32
    scf.if %13 {
      %c0_12 = arith.constant 0 : index
      %c0_13 = arith.constant 0 : index
      %14 = vector.load %arg8[%c0_12, %c0_13] : memref<16x128xf32, #tpu.memory_space<vmem>>, vector<16x128xf32>
      %c0_14 = arith.constant 0 : index
      %c0_15 = arith.constant 0 : index
      %c0_16 = arith.constant 0 : index
      %15 = vector.load %arg6[%c0_14, %c0_15, %c0_16] : memref<1x1x128xf32, #tpu.memory_space<vmem>>, vector<1x1x128xf32>
      %16 = vector.shape_cast %15 : vector<1x1x128xf32> to vector<1x128xf32>
      %17 = vector.broadcast %16 : vector<1x128xf32> to vector<16x128xf32>
      %18 = arith.addf %14, %17 : vector<16x128xf32>
      %cst_17 = arith.constant 0.000000e+00 : f32
      %19 = vector.broadcast %cst_17 : f32 to vector<16x128xf32>
      %20 = arith.maximumf %18, %19 : vector<16x128xf32>
      %21 = arith.truncf %20 : vector<16x128xf32> to vector<16x128xbf16>
      %c0_18 = arith.constant 0 : index
      %c0_19 = arith.constant 0 : index
      %c0_20 = arith.constant 0 : index
      %22 = vector.load %arg7[%c0_18, %c0_19, %c0_20] : memref<1x16x128xbf16, #tpu.memory_space<vmem>>, vector<1x16x128xbf16>
      %23 = vector.shape_cast %22 : vector<1x16x128xbf16> to vector<16x128xbf16>
      %24 = vector.shape_cast %21 : vector<16x128xbf16> to vector<1x16x128xbf16>
      tpu.vector_store %arg7[%c0_18, %c0_19, %c0_20], %24 {strides = array<i32>} : memref<1x16x128xbf16, #tpu.memory_space<vmem>>, vector<1x16x128xbf16>,
    } else {
    }
    return
  }
  func.func @transform_0(%arg0: i32, %arg1: i32, %arg2: i32, %arg3: i32) -> (i32, i32, i32) {
    %c0_i32 = arith.constant 0 : i32
    return %arg0, %arg1, %arg3 : i32, i32, i32
  }
  func.func @transform_1(%arg0: i32, %arg1: i32, %arg2: i32, %arg3: i32) -> (i32, i32, i32) {
    %c0_i32 = arith.constant 0 : i32
    return %arg0, %arg3, %arg2 : i32, i32, i32
  }
  func.func @transform_2(%arg0: i32, %arg1: i32, %arg2: i32, %arg3: i32) -> (i32, i32, i32) {
    %c0_i32 = arith.constant 0 : i32
    %c0_i32_0 = arith.constant 0 : i32
    return %arg0, %c0_i32, %arg2 : i32, i32, i32
  }
  func.func @transform_3(%arg0: i32, %arg1: i32, %arg2: i32, %arg3: i32) -> (i32, i32, i32) {
    %c0_i32 = arith.constant 0 : i32
    return %arg0, %arg1, %arg2 : i32, i32, i32
  }
}

module attributes {stable_mosaic.version = 11 : i64} {
  func.func @kern(%arg0: i32, %arg1: memref<2x4x512xbf16, #tpu.memory_space<vmem>>, %arg2: memref<2x512xf32, #tpu.memory_space<vmem>>, %arg3: memref<2x4x512xbf16, #tpu.memory_space<vmem>>, %arg4: memref<2x4x1xf32, #tpu.memory_space<vmem>>, %arg5: memref<2x4x1xf32, #tpu.memory_space<vmem>>) attributes {dimension_semantics = [#tpu.dimension_semantics<arbitrary>], iteration_bounds = array<i64: 1>, scalar_prefetch = 0 : i64, scratch_operands = 0 : i64, tpu.core_type = #tpu.core_type<tc>, window_params = [{pipeline_mode = #tpu.pipeline_mode<synchronous>, transform_indices = @transform_0, window_bounds = array<i64: 2, 4, 512>}, {pipeline_mode = #tpu.pipeline_mode<synchronous>, transform_indices = @transform_1, window_bounds = array<i64: 2, 512>}, {pipeline_mode = #tpu.pipeline_mode<synchronous>, transform_indices = @transform_2, window_bounds = array<i64: 2, 4, 512>}, {pipeline_mode = #tpu.pipeline_mode<synchronous>, transform_indices = @transform_3, window_bounds = array<i64: 2, 4, 1>}, {pipeline_mode = #tpu.pipeline_mode<synchronous>, transform_indices = @transform_4, window_bounds = array<i64: 2, 4, 1>}]} {
    %c0 = arith.constant 0 : index
    %c0_0 = arith.constant 0 : index
    %c0_1 = arith.constant 0 : index
    %0 = vector.load %arg1[%c0, %c0_0, %c0_1] : memref<2x4x512xbf16, #tpu.memory_space<vmem>>, vector<2x4x512xbf16>
    %1 = arith.extf %0 : vector<2x4x512xbf16> to vector<2x4x512xf32>
    %c0_2 = arith.constant 0 : index
    %c0_3 = arith.constant 0 : index
    %2 = vector.load %arg2[%c0_2, %c0_3] : memref<2x512xf32, #tpu.memory_space<vmem>>, vector<2x512xf32>
    %3 = arith.negf %2 : vector<2x512xf32>
    %4 = math.exp %3 : vector<2x512xf32>
    %cst = arith.constant 1.000000e+00 : f32
    %5 = vector.broadcast %cst : f32 to vector<2x512xf32>
    %6 = arith.addf %5, %4 : vector<2x512xf32>
    %7 = arith.divf %5, %6 : vector<2x512xf32>
    %8 = vector.shape_cast %7 : vector<2x512xf32> to vector<2x1x512xf32>
    %9 = vector.broadcast %8 : vector<2x1x512xf32> to vector<2x4x512xf32>
    %10 = arith.mulf %1, %9 : vector<2x4x512xf32>
    %11 = arith.truncf %10 : vector<2x4x512xf32> to vector<2x4x512xbf16>
    %c0_4 = arith.constant 0 : index
    %c0_5 = arith.constant 0 : index
    %c0_6 = arith.constant 0 : index
    %12 = vector.load %arg3[%c0_4, %c0_5, %c0_6] : memref<2x4x512xbf16, #tpu.memory_space<vmem>>, vector<2x4x512xbf16>
    tpu.vector_store %arg3[%c0_4, %c0_5, %c0_6], %11 {strides = array<i32>} : memref<2x4x512xbf16, #tpu.memory_space<vmem>>, vector<2x4x512xbf16>,
    %cst_7 = arith.constant dense<0.000000e+00> : vector<2x4xf32>
    %13 = vector.multi_reduction <add>, %10, %cst_7 [2] : vector<2x4x512xf32> to vector<2x4xf32>
    %14 = vector.shape_cast %13 : vector<2x4xf32> to vector<2x4x1xf32>
    %cst_8 = arith.constant 5.120000e+02 : f32
    %15 = vector.broadcast %cst_8 : f32 to vector<2x4x1xf32>
    %16 = arith.divf %14, %15 : vector<2x4x1xf32>
    %c0_9 = arith.constant 0 : index
    %c0_10 = arith.constant 0 : index
    %c0_11 = arith.constant 0 : index
    %17 = vector.load %arg4[%c0_9, %c0_10, %c0_11] : memref<2x4x1xf32, #tpu.memory_space<vmem>>, vector<2x4x1xf32>
    tpu.vector_store %arg4[%c0_9, %c0_10, %c0_11], %16 {strides = array<i32>} : memref<2x4x1xf32, #tpu.memory_space<vmem>>, vector<2x4x1xf32>,
    %cst_12 = arith.constant dense<0xFF800000> : vector<2x4xf32>
    %18 = vector.multi_reduction <maximumf>, %10, %cst_12 [2] : vector<2x4x512xf32> to vector<2x4xf32>
    %19 = vector.shape_cast %18 : vector<2x4xf32> to vector<2x4x1xf32>
    %c0_13 = arith.constant 0 : index
    %c0_14 = arith.constant 0 : index
    %c0_15 = arith.constant 0 : index
    %20 = vector.load %arg5[%c0_13, %c0_14, %c0_15] : memref<2x4x1xf32, #tpu.memory_space<vmem>>, vector<2x4x1xf32>
    tpu.vector_store %arg5[%c0_13, %c0_14, %c0_15], %19 {strides = array<i32>} : memref<2x4x1xf32, #tpu.memory_space<vmem>>, vector<2x4x1xf32>,
    return
  }
  func.func @transform_0(%arg0: i32) -> (i32, i32, i32) {
    %c0_i32 = arith.constant 0 : i32
    %c0_i32_0 = arith.constant 0 : i32
    %c0_i32_1 = arith.constant 0 : i32
    %c0_i32_2 = arith.constant 0 : i32
    return %c0_i32, %c0_i32_0, %c0_i32_1 : i32, i32, i32
  }
  func.func @transform_1(%arg0: i32) -> (i32, i32) {
    %c0_i32 = arith.constant 0 : i32
    %c0_i32_0 = arith.constant 0 : i32
    %c0_i32_1 = arith.constant 0 : i32
    return %c0_i32, %c0_i32_0 : i32, i32
  }
  func.func @transform_2(%arg0: i32) -> (i32, i32, i32) {
    %c0_i32 = arith.constant 0 : i32
    %c0_i32_0 = arith.constant 0 : i32
    %c0_i32_1 = arith.constant 0 : i32
    %c0_i32_2 = arith.constant 0 : i32
    return %c0_i32, %c0_i32_0, %c0_i32_1 : i32, i32, i32
  }
  func.func @transform_3(%arg0: i32) -> (i32, i32, i32) {
    %c0_i32 = arith.constant 0 : i32
    %c0_i32_0 = arith.constant 0 : i32
    %c0_i32_1 = arith.constant 0 : i32
    %c0_i32_2 = arith.constant 0 : i32
    return %c0_i32, %c0_i32_0, %c0_i32_1 : i32, i32, i32
  }
  func.func @transform_4(%arg0: i32) -> (i32, i32, i32) {
    %c0_i32 = arith.constant 0 : i32
    %c0_i32_0 = arith.constant 0 : i32
    %c0_i32_1 = arith.constant 0 : i32
    %c0_i32_2 = arith.constant 0 : i32
    return %c0_i32, %c0_i32_0, %c0_i32_1 : i32, i32, i32
  }
}

module attributes {stable_mosaic.version = 11 : i64} {
  func.func @kern(%arg0: i32, %arg1: memref<2x4x512xbf16, #tpu.memory_space<vmem>>, %arg2: memref<2x512xf32, #tpu.memory_space<vmem>>, %arg3: memref<2x512xf32, #tpu.memory_space<vmem>>) attributes {dimension_semantics = [#tpu.dimension_semantics<arbitrary>], iteration_bounds = array<i64: 1>, scalar_prefetch = 0 : i64, scratch_operands = 0 : i64, tpu.core_type = #tpu.core_type<tc>, window_params = [{pipeline_mode = #tpu.pipeline_mode<synchronous>, transform_indices = @transform_0, window_bounds = array<i64: 2, 4, 512>}, {pipeline_mode = #tpu.pipeline_mode<synchronous>, transform_indices = @transform_1, window_bounds = array<i64: 2, 512>}, {pipeline_mode = #tpu.pipeline_mode<synchronous>, transform_indices = @transform_2, window_bounds = array<i64: 2, 512>}]} {
    %c0 = arith.constant 0 : index
    %c0_0 = arith.constant 0 : index
    %c0_1 = arith.constant 0 : index
    %0 = vector.load %arg1[%c0, %c0_0, %c0_1] : memref<2x4x512xbf16, #tpu.memory_space<vmem>>, vector<2x4x512xbf16>
    %1 = arith.extf %0 : vector<2x4x512xbf16> to vector<2x4x512xf32>
    %cst = arith.constant dense<0.000000e+00> : vector<2x512xf32>
    %2 = vector.multi_reduction <add>, %1, %cst [1] : vector<2x4x512xf32> to vector<2x512xf32>
    %cst_2 = arith.constant 4.000000e+00 : f32
    %3 = vector.broadcast %cst_2 : f32 to vector<2x512xf32>
    %4 = arith.divf %2, %3 : vector<2x512xf32>
    %c0_3 = arith.constant 0 : index
    %c0_4 = arith.constant 0 : index
    %5 = vector.load %arg2[%c0_3, %c0_4] : memref<2x512xf32, #tpu.memory_space<vmem>>, vector<2x512xf32>
    tpu.vector_store %arg2[%c0_3, %c0_4], %4 {strides = array<i32>} : memref<2x512xf32, #tpu.memory_space<vmem>>, vector<2x512xf32>,
    %cst_5 = arith.constant dense<0xFF800000> : vector<2x512xf32>
    %6 = vector.multi_reduction <maximumf>, %1, %cst_5 [1] : vector<2x4x512xf32> to vector<2x512xf32>
    %c0_6 = arith.constant 0 : index
    %c0_7 = arith.constant 0 : index
    %7 = vector.load %arg3[%c0_6, %c0_7] : memref<2x512xf32, #tpu.memory_space<vmem>>, vector<2x512xf32>
    tpu.vector_store %arg3[%c0_6, %c0_7], %6 {strides = array<i32>} : memref<2x512xf32, #tpu.memory_space<vmem>>, vector<2x512xf32>,
    return
  }
  func.func @transform_0(%arg0: i32) -> (i32, i32, i32) {
    %c0_i32 = arith.constant 0 : i32
    %c0_i32_0 = arith.constant 0 : i32
    %c0_i32_1 = arith.constant 0 : i32
    %c0_i32_2 = arith.constant 0 : i32
    return %c0_i32, %c0_i32_0, %c0_i32_1 : i32, i32, i32
  }
  func.func @transform_1(%arg0: i32) -> (i32, i32) {
    %c0_i32 = arith.constant 0 : i32
    %c0_i32_0 = arith.constant 0 : i32
    %c0_i32_1 = arith.constant 0 : i32
    return %c0_i32, %c0_i32_0 : i32, i32
  }
  func.func @transform_2(%arg0: i32) -> (i32, i32) {
    %c0_i32 = arith.constant 0 : i32
    %c0_i32_0 = arith.constant 0 : i32
    %c0_i32_1 = arith.constant 0 : i32
    return %c0_i32, %c0_i32_0 : i32, i32
  }
}

module attributes {stable_mosaic.version = 11 : i64} {
  func.func @kern(%arg0: i32, %arg1: memref<8x512xf32, #tpu.memory_space<vmem>>, %arg2: memref<512x128xf32, #tpu.memory_space<vmem>>, %arg3: memref<128x512xf32, #tpu.memory_space<vmem>>, %arg4: memref<8x512xf32, #tpu.memory_space<vmem>>) attributes {dimension_semantics = [#tpu.dimension_semantics<arbitrary>], iteration_bounds = array<i64: 1>, scalar_prefetch = 0 : i64, scratch_operands = 0 : i64, tpu.core_type = #tpu.core_type<tc>, window_params = [{pipeline_mode = #tpu.pipeline_mode<synchronous>, transform_indices = @transform_0, window_bounds = array<i64: 8, 512>}, {pipeline_mode = #tpu.pipeline_mode<synchronous>, transform_indices = @transform_1, window_bounds = array<i64: 512, 128>}, {pipeline_mode = #tpu.pipeline_mode<synchronous>, transform_indices = @transform_2, window_bounds = array<i64: 128, 512>}, {pipeline_mode = #tpu.pipeline_mode<synchronous>, transform_indices = @transform_3, window_bounds = array<i64: 8, 512>}]} {
    %c0 = arith.constant 0 : index
    %c0_0 = arith.constant 0 : index
    %0 = vector.load %arg1[%c0, %c0_0] : memref<8x512xf32, #tpu.memory_space<vmem>>, vector<8x512xf32>
    %c0_1 = arith.constant 0 : index
    %c0_2 = arith.constant 0 : index
    %1 = vector.load %arg2[%c0_1, %c0_2] : memref<512x128xf32, #tpu.memory_space<vmem>>, vector<512x128xf32>
    %cst = arith.constant dense<0.000000e+00> : vector<8x128xf32>
    %2 = tpu.matmul %0, %1, %cst {dimension_numbers = #tpu.dot_dimension_numbers<[1], [0], [0], [1], [0, 0, 1, 1], [], []>} : vector<8x512xf32>, vector<512x128xf32>, vector<8x128xf32> -> vector<8x128xf32>
    %cst_3 = arith.constant 0.000000e+00 : f32
    %3 = vector.broadcast %cst_3 : f32 to vector<8x128xf32>
    %4 = arith.maximumf %2, %3 : vector<8x128xf32>
    %c0_4 = arith.constant 0 : index
    %c0_5 = arith.constant 0 : index
    %5 = vector.load %arg3[%c0_4, %c0_5] : memref<128x512xf32, #tpu.memory_space<vmem>>, vector<128x512xf32>
    %cst_6 = arith.constant dense<0.000000e+00> : vector<8x512xf32>
    %6 = tpu.matmul %4, %5, %cst_6 {dimension_numbers = #tpu.dot_dimension_numbers<[1], [0], [0], [1], [0, 0, 1, 1], [], []>} : vector<8x128xf32>, vector<128x512xf32>, vector<8x512xf32> -> vector<8x512xf32>
    %c0_7 = arith.constant 0 : index
    %c0_8 = arith.constant 0 : index
    %7 = vector.load %arg4[%c0_7, %c0_8] : memref<8x512xf32, #tpu.memory_space<vmem>>, vector<8x512xf32>
    tpu.vector_store %arg4[%c0_7, %c0_8], %6 {strides = array<i32>} : memref<8x512xf32, #tpu.memory_space<vmem>>, vector<8x512xf32>,
    return
  }
  func.func @transform_0(%arg0: i32) -> (i32, i32) {
    %c0_i32 = arith.constant 0 : i32
    %c0_i32_0 = arith.constant 0 : i32
    %c0_i32_1 = arith.constant 0 : i32
    return %c0_i32, %c0_i32_0 : i32, i32
  }
  func.func @transform_1(%arg0: i32) -> (i32, i32) {
    %c0_i32 = arith.constant 0 : i32
    %c0_i32_0 = arith.constant 0 : i32
    %c0_i32_1 = arith.constant 0 : i32
    return %c0_i32, %c0_i32_0 : i32, i32
  }
  func.func @transform_2(%arg0: i32) -> (i32, i32) {
    %c0_i32 = arith.constant 0 : i32
    %c0_i32_0 = arith.constant 0 : i32
    %c0_i32_1 = arith.constant 0 : i32
    return %c0_i32, %c0_i32_0 : i32, i32
  }
  func.func @transform_3(%arg0: i32) -> (i32, i32) {
    %c0_i32 = arith.constant 0 : i32
    %c0_i32_0 = arith.constant 0 : i32
    %c0_i32_1 = arith.constant 0 : i32
    return %c0_i32, %c0_i32_0 : i32, i32
  }
}

module attributes {stable_mosaic.version = 11 : i64} {
  func.func @kern(%arg0: i32, %arg1: memref<2x4x512xbf16, #tpu.memory_space<vmem>>, %arg2: memref<2x4x1xf32, #tpu.memory_space<vmem>>, %arg3: memref<2x4x512xbf16, #tpu.memory_space<vmem>>, %arg4: memref<2x4x512xf32, #tpu.memory_space<vmem>>, %arg5: memref<2x512xf32, #tpu.memory_space<vmem>>) attributes {dimension_semantics = [#tpu.dimension_semantics<arbitrary>], iteration_bounds = array<i64: 1>, scalar_prefetch = 0 : i64, scratch_operands = 0 : i64, tpu.core_type = #tpu.core_type<tc>, window_params = [{pipeline_mode = #tpu.pipeline_mode<synchronous>, transform_indices = @transform_0, window_bounds = array<i64: 2, 4, 512>}, {pipeline_mode = #tpu.pipeline_mode<synchronous>, transform_indices = @transform_1, window_bounds = array<i64: 2, 4, 1>}, {pipeline_mode = #tpu.pipeline_mode<synchronous>, transform_indices = @transform_2, window_bounds = array<i64: 2, 4, 512>}, {pipeline_mode = #tpu.pipeline_mode<synchronous>, transform_indices = @transform_3, window_bounds = array<i64: 2, 4, 512>}, {pipeline_mode = #tpu.pipeline_mode<synchronous>, transform_indices = @transform_4, window_bounds = array<i64: 2, 512>}]} {
    %c0 = arith.constant 0 : index
    %c0_0 = arith.constant 0 : index
    %c0_1 = arith.constant 0 : index
    %0 = vector.load %arg1[%c0, %c0_0, %c0_1] : memref<2x4x512xbf16, #tpu.memory_space<vmem>>, vector<2x4x512xbf16>
    %1 = arith.extf %0 : vector<2x4x512xbf16> to vector<2x4x512xf32>
    %c0_2 = arith.constant 0 : index
    %c0_3 = arith.constant 0 : index
    %c0_4 = arith.constant 0 : index
    %2 = vector.load %arg3[%c0_2, %c0_3, %c0_4] : memref<2x4x512xbf16, #tpu.memory_space<vmem>>, vector<2x4x512xbf16>
    %3 = arith.extf %2 : vector<2x4x512xbf16> to vector<2x4x512xf32>
    %c0_5 = arith.constant 0 : index
    %c0_6 = arith.constant 0 : index
    %c0_7 = arith.constant 0 : index
    %4 = vector.load %arg2[%c0_5, %c0_6, %c0_7] : memref<2x4x1xf32, #tpu.memory_space<vmem>>, vector<2x4x1xf32>
    %5 = arith.negf %4 : vector<2x4x1xf32>
    %6 = math.exp %5 : vector<2x4x1xf32>
    %cst = arith.constant 1.000000e+00 : f32
    %7 = vector.broadcast %cst : f32 to vector<2x4x1xf32>
    %8 = arith.addf %7, %6 : vector<2x4x1xf32>
    %9 = arith.divf %7, %8 : vector<2x4x1xf32>
    %10 = vector.broadcast %9 : vector<2x4x1xf32> to vector<2x4x512xf32>
    %11 = arith.mulf %1, %10 : vector<2x4x512xf32>
    %12 = arith.addf %3, %11 : vector<2x4x512xf32>
    %c0_8 = arith.constant 0 : index
    %c0_9 = arith.constant 0 : index
    %c0_10 = arith.constant 0 : index
    %13 = vector.load %arg4[%c0_8, %c0_9, %c0_10] : memref<2x4x512xf32, #tpu.memory_space<vmem>>, vector<2x4x512xf32>
    tpu.vector_store %arg4[%c0_8, %c0_9, %c0_10], %12 {strides = array<i32>} : memref<2x4x512xf32, #tpu.memory_space<vmem>>, vector<2x4x512xf32>,
    %cst_11 = arith.constant dense<0.000000e+00> : vector<2x512xf32>
    %14 = vector.multi_reduction <add>, %12, %cst_11 [1] : vector<2x4x512xf32> to vector<2x512xf32>
    %cst_12 = arith.constant 4.000000e+00 : f32
    %15 = vector.broadcast %cst_12 : f32 to vector<2x512xf32>
    %16 = arith.divf %14, %15 : vector<2x512xf32>
    %c0_13 = arith.constant 0 : index
    %c0_14 = arith.constant 0 : index
    %17 = vector.load %arg5[%c0_13, %c0_14] : memref<2x512xf32, #tpu.memory_space<vmem>>, vector<2x512xf32>
    tpu.vector_store %arg5[%c0_13, %c0_14], %16 {strides = array<i32>} : memref<2x512xf32, #tpu.memory_space<vmem>>, vector<2x512xf32>,
    return
  }
  func.func @transform_0(%arg0: i32) -> (i32, i32, i32) {
    %c0_i32 = arith.constant 0 : i32
    %c0_i32_0 = arith.constant 0 : i32
    %c0_i32_1 = arith.constant 0 : i32
    %c0_i32_2 = arith.constant 0 : i32
    return %c0_i32, %c0_i32_0, %c0_i32_1 : i32, i32, i32
  }
  func.func @transform_1(%arg0: i32) -> (i32, i32, i32) {
    %c0_i32 = arith.constant 0 : i32
    %c0_i32_0 = arith.constant 0 : i32
    %c0_i32_1 = arith.constant 0 : i32
    %c0_i32_2 = arith.constant 0 : i32
    return %c0_i32, %c0_i32_0, %c0_i32_1 : i32, i32, i32
  }
  func.func @transform_2(%arg0: i32) -> (i32, i32, i32) {
    %c0_i32 = arith.constant 0 : i32
    %c0_i32_0 = arith.constant 0 : i32
    %c0_i32_1 = arith.constant 0 : i32
    %c0_i32_2 = arith.constant 0 : i32
    return %c0_i32, %c0_i32_0, %c0_i32_1 : i32, i32, i32
  }
  func.func @transform_3(%arg0: i32) -> (i32, i32, i32) {
    %c0_i32 = arith.constant 0 : i32
    %c0_i32_0 = arith.constant 0 : i32
    %c0_i32_1 = arith.constant 0 : i32
    %c0_i32_2 = arith.constant 0 : i32
    return %c0_i32, %c0_i32_0, %c0_i32_1 : i32, i32, i32
  }
  func.func @transform_4(%arg0: i32) -> (i32, i32) {
    %c0_i32 = arith.constant 0 : i32
    %c0_i32_0 = arith.constant 0 : i32
    %c0_i32_1 = arith.constant 0 : i32
    return %c0_i32, %c0_i32_0 : i32, i32
  }
}

module attributes {stable_mosaic.version = 11 : i64} {
  func.func @kern(%arg0: i32, %arg1: i32, %arg2: i32, %arg3: i32, %arg4: memref<1x16x512xbf16, #tpu.memory_space<vmem>>, %arg5: memref<1x512x128xbf16, #tpu.memory_space<vmem>>, %arg6: memref<1x1x128xf32, #tpu.memory_space<vmem>>, %arg7: memref<1x16x128xf32, #tpu.memory_space<vmem>>, %arg8: memref<16x128xf32, #tpu.memory_space<vmem>>) attributes {dimension_semantics = [#tpu.dimension_semantics<parallel>, #tpu.dimension_semantics<parallel>, #tpu.dimension_semantics<parallel>, #tpu.dimension_semantics<arbitrary>], iteration_bounds = array<i64: 1, 1, 1, 1>, scalar_prefetch = 0 : i64, scratch_operands = 1 : i64, tpu.core_type = #tpu.core_type<tc>, window_params = [{transform_indices = @transform_0, window_bounds = array<i64: 1, 16, 512>}, {transform_indices = @transform_1, window_bounds = array<i64: 1, 512, 128>}, {transform_indices = @transform_2, window_bounds = array<i64: 1, 1, 128>}, {transform_indices = @transform_3, window_bounds = array<i64: 1, 16, 128>}]} {
    %c0_i32 = arith.constant 0 : i32
    %0 = arith.cmpi eq, %arg3, %c0_i32 : i32
    %1 = arith.extui %0 : i1 to i32
    %c0_i32_0 = arith.constant 0 : i32
    %2 = arith.cmpi ne, %1, %c0_i32_0 : i32
    scf.if %2 {
      %cst_12 = arith.constant 0.000000e+00 : f32
      %14 = vector.broadcast %cst_12 : f32 to vector<16x128xf32>
      %c0_13 = arith.constant 0 : index
      %c0_14 = arith.constant 0 : index
      %15 = vector.load %arg8[%c0_13, %c0_14] : memref<16x128xf32, #tpu.memory_space<vmem>>, vector<16x128xf32>
      tpu.vector_store %arg8[%c0_13, %c0_14], %14 {strides = array<i32>} : memref<16x128xf32, #tpu.memory_space<vmem>>, vector<16x128xf32>,
    } else {
    }
    %c0 = arith.constant 0 : index
    %c0_1 = arith.constant 0 : index
    %3 = vector.load %arg8[%c0, %c0_1] : memref<16x128xf32, #tpu.memory_space<vmem>>, vector<16x128xf32>
    %c0_2 = arith.constant 0 : index
    %c0_3 = arith.constant 0 : index
    %c0_4 = arith.constant 0 : index
    %4 = vector.load %arg4[%c0_2, %c0_3, %c0_4] : memref<1x16x512xbf16, #tpu.memory_space<vmem>>, vector<1x16x512xbf16>
    %5 = vector.shape_cast %4 : vector<1x16x512xbf16> to vector<16x512xbf16>
    %c0_5 = arith.constant 0 : index
    %c0_6 = arith.constant 0 : index
    %c0_7 = arith.constant 0 : index
    %6 = vector.load %arg5[%c0_5, %c0_6, %c0_7] : memref<1x512x128xbf16, #tpu.memory_space<vmem>>, vector<1x512x128xbf16>
    %7 = vector.shape_cast %6 : vector<1x512x128xbf16> to vector<512x128xbf16>
    %cst = arith.constant dense<0.000000e+00> : vector<16x128xf32>
    %8 = tpu.matmul %5, %7, %cst {dimension_numbers = #tpu.dot_dimension_numbers<[1], [0], [0], [1], [0, 0, 1, 1], [], []>} : vector<16x512xbf16>, vector<512x128xbf16>, vector<16x128xf32> -> vector<16x128xf32>
    %9 = arith.addf %3, %8 : vector<16x128xf32>
    %c0_8 = arith.constant 0 : index
    %c0_9 = arith.constant 0 : index
    %10 = vector.load %arg8[%c0_8, %c0_9] : memref<16x128xf32, #tpu.memory_space<vmem>>, vector<16x128xf32>
    tpu.vector_store %arg8[%c0_8, %c0_9], %9 {strides = array<i32>} : memref<16x128xf32, #tpu.memory_space<vmem>>, vector<16x128xf32>,
    %c0_i32_10 = arith.constant 0 : i32
    %11 = arith.cmpi eq, %arg3, %c0_i32_10 : i32
    %12 = arith.extui %11 : i1 to i32
    %c0_i32_11 = arith.constant 0 : i32
    %13 = arith.cmpi ne, %12, %c0_i32_11 : i32
    scf.if %13 {
      %c0_12 = arith.constant 0 : index
      %c0_13 = arith.constant 0 : index
      %14 = vector.load %arg8[%c0_12, %c0_13] : memref<16x128xf32, #tpu.memory_space<vmem>>, vector<16x128xf32>
      %c0_14 = arith.constant 0 : index
      %c0_15 = arith.constant 0 : index
      %c0_16 = arith.constant 0 : index
      %15 = vector.load %arg6[%c0_14, %c0_15, %c0_16] : memref<1x1x128xf32, #tpu.memory_space<vmem>>, vector<1x1x128xf32>
      %16 = vector.shape_cast %15 : vector<1x1x128xf32> to vector<1x128xf32>
      %17 = vector.broadcast %16 : vector<1x128xf32> to vector<16x128xf32>
      %18 = arith.addf %14, %17 : vector<16x128xf32>
      %c0_17 = arith.constant 0 : index
      %c0_18 = arith.constant 0 : index
      %c0_19 = arith.constant 0 : index
      %19 = vector.load %arg7[%c0_17, %c0_18, %c0_19] : memref<1x16x128xf32, #tpu.memory_space<vmem>>, vector<1x16x128xf32>
      %20 = vector.shape_cast %19 : vector<1x16x128xf32> to vector<16x128xf32>
      %21 = vector.shape_cast %18 : vector<16x128xf32> to vector<1x16x128xf32>
      tpu.vector_store %arg7[%c0_17, %c0_18, %c0_19], %21 {strides = array<i32>} : memref<1x16x128xf32, #tpu.memory_space<vmem>>, vector<1x16x128xf32>,
    } else {
    }
    return
  }
  func.func @transform_0(%arg0: i32, %arg1: i32, %arg2: i32, %arg3: i32) -> (i32, i32, i32) {
    %c0_i32 = arith.constant 0 : i32
    return %arg0, %arg1, %arg3 : i32, i32, i32
  }
  func.func @transform_1(%arg0: i32, %arg1: i32, %arg2: i32, %arg3: i32) -> (i32, i32, i32) {
    %c0_i32 = arith.constant 0 : i32
    return %arg0, %arg3, %arg2 : i32, i32, i32
  }
  func.func @transform_2(%arg0: i32, %arg1: i32, %arg2: i32, %arg3: i32) -> (i32, i32, i32) {
    %c0_i32 = arith.constant 0 : i32
    %c0_i32_0 = arith.constant 0 : i32
    return %arg0, %c0_i32, %arg2 : i32, i32, i32
  }
  func.func @transform_3(%arg0: i32, %arg1: i32, %arg2: i32, %arg3: i32) -> (i32, i32, i32) {
    %c0_i32 = arith.constant 0 : i32
    return %arg0, %arg1, %arg2 : i32, i32, i32
  }
}

</mosaic_0001>

<bundles_post_ra>
// kernel: _forward_impl.109
= control target key start
LH: loop header
LB: loop body
LE: loop exit
PB: predicated region body
PF: predicated region fallthrough
CT: control target
= control target key end

     0   :  { %s1834_s12 = smov 0   ;;  %s1836_s13 = smov 0   ;;  %s2008_s0 = inlined_call_operand.vmem [shape: bf16[1,2048,256], index: 0, kind: input, shape index: {}]   ;;  %s2009_s1 = inlined_call_operand.vmem [shape: bf16[1,256,128], index: 1, kind: input, shape index: {}]   ;;  %s2010_s2 = inlined_call_operand.vmem [shape: f32[1,1,128], index: 2, kind: input, shape index: {}]   ;;  %s2011_s3 = inlined_call_operand.vmem [shape: bf16[1,2048,128], index: 3, kind: output, shape index: {}]  }
   0x1   :  { %s1838_s14 = smov 0  }
   0x2 LB: > { %s35_s15 = sadd.s32 1, %s1808_s13  ;;  %p1357_p0 = scmp.ge.s32.totalorder %s1812_s14, 1  ;;  %s1812_s14 = sphi %s1838_s14, %s13_s14   ;;  %s1808_s13 = sphi %s1836_s13, %s2013_s13   ;;  %s1804_s12 = sphi %s1834_s12, %s2012_s12  }
   0x3   : > { %p37_p1 = scmp.ge.s32.totalorder %s35_s15, 8  ;;  %p217_p2 = scmp.lt.s32.totalorder %s1812_s14, 9 }
   0x5   : > { %s2015_s15 = smov (%p37_p1, %s35_s15), 0  ;;  %p218_p3 = pnand %p1357_p0, %p217_p2 }
   0x6   : > { %v1726_v0 = vld [vmem:[%s2009_s1 + $0x40] sm:$0xff] (!%p218_p3)   ;;  %s1358_s18 = sshll.u32 (!%p218_p3), %s1804_s12, 5  ;;  %v1728_v2 = vld [vmem:[%s2009_s1 + $0x48] sm:$0xff] (!%p218_p3)   ;;  %v1730_v4 = vld [vmem:[%s2009_s1 + $0x50] sm:$0xff] (!%p218_p3)  }
   0x7   : > { %221 = sbr.rel (%p218_p3) target bundleno = 320 (0x140), region = 32  ;;  %v1727_v1 = vld [vmem:[%s2009_s1] sm:$0xff] (!%p218_p3)   ;;  %1574 = vmatprep.subr.bf16.mxu0 (!%p218_p3), %v1726_v0  ;;  %1686 = vmatprep.subr.bf16.mxu1 (!%p218_p3), %v1726_v0  ;;  %v1729_v3 = vld [vmem:[%s2009_s1 + $0x8] sm:$0xff] (!%p218_p3)   ;;  %p279_p4 = scmp.lt.s32.totalorder (!%p218_p3), %s1358_s18, 255  ;;  %v1731_v5 = vld [vmem:[%s2009_s1 + $0x10] sm:$0xff] (!%p218_p3)  }
   0x8   : > { %1575 = vmatpush3.bf16.msra.mxu0 (!%p218_p3), %v1727_v1  ;;  %1694 = vmatpush3.bf16.msra.mxu1 (!%p218_p3), %v1727_v1  ;;  %v1732_v6 = vld [vmem:[%s2009_s1 + $0x58] sm:$0xff] (!%p218_p3)   ;;  %v1734_v8 = vld [vmem:[%s2009_s1 + $0x60] sm:$0xff] (!%p218_p3)   ;;  %v1736_v10 = vld [vmem:[%s2009_s1 + $0x68] sm:$0xff] (!%p218_p3)  }
   0x9   : > { %1576 = vmatprep.subr.bf16.mxu0 (!%p218_p3), %v1728_v2  ;;  %1687 = vmatprep.subr.bf16.mxu1 (!%p218_p3), %v1728_v2  ;;  %v1733_v7 = vld [vmem:[%s2009_s1 + $0x18] sm:$0xff] (!%p218_p3)   ;;  %v1735_v9 = vld [vmem:[%s2009_s1 + $0x20] sm:$0xff] (!%p218_p3)   ;;  %v1737_v13 = vld [vmem:[%s2009_s1 + $0x28] sm:$0xff] (!%p218_p3)  }
   0xa   : > { %v1738_v14 = vld [vmem:[%s2009_s1 + $0x70] sm:$0xff] (!%p218_p3)   ;;  %v1740_v16 = vld [vmem:[%s2009_s1 + $0x78] sm:$0xff] (!%p218_p3)   ;;  %v1943_v51 = vld [vmem:[%s2010_s2] ss:$0 sm:$0xff] (!%p218_p3) }
   0xb   : > { %v1739_v15 = vld [vmem:[%s2009_s1 + $0x30] sm:$0xff] (!%p218_p3)   ;;  %v1741_v17 = vld [vmem:[%s2009_s1 + $0x38] sm:$0xff] (!%p218_p3)  }
   0xc   : > { %1577 = vmatpush3.bf16.msra.mxu0 (!%p218_p3), %v1729_v3  ;;  %1695 = vmatpush3.bf16.msra.mxu1 (!%p218_p3), %v1729_v3 }
   0xd   : > { %1578 = vmatprep.subr.bf16.mxu0 (!%p218_p3), %v1730_v4  ;;  %1688 = vmatprep.subr.bf16.mxu1 (!%p218_p3), %v1730_v4 }
   0xe   : > { %s2017_s18 = smov (!%p279_p4, %s1358_s18), 255 }
   0xf   : > { %s1446_s6 = sshll.u32 %s2017_s18, 3  ;;  %s1362_s5 = sshll.u32 %s2017_s18, 2 }
  0x10   : > { %1579 = vmatpush3.bf16.msra.mxu0 %v1731_v5  ;;  %1696 = vmatpush3.bf16.msra.mxu1 %v1731_v5  ;;  %s1885_s11 = scalar_lea.vmem %s2008_s0, %s1446_s6  ;;  %s1953_s8 = scalar_lea.vmem %s2011_s3, %s1362_s5 }
  0x11   : > { %1580 = vmatprep.subr.bf16.mxu0 %v1732_v6  ;;  %1689 = vmatprep.subr.bf16.mxu1 %v1732_v6  ;;  %v1744_v11 = vld [vmem:[%s1885_s11 + $0x4] ss:$8 sps:$4 sm:$0xff]   ;;  %v1742_v18 = vld [vmem:[%s1885_s11] ss:$8 sps:$4 sm:$0xff]   ;;  %v1748_v20 = vld [vmem:[%s1885_s11 + $0x14] ss:$8 sps:$4 sm:$0xff]  }
  0x12   : > { %v1747_v12 = vld [vmem:[%s1885_s11 + $0x84] ss:$8 sps:$4 sm:$0xff]   ;;  %744 = vmatprep.mubr.bf16.mxu0 %v1744_v11  ;;  %v1745_v19 = vld [vmem:[%s1885_s11 + $0x80] ss:$8 sps:$4 sm:$0xff]   ;;  %v1750_v21 = vld [vmem:[%s1885_s11 + $0x94] ss:$8 sps:$4 sm:$0xff]  }
  0x13   : > { %808 = vmatprep.mubr.bf16.mxu1 %v1747_v12  ;;  %v1752_v22 = vld [vmem:[%s1885_s11 + $0x10] ss:$8 sps:$4 sm:$0xff]   ;;  %v1754_v24 = vld [vmem:[%s1885_s11 + $0x24] ss:$8 sps:$4 sm:$0xff]   ;;  %v1758_v26 = vld [vmem:[%s1885_s11 + $0x20] ss:$8 sps:$4 sm:$0xff]  }
  0x14   : > { %1581 = vmatpush3.bf16.msra.mxu0 %v1733_v7  ;;  %1697 = vmatpush3.bf16.msra.mxu1 %v1733_v7  ;;  %v1753_v23 = vld [vmem:[%s1885_s11 + $0x90] ss:$8 sps:$4 sm:$0xff]   ;;  %v1756_v25 = vld [vmem:[%s1885_s11 + $0xa4] ss:$8 sps:$4 sm:$0xff]   ;;  %v1759_v27 = vld [vmem:[%s1885_s11 + $0xa0] ss:$8 sps:$4 sm:$0xff]  }
  0x15   : > { %1582 = vmatprep.subr.bf16.mxu0 %v1734_v8  ;;  %1690 = vmatprep.subr.bf16.mxu1 %v1734_v8  ;;  %v1760_v28 = vld [vmem:[%s1885_s11 + $0x34] ss:$8 sps:$4 sm:$0xff]   ;;  %v1764_v30 = vld [vmem:[%s1885_s11 + $0x30] ss:$8 sps:$4 sm:$0xff]   ;;  %v1766_v32 = vld [vmem:[%s1885_s11 + $0x44] ss:$8 sps:$4 sm:$0xff]  }
  0x16   : > { %v1762_v29 = vld [vmem:[%s1885_s11 + $0xb4] ss:$8 sps:$4 sm:$0xff]   ;;  %v1765_v31 = vld [vmem:[%s1885_s11 + $0xb0] ss:$8 sps:$4 sm:$0xff]   ;;  %v1768_v33 = vld [vmem:[%s1885_s11 + $0xc4] ss:$8 sps:$4 sm:$0xff]  }
  0x17   : > { %v1770_v34 = vld [vmem:[%s1885_s11 + $0x40] ss:$8 sps:$4 sm:$0xff]   ;;  %v1772_v36 = vld [vmem:[%s1885_s11 + $0x54] ss:$8 sps:$4 sm:$0xff]   ;;  %v1776_v38 = vld [vmem:[%s1885_s11 + $0x50] ss:$8 sps:$4 sm:$0xff]  }
  0x18   : > { %1583 = vmatpush3.bf16.msra.mxu0 %v1735_v9  ;;  %1698 = vmatpush3.bf16.msra.mxu1 %v1735_v9  ;;  %v1771_v35 = vld [vmem:[%s1885_s11 + $0xc0] ss:$8 sps:$4 sm:$0xff]   ;;  %v1774_v37 = vld [vmem:[%s1885_s11 + $0xd4] ss:$8 sps:$4 sm:$0xff]   ;;  %v1777_v39 = vld [vmem:[%s1885_s11 + $0xd0] ss:$8 sps:$4 sm:$0xff]  }
  0x19   : > { %1584 = vmatprep.subr.bf16.mxu0 %v1736_v10  ;;  %1691 = vmatprep.subr.bf16.mxu1 %v1736_v10  ;;  %v1778_v40 = vld [vmem:[%s1885_s11 + $0x64] ss:$8 sps:$4 sm:$0xff]   ;;  %v1782_v42 = vld [vmem:[%s1885_s11 + $0x60] ss:$8 sps:$4 sm:$0xff]   ;;  %v1784_v44 = vld [vmem:[%s1885_s11 + $0x74] ss:$8 sps:$4 sm:$0xff]  }
  0x1a   : > { %v1780_v41 = vld [vmem:[%s1885_s11 + $0xe4] ss:$8 sps:$4 sm:$0xff]   ;;  %v1783_v43 = vld [vmem:[%s1885_s11 + $0xe0] ss:$8 sps:$4 sm:$0xff]   ;;  %v1786_v45 = vld [vmem:[%s1885_s11 + $0xf4] ss:$8 sps:$4 sm:$0xff]  }
  0x1b   : > { %v1788_v46 = vld [vmem:[%s1885_s11 + $0x70] ss:$8 sps:$4 sm:$0xff]  }
  0x1c   : > { %1585 = vmatpush3.bf16.msra.mxu0 %v1737_v13  ;;  %1699 = vmatpush3.bf16.msra.mxu1 %v1737_v13  ;;  %v1789_v47 = vld [vmem:[%s1885_s11 + $0xf0] ss:$8 sps:$4 sm:$0xff]  }
  0x1d   : > { %1586 = vmatprep.subr.bf16.mxu0 %v1738_v14  ;;  %1692 = vmatprep.subr.bf16.mxu1 %v1738_v14 }
  0x20   : > { %1587 = vmatpush3.bf16.msra.mxu0 %v1739_v15  ;;  %1700 = vmatpush3.bf16.msra.mxu1 %v1739_v15 }
  0x21   : > { %1588 = vmatprep.subr.bf16.mxu0 %v1740_v16  ;;  %1693 = vmatprep.subr.bf16.mxu1 %v1740_v16 }
  0x24   : > { %1589 = vmatpush3.bf16.msra.mxu0 %v1741_v17  ;;  %1701 = vmatpush3.bf16.msra.mxu1 %v1741_v17 }
  0x27   : > { %745 = vmatmul.mubr.bf16.vlgmr.msra.gmra.mrb[0].mxu0 %v1742_v18  ;;  %809 = vmatmul.mubr.bf16.vlgmr.msra.gmra.mrb[0].mxu1 %v1745_v19 }
  0x28   : > { %752 = vmatprep.mubr.bf16.mxu0 %v1748_v20  ;;  %816 = vmatprep.mubr.bf16.mxu1 %v1750_v21 }
  0x2f   : > { %753 = vmatmul.mubr.bf16.gmra.mrb[4].mxu0 %v1752_v22  ;;  %817 = vmatmul.mubr.bf16.gmra.mrb[4].mxu1 %v1753_v23 }
  0x30   : > { %760 = vmatprep.mubr.bf16.mxu0 %v1754_v24  ;;  %824 = vmatprep.mubr.bf16.mxu1 %v1756_v25 }
  0x37   : > { %761 = vmatmul.mubr.bf16.gmra.mrb[8].mxu0 %v1758_v26  ;;  %825 = vmatmul.mubr.bf16.gmra.mrb[8].mxu1 %v1759_v27 }
  0x38   : > { %768 = vmatprep.mubr.bf16.mxu0 %v1760_v28  ;;  %832 = vmatprep.mubr.bf16.mxu1 %v1762_v29 }
  0x3f   : > { %769 = vmatmul.mubr.bf16.gmra.mrb[12].mxu0 %v1764_v30  ;;  %833 = vmatmul.mubr.bf16.gmra.mrb[12].mxu1 %v1765_v31 }
  0x40   : > { %776 = vmatprep.mubr.bf16.mxu0 %v1766_v32  ;;  %840 = vmatprep.mubr.bf16.mxu1 %v1768_v33 }
  0x47   : > { %777 = vmatmul.mubr.bf16.gmra.mrb[16].mxu0 %v1770_v34  ;;  %841 = vmatmul.mubr.bf16.gmra.mrb[16].mxu1 %v1771_v35 }
  0x48   : > { %784 = vmatprep.mubr.bf16.mxu0 %v1772_v36  ;;  %848 = vmatprep.mubr.bf16.mxu1 %v1774_v37 }
  0x4f   : > { %785 = vmatmul.mubr.bf16.gmra.mrb[20].mxu0 %v1776_v38  ;;  %849 = vmatmul.mubr.bf16.gmra.mrb[20].mxu1 %v1777_v39 }
  0x50   : > { %792 = vmatprep.mubr.bf16.mxu0 %v1778_v40  ;;  %856 = vmatprep.mubr.bf16.mxu1 %v1780_v41 }
  0x57   : > { %793 = vmatmul.mubr.bf16.gmra.mrb[24].mxu0 %v1782_v42  ;;  %857 = vmatmul.mubr.bf16.gmra.mrb[24].mxu1 %v1783_v43 }
  0x58   : > { %800 = vmatprep.mubr.bf16.mxu0 %v1784_v44  ;;  %864 = vmatprep.mubr.bf16.mxu1 %v1786_v45 }
  0x5f   : > { %801 = vmatmul.mubr.bf16.gmra.mrb[28].mxu0 %v1788_v46  ;;  %865 = vmatmul.mubr.bf16.gmra.mrb[28].mxu1 %v1789_v47 }
  0xfa   : > { %v1590_v48 = vpop.f32.mrb[0].mxu0  ;;  %v1638_v49 = vpop.f32.mrb[0].mxu1 }
  0xfb   : > { %v1591_v50 = vpop.f32.mrb[1].mxu0  ;;  %v1639_v52 = vpop.f32.mrb[1].mxu1 }
  0xfc   : > { %v1592_v53 = vadd.f32 %v1591_v50, %v1590_v48  ;;  %v1640_v54 = vadd.f32 %v1639_v52, %v1638_v49  ;;  %v1593_v55 = vpop.f32.mrb[2].mxu0  ;;  %v1641_v56 = vpop.f32.mrb[2].mxu1 }
  0xfd   : > { %v1594_v57 = vpop.f32.mrb[3].mxu0  ;;  %v1642_v58 = vpop.f32.mrb[3].mxu1 }
  0xfe   : > { %v979_v59 = vadd.f32 %v1592_v53, %v1943_v51  ;;  %v995_v60 = vadd.f32 %v1640_v54, %v1943_v51  ;;  %v1595_v61 = vadd.f32 %v1594_v57, %v1593_v55  ;;  %v1643_v62 = vadd.f32 %v1642_v58, %v1641_v56 }
 0x100   : > { %v980_v63 = vadd.f32 %v1595_v61, %v1943_v51  ;;  %v996_v0 = vadd.f32 %v1643_v62, %v1943_v51  ;;  %v1011_v1 = vmax.f32 %v979_v59, 0.0  ;;  %v1027_v2 = vmax.f32 %v995_v60, 0.0 }
 0x102   : > { %v1012_v3 = vmax.f32 %v980_v63, 0.0  ;;  %v1028_v4 = vmax.f32 %v996_v0, 0.0  ;;  %v1596_v5 = vpop.f32.mrb[4].mxu0  ;;  %v1644_v6 = vpop.f32.mrb[4].mxu1 }
 0x103   : > { %v1597_v7 = vpop.f32.mrb[5].mxu0  ;;  %v1645_v8 = vpop.f32.mrb[5].mxu1 }
 0x104   : > { %v1482_v9 = vpack.c.bf16 %v1012_v3, %v1011_v1  ;;  %v1522_v10 = vpack.c.bf16 %v1028_v4, %v1027_v2  ;;  %v1598_v11 = vadd.f32 %v1597_v7, %v1596_v5  ;;  %v1646_v12 = vadd.f32 %v1645_v8, %v1644_v6  ;;  %v1599_v13 = vpop.f32.mrb[6].mxu0  ;;  %v1647_v14 = vpop.f32.mrb[6].mxu1 }
 0x105   : > { %v1600_v15 = vpop.f32.mrb[7].mxu0  ;;  %v1648_v16 = vpop.f32.mrb[7].mxu1 }
 0x106   : > { %1483 = vst [vmem:[%s1953_s8] sm:$0xff] %v1482_v9   ;;  %1566 = vst [vmem:[%s1953_s8 + $0x40] sm:$0xff] %v1522_v10   ;;  %v981_v17 = vadd.f32 %v1598_v11, %v1943_v51  ;;  %v997_v18 = vadd.f32 %v1646_v12, %v1943_v51  ;;  %v1601_v19 = vadd.f32 %v1600_v15, %v1599_v13 }
 0x107   : > { %v1649_v20 = vadd.f32 %v1648_v16, %v1647_v14 }
 0x108   : > { %v982_v21 = vadd.f32 %v1601_v19, %v1943_v51  ;;  %v1013_v23 = vmax.f32 %v981_v17, 0.0  ;;  %v1029_v24 = vmax.f32 %v997_v18, 0.0 }
 0x109   : > { %v998_v22 = vadd.f32 %v1649_v20, %v1943_v51 }
 0x10a   : > { %v1014_v25 = vmax.f32 %v982_v21, 0.0  ;;  %v1602_v27 = vpop.f32.mrb[8].mxu0  ;;  %v1650_v28 = vpop.f32.mrb[8].mxu1 }
 0x10b   : > { %v1030_v26 = vmax.f32 %v998_v22, 0.0  ;;  %v1603_v29 = vpop.f32.mrb[9].mxu0  ;;  %v1651_v30 = vpop.f32.mrb[9].mxu1 }
 0x10c   : > { %v1487_v31 = vpack.c.bf16 %v1014_v25, %v1013_v23  ;;  %v1604_v33 = vadd.f32 %v1603_v29, %v1602_v27  ;;  %v1652_v34 = vadd.f32 %v1651_v30, %v1650_v28  ;;  %v1605_v35 = vpop.f32.mrb[10].mxu0  ;;  %v1653_v36 = vpop.f32.mrb[10].mxu1 }
 0x10d   : > { %v1527_v32 = vpack.c.bf16 %v1030_v26, %v1029_v24  ;;  %v1606_v37 = vpop.f32.mrb[11].mxu0  ;;  %v1654_v38 = vpop.f32.mrb[11].mxu1 }
 0x10e   : > { %1559 = vst [vmem:[%s1953_s8 + $0x8] sm:$0xff] %v1487_v31   ;;  %v983_v39 = vadd.f32 %v1604_v33, %v1943_v51  ;;  %v999_v40 = vadd.f32 %v1652_v34, %v1943_v51  ;;  %v1607_v41 = vadd.f32 %v1606_v37, %v1605_v35  ;;  %v1655_v42 = vadd.f32 %v1654_v38, %v1653_v36 }
 0x10f   : > { %1567 = vst [vmem:[%s1953_s8 + $0x48] sm:$0xff] %v1527_v32  }
 0x110   : > { %v984_v43 = vadd.f32 %v1607_v41, %v1943_v51  ;;  %v1000_v44 = vadd.f32 %v1655_v42, %v1943_v51  ;;  %v1015_v45 = vmax.f32 %v983_v39, 0.0  ;;  %v1031_v46 = vmax.f32 %v999_v40, 0.0 }
 0x112   : > { %v1016_v47 = vmax.f32 %v984_v43, 0.0  ;;  %v1032_v48 = vmax.f32 %v1000_v44, 0.0  ;;  %v1608_v49 = vpop.f32.mrb[12].mxu0  ;;  %v1656_v50 = vpop.f32.mrb[12].mxu1 }
 0x113   : > { %v1609_v52 = vpop.f32.mrb[13].mxu0  ;;  %v1657_v53 = vpop.f32.mrb[13].mxu1 }
 0x114   : > { %v1492_v54 = vpack.c.bf16 %v1016_v47, %v1015_v45  ;;  %v1532_v55 = vpack.c.bf16 %v1032_v48, %v1031_v46  ;;  %v1610_v56 = vadd.f32 %v1609_v52, %v1608_v49  ;;  %v1658_v57 = vadd.f32 %v1657_v53, %v1656_v50  ;;  %v1611_v58 = vpop.f32.mrb[14].mxu0  ;;  %v1659_v59 = vpop.f32.mrb[14].mxu1 }
 0x115   : > { %v1612_v60 = vpop.f32.mrb[15].mxu0  ;;  %v1660_v61 = vpop.f32.mrb[15].mxu1 }
 0x116   : > { %1560 = vst [vmem:[%s1953_s8 + $0x10] sm:$0xff] %v1492_v54   ;;  %1568 = vst [vmem:[%s1953_s8 + $0x50] sm:$0xff] %v1532_v55   ;;  %v985_v62 = vadd.f32 %v1610_v56, %v1943_v51  ;;  %v1001_v63 = vadd.f32 %v1658_v57, %v1943_v51  ;;  %v1613_v0 = vadd.f32 %v1612_v60, %v1611_v58 }
 0x117   : > { %v1661_v1 = vadd.f32 %v1660_v61, %v1659_v59 }
 0x118   : > { %v986_v2 = vadd.f32 %v1613_v0, %v1943_v51  ;;  %v1017_v4 = vmax.f32 %v985_v62, 0.0  ;;  %v1033_v5 = vmax.f32 %v1001_v63, 0.0 }
 0x119   : > { %v1002_v3 = vadd.f32 %v1661_v1, %v1943_v51 }
 0x11a   : > { %v1018_v6 = vmax.f32 %v986_v2, 0.0  ;;  %v1614_v8 = vpop.f32.mrb[16].mxu0  ;;  %v1662_v9 = vpop.f32.mrb[16].mxu1 }
 0x11b   : > { %v1034_v7 = vmax.f32 %v1002_v3, 0.0  ;;  %v1615_v10 = vpop.f32.mrb[17].mxu0  ;;  %v1663_v11 = vpop.f32.mrb[17].mxu1 }
 0x11c   : > { %v1497_v12 = vpack.c.bf16 %v1018_v6, %v1017_v4  ;;  %v1616_v14 = vadd.f32 %v1615_v10, %v1614_v8  ;;  %v1664_v15 = vadd.f32 %v1663_v11, %v1662_v9  ;;  %v1617_v16 = vpop.f32.mrb[18].mxu0  ;;  %v1665_v17 = vpop.f32.mrb[18].mxu1 }
 0x11d   : > { %v1537_v13 = vpack.c.bf16 %v1034_v7, %v1033_v5  ;;  %v1618_v18 = vpop.f32.mrb[19].mxu0  ;;  %v1666_v19 = vpop.f32.mrb[19].mxu1 }
 0x11e   : > { %1561 = vst [vmem:[%s1953_s8 + $0x18] sm:$0xff] %v1497_v12   ;;  %v987_v20 = vadd.f32 %v1616_v14, %v1943_v51  ;;  %v1003_v21 = vadd.f32 %v1664_v15, %v1943_v51  ;;  %v1619_v22 = vadd.f32 %v1618_v18, %v1617_v16  ;;  %v1667_v23 = vadd.f32 %v1666_v19, %v1665_v17 }
 0x11f   : > { %1569 = vst [vmem:[%s1953_s8 + $0x58] sm:$0xff] %v1537_v13  }
 0x120   : > { %v988_v24 = vadd.f32 %v1619_v22, %v1943_v51  ;;  %v1004_v25 = vadd.f32 %v1667_v23, %v1943_v51  ;;  %v1019_v26 = vmax.f32 %v987_v20, 0.0  ;;  %v1035_v27 = vmax.f32 %v1003_v21, 0.0 }
 0x122   : > { %v1020_v28 = vmax.f32 %v988_v24, 0.0  ;;  %v1036_v29 = vmax.f32 %v1004_v25, 0.0  ;;  %v1620_v30 = vpop.f32.mrb[20].mxu0  ;;  %v1668_v31 = vpop.f32.mrb[20].mxu1 }
 0x123   : > { %v1621_v32 = vpop.f32.mrb[21].mxu0  ;;  %v1669_v33 = vpop.f32.mrb[21].mxu1 }
 0x124   : > { %v1502_v34 = vpack.c.bf16 %v1020_v28, %v1019_v26  ;;  %v1542_v35 = vpack.c.bf16 %v1036_v29, %v1035_v27  ;;  %v1622_v36 = vadd.f32 %v1621_v32, %v1620_v30  ;;  %v1670_v37 = vadd.f32 %v1669_v33, %v1668_v31  ;;  %v1623_v38 = vpop.f32.mrb[22].mxu0  ;;  %v1671_v39 = vpop.f32.mrb[22].mxu1 }
 0x125   : > { %v1624_v40 = vpop.f32.mrb[23].mxu0  ;;  %v1672_v41 = vpop.f32.mrb[23].mxu1 }
 0x126   : > { %1562 = vst [vmem:[%s1953_s8 + $0x20] sm:$0xff] %v1502_v34   ;;  %1570 = vst [vmem:[%s1953_s8 + $0x60] sm:$0xff] %v1542_v35   ;;  %v989_v42 = vadd.f32 %v1622_v36, %v1943_v51  ;;  %v1005_v43 = vadd.f32 %v1670_v37, %v1943_v51  ;;  %v1625_v44 = vadd.f32 %v1624_v40, %v1623_v38 }
 0x127   : > { %v1673_v45 = vadd.f32 %v1672_v41, %v1671_v39 }
 0x128   : > { %v990_v46 = vadd.f32 %v1625_v44, %v1943_v51  ;;  %v1021_v48 = vmax.f32 %v989_v42, 0.0  ;;  %v1037_v49 = vmax.f32 %v1005_v43, 0.0 }
 0x129   : > { %v1006_v47 = vadd.f32 %v1673_v45, %v1943_v51 }
 0x12a   : > { %v1022_v50 = vmax.f32 %v990_v46, 0.0  ;;  %v1626_v53 = vpop.f32.mrb[24].mxu0  ;;  %v1674_v54 = vpop.f32.mrb[24].mxu1 }
 0x12b   : > { %v1038_v52 = vmax.f32 %v1006_v47, 0.0  ;;  %v1627_v55 = vpop.f32.mrb[25].mxu0  ;;  %v1675_v56 = vpop.f32.mrb[25].mxu1 }
 0x12c   : > { %v1507_v57 = vpack.c.bf16 %v1022_v50, %v1021_v48  ;;  %v1628_v59 = vadd.f32 %v1627_v55, %v1626_v53  ;;  %v1676_v60 = vadd.f32 %v1675_v56, %v1674_v54  ;;  %v1629_v61 = vpop.f32.mrb[26].mxu0  ;;  %v1677_v62 = vpop.f32.mrb[26].mxu1 }
 0x12d   : > { %v1547_v58 = vpack.c.bf16 %v1038_v52, %v1037_v49  ;;  %v1630_v63 = vpop.f32.mrb[27].mxu0  ;;  %v1678_v0 = vpop.f32.mrb[27].mxu1 }
 0x12e   : > { %1563 = vst [vmem:[%s1953_s8 + $0x28] sm:$0xff] %v1507_v57   ;;  %v991_v1 = vadd.f32 %v1628_v59, %v1943_v51  ;;  %v1007_v2 = vadd.f32 %v1676_v60, %v1943_v51  ;;  %v1631_v3 = vadd.f32 %v1630_v63, %v1629_v61  ;;  %v1679_v4 = vadd.f32 %v1678_v0, %v1677_v62 }
 0x12f   : > { %1571 = vst [vmem:[%s1953_s8 + $0x68] sm:$0xff] %v1547_v58  }
 0x130   : > { %v992_v5 = vadd.f32 %v1631_v3, %v1943_v51  ;;  %v1008_v6 = vadd.f32 %v1679_v4, %v1943_v51  ;;  %v1023_v7 = vmax.f32 %v991_v1, 0.0  ;;  %v1039_v8 = vmax.f32 %v1007_v2, 0.0 }
 0x132   : > { %v1024_v9 = vmax.f32 %v992_v5, 0.0  ;;  %v1040_v10 = vmax.f32 %v1008_v6, 0.0  ;;  %v1632_v11 = vpop.f32.mrb[28].mxu0  ;;  %v1680_v12 = vpop.f32.mrb[28].mxu1 }
 0x133   : > { %v1633_v13 = vpop.f32.mrb[29].mxu0  ;;  %v1681_v14 = vpop.f32.mrb[29].mxu1 }
 0x134   : > { %v1512_v15 = vpack.c.bf16 %v1024_v9, %v1023_v7  ;;  %v1552_v16 = vpack.c.bf16 %v1040_v10, %v1039_v8  ;;  %v1634_v17 = vadd.f32 %v1633_v13, %v1632_v11  ;;  %v1682_v18 = vadd.f32 %v1681_v14, %v1680_v12  ;;  %v1635_v19 = vpop.f32.mrb[30].mxu0  ;;  %v1683_v20 = vpop.f32.mrb[30].mxu1 }
 0x135   : > { %v1636_v21 = vpop.f32.mrb[31].mxu0  ;;  %v1684_v22 = vpop.f32.mrb[31].mxu1 }
 0x136   : > { %1564 = vst [vmem:[%s1953_s8 + $0x30] sm:$0xff] %v1512_v15   ;;  %1572 = vst [vmem:[%s1953_s8 + $0x70] sm:$0xff] %v1552_v16   ;;  %v993_v23 = vadd.f32 %v1634_v17, %v1943_v51  ;;  %v1009_v24 = vadd.f32 %v1682_v18, %v1943_v51  ;;  %v1637_v25 = vadd.f32 %v1636_v21, %v1635_v19 }
 0x137   : > { %v1685_v26 = vadd.f32 %v1684_v22, %v1683_v20 }
 0x138   : > { %v994_v27 = vadd.f32 %v1637_v25, %v1943_v51  ;;  %v1025_v29 = vmax.f32 %v993_v23, 0.0  ;;  %v1041_v30 = vmax.f32 %v1009_v24, 0.0 }
 0x139   : > { %v1010_v28 = vadd.f32 %v1685_v26, %v1943_v51 }
 0x13a   : > { %v1026_v31 = vmax.f32 %v994_v27, 0.0 }
 0x13b   : > { %v1042_v32 = vmax.f32 %v1010_v28, 0.0 }
 0x13c   : > { %v1517_v33 = vpack.c.bf16 %v1026_v31, %v1025_v29 }
 0x13d   : > { %v1557_v34 = vpack.c.bf16 %v1042_v32, %v1041_v30 }
 0x13e   : > { %1565 = vst [vmem:[%s1953_s8 + $0x38] sm:$0xff] %v1517_v33  }
 0x13f   : > { %1573 = vst [vmem:[%s1953_s8 + $0x78] sm:$0xff] %v1557_v34  }
 0x140 PF: > { %s13_s14 = sadd.s32 1, %s1812_s14   ;;  %s2012_s12 = smov %s1808_s13 }
 0x141   : > { %p10_p5 = scmp.ge.s32.totalorder %s13_s14, 10   ;;  %s2013_s13 = smov %s2015_s15 }
 0x143   :  { %12 = sbr.rel (!%p10_p5) target bundleno = 2 (0x2), region = 76 }

// kernel: _forward_impl.110
= control target key start
LH: loop header
LB: loop body
LE: loop exit
PB: predicated region body
PF: predicated region fallthrough
CT: control target
= control target key end

     0   :  { %s1621_s12 = smov 0   ;;  %s1623_s13 = smov 0   ;;  %s1769_s0 = inlined_call_operand.vmem [shape: bf16[2,512,128], index: 0, kind: input, shape index: {}]   ;;  %s1770_s1 = inlined_call_operand.vmem [shape: bf16[2,128,128], index: 1, kind: input, shape index: {}]   ;;  %s1771_s2 = inlined_call_operand.vmem [shape: f32[2,1,128], index: 2, kind: input, shape index: {}]   ;;  %s1772_s3 = inlined_call_operand.vmem [shape: bf16[2,512,128], index: 3, kind: output, shape index: {}]  }
   0x1   :  { %s1625_s14 = smov 0   ;;  %s1627_s15 = smov 0  }
   0x2   :  { %s1629_s16 = smov 0  }
   0x3 LB: > { %s35_s17 = sadd.s32 1, %s1591_s14  ;;  %s39_s18 = sadd.s32 1, %s1595_s15  ;;  %s1599_s16 = sphi %s1629_s16, %s13_s16   ;;  %s1595_s15 = sphi %s1627_s15, %s1776_s15   ;;  %s1591_s14 = sphi %s1625_s14, %s1775_s14   ;;  %s1587_s13 = sphi %s1623_s13, %s1774_s13   ;;  %s1583_s12 = sphi %s1621_s12, %s1773_s12  }
   0x4   : > { %p37_p0 = scmp.ge.s32.totalorder %s35_s17, 2  ;;  %p1213_p1 = scmp.ge.s32.totalorder %s1599_s16, 1 }
   0x5   : > { %p214_p2 = scmp.lt.s32.totalorder %s1599_s16, 5 }
   0x6   : > { %s1778_s17 = smov (%p37_p0, %s35_s17), 0  ;;  %s1780_s18 = smov (!%p37_p0, %s39_s18), %s1595_s15 }
   0x7   : > { %p215_p3 = pnand %p1213_p1, %p214_p2  ;;  %p41_p4 = scmp.ge.s32.totalorder %s1780_s18, 2 }
   0x8   : > { %s1214_s19 = sshll.u32 (!%p215_p3), %s1583_s12, 5  ;;  %p271_p5 = scmp.lt.s32.totalorder (!%p215_p3), %s1587_s13, 1 }
   0x9   : > { %s1782_s18 = smov (%p41_p4, %s1780_s18), 0  ;;  %218 = sbr.rel (%p215_p3) target bundleno = 298 (0x12a), region = 32 }
   0xa   : > { %p273_p6 = scmp.lt.s32.totalorder (!%p215_p3), %s1214_s19, 63 }
  0x10   : > { %s1784_s13 = smov (!%p271_p5, %s1587_s13), 1  ;;  %s1786_s19 = smov (!%p273_p6, %s1214_s19), 63 }
  0x11   : > { %s1215_s20 = sshll.u32 %s1784_s13, 6  ;;  %s301_s4 = scalar_lea.vmem %s1771_s2, %s1784_s13 }
  0x12   : > { %s1654_s21 = sadd.s32 %s1215_s20, %s1786_s19  ;;  %s1659_s24 = scalar_lea.vmem %s1770_s1, %s1215_s20  ;;  %v1697_v24 = vld [vmem:[%s301_s4] ss:$0 sm:$0xff] }
  0x13   : > { %v1537_v0 = vld [vmem:[%s1659_s24] sm:$0xff]   ;;  %v1538_v1 = vld [vmem:[%s1659_s24 + $0x8] sm:$0xff]   ;;  %s1216_s25 = sshll.u32 %s1654_s21, 2  ;;  %v1539_v2 = vld [vmem:[%s1659_s24 + $0x10] sm:$0xff]  }
  0x14   : > { %1433 = vmatprep.subr.bf16.mxu0 %v1537_v0  ;;  %1481 = vmatprep.subr.bf16.mxu1 %v1537_v0  ;;  %s1670_s28 = scalar_lea.vmem %s1769_s0, %s1216_s25  ;;  %v1540_v3 = vld [vmem:[%s1659_s24 + $0x18] sm:$0xff]   ;;  %v1541_v6 = vld [vmem:[%s1659_s24 + $0x20] sm:$0xff]   ;;  %v1542_v7 = vld [vmem:[%s1659_s24 + $0x28] sm:$0xff]   ;;  %s1712_s7 = scalar_lea.vmem %s1772_s3, %s1216_s25 }
  0x15   : > { %1434 = vmatpush3.bf16.msra.mxu0 %v1537_v0  ;;  %1489 = vmatpush3.bf16.msra.mxu1 %v1537_v0  ;;  %v1545_v4 = vld [vmem:[%s1670_s28] sm:$0xff]   ;;  %v1543_v8 = vld [vmem:[%s1659_s24 + $0x30] sm:$0xff]   ;;  %v1544_v9 = vld [vmem:[%s1659_s24 + $0x38] sm:$0xff]  }
  0x16   : > { %1435 = vmatprep.subr.bf16.mxu0 %v1538_v1  ;;  %1482 = vmatprep.subr.bf16.mxu1 %v1538_v1  ;;  %v1546_v5 = vld [vmem:[%s1670_s28 + $0x40] sm:$0xff]   ;;  %v1547_v10 = vld [vmem:[%s1670_s28 + $0x8] sm:$0xff]   ;;  %v1549_v12 = vld [vmem:[%s1670_s28 + $0x10] sm:$0xff]  }
  0x17   : > { %1449 = vmatprep.mubr.bf16.mxu0 %v1545_v4  ;;  %1465 = vmatprep.mubr.bf16.mxu1 %v1546_v5  ;;  %v1548_v11 = vld [vmem:[%s1670_s28 + $0x48] sm:$0xff]   ;;  %v1550_v13 = vld [vmem:[%s1670_s28 + $0x50] sm:$0xff]   ;;  %v1551_v14 = vld [vmem:[%s1670_s28 + $0x18] sm:$0xff]  }
  0x18   : > { %v1552_v15 = vld [vmem:[%s1670_s28 + $0x58] sm:$0xff]   ;;  %v1553_v16 = vld [vmem:[%s1670_s28 + $0x20] sm:$0xff]   ;;  %v1555_v18 = vld [vmem:[%s1670_s28 + $0x28] sm:$0xff]  }
  0x19   : > { %1436 = vmatpush3.bf16.msra.mxu0 %v1538_v1  ;;  %1490 = vmatpush3.bf16.msra.mxu1 %v1538_v1  ;;  %v1554_v17 = vld [vmem:[%s1670_s28 + $0x60] sm:$0xff]   ;;  %v1556_v19 = vld [vmem:[%s1670_s28 + $0x68] sm:$0xff]   ;;  %v1557_v20 = vld [vmem:[%s1670_s28 + $0x30] sm:$0xff]  }
  0x1a   : > { %1437 = vmatprep.subr.bf16.mxu0 %v1539_v2  ;;  %1483 = vmatprep.subr.bf16.mxu1 %v1539_v2  ;;  %v1558_v21 = vld [vmem:[%s1670_s28 + $0x70] sm:$0xff]   ;;  %v1559_v22 = vld [vmem:[%s1670_s28 + $0x38] sm:$0xff]  }
  0x1b   : > { %v1560_v23 = vld [vmem:[%s1670_s28 + $0x78] sm:$0xff]  }
  0x1d   : > { %1438 = vmatpush3.bf16.msra.mxu0 %v1539_v2  ;;  %1491 = vmatpush3.bf16.msra.mxu1 %v1539_v2 }
  0x1e   : > { %1439 = vmatprep.subr.bf16.mxu0 %v1540_v3  ;;  %1484 = vmatprep.subr.bf16.mxu1 %v1540_v3 }
  0x21   : > { %1440 = vmatpush3.bf16.msra.mxu0 %v1540_v3  ;;  %1492 = vmatpush3.bf16.msra.mxu1 %v1540_v3 }
  0x22   : > { %1441 = vmatprep.subr.bf16.mxu0 %v1541_v6  ;;  %1485 = vmatprep.subr.bf16.mxu1 %v1541_v6 }
  0x25   : > { %1442 = vmatpush3.bf16.msra.mxu0 %v1541_v6  ;;  %1493 = vmatpush3.bf16.msra.mxu1 %v1541_v6 }
  0x26   : > { %1443 = vmatprep.subr.bf16.mxu0 %v1542_v7  ;;  %1486 = vmatprep.subr.bf16.mxu1 %v1542_v7 }
  0x29   : > { %1444 = vmatpush3.bf16.msra.mxu0 %v1542_v7  ;;  %1494 = vmatpush3.bf16.msra.mxu1 %v1542_v7 }
  0x2a   : > { %1445 = vmatprep.subr.bf16.mxu0 %v1543_v8  ;;  %1487 = vmatprep.subr.bf16.mxu1 %v1543_v8 }
  0x2d   : > { %1446 = vmatpush3.bf16.msra.mxu0 %v1543_v8  ;;  %1495 = vmatpush3.bf16.msra.mxu1 %v1543_v8 }
  0x2e   : > { %1447 = vmatprep.subr.bf16.mxu0 %v1544_v9  ;;  %1488 = vmatprep.subr.bf16.mxu1 %v1544_v9 }
  0x31   : > { %1448 = vmatpush3.bf16.msra.mxu0 %v1544_v9  ;;  %1496 = vmatpush3.bf16.msra.mxu1 %v1544_v9 }
  0x34   : > { %1450 = vmatmul.mubr.bf16.vlgmr.msra.gmra.mrb[0].mxu0 %v1547_v10  ;;  %1466 = vmatmul.mubr.bf16.vlgmr.msra.gmra.mrb[0].mxu1 %v1548_v11 }
  0x35   : > { %1453 = vmatprep.mubr.bf16.mxu0 %v1549_v12  ;;  %1469 = vmatprep.mubr.bf16.mxu1 %v1550_v13 }
  0x3c   : > { %1454 = vmatmul.mubr.bf16.gmra.mrb[4].mxu0 %v1551_v14  ;;  %1470 = vmatmul.mubr.bf16.gmra.mrb[4].mxu1 %v1552_v15 }
  0x3d   : > { %1457 = vmatprep.mubr.bf16.mxu0 %v1553_v16  ;;  %1473 = vmatprep.mubr.bf16.mxu1 %v1554_v17 }
  0x44   : > { %1458 = vmatmul.mubr.bf16.gmra.mrb[8].mxu0 %v1555_v18  ;;  %1474 = vmatmul.mubr.bf16.gmra.mrb[8].mxu1 %v1556_v19 }
  0x45   : > { %1461 = vmatprep.mubr.bf16.mxu0 %v1557_v20  ;;  %1477 = vmatprep.mubr.bf16.mxu1 %v1558_v21 }
  0x4c   : > { %1462 = vmatmul.mubr.bf16.gmra.mrb[12].mxu0 %v1559_v22  ;;  %1478 = vmatmul.mubr.bf16.gmra.mrb[12].mxu1 %v1560_v23 }
 0x107   : > { %v1451_v25 = vpop.f32.mrb[0].mxu0  ;;  %v1467_v26 = vpop.f32.mrb[0].mxu1 }
 0x108   : > { %v845_v27 = vadd.f32 %v1451_v25, %v1697_v24  ;;  %v861_v28 = vadd.f32 %v1467_v26, %v1697_v24  ;;  %v610_v29 = vpop.f32.mrb[1].mxu0  ;;  %v674_v30 = vpop.f32.mrb[1].mxu1 }
 0x109   : > { %v843_v31 = vadd.f32 %v1697_v24, %v610_v29  ;;  %v859_v32 = vadd.f32 %v1697_v24, %v674_v30  ;;  %v1452_v33 = vpop.f32.mrb[2].mxu0  ;;  %v1468_v34 = vpop.f32.mrb[2].mxu1 }
 0x10a   : > { %v846_v35 = vadd.f32 %v1452_v33, %v1697_v24  ;;  %v862_v36 = vadd.f32 %v1468_v34, %v1697_v24  ;;  %v613_v37 = vpop.f32.mrb[3].mxu0  ;;  %v677_v38 = vpop.f32.mrb[3].mxu1  ;;  %v877_v41 = vmax.f32 %v845_v27, 0.0  ;;  %v893_v42 = vmax.f32 %v861_v28, 0.0 }
 0x10b   : > { %v844_v39 = vadd.f32 %v1697_v24, %v613_v37  ;;  %v860_v40 = vadd.f32 %v1697_v24, %v677_v38  ;;  %v875_v45 = vmax.f32 %v843_v31, 0.0  ;;  %v891_v46 = vmax.f32 %v859_v32, 0.0 }
 0x10c   : > { %v878_v43 = vmax.f32 %v846_v35, 0.0  ;;  %v894_v44 = vmax.f32 %v862_v36, 0.0 }
 0x10d   : > { %v876_v47 = vmax.f32 %v844_v39, 0.0  ;;  %v892_v48 = vmax.f32 %v860_v40, 0.0 }
 0x10e   : > { %v1322_v49 = vpack.c.bf16 %v878_v43, %v877_v41  ;;  %v1362_v50 = vpack.c.bf16 %v894_v44, %v893_v42 }
 0x10f   : > { %v1317_v51 = vpack.c.bf16 %v876_v47, %v875_v45  ;;  %v1357_v52 = vpack.c.bf16 %v892_v48, %v891_v46  ;;  %v1455_v53 = vpop.f32.mrb[4].mxu0  ;;  %v1471_v54 = vpop.f32.mrb[4].mxu1 }
 0x110   : > { %1394 = vst [vmem:[%s1712_s7 + $0x8] sm:$0xff] %v1322_v49   ;;  %1402 = vst [vmem:[%s1712_s7 + $0x48] sm:$0xff] %v1362_v50   ;;  %v849_v55 = vadd.f32 %v1455_v53, %v1697_v24  ;;  %v865_v56 = vadd.f32 %v1471_v54, %v1697_v24  ;;  %v626_v57 = vpop.f32.mrb[5].mxu0  ;;  %v690_v58 = vpop.f32.mrb[5].mxu1 }
 0x111   : > { %1318 = vst [vmem:[%s1712_s7] sm:$0xff] %v1317_v51   ;;  %1401 = vst [vmem:[%s1712_s7 + $0x40] sm:$0xff] %v1357_v52   ;;  %v847_v59 = vadd.f32 %v1697_v24, %v626_v57  ;;  %v863_v60 = vadd.f32 %v1697_v24, %v690_v58  ;;  %v1456_v61 = vpop.f32.mrb[6].mxu0  ;;  %v1472_v62 = vpop.f32.mrb[6].mxu1 }
 0x112   : > { %v850_v63 = vadd.f32 %v1456_v61, %v1697_v24  ;;  %v866_v0 = vadd.f32 %v1472_v62, %v1697_v24  ;;  %v629_v1 = vpop.f32.mrb[7].mxu0  ;;  %v693_v2 = vpop.f32.mrb[7].mxu1  ;;  %v881_v5 = vmax.f32 %v849_v55, 0.0  ;;  %v897_v6 = vmax.f32 %v865_v56, 0.0 }
 0x113   : > { %v848_v3 = vadd.f32 %v1697_v24, %v629_v1  ;;  %v864_v4 = vadd.f32 %v1697_v24, %v693_v2  ;;  %v879_v9 = vmax.f32 %v847_v59, 0.0  ;;  %v895_v10 = vmax.f32 %v863_v60, 0.0 }
 0x114   : > { %v882_v7 = vmax.f32 %v850_v63, 0.0  ;;  %v898_v8 = vmax.f32 %v866_v0, 0.0 }
 0x115   : > { %v880_v11 = vmax.f32 %v848_v3, 0.0  ;;  %v896_v12 = vmax.f32 %v864_v4, 0.0 }
 0x116   : > { %v1332_v13 = vpack.c.bf16 %v882_v7, %v881_v5  ;;  %v1372_v14 = vpack.c.bf16 %v898_v8, %v897_v6 }
 0x117   : > { %v1327_v15 = vpack.c.bf16 %v880_v11, %v879_v9  ;;  %v1367_v16 = vpack.c.bf16 %v896_v12, %v895_v10  ;;  %v1459_v17 = vpop.f32.mrb[8].mxu0  ;;  %v1475_v18 = vpop.f32.mrb[8].mxu1 }
 0x118   : > { %1396 = vst [vmem:[%s1712_s7 + $0x18] sm:$0xff] %v1332_v13   ;;  %1404 = vst [vmem:[%s1712_s7 + $0x58] sm:$0xff] %v1372_v14   ;;  %v853_v19 = vadd.f32 %v1459_v17, %v1697_v24  ;;  %v869_v20 = vadd.f32 %v1475_v18, %v1697_v24  ;;  %v642_v21 = vpop.f32.mrb[9].mxu0  ;;  %v706_v22 = vpop.f32.mrb[9].mxu1 }
 0x119   : > { %1395 = vst [vmem:[%s1712_s7 + $0x10] sm:$0xff] %v1327_v15   ;;  %1403 = vst [vmem:[%s1712_s7 + $0x50] sm:$0xff] %v1367_v16   ;;  %v851_v23 = vadd.f32 %v1697_v24, %v642_v21  ;;  %v867_v25 = vadd.f32 %v1697_v24, %v706_v22  ;;  %v1460_v26 = vpop.f32.mrb[10].mxu0  ;;  %v1476_v27 = vpop.f32.mrb[10].mxu1 }
 0x11a   : > { %v854_v28 = vadd.f32 %v1460_v26, %v1697_v24  ;;  %v870_v29 = vadd.f32 %v1476_v27, %v1697_v24  ;;  %v645_v30 = vpop.f32.mrb[11].mxu0  ;;  %v709_v31 = vpop.f32.mrb[11].mxu1  ;;  %v885_v34 = vmax.f32 %v853_v19, 0.0  ;;  %v901_v35 = vmax.f32 %v869_v20, 0.0 }
 0x11b   : > { %v852_v32 = vadd.f32 %v1697_v24, %v645_v30  ;;  %v868_v33 = vadd.f32 %v1697_v24, %v709_v31  ;;  %v883_v38 = vmax.f32 %v851_v23, 0.0  ;;  %v899_v39 = vmax.f32 %v867_v25, 0.0 }
 0x11c   : > { %v886_v36 = vmax.f32 %v854_v28, 0.0  ;;  %v902_v37 = vmax.f32 %v870_v29, 0.0 }
 0x11d   : > { %v884_v40 = vmax.f32 %v852_v32, 0.0  ;;  %v900_v41 = vmax.f32 %v868_v33, 0.0 }
 0x11e   : > { %v1342_v42 = vpack.c.bf16 %v886_v36, %v885_v34  ;;  %v1382_v43 = vpack.c.bf16 %v902_v37, %v901_v35 }
 0x11f   : > { %v1337_v44 = vpack.c.bf16 %v884_v40, %v883_v38  ;;  %v1377_v45 = vpack.c.bf16 %v900_v41, %v899_v39  ;;  %v1463_v46 = vpop.f32.mrb[12].mxu0  ;;  %v1479_v47 = vpop.f32.mrb[12].mxu1 }
 0x120   : > { %1398 = vst [vmem:[%s1712_s7 + $0x28] sm:$0xff] %v1342_v42   ;;  %1406 = vst [vmem:[%s1712_s7 + $0x68] sm:$0xff] %v1382_v43   ;;  %v857_v48 = vadd.f32 %v1463_v46, %v1697_v24  ;;  %v873_v49 = vadd.f32 %v1479_v47, %v1697_v24  ;;  %v658_v50 = vpop.f32.mrb[13].mxu0  ;;  %v722_v51 = vpop.f32.mrb[13].mxu1 }
 0x121   : > { %1397 = vst [vmem:[%s1712_s7 + $0x20] sm:$0xff] %v1337_v44   ;;  %1405 = vst [vmem:[%s1712_s7 + $0x60] sm:$0xff] %v1377_v45   ;;  %v855_v52 = vadd.f32 %v1697_v24, %v658_v50  ;;  %v871_v53 = vadd.f32 %v1697_v24, %v722_v51  ;;  %v1464_v54 = vpop.f32.mrb[14].mxu0  ;;  %v1480_v55 = vpop.f32.mrb[14].mxu1 }
 0x122   : > { %v858_v56 = vadd.f32 %v1464_v54, %v1697_v24  ;;  %v874_v57 = vadd.f32 %v1480_v55, %v1697_v24  ;;  %v661_v58 = vpop.f32.mrb[15].mxu0  ;;  %v725_v59 = vpop.f32.mrb[15].mxu1  ;;  %v889_v62 = vmax.f32 %v857_v48, 0.0  ;;  %v905_v63 = vmax.f32 %v873_v49, 0.0 }
 0x123   : > { %v856_v60 = vadd.f32 %v1697_v24, %v661_v58  ;;  %v872_v61 = vadd.f32 %v1697_v24, %v725_v59  ;;  %v887_v2 = vmax.f32 %v855_v52, 0.0  ;;  %v903_v3 = vmax.f32 %v871_v53, 0.0 }
 0x124   : > { %v890_v0 = vmax.f32 %v858_v56, 0.0  ;;  %v906_v1 = vmax.f32 %v874_v57, 0.0 }
 0x125   : > { %v888_v4 = vmax.f32 %v856_v60, 0.0  ;;  %v904_v5 = vmax.f32 %v872_v61, 0.0 }
 0x126   : > { %v1352_v6 = vpack.c.bf16 %v890_v0, %v889_v62  ;;  %v1392_v7 = vpack.c.bf16 %v906_v1, %v905_v63 }
 0x127   : > { %v1347_v8 = vpack.c.bf16 %v888_v4, %v887_v2  ;;  %v1387_v9 = vpack.c.bf16 %v904_v5, %v903_v3 }
 0x128   : > { %1400 = vst [vmem:[%s1712_s7 + $0x38] sm:$0xff] %v1352_v6   ;;  %1408 = vst [vmem:[%s1712_s7 + $0x78] sm:$0xff] %v1392_v7  }
 0x129   : > { %1399 = vst [vmem:[%s1712_s7 + $0x30] sm:$0xff] %v1347_v8   ;;  %1407 = vst [vmem:[%s1712_s7 + $0x70] sm:$0xff] %v1387_v9  }
 0x12a PF: > { %s13_s16 = sadd.s32 1, %s1599_s16   ;;  %s1773_s12 = smov %s1591_s14 }
 0x12b   : > { %p10_p7 = scmp.ge.s32.totalorder %s13_s16, 6   ;;  %s1774_s13 = smov %s1595_s15 }
 0x12c   : > { %s1775_s14 = smov %s1778_s17  ;;  %s1776_s15 = smov %s1782_s18 }
 0x12d   :  { %12 = sbr.rel (!%p10_p7) target bundleno = 3 (0x3), region = 76 }

// kernel: _forward_impl.111
= control target key start
LH: loop header
LB: loop body
LE: loop exit
PB: predicated region body
PF: predicated region fallthrough
CT: control target
= control target key end

     0   :  { %s1865_s12 = smov 0   ;;  %s1867_s13 = smov 0   ;;  %s2035_s0 = inlined_call_operand.vmem [shape: bf16[2,512,256], index: 0, kind: input, shape index: {}]   ;;  %s2036_s1 = inlined_call_operand.vmem [shape: bf16[2,256,128], index: 1, kind: input, shape index: {}]   ;;  %s2037_s2 = inlined_call_operand.vmem [shape: f32[2,1,128], index: 2, kind: input, shape index: {}]   ;;  %s2038_s3 = inlined_call_operand.vmem [shape: bf16[2,512,128], index: 3, kind: output, shape index: {}]  }
   0x1   :  { %s1869_s14 = smov 0   ;;  %s1871_s15 = smov 0  }
   0x2   :  { %s1873_s16 = smov 0  }
   0x3 LB: > { %s35_s17 = sadd.s32 1, %s1835_s14  ;;  %s39_s18 = sadd.s32 1, %s1839_s15  ;;  %s1843_s16 = sphi %s1873_s16, %s13_s16   ;;  %s1839_s15 = sphi %s1871_s15, %s2042_s15   ;;  %s1835_s14 = sphi %s1869_s14, %s2041_s14   ;;  %s1831_s13 = sphi %s1867_s13, %s2040_s13   ;;  %s1827_s12 = sphi %s1865_s12, %s2039_s12  }
   0x4   : > { %p37_p0 = scmp.ge.s32.totalorder %s35_s17, 2  ;;  %p1352_p1 = scmp.ge.s32.totalorder %s1843_s16, 1 }
   0x5   : > { %p217_p2 = scmp.lt.s32.totalorder %s1843_s16, 5 }
   0x6   : > { %s2044_s17 = smov (%p37_p0, %s35_s17), 0  ;;  %s2046_s18 = smov (!%p37_p0, %s39_s18), %s1839_s15 }
   0x7   : > { %p218_p3 = pnand %p1352_p1, %p217_p2  ;;  %p41_p4 = scmp.ge.s32.totalorder %s2046_s18, 2 }
   0x8   : > { %p277_p5 = scmp.lt.s32.totalorder (!%p218_p3), %s1831_s13, 1  ;;  %s1353_s19 = sshll.u32 (!%p218_p3), %s1827_s12, 5 }
   0x9   : > { %s2048_s18 = smov (%p41_p4, %s2046_s18), 0  ;;  %221 = sbr.rel (%p218_p3) target bundleno = 333 (0x14d), region = 32 }
   0xa   : > { %p279_p6 = scmp.lt.s32.totalorder (!%p218_p3), %s1353_s19, 63 }
  0x10   : > { %s2050_s13 = smov (!%p277_p5, %s1831_s13), 1  ;;  %s2052_s19 = smov (!%p279_p6, %s1353_s19), 63 }
  0x11   : > { %s1355_s20 = sshll.u32 %s2050_s13, 7  ;;  %s1354_s24 = sshll.u32 %s2052_s19, 1 }
  0x12   : > { %s1901_s23 = scalar_lea.vmem %s2036_s1, %s1355_s20  ;;  %s286_s25 = sadd.s32 %s1355_s20, %s1354_s24 }
  0x13   : > { %v1741_v0 = vld [vmem:[%s1901_s23 + $0x40] sm:$0xff]   ;;  %v1743_v2 = vld [vmem:[%s1901_s23 + $0x48] sm:$0xff]   ;;  %v1745_v4 = vld [vmem:[%s1901_s23 + $0x50] sm:$0xff]   ;;  %s1356_s26 = sshll.u32 %s286_s25, 2  ;;  %s309_s5 = scalar_lea.vmem %s2037_s2, %s2050_s13 }
  0x14   : > { %v1742_v1 = vld [vmem:[%s1901_s23] sm:$0xff]   ;;  %1573 = vmatprep.subr.bf16.mxu0 %v1741_v0  ;;  %1685 = vmatprep.subr.bf16.mxu1 %v1741_v0  ;;  %v1744_v3 = vld [vmem:[%s1901_s23 + $0x8] sm:$0xff]   ;;  %v1746_v5 = vld [vmem:[%s1901_s23 + $0x10] sm:$0xff]   ;;  %s1918_s29 = scalar_lea.vmem %s2035_s0, %s1356_s26  ;;  %s1360_s6 = sshll.u32 %s2050_s13, 6 }
  0x15   : > { %1574 = vmatpush3.bf16.msra.mxu0 %v1742_v1  ;;  %1693 = vmatpush3.bf16.msra.mxu1 %v1742_v1  ;;  %v1747_v6 = vld [vmem:[%s1901_s23 + $0x58] sm:$0xff]   ;;  %v1749_v8 = vld [vmem:[%s1901_s23 + $0x60] sm:$0xff]   ;;  %v1751_v10 = vld [vmem:[%s1901_s23 + $0x68] sm:$0xff]   ;;  %s319_s7 = sadd.s32 %s1360_s6, %s2052_s19 }
  0x16   : > { %1575 = vmatprep.subr.bf16.mxu0 %v1743_v2  ;;  %1686 = vmatprep.subr.bf16.mxu1 %v1743_v2  ;;  %v1748_v7 = vld [vmem:[%s1901_s23 + $0x18] sm:$0xff]   ;;  %v1750_v9 = vld [vmem:[%s1901_s23 + $0x20] sm:$0xff]   ;;  %v1752_v13 = vld [vmem:[%s1901_s23 + $0x28] sm:$0xff]   ;;  %s1361_s8 = sshll.u32 %s319_s7, 2 }
  0x17   : > { %v1759_v11 = vld [vmem:[%s1918_s29 + $0x4] ss:$8 sps:$4 sm:$0xff]   ;;  %v1753_v14 = vld [vmem:[%s1901_s23 + $0x70] sm:$0xff]   ;;  %v1755_v16 = vld [vmem:[%s1901_s23 + $0x78] sm:$0xff]   ;;  %s1974_s11 = scalar_lea.vmem %s2038_s3, %s1361_s8 }
  0x18   : > { %v1762_v12 = vld [vmem:[%s1918_s29 + $0x84] ss:$8 sps:$4 sm:$0xff]   ;;  %744 = vmatprep.mubr.bf16.mxu0 %v1759_v11  ;;  %v1754_v15 = vld [vmem:[%s1901_s23 + $0x30] sm:$0xff]   ;;  %v1756_v17 = vld [vmem:[%s1901_s23 + $0x38] sm:$0xff]  }
  0x19   : > { %1576 = vmatpush3.bf16.msra.mxu0 %v1744_v3  ;;  %1694 = vmatpush3.bf16.msra.mxu1 %v1744_v3  ;;  %v1757_v18 = vld [vmem:[%s1918_s29] ss:$8 sps:$4 sm:$0xff]   ;;  %v1763_v20 = vld [vmem:[%s1918_s29 + $0x14] ss:$8 sps:$4 sm:$0xff]   ;;  %v1767_v22 = vld [vmem:[%s1918_s29 + $0x10] ss:$8 sps:$4 sm:$0xff]  }
  0x1a   : > { %1577 = vmatprep.subr.bf16.mxu0 %v1745_v4  ;;  %1687 = vmatprep.subr.bf16.mxu1 %v1745_v4  ;;  %v1760_v19 = vld [vmem:[%s1918_s29 + $0x80] ss:$8 sps:$4 sm:$0xff]   ;;  %v1765_v21 = vld [vmem:[%s1918_s29 + $0x94] ss:$8 sps:$4 sm:$0xff]   ;;  %v1768_v23 = vld [vmem:[%s1918_s29 + $0x90] ss:$8 sps:$4 sm:$0xff]  }
  0x1b   : > { %808 = vmatprep.mubr.bf16.mxu1 %v1762_v12  ;;  %v1769_v24 = vld [vmem:[%s1918_s29 + $0x24] ss:$8 sps:$4 sm:$0xff]   ;;  %v1773_v26 = vld [vmem:[%s1918_s29 + $0x20] ss:$8 sps:$4 sm:$0xff]   ;;  %v1775_v28 = vld [vmem:[%s1918_s29 + $0x34] ss:$8 sps:$4 sm:$0xff]  }
  0x1c   : > { %v1771_v25 = vld [vmem:[%s1918_s29 + $0xa4] ss:$8 sps:$4 sm:$0xff]   ;;  %v1774_v27 = vld [vmem:[%s1918_s29 + $0xa0] ss:$8 sps:$4 sm:$0xff]   ;;  %v1777_v29 = vld [vmem:[%s1918_s29 + $0xb4] ss:$8 sps:$4 sm:$0xff]  }
  0x1d   : > { %1578 = vmatpush3.bf16.msra.mxu0 %v1746_v5  ;;  %1695 = vmatpush3.bf16.msra.mxu1 %v1746_v5  ;;  %v1779_v30 = vld [vmem:[%s1918_s29 + $0x30] ss:$8 sps:$4 sm:$0xff]   ;;  %v1781_v32 = vld [vmem:[%s1918_s29 + $0x44] ss:$8 sps:$4 sm:$0xff]   ;;  %v1785_v34 = vld [vmem:[%s1918_s29 + $0x40] ss:$8 sps:$4 sm:$0xff]  }
  0x1e   : > { %1579 = vmatprep.subr.bf16.mxu0 %v1747_v6  ;;  %1688 = vmatprep.subr.bf16.mxu1 %v1747_v6  ;;  %v1780_v31 = vld [vmem:[%s1918_s29 + $0xb0] ss:$8 sps:$4 sm:$0xff]   ;;  %v1783_v33 = vld [vmem:[%s1918_s29 + $0xc4] ss:$8 sps:$4 sm:$0xff]   ;;  %v1786_v35 = vld [vmem:[%s1918_s29 + $0xc0] ss:$8 sps:$4 sm:$0xff]  }
  0x1f   : > { %v1787_v36 = vld [vmem:[%s1918_s29 + $0x54] ss:$8 sps:$4 sm:$0xff]   ;;  %v1791_v38 = vld [vmem:[%s1918_s29 + $0x50] ss:$8 sps:$4 sm:$0xff]   ;;  %v1793_v40 = vld [vmem:[%s1918_s29 + $0x64] ss:$8 sps:$4 sm:$0xff]  }
  0x20   : > { %v1789_v37 = vld [vmem:[%s1918_s29 + $0xd4] ss:$8 sps:$4 sm:$0xff]   ;;  %v1792_v39 = vld [vmem:[%s1918_s29 + $0xd0] ss:$8 sps:$4 sm:$0xff]   ;;  %v1795_v41 = vld [vmem:[%s1918_s29 + $0xe4] ss:$8 sps:$4 sm:$0xff]  }
  0x21   : > { %1580 = vmatpush3.bf16.msra.mxu0 %v1748_v7  ;;  %1696 = vmatpush3.bf16.msra.mxu1 %v1748_v7  ;;  %v1797_v42 = vld [vmem:[%s1918_s29 + $0x60] ss:$8 sps:$4 sm:$0xff]   ;;  %v1799_v44 = vld [vmem:[%s1918_s29 + $0x74] ss:$8 sps:$4 sm:$0xff]   ;;  %v1803_v46 = vld [vmem:[%s1918_s29 + $0x70] ss:$8 sps:$4 sm:$0xff]  }
  0x22   : > { %1581 = vmatprep.subr.bf16.mxu0 %v1749_v8  ;;  %1689 = vmatprep.subr.bf16.mxu1 %v1749_v8  ;;  %v1798_v43 = vld [vmem:[%s1918_s29 + $0xe0] ss:$8 sps:$4 sm:$0xff]   ;;  %v1801_v45 = vld [vmem:[%s1918_s29 + $0xf4] ss:$8 sps:$4 sm:$0xff]   ;;  %v1804_v47 = vld [vmem:[%s1918_s29 + $0xf0] ss:$8 sps:$4 sm:$0xff]  }
  0x23   : > { %v1964_v51 = vld [vmem:[%s309_s5] ss:$0 sm:$0xff] }
  0x25   : > { %1582 = vmatpush3.bf16.msra.mxu0 %v1750_v9  ;;  %1697 = vmatpush3.bf16.msra.mxu1 %v1750_v9 }
  0x26   : > { %1583 = vmatprep.subr.bf16.mxu0 %v1751_v10  ;;  %1690 = vmatprep.subr.bf16.mxu1 %v1751_v10 }
  0x29   : > { %1584 = vmatpush3.bf16.msra.mxu0 %v1752_v13  ;;  %1698 = vmatpush3.bf16.msra.mxu1 %v1752_v13 }
  0x2a   : > { %1585 = vmatprep.subr.bf16.mxu0 %v1753_v14  ;;  %1691 = vmatprep.subr.bf16.mxu1 %v1753_v14 }
  0x2d   : > { %1586 = vmatpush3.bf16.msra.mxu0 %v1754_v15  ;;  %1699 = vmatpush3.bf16.msra.mxu1 %v1754_v15 }
  0x2e   : > { %1587 = vmatprep.subr.bf16.mxu0 %v1755_v16  ;;  %1692 = vmatprep.subr.bf16.mxu1 %v1755_v16 }
  0x31   : > { %1588 = vmatpush3.bf16.msra.mxu0 %v1756_v17  ;;  %1700 = vmatpush3.bf16.msra.mxu1 %v1756_v17 }
  0x34   : > { %745 = vmatmul.mubr.bf16.vlgmr.msra.gmra.mrb[0].mxu0 %v1757_v18  ;;  %809 = vmatmul.mubr.bf16.vlgmr.msra.gmra.mrb[0].mxu1 %v1760_v19 }
  0x35   : > { %752 = vmatprep.mubr.bf16.mxu0 %v1763_v20  ;;  %816 = vmatprep.mubr.bf16.mxu1 %v1765_v21 }
  0x3c   : > { %753 = vmatmul.mubr.bf16.gmra.mrb[4].mxu0 %v1767_v22  ;;  %817 = vmatmul.mubr.bf16.gmra.mrb[4].mxu1 %v1768_v23 }
  0x3d   : > { %760 = vmatprep.mubr.bf16.mxu0 %v1769_v24  ;;  %824 = vmatprep.mubr.bf16.mxu1 %v1771_v25 }
  0x44   : > { %761 = vmatmul.mubr.bf16.gmra.mrb[8].mxu0 %v1773_v26  ;;  %825 = vmatmul.mubr.bf16.gmra.mrb[8].mxu1 %v1774_v27 }
  0x45   : > { %768 = vmatprep.mubr.bf16.mxu0 %v1775_v28  ;;  %832 = vmatprep.mubr.bf16.mxu1 %v1777_v29 }
  0x4c   : > { %769 = vmatmul.mubr.bf16.gmra.mrb[12].mxu0 %v1779_v30  ;;  %833 = vmatmul.mubr.bf16.gmra.mrb[12].mxu1 %v1780_v31 }
  0x4d   : > { %776 = vmatprep.mubr.bf16.mxu0 %v1781_v32  ;;  %840 = vmatprep.mubr.bf16.mxu1 %v1783_v33 }
  0x54   : > { %777 = vmatmul.mubr.bf16.gmra.mrb[16].mxu0 %v1785_v34  ;;  %841 = vmatmul.mubr.bf16.gmra.mrb[16].mxu1 %v1786_v35 }
  0x55   : > { %784 = vmatprep.mubr.bf16.mxu0 %v1787_v36  ;;  %848 = vmatprep.mubr.bf16.mxu1 %v1789_v37 }
  0x5c   : > { %785 = vmatmul.mubr.bf16.gmra.mrb[20].mxu0 %v1791_v38  ;;  %849 = vmatmul.mubr.bf16.gmra.mrb[20].mxu1 %v1792_v39 }
  0x5d   : > { %792 = vmatprep.mubr.bf16.mxu0 %v1793_v40  ;;  %856 = vmatprep.mubr.bf16.mxu1 %v1795_v41 }
  0x64   : > { %793 = vmatmul.mubr.bf16.gmra.mrb[24].mxu0 %v1797_v42  ;;  %857 = vmatmul.mubr.bf16.gmra.mrb[24].mxu1 %v1798_v43 }
  0x65   : > { %800 = vmatprep.mubr.bf16.mxu0 %v1799_v44  ;;  %864 = vmatprep.mubr.bf16.mxu1 %v1801_v45 }
  0x6c   : > { %801 = vmatmul.mubr.bf16.gmra.mrb[28].mxu0 %v1803_v46  ;;  %865 = vmatmul.mubr.bf16.gmra.mrb[28].mxu1 %v1804_v47 }
 0x107   : > { %v1589_v48 = vpop.f32.mrb[0].mxu0  ;;  %v1637_v49 = vpop.f32.mrb[0].mxu1 }
 0x108   : > { %v1590_v50 = vpop.f32.mrb[1].mxu0  ;;  %v1638_v52 = vpop.f32.mrb[1].mxu1 }
 0x109   : > { %v1591_v53 = vadd.f32 %v1590_v50, %v1589_v48  ;;  %v1639_v54 = vadd.f32 %v1638_v52, %v1637_v49  ;;  %v1592_v55 = vpop.f32.mrb[2].mxu0  ;;  %v1640_v56 = vpop.f32.mrb[2].mxu1 }
 0x10a   : > { %v1593_v57 = vpop.f32.mrb[3].mxu0  ;;  %v1641_v58 = vpop.f32.mrb[3].mxu1 }
 0x10b   : > { %v979_v59 = vadd.f32 %v1591_v53, %v1964_v51  ;;  %v995_v60 = vadd.f32 %v1639_v54, %v1964_v51  ;;  %v1594_v61 = vadd.f32 %v1593_v57, %v1592_v55  ;;  %v1642_v62 = vadd.f32 %v1641_v58, %v1640_v56 }
 0x10d   : > { %v980_v63 = vadd.f32 %v1594_v61, %v1964_v51  ;;  %v996_v0 = vadd.f32 %v1642_v62, %v1964_v51  ;;  %v1011_v1 = vmax.f32 %v979_v59, 0.0  ;;  %v1027_v2 = vmax.f32 %v995_v60, 0.0 }
 0x10f   : > { %v1012_v3 = vmax.f32 %v980_v63, 0.0  ;;  %v1028_v4 = vmax.f32 %v996_v0, 0.0  ;;  %v1595_v5 = vpop.f32.mrb[4].mxu0  ;;  %v1643_v6 = vpop.f32.mrb[4].mxu1 }
 0x110   : > { %v1596_v7 = vpop.f32.mrb[5].mxu0  ;;  %v1644_v8 = vpop.f32.mrb[5].mxu1 }
 0x111   : > { %v1481_v9 = vpack.c.bf16 %v1012_v3, %v1011_v1  ;;  %v1521_v10 = vpack.c.bf16 %v1028_v4, %v1027_v2  ;;  %v1597_v11 = vadd.f32 %v1596_v7, %v1595_v5  ;;  %v1645_v12 = vadd.f32 %v1644_v8, %v1643_v6  ;;  %v1598_v13 = vpop.f32.mrb[6].mxu0  ;;  %v1646_v14 = vpop.f32.mrb[6].mxu1 }
 0x112   : > { %v1599_v15 = vpop.f32.mrb[7].mxu0  ;;  %v1647_v16 = vpop.f32.mrb[7].mxu1 }
 0x113   : > { %1482 = vst [vmem:[%s1974_s11] sm:$0xff] %v1481_v9   ;;  %1565 = vst [vmem:[%s1974_s11 + $0x40] sm:$0xff] %v1521_v10   ;;  %v981_v17 = vadd.f32 %v1597_v11, %v1964_v51  ;;  %v997_v18 = vadd.f32 %v1645_v12, %v1964_v51  ;;  %v1600_v19 = vadd.f32 %v1599_v15, %v1598_v13 }
 0x114   : > { %v1648_v20 = vadd.f32 %v1647_v16, %v1646_v14 }
 0x115   : > { %v982_v21 = vadd.f32 %v1600_v19, %v1964_v51  ;;  %v1013_v23 = vmax.f32 %v981_v17, 0.0  ;;  %v1029_v24 = vmax.f32 %v997_v18, 0.0 }
 0x116   : > { %v998_v22 = vadd.f32 %v1648_v20, %v1964_v51 }
 0x117   : > { %v1014_v25 = vmax.f32 %v982_v21, 0.0  ;;  %v1601_v27 = vpop.f32.mrb[8].mxu0  ;;  %v1649_v28 = vpop.f32.mrb[8].mxu1 }
 0x118   : > { %v1030_v26 = vmax.f32 %v998_v22, 0.0  ;;  %v1602_v29 = vpop.f32.mrb[9].mxu0  ;;  %v1650_v30 = vpop.f32.mrb[9].mxu1 }
 0x119   : > { %v1486_v31 = vpack.c.bf16 %v1014_v25, %v1013_v23  ;;  %v1603_v33 = vadd.f32 %v1602_v29, %v1601_v27  ;;  %v1651_v34 = vadd.f32 %v1650_v30, %v1649_v28  ;;  %v1604_v35 = vpop.f32.mrb[10].mxu0  ;;  %v1652_v36 = vpop.f32.mrb[10].mxu1 }
 0x11a   : > { %v1526_v32 = vpack.c.bf16 %v1030_v26, %v1029_v24  ;;  %v1605_v37 = vpop.f32.mrb[11].mxu0  ;;  %v1653_v38 = vpop.f32.mrb[11].mxu1 }
 0x11b   : > { %1558 = vst [vmem:[%s1974_s11 + $0x8] sm:$0xff] %v1486_v31   ;;  %v983_v39 = vadd.f32 %v1603_v33, %v1964_v51  ;;  %v999_v40 = vadd.f32 %v1651_v34, %v1964_v51  ;;  %v1606_v41 = vadd.f32 %v1605_v37, %v1604_v35  ;;  %v1654_v42 = vadd.f32 %v1653_v38, %v1652_v36 }
 0x11c   : > { %1566 = vst [vmem:[%s1974_s11 + $0x48] sm:$0xff] %v1526_v32  }
 0x11d   : > { %v984_v43 = vadd.f32 %v1606_v41, %v1964_v51  ;;  %v1000_v44 = vadd.f32 %v1654_v42, %v1964_v51  ;;  %v1015_v45 = vmax.f32 %v983_v39, 0.0  ;;  %v1031_v46 = vmax.f32 %v999_v40, 0.0 }
 0x11f   : > { %v1016_v47 = vmax.f32 %v984_v43, 0.0  ;;  %v1032_v48 = vmax.f32 %v1000_v44, 0.0  ;;  %v1607_v49 = vpop.f32.mrb[12].mxu0  ;;  %v1655_v50 = vpop.f32.mrb[12].mxu1 }
 0x120   : > { %v1608_v52 = vpop.f32.mrb[13].mxu0  ;;  %v1656_v53 = vpop.f32.mrb[13].mxu1 }
 0x121   : > { %v1491_v54 = vpack.c.bf16 %v1016_v47, %v1015_v45  ;;  %v1531_v55 = vpack.c.bf16 %v1032_v48, %v1031_v46  ;;  %v1609_v56 = vadd.f32 %v1608_v52, %v1607_v49  ;;  %v1657_v57 = vadd.f32 %v1656_v53, %v1655_v50  ;;  %v1610_v58 = vpop.f32.mrb[14].mxu0  ;;  %v1658_v59 = vpop.f32.mrb[14].mxu1 }
 0x122   : > { %v1611_v60 = vpop.f32.mrb[15].mxu0  ;;  %v1659_v61 = vpop.f32.mrb[15].mxu1 }
 0x123   : > { %1559 = vst [vmem:[%s1974_s11 + $0x10] sm:$0xff] %v1491_v54   ;;  %1567 = vst [vmem:[%s1974_s11 + $0x50] sm:$0xff] %v1531_v55   ;;  %v985_v62 = vadd.f32 %v1609_v56, %v1964_v51  ;;  %v1001_v63 = vadd.f32 %v1657_v57, %v1964_v51  ;;  %v1612_v0 = vadd.f32 %v1611_v60, %v1610_v58 }
 0x124   : > { %v1660_v1 = vadd.f32 %v1659_v61, %v1658_v59 }
 0x125   : > { %v986_v2 = vadd.f32 %v1612_v0, %v1964_v51  ;;  %v1017_v4 = vmax.f32 %v985_v62, 0.0  ;;  %v1033_v5 = vmax.f32 %v1001_v63, 0.0 }
 0x126   : > { %v1002_v3 = vadd.f32 %v1660_v1, %v1964_v51 }
 0x127   : > { %v1018_v6 = vmax.f32 %v986_v2, 0.0  ;;  %v1613_v8 = vpop.f32.mrb[16].mxu0  ;;  %v1661_v9 = vpop.f32.mrb[16].mxu1 }
 0x128   : > { %v1034_v7 = vmax.f32 %v1002_v3, 0.0  ;;  %v1614_v10 = vpop.f32.mrb[17].mxu0  ;;  %v1662_v11 = vpop.f32.mrb[17].mxu1 }
 0x129   : > { %v1496_v12 = vpack.c.bf16 %v1018_v6, %v1017_v4  ;;  %v1615_v14 = vadd.f32 %v1614_v10, %v1613_v8  ;;  %v1663_v15 = vadd.f32 %v1662_v11, %v1661_v9  ;;  %v1616_v16 = vpop.f32.mrb[18].mxu0  ;;  %v1664_v17 = vpop.f32.mrb[18].mxu1 }
 0x12a   : > { %v1536_v13 = vpack.c.bf16 %v1034_v7, %v1033_v5  ;;  %v1617_v18 = vpop.f32.mrb[19].mxu0  ;;  %v1665_v19 = vpop.f32.mrb[19].mxu1 }
 0x12b   : > { %1560 = vst [vmem:[%s1974_s11 + $0x18] sm:$0xff] %v1496_v12   ;;  %v987_v20 = vadd.f32 %v1615_v14, %v1964_v51  ;;  %v1003_v21 = vadd.f32 %v1663_v15, %v1964_v51  ;;  %v1618_v22 = vadd.f32 %v1617_v18, %v1616_v16  ;;  %v1666_v23 = vadd.f32 %v1665_v19, %v1664_v17 }
 0x12c   : > { %1568 = vst [vmem:[%s1974_s11 + $0x58] sm:$0xff] %v1536_v13  }
 0x12d   : > { %v988_v24 = vadd.f32 %v1618_v22, %v1964_v51  ;;  %v1004_v25 = vadd.f32 %v1666_v23, %v1964_v51  ;;  %v1019_v26 = vmax.f32 %v987_v20, 0.0  ;;  %v1035_v27 = vmax.f32 %v1003_v21, 0.0 }
 0x12f   : > { %v1020_v28 = vmax.f32 %v988_v24, 0.0  ;;  %v1036_v29 = vmax.f32 %v1004_v25, 0.0  ;;  %v1619_v30 = vpop.f32.mrb[20].mxu0  ;;  %v1667_v31 = vpop.f32.mrb[20].mxu1 }
 0x130   : > { %v1620_v32 = vpop.f32.mrb[21].mxu0  ;;  %v1668_v33 = vpop.f32.mrb[21].mxu1 }
 0x131   : > { %v1501_v34 = vpack.c.bf16 %v1020_v28, %v1019_v26  ;;  %v1541_v35 = vpack.c.bf16 %v1036_v29, %v1035_v27  ;;  %v1621_v36 = vadd.f32 %v1620_v32, %v1619_v30  ;;  %v1669_v37 = vadd.f32 %v1668_v33, %v1667_v31  ;;  %v1622_v38 = vpop.f32.mrb[22].mxu0  ;;  %v1670_v39 = vpop.f32.mrb[22].mxu1 }
 0x132   : > { %v1623_v40 = vpop.f32.mrb[23].mxu0  ;;  %v1671_v41 = vpop.f32.mrb[23].mxu1 }
 0x133   : > { %1561 = vst [vmem:[%s1974_s11 + $0x20] sm:$0xff] %v1501_v34   ;;  %1569 = vst [vmem:[%s1974_s11 + $0x60] sm:$0xff] %v1541_v35   ;;  %v989_v42 = vadd.f32 %v1621_v36, %v1964_v51  ;;  %v1005_v43 = vadd.f32 %v1669_v37, %v1964_v51  ;;  %v1624_v44 = vadd.f32 %v1623_v40, %v1622_v38 }
 0x134   : > { %v1672_v45 = vadd.f32 %v1671_v41, %v1670_v39 }
 0x135   : > { %v990_v46 = vadd.f32 %v1624_v44, %v1964_v51  ;;  %v1021_v48 = vmax.f32 %v989_v42, 0.0  ;;  %v1037_v49 = vmax.f32 %v1005_v43, 0.0 }
 0x136   : > { %v1006_v47 = vadd.f32 %v1672_v45, %v1964_v51 }
 0x137   : > { %v1022_v50 = vmax.f32 %v990_v46, 0.0  ;;  %v1625_v53 = vpop.f32.mrb[24].mxu0  ;;  %v1673_v54 = vpop.f32.mrb[24].mxu1 }
 0x138   : > { %v1038_v52 = vmax.f32 %v1006_v47, 0.0  ;;  %v1626_v55 = vpop.f32.mrb[25].mxu0  ;;  %v1674_v56 = vpop.f32.mrb[25].mxu1 }
 0x139   : > { %v1506_v57 = vpack.c.bf16 %v1022_v50, %v1021_v48  ;;  %v1627_v59 = vadd.f32 %v1626_v55, %v1625_v53  ;;  %v1675_v60 = vadd.f32 %v1674_v56, %v1673_v54  ;;  %v1628_v61 = vpop.f32.mrb[26].mxu0  ;;  %v1676_v62 = vpop.f32.mrb[26].mxu1 }
 0x13a   : > { %v1546_v58 = vpack.c.bf16 %v1038_v52, %v1037_v49  ;;  %v1629_v63 = vpop.f32.mrb[27].mxu0  ;;  %v1677_v0 = vpop.f32.mrb[27].mxu1 }
 0x13b   : > { %1562 = vst [vmem:[%s1974_s11 + $0x28] sm:$0xff] %v1506_v57   ;;  %v991_v1 = vadd.f32 %v1627_v59, %v1964_v51  ;;  %v1007_v2 = vadd.f32 %v1675_v60, %v1964_v51  ;;  %v1630_v3 = vadd.f32 %v1629_v63, %v1628_v61  ;;  %v1678_v4 = vadd.f32 %v1677_v0, %v1676_v62 }
 0x13c   : > { %1570 = vst [vmem:[%s1974_s11 + $0x68] sm:$0xff] %v1546_v58  }
 0x13d   : > { %v992_v5 = vadd.f32 %v1630_v3, %v1964_v51  ;;  %v1008_v6 = vadd.f32 %v1678_v4, %v1964_v51  ;;  %v1023_v7 = vmax.f32 %v991_v1, 0.0  ;;  %v1039_v8 = vmax.f32 %v1007_v2, 0.0 }
 0x13f   : > { %v1024_v9 = vmax.f32 %v992_v5, 0.0  ;;  %v1040_v10 = vmax.f32 %v1008_v6, 0.0  ;;  %v1631_v11 = vpop.f32.mrb[28].mxu0  ;;  %v1679_v12 = vpop.f32.mrb[28].mxu1 }
 0x140   : > { %v1632_v13 = vpop.f32.mrb[29].mxu0  ;;  %v1680_v14 = vpop.f32.mrb[29].mxu1 }
 0x141   : > { %v1511_v15 = vpack.c.bf16 %v1024_v9, %v1023_v7  ;;  %v1551_v16 = vpack.c.bf16 %v1040_v10, %v1039_v8  ;;  %v1633_v17 = vadd.f32 %v1632_v13, %v1631_v11  ;;  %v1681_v18 = vadd.f32 %v1680_v14, %v1679_v12  ;;  %v1634_v19 = vpop.f32.mrb[30].mxu0  ;;  %v1682_v20 = vpop.f32.mrb[30].mxu1 }
 0x142   : > { %v1635_v21 = vpop.f32.mrb[31].mxu0  ;;  %v1683_v22 = vpop.f32.mrb[31].mxu1 }
 0x143   : > { %1563 = vst [vmem:[%s1974_s11 + $0x30] sm:$0xff] %v1511_v15   ;;  %1571 = vst [vmem:[%s1974_s11 + $0x70] sm:$0xff] %v1551_v16   ;;  %v993_v23 = vadd.f32 %v1633_v17, %v1964_v51  ;;  %v1009_v24 = vadd.f32 %v1681_v18, %v1964_v51  ;;  %v1636_v25 = vadd.f32 %v1635_v21, %v1634_v19 }
 0x144   : > { %v1684_v26 = vadd.f32 %v1683_v22, %v1682_v20 }
 0x145   : > { %v994_v27 = vadd.f32 %v1636_v25, %v1964_v51  ;;  %v1025_v29 = vmax.f32 %v993_v23, 0.0  ;;  %v1041_v30 = vmax.f32 %v1009_v24, 0.0 }
 0x146   : > { %v1010_v28 = vadd.f32 %v1684_v26, %v1964_v51 }
 0x147   : > { %v1026_v31 = vmax.f32 %v994_v27, 0.0 }
 0x148   : > { %v1042_v32 = vmax.f32 %v1010_v28, 0.0 }
 0x149   : > { %v1516_v33 = vpack.c.bf16 %v1026_v31, %v1025_v29 }
 0x14a   : > { %v1556_v34 = vpack.c.bf16 %v1042_v32, %v1041_v30 }
 0x14b   : > { %1564 = vst [vmem:[%s1974_s11 + $0x38] sm:$0xff] %v1516_v33  }
 0x14c   : > { %1572 = vst [vmem:[%s1974_s11 + $0x78] sm:$0xff] %v1556_v34  }
 0x14d PF: > { %s13_s16 = sadd.s32 1, %s1843_s16   ;;  %s2039_s12 = smov %s1835_s14 }
 0x14e   : > { %p10_p7 = scmp.ge.s32.totalorder %s13_s16, 6   ;;  %s2040_s13 = smov %s1839_s15 }
 0x14f   : > { %s2041_s14 = smov %s2044_s17  ;;  %s2042_s15 = smov %s2048_s18 }
 0x150   :  { %12 = sbr.rel (!%p10_p7) target bundleno = 3 (0x3), region = 76 }

// kernel: _forward_impl.112
= control target key start
LH: loop header
LB: loop body
LE: loop exit
PB: predicated region body
PF: predicated region fallthrough
CT: control target
= control target key end

     0   :  { %s1589_s12 = smov 0   ;;  %s1591_s13 = smov 0   ;;  %s1737_s0 = inlined_call_operand.vmem [shape: bf16[2,512,128], index: 0, kind: input, shape index: {}]   ;;  %s1738_s1 = inlined_call_operand.vmem [shape: bf16[2,128,128], index: 1, kind: input, shape index: {}]   ;;  %s1739_s2 = inlined_call_operand.vmem [shape: f32[2,1,128], index: 2, kind: input, shape index: {}]   ;;  %s1740_s3 = inlined_call_operand.vmem [shape: bf16[2,512,128], index: 3, kind: output, shape index: {}]  }
   0x1   :  { %s1593_s14 = smov 0   ;;  %s1595_s15 = smov 0  }
   0x2   :  { %s1597_s16 = smov 0  }
   0x3 LB: > { %s35_s17 = sadd.s32 1, %s1559_s14  ;;  %s39_s18 = sadd.s32 1, %s1563_s15  ;;  %s1567_s16 = sphi %s1597_s16, %s13_s16   ;;  %s1563_s15 = sphi %s1595_s15, %s1744_s15   ;;  %s1559_s14 = sphi %s1593_s14, %s1743_s14   ;;  %s1555_s13 = sphi %s1591_s13, %s1742_s13   ;;  %s1551_s12 = sphi %s1589_s12, %s1741_s12  }
   0x4   : > { %p37_p0 = scmp.ge.s32.totalorder %s35_s17, 2  ;;  %p1181_p1 = scmp.ge.s32.totalorder %s1567_s16, 1 }
   0x5   : > { %p214_p2 = scmp.lt.s32.totalorder %s1567_s16, 5 }
   0x6   : > { %s1746_s17 = smov (%p37_p0, %s35_s17), 0  ;;  %s1748_s18 = smov (!%p37_p0, %s39_s18), %s1563_s15 }
   0x7   : > { %p215_p3 = pnand %p1181_p1, %p214_p2  ;;  %p41_p4 = scmp.ge.s32.totalorder %s1748_s18, 2 }
   0x8   : > { %s1182_s19 = sshll.u32 (!%p215_p3), %s1551_s12, 5  ;;  %p271_p5 = scmp.lt.s32.totalorder (!%p215_p3), %s1555_s13, 1 }
   0x9   : > { %s1750_s18 = smov (%p41_p4, %s1748_s18), 0  ;;  %218 = sbr.rel (%p215_p3) target bundleno = 296 (0x128), region = 32 }
   0xa   : > { %p273_p6 = scmp.lt.s32.totalorder (!%p215_p3), %s1182_s19, 63 }
  0x10   : > { %s1752_s13 = smov (!%p271_p5, %s1555_s13), 1  ;;  %s1754_s19 = smov (!%p273_p6, %s1182_s19), 63 }
  0x11   : > { %s1183_s20 = sshll.u32 %s1752_s13, 6  ;;  %s301_s4 = scalar_lea.vmem %s1739_s2, %s1752_s13 }
  0x12   : > { %s1622_s21 = sadd.s32 %s1183_s20, %s1754_s19  ;;  %s1627_s24 = scalar_lea.vmem %s1738_s1, %s1183_s20  ;;  %v1665_v24 = vld [vmem:[%s301_s4] ss:$0 sm:$0xff] }
  0x13   : > { %v1505_v0 = vld [vmem:[%s1627_s24] sm:$0xff]   ;;  %v1506_v1 = vld [vmem:[%s1627_s24 + $0x8] sm:$0xff]   ;;  %s1184_s25 = sshll.u32 %s1622_s21, 2  ;;  %v1507_v2 = vld [vmem:[%s1627_s24 + $0x10] sm:$0xff]  }
  0x14   : > { %1401 = vmatprep.subr.bf16.mxu0 %v1505_v0  ;;  %1449 = vmatprep.subr.bf16.mxu1 %v1505_v0  ;;  %s1638_s28 = scalar_lea.vmem %s1737_s0, %s1184_s25  ;;  %v1508_v3 = vld [vmem:[%s1627_s24 + $0x18] sm:$0xff]   ;;  %v1509_v6 = vld [vmem:[%s1627_s24 + $0x20] sm:$0xff]   ;;  %v1510_v7 = vld [vmem:[%s1627_s24 + $0x28] sm:$0xff]   ;;  %s1678_s7 = scalar_lea.vmem %s1740_s3, %s1184_s25 }
  0x15   : > { %1402 = vmatpush3.bf16.msra.mxu0 %v1505_v0  ;;  %1457 = vmatpush3.bf16.msra.mxu1 %v1505_v0  ;;  %v1513_v4 = vld [vmem:[%s1638_s28] sm:$0xff]   ;;  %v1511_v8 = vld [vmem:[%s1627_s24 + $0x30] sm:$0xff]   ;;  %v1512_v9 = vld [vmem:[%s1627_s24 + $0x38] sm:$0xff]  }
  0x16   : > { %1403 = vmatprep.subr.bf16.mxu0 %v1506_v1  ;;  %1450 = vmatprep.subr.bf16.mxu1 %v1506_v1  ;;  %v1514_v5 = vld [vmem:[%s1638_s28 + $0x40] sm:$0xff]   ;;  %v1515_v10 = vld [vmem:[%s1638_s28 + $0x8] sm:$0xff]   ;;  %v1517_v12 = vld [vmem:[%s1638_s28 + $0x10] sm:$0xff]  }
  0x17   : > { %1417 = vmatprep.mubr.bf16.mxu0 %v1513_v4  ;;  %1433 = vmatprep.mubr.bf16.mxu1 %v1514_v5  ;;  %v1516_v11 = vld [vmem:[%s1638_s28 + $0x48] sm:$0xff]   ;;  %v1518_v13 = vld [vmem:[%s1638_s28 + $0x50] sm:$0xff]   ;;  %v1519_v14 = vld [vmem:[%s1638_s28 + $0x18] sm:$0xff]  }
  0x18   : > { %v1520_v15 = vld [vmem:[%s1638_s28 + $0x58] sm:$0xff]   ;;  %v1521_v16 = vld [vmem:[%s1638_s28 + $0x20] sm:$0xff]   ;;  %v1523_v18 = vld [vmem:[%s1638_s28 + $0x28] sm:$0xff]  }
  0x19   : > { %1404 = vmatpush3.bf16.msra.mxu0 %v1506_v1  ;;  %1458 = vmatpush3.bf16.msra.mxu1 %v1506_v1  ;;  %v1522_v17 = vld [vmem:[%s1638_s28 + $0x60] sm:$0xff]   ;;  %v1524_v19 = vld [vmem:[%s1638_s28 + $0x68] sm:$0xff]   ;;  %v1525_v20 = vld [vmem:[%s1638_s28 + $0x30] sm:$0xff]  }
  0x1a   : > { %1405 = vmatprep.subr.bf16.mxu0 %v1507_v2  ;;  %1451 = vmatprep.subr.bf16.mxu1 %v1507_v2  ;;  %v1526_v21 = vld [vmem:[%s1638_s28 + $0x70] sm:$0xff]   ;;  %v1527_v22 = vld [vmem:[%s1638_s28 + $0x38] sm:$0xff]  }
  0x1b   : > { %v1528_v23 = vld [vmem:[%s1638_s28 + $0x78] sm:$0xff]  }
  0x1d   : > { %1406 = vmatpush3.bf16.msra.mxu0 %v1507_v2  ;;  %1459 = vmatpush3.bf16.msra.mxu1 %v1507_v2 }
  0x1e   : > { %1407 = vmatprep.subr.bf16.mxu0 %v1508_v3  ;;  %1452 = vmatprep.subr.bf16.mxu1 %v1508_v3 }
  0x21   : > { %1408 = vmatpush3.bf16.msra.mxu0 %v1508_v3  ;;  %1460 = vmatpush3.bf16.msra.mxu1 %v1508_v3 }
  0x22   : > { %1409 = vmatprep.subr.bf16.mxu0 %v1509_v6  ;;  %1453 = vmatprep.subr.bf16.mxu1 %v1509_v6 }
  0x25   : > { %1410 = vmatpush3.bf16.msra.mxu0 %v1509_v6  ;;  %1461 = vmatpush3.bf16.msra.mxu1 %v1509_v6 }
  0x26   : > { %1411 = vmatprep.subr.bf16.mxu0 %v1510_v7  ;;  %1454 = vmatprep.subr.bf16.mxu1 %v1510_v7 }
  0x29   : > { %1412 = vmatpush3.bf16.msra.mxu0 %v1510_v7  ;;  %1462 = vmatpush3.bf16.msra.mxu1 %v1510_v7 }
  0x2a   : > { %1413 = vmatprep.subr.bf16.mxu0 %v1511_v8  ;;  %1455 = vmatprep.subr.bf16.mxu1 %v1511_v8 }
  0x2d   : > { %1414 = vmatpush3.bf16.msra.mxu0 %v1511_v8  ;;  %1463 = vmatpush3.bf16.msra.mxu1 %v1511_v8 }
  0x2e   : > { %1415 = vmatprep.subr.bf16.mxu0 %v1512_v9  ;;  %1456 = vmatprep.subr.bf16.mxu1 %v1512_v9 }
  0x31   : > { %1416 = vmatpush3.bf16.msra.mxu0 %v1512_v9  ;;  %1464 = vmatpush3.bf16.msra.mxu1 %v1512_v9 }
  0x34   : > { %1418 = vmatmul.mubr.bf16.vlgmr.msra.gmra.mrb[0].mxu0 %v1515_v10  ;;  %1434 = vmatmul.mubr.bf16.vlgmr.msra.gmra.mrb[0].mxu1 %v1516_v11 }
  0x35   : > { %1421 = vmatprep.mubr.bf16.mxu0 %v1517_v12  ;;  %1437 = vmatprep.mubr.bf16.mxu1 %v1518_v13 }
  0x3c   : > { %1422 = vmatmul.mubr.bf16.gmra.mrb[4].mxu0 %v1519_v14  ;;  %1438 = vmatmul.mubr.bf16.gmra.mrb[4].mxu1 %v1520_v15 }
  0x3d   : > { %1425 = vmatprep.mubr.bf16.mxu0 %v1521_v16  ;;  %1441 = vmatprep.mubr.bf16.mxu1 %v1522_v17 }
  0x44   : > { %1426 = vmatmul.mubr.bf16.gmra.mrb[8].mxu0 %v1523_v18  ;;  %1442 = vmatmul.mubr.bf16.gmra.mrb[8].mxu1 %v1524_v19 }
  0x45   : > { %1429 = vmatprep.mubr.bf16.mxu0 %v1525_v20  ;;  %1445 = vmatprep.mubr.bf16.mxu1 %v1526_v21 }
  0x4c   : > { %1430 = vmatmul.mubr.bf16.gmra.mrb[12].mxu0 %v1527_v22  ;;  %1446 = vmatmul.mubr.bf16.gmra.mrb[12].mxu1 %v1528_v23 }
 0x107   : > { %v1419_v25 = vpop.f32.mrb[0].mxu0  ;;  %v1435_v26 = vpop.f32.mrb[0].mxu1 }
 0x108   : > { %v845_v27 = vadd.f32 %v1419_v25, %v1665_v24  ;;  %v861_v28 = vadd.f32 %v1435_v26, %v1665_v24  ;;  %v610_v29 = vpop.f32.mrb[1].mxu0  ;;  %v674_v30 = vpop.f32.mrb[1].mxu1 }
 0x109   : > { %v843_v31 = vadd.f32 %v1665_v24, %v610_v29  ;;  %v859_v32 = vadd.f32 %v1665_v24, %v674_v30  ;;  %v1420_v33 = vpop.f32.mrb[2].mxu0  ;;  %v1436_v34 = vpop.f32.mrb[2].mxu1 }
 0x10a   : > { %v846_v35 = vadd.f32 %v1420_v33, %v1665_v24  ;;  %v862_v36 = vadd.f32 %v1436_v34, %v1665_v24  ;;  %v613_v37 = vpop.f32.mrb[3].mxu0  ;;  %v677_v38 = vpop.f32.mrb[3].mxu1 }
 0x10b   : > { %v844_v39 = vadd.f32 %v1665_v24, %v613_v37  ;;  %v860_v40 = vadd.f32 %v1665_v24, %v677_v38 }
 0x10c   : > { %v1290_v41 = vpack.c.bf16 %v846_v35, %v845_v27  ;;  %v1330_v42 = vpack.c.bf16 %v862_v36, %v861_v28 }
 0x10d   : > { %v1285_v43 = vpack.c.bf16 %v844_v39, %v843_v31  ;;  %v1325_v44 = vpack.c.bf16 %v860_v40, %v859_v32 }
 0x10e   : > { %1362 = vst [vmem:[%s1678_s7 + $0x8] sm:$0xff] %v1290_v41   ;;  %1370 = vst [vmem:[%s1678_s7 + $0x48] sm:$0xff] %v1330_v42  }
 0x10f   : > { %1286 = vst [vmem:[%s1678_s7] sm:$0xff] %v1285_v43   ;;  %1369 = vst [vmem:[%s1678_s7 + $0x40] sm:$0xff] %v1325_v44   ;;  %v1423_v45 = vpop.f32.mrb[4].mxu0  ;;  %v1439_v46 = vpop.f32.mrb[4].mxu1 }
 0x110   : > { %v849_v47 = vadd.f32 %v1423_v45, %v1665_v24  ;;  %v865_v48 = vadd.f32 %v1439_v46, %v1665_v24  ;;  %v626_v49 = vpop.f32.mrb[5].mxu0  ;;  %v690_v50 = vpop.f32.mrb[5].mxu1 }
 0x111   : > { %v847_v51 = vadd.f32 %v1665_v24, %v626_v49  ;;  %v863_v52 = vadd.f32 %v1665_v24, %v690_v50  ;;  %v1424_v53 = vpop.f32.mrb[6].mxu0  ;;  %v1440_v54 = vpop.f32.mrb[6].mxu1 }
 0x112   : > { %v850_v55 = vadd.f32 %v1424_v53, %v1665_v24  ;;  %v866_v56 = vadd.f32 %v1440_v54, %v1665_v24  ;;  %v629_v57 = vpop.f32.mrb[7].mxu0  ;;  %v693_v58 = vpop.f32.mrb[7].mxu1 }
 0x113   : > { %v848_v59 = vadd.f32 %v1665_v24, %v629_v57  ;;  %v864_v60 = vadd.f32 %v1665_v24, %v693_v58 }
 0x114   : > { %v1300_v61 = vpack.c.bf16 %v850_v55, %v849_v47  ;;  %v1340_v62 = vpack.c.bf16 %v866_v56, %v865_v48 }
 0x115   : > { %v1295_v63 = vpack.c.bf16 %v848_v59, %v847_v51  ;;  %v1335_v0 = vpack.c.bf16 %v864_v60, %v863_v52 }
 0x116   : > { %1364 = vst [vmem:[%s1678_s7 + $0x18] sm:$0xff] %v1300_v61   ;;  %1372 = vst [vmem:[%s1678_s7 + $0x58] sm:$0xff] %v1340_v62  }
 0x117   : > { %1363 = vst [vmem:[%s1678_s7 + $0x10] sm:$0xff] %v1295_v63   ;;  %1371 = vst [vmem:[%s1678_s7 + $0x50] sm:$0xff] %v1335_v0   ;;  %v1427_v1 = vpop.f32.mrb[8].mxu0  ;;  %v1443_v2 = vpop.f32.mrb[8].mxu1 }
 0x118   : > { %v853_v3 = vadd.f32 %v1427_v1, %v1665_v24  ;;  %v869_v4 = vadd.f32 %v1443_v2, %v1665_v24  ;;  %v642_v5 = vpop.f32.mrb[9].mxu0  ;;  %v706_v6 = vpop.f32.mrb[9].mxu1 }
 0x119   : > { %v851_v7 = vadd.f32 %v1665_v24, %v642_v5  ;;  %v867_v8 = vadd.f32 %v1665_v24, %v706_v6  ;;  %v1428_v9 = vpop.f32.mrb[10].mxu0  ;;  %v1444_v10 = vpop.f32.mrb[10].mxu1 }
 0x11a   : > { %v854_v11 = vadd.f32 %v1428_v9, %v1665_v24  ;;  %v870_v12 = vadd.f32 %v1444_v10, %v1665_v24  ;;  %v645_v13 = vpop.f32.mrb[11].mxu0  ;;  %v709_v14 = vpop.f32.mrb[11].mxu1 }
 0x11b   : > { %v852_v15 = vadd.f32 %v1665_v24, %v645_v13  ;;  %v868_v16 = vadd.f32 %v1665_v24, %v709_v14 }
 0x11c   : > { %v1310_v17 = vpack.c.bf16 %v854_v11, %v853_v3  ;;  %v1350_v18 = vpack.c.bf16 %v870_v12, %v869_v4 }
 0x11d   : > { %v1305_v19 = vpack.c.bf16 %v852_v15, %v851_v7  ;;  %v1345_v20 = vpack.c.bf16 %v868_v16, %v867_v8 }
 0x11e   : > { %1366 = vst [vmem:[%s1678_s7 + $0x28] sm:$0xff] %v1310_v17   ;;  %1374 = vst [vmem:[%s1678_s7 + $0x68] sm:$0xff] %v1350_v18  }
 0x11f   : > { %1365 = vst [vmem:[%s1678_s7 + $0x20] sm:$0xff] %v1305_v19   ;;  %1373 = vst [vmem:[%s1678_s7 + $0x60] sm:$0xff] %v1345_v20   ;;  %v1431_v21 = vpop.f32.mrb[12].mxu0  ;;  %v1447_v22 = vpop.f32.mrb[12].mxu1 }
 0x120   : > { %v857_v23 = vadd.f32 %v1431_v21, %v1665_v24  ;;  %v873_v25 = vadd.f32 %v1447_v22, %v1665_v24  ;;  %v658_v26 = vpop.f32.mrb[13].mxu0  ;;  %v722_v27 = vpop.f32.mrb[13].mxu1 }
 0x121   : > { %v855_v28 = vadd.f32 %v1665_v24, %v658_v26  ;;  %v871_v29 = vadd.f32 %v1665_v24, %v722_v27  ;;  %v1432_v30 = vpop.f32.mrb[14].mxu0  ;;  %v1448_v31 = vpop.f32.mrb[14].mxu1 }
 0x122   : > { %v858_v32 = vadd.f32 %v1432_v30, %v1665_v24  ;;  %v874_v33 = vadd.f32 %v1448_v31, %v1665_v24  ;;  %v661_v34 = vpop.f32.mrb[15].mxu0  ;;  %v725_v35 = vpop.f32.mrb[15].mxu1 }
 0x123   : > { %v856_v36 = vadd.f32 %v1665_v24, %v661_v34  ;;  %v872_v37 = vadd.f32 %v1665_v24, %v725_v35 }
 0x124   : > { %v1320_v38 = vpack.c.bf16 %v858_v32, %v857_v23  ;;  %v1360_v39 = vpack.c.bf16 %v874_v33, %v873_v25 }
 0x125   : > { %v1315_v40 = vpack.c.bf16 %v856_v36, %v855_v28  ;;  %v1355_v41 = vpack.c.bf16 %v872_v37, %v871_v29 }
 0x126   : > { %1368 = vst [vmem:[%s1678_s7 + $0x38] sm:$0xff] %v1320_v38   ;;  %1376 = vst [vmem:[%s1678_s7 + $0x78] sm:$0xff] %v1360_v39  }
 0x127   : > { %1367 = vst [vmem:[%s1678_s7 + $0x30] sm:$0xff] %v1315_v40   ;;  %1375 = vst [vmem:[%s1678_s7 + $0x70] sm:$0xff] %v1355_v41  }
 0x128 PF: > { %s13_s16 = sadd.s32 1, %s1567_s16   ;;  %s1741_s12 = smov %s1559_s14 }
 0x129   : > { %p10_p7 = scmp.ge.s32.totalorder %s13_s16, 6   ;;  %s1742_s13 = smov %s1563_s15 }
 0x12a   : > { %s1743_s14 = smov %s1746_s17  ;;  %s1744_s15 = smov %s1750_s18 }
 0x12b   :  { %12 = sbr.rel (!%p10_p7) target bundleno = 3 (0x3), region = 76 }

// kernel: _forward_impl.113
= control target key start
LH: loop header
LB: loop body
LE: loop exit
PB: predicated region body
PF: predicated region fallthrough
CT: control target
= control target key end

     0   :  { %s1899_s15 = smov 0   ;;  %s1901_s16 = smov 0   ;;  %s2154_s0 = inlined_call_operand.vmem [shape: bf16[2,512,128], index: 0, kind: input, shape index: {}]   ;;  %s2155_s1 = inlined_call_operand.vmem [shape: bf16[2,128,128], index: 1, kind: input, shape index: {}]   ;;  %s2156_s2 = inlined_call_operand.vmem [shape: f32[2,1,128], index: 2, kind: input, shape index: {}]   ;;  %s2157_s3 = inlined_call_operand.vmem [shape: bf16[2,512,128], index: 3, kind: input, shape index: {}]   ;;  %s2158_s4 = inlined_call_operand.vmem [shape: bf16[2,512,128], index: 4, kind: output, shape index: {}]  }
   0x1   :  { %s1903_s17 = smov 0   ;;  %s1905_s18 = smov 0  }
   0x2   :  { %s1907_s19 = smov 0  }
   0x3 LB: > { %s36_s20 = sadd.s32 1, %s1864_s17  ;;  %s40_s21 = sadd.s32 1, %s1868_s18  ;;  %s1872_s19 = sphi %s1907_s19, %s14_s19   ;;  %s1868_s18 = sphi %s1905_s18, %s2162_s18   ;;  %s1864_s17 = sphi %s1903_s17, %s2161_s17   ;;  %s1860_s16 = sphi %s1901_s16, %s2160_s16   ;;  %s1856_s15 = sphi %s1899_s15, %s2159_s15  }
   0x4   : > { %p38_p0 = scmp.ge.s32.totalorder %s36_s20, 2  ;;  %p1404_p1 = scmp.ge.s32.totalorder %s1872_s19, 1 }
   0x5   : > { %p261_p2 = scmp.lt.s32.totalorder %s1872_s19, 5 }
   0x6   : > { %s2164_s20 = smov (%p38_p0, %s36_s20), 0  ;;  %s2166_s21 = smov (!%p38_p0, %s40_s21), %s1868_s18 }
   0x7   : > { %p262_p3 = pnand %p1404_p1, %p261_p2  ;;  %p42_p4 = scmp.ge.s32.totalorder %s2166_s21, 2 }
   0x8   : > { %s1405_s22 = sshll.u32 (!%p262_p3), %s1856_s15, 5  ;;  %p332_p5 = scmp.lt.s32.totalorder (!%p262_p3), %s1860_s16, 1 }
   0x9   : > { %s2168_s21 = smov (%p42_p4, %s2166_s21), 0  ;;  %265 = sbr.rel (%p262_p3) target bundleno = 301 (0x12d), region = 36 }
   0xa   : > { %p334_p6 = scmp.lt.s32.totalorder (!%p262_p3), %s1405_s22, 63 }
  0x10   : > { %s2170_s16 = smov (!%p332_p5, %s1860_s16), 1  ;;  %s2172_s22 = smov (!%p334_p6, %s1405_s22), 63 }
  0x11   : > { %s1406_s23 = sshll.u32 %s2170_s16, 6  ;;  %s362_s11 = scalar_lea.vmem %s2156_s2, %s2170_s16 }
  0x12   : > { %s340_s24 = sadd.s32 %s1406_s23, %s2172_s22  ;;  %s1935_s27 = scalar_lea.vmem %s2155_s1, %s1406_s23  ;;  %v1995_v36 = vld [vmem:[%s362_s11] ss:$0 sm:$0xff] }
  0x13   : > { %v1810_v0 = vld [vmem:[%s1935_s27] sm:$0xff]   ;;  %v1811_v1 = vld [vmem:[%s1935_s27 + $0x8] sm:$0xff]   ;;  %s1939_s28 = sshll.u32 %s340_s24, 2  ;;  %v1812_v2 = vld [vmem:[%s1935_s27 + $0x10] sm:$0xff]  }
  0x14   : > { %1706 = vmatprep.subr.bf16.mxu0 %v1810_v0  ;;  %1754 = vmatprep.subr.bf16.mxu1 %v1810_v0  ;;  %s1946_s5 = scalar_lea.vmem %s2154_s0, %s1939_s28  ;;  %v1813_v3 = vld [vmem:[%s1935_s27 + $0x18] sm:$0xff]   ;;  %v1814_v6 = vld [vmem:[%s1935_s27 + $0x20] sm:$0xff]   ;;  %v1815_v7 = vld [vmem:[%s1935_s27 + $0x28] sm:$0xff]   ;;  %s1973_s8 = scalar_lea.vmem %s2157_s3, %s1939_s28 }
  0x15   : > { %1707 = vmatpush3.bf16.msra.mxu0 %v1810_v0  ;;  %1762 = vmatpush3.bf16.msra.mxu1 %v1810_v0  ;;  %v1818_v4 = vld [vmem:[%s1946_s5] sm:$0xff]   ;;  %v1816_v8 = vld [vmem:[%s1935_s27 + $0x30] sm:$0xff]   ;;  %v1817_v9 = vld [vmem:[%s1935_s27 + $0x38] sm:$0xff]   ;;  %s2037_s14 = scalar_lea.vmem %s2158_s4, %s1939_s28 }
  0x16   : > { %1708 = vmatprep.subr.bf16.mxu0 %v1811_v1  ;;  %1755 = vmatprep.subr.bf16.mxu1 %v1811_v1  ;;  %v1819_v5 = vld [vmem:[%s1946_s5 + $0x40] sm:$0xff]   ;;  %v1820_v10 = vld [vmem:[%s1946_s5 + $0x8] sm:$0xff]   ;;  %v1822_v12 = vld [vmem:[%s1946_s5 + $0x10] sm:$0xff]  }
  0x17   : > { %1722 = vmatprep.mubr.bf16.mxu0 %v1818_v4  ;;  %1738 = vmatprep.mubr.bf16.mxu1 %v1819_v5  ;;  %v1821_v11 = vld [vmem:[%s1946_s5 + $0x48] sm:$0xff]   ;;  %v1823_v13 = vld [vmem:[%s1946_s5 + $0x50] sm:$0xff]   ;;  %v1824_v14 = vld [vmem:[%s1946_s5 + $0x18] sm:$0xff]  }
  0x18   : > { %v1825_v15 = vld [vmem:[%s1946_s5 + $0x58] sm:$0xff]   ;;  %v1826_v16 = vld [vmem:[%s1946_s5 + $0x20] sm:$0xff]   ;;  %v1828_v18 = vld [vmem:[%s1946_s5 + $0x28] sm:$0xff]  }
  0x19   : > { %1709 = vmatpush3.bf16.msra.mxu0 %v1811_v1  ;;  %1763 = vmatpush3.bf16.msra.mxu1 %v1811_v1  ;;  %v1827_v17 = vld [vmem:[%s1946_s5 + $0x60] sm:$0xff]   ;;  %v1829_v19 = vld [vmem:[%s1946_s5 + $0x68] sm:$0xff]   ;;  %v1830_v20 = vld [vmem:[%s1946_s5 + $0x30] sm:$0xff]  }
  0x1a   : > { %1710 = vmatprep.subr.bf16.mxu0 %v1812_v2  ;;  %1756 = vmatprep.subr.bf16.mxu1 %v1812_v2  ;;  %v1831_v21 = vld [vmem:[%s1946_s5 + $0x70] sm:$0xff]   ;;  %v1832_v22 = vld [vmem:[%s1946_s5 + $0x38] sm:$0xff]   ;;  %v1652_v24 = vld [vmem:[%s1973_s8 + $0x8] sm:$0xff]  }
  0x1b   : > { %v1833_v23 = vld [vmem:[%s1946_s5 + $0x78] sm:$0xff]   ;;  %v1660_v25 = vld [vmem:[%s1973_s8 + $0x48] sm:$0xff]   ;;  %v1509_v26 = vld [vmem:[%s1973_s8] sm:$0xff]   ;;  %v1514_v32 = vunpack.c.l.bf16 %v1652_v24  ;;  %v1515_v37 = vunpack.c.h.bf16 %v1652_v24 }
  0x1c   : > { %v1659_v27 = vld [vmem:[%s1973_s8 + $0x40] sm:$0xff]   ;;  %v1984_v28 = vld [vmem:[%s1973_s8 + $0x18] sm:$0xff]   ;;  %v1990_v30 = vld [vmem:[%s1973_s8 + $0x10] sm:$0xff]   ;;  %v1546_v33 = vunpack.c.l.bf16 %v1660_v25  ;;  %v1510_v34 = vunpack.c.l.bf16 %v1509_v26  ;;  %v1547_v38 = vunpack.c.h.bf16 %v1660_v25  ;;  %v1511_v39 = vunpack.c.h.bf16 %v1509_v26 }
  0x1d   : > { %1711 = vmatpush3.bf16.msra.mxu0 %v1812_v2  ;;  %1764 = vmatpush3.bf16.msra.mxu1 %v1812_v2  ;;  %v1987_v29 = vld [vmem:[%s1973_s8 + $0x58] sm:$0xff]   ;;  %v1993_v31 = vld [vmem:[%s1973_s8 + $0x50] sm:$0xff]   ;;  %v1542_v35 = vunpack.c.l.bf16 %v1659_v27  ;;  %v1543_v40 = vunpack.c.h.bf16 %v1659_v27  ;;  %v1998_v41 = vld [vmem:[%s1973_s8 + $0x28] sm:$0xff]   ;;  %v1522_v43 = vunpack.c.l.bf16 %v1984_v28  ;;  %v1518_v45 = vunpack.c.l.bf16 %v1990_v30 }
  0x1e   : > { %1712 = vmatprep.subr.bf16.mxu0 %v1813_v3  ;;  %1757 = vmatprep.subr.bf16.mxu1 %v1813_v3  ;;  %v2001_v42 = vld [vmem:[%s1973_s8 + $0x68] sm:$0xff]   ;;  %v1554_v44 = vunpack.c.l.bf16 %v1987_v29  ;;  %v1550_v46 = vunpack.c.l.bf16 %v1993_v31  ;;  %v2008_v47 = vld [vmem:[%s1973_s8 + $0x20] sm:$0xff]   ;;  %v1523_v51 = vunpack.c.h.bf16 %v1984_v28  ;;  %v1555_v52 = vunpack.c.h.bf16 %v1987_v29 }
  0x1f   : > { %v2011_v48 = vld [vmem:[%s1973_s8 + $0x60] sm:$0xff]   ;;  %v1519_v53 = vunpack.c.h.bf16 %v1990_v30  ;;  %v1551_v54 = vunpack.c.h.bf16 %v1993_v31  ;;  %v1530_v59 = vunpack.c.l.bf16 %v1998_v41  ;;  %v1562_v60 = vunpack.c.l.bf16 %v2001_v42 }
  0x20   : > { %v1526_v1 = vunpack.c.l.bf16 %v2008_v47  ;;  %v1558_v2 = vunpack.c.l.bf16 %v2011_v48 }
  0x21   : > { %1713 = vmatpush3.bf16.msra.mxu0 %v1813_v3  ;;  %1765 = vmatpush3.bf16.msra.mxu1 %v1813_v3 }
  0x22   : > { %1714 = vmatprep.subr.bf16.mxu0 %v1814_v6  ;;  %1758 = vmatprep.subr.bf16.mxu1 %v1814_v6 }
  0x25   : > { %1715 = vmatpush3.bf16.msra.mxu0 %v1814_v6  ;;  %1766 = vmatpush3.bf16.msra.mxu1 %v1814_v6 }
  0x26   : > { %1716 = vmatprep.subr.bf16.mxu0 %v1815_v7  ;;  %1759 = vmatprep.subr.bf16.mxu1 %v1815_v7 }
  0x29   : > { %1717 = vmatpush3.bf16.msra.mxu0 %v1815_v7  ;;  %1767 = vmatpush3.bf16.msra.mxu1 %v1815_v7 }
  0x2a   : > { %1718 = vmatprep.subr.bf16.mxu0 %v1816_v8  ;;  %1760 = vmatprep.subr.bf16.mxu1 %v1816_v8 }
  0x2d   : > { %1719 = vmatpush3.bf16.msra.mxu0 %v1816_v8  ;;  %1768 = vmatpush3.bf16.msra.mxu1 %v1816_v8 }
  0x2e   : > { %1720 = vmatprep.subr.bf16.mxu0 %v1817_v9  ;;  %1761 = vmatprep.subr.bf16.mxu1 %v1817_v9 }
  0x31   : > { %1721 = vmatpush3.bf16.msra.mxu0 %v1817_v9  ;;  %1769 = vmatpush3.bf16.msra.mxu1 %v1817_v9 }
  0x34   : > { %1723 = vmatmul.mubr.bf16.vlgmr.msra.gmra.mrb[0].mxu0 %v1820_v10  ;;  %1739 = vmatmul.mubr.bf16.vlgmr.msra.gmra.mrb[0].mxu1 %v1821_v11 }
  0x35   : > { %1726 = vmatprep.mubr.bf16.mxu0 %v1822_v12  ;;  %1742 = vmatprep.mubr.bf16.mxu1 %v1823_v13 }
  0x3c   : > { %1727 = vmatmul.mubr.bf16.gmra.mrb[4].mxu0 %v1824_v14  ;;  %1743 = vmatmul.mubr.bf16.gmra.mrb[4].mxu1 %v1825_v15  ;;  %v1531_v15 = vunpack.c.h.bf16 %v1998_v41 }
  0x3d   : > { %1730 = vmatprep.mubr.bf16.mxu0 %v1826_v16  ;;  %1746 = vmatprep.mubr.bf16.mxu1 %v1827_v17  ;;  %v1563_v16 = vunpack.c.h.bf16 %v2001_v42 }
  0x44   : > { %1731 = vmatmul.mubr.bf16.gmra.mrb[8].mxu0 %v1828_v18  ;;  %1747 = vmatmul.mubr.bf16.gmra.mrb[8].mxu1 %v1829_v19  ;;  %v1527_v19 = vunpack.c.h.bf16 %v2008_v47 }
  0x45   : > { %1734 = vmatprep.mubr.bf16.mxu0 %v1830_v20  ;;  %1750 = vmatprep.mubr.bf16.mxu1 %v1831_v21  ;;  %v1559_v20 = vunpack.c.h.bf16 %v2011_v48 }
  0x4c   : > { %1735 = vmatmul.mubr.bf16.gmra.mrb[12].mxu0 %v1832_v22  ;;  %1751 = vmatmul.mubr.bf16.gmra.mrb[12].mxu1 %v1833_v23 }
 0x107   : > { %v1724_v49 = vpop.f32.mrb[0].mxu0  ;;  %v1740_v50 = vpop.f32.mrb[0].mxu1 }
 0x108   : > { %v919_v55 = vadd.f32 %v1724_v49, %v1995_v36  ;;  %v935_v56 = vadd.f32 %v1740_v50, %v1995_v36  ;;  %v684_v57 = vpop.f32.mrb[1].mxu0  ;;  %v748_v58 = vpop.f32.mrb[1].mxu1 }
 0x109   : > { %v917_v61 = vadd.f32 %v1995_v36, %v684_v57  ;;  %v933_v62 = vadd.f32 %v1995_v36, %v748_v58  ;;  %v1725_v63 = vpop.f32.mrb[2].mxu0  ;;  %v1741_v0 = vpop.f32.mrb[2].mxu1 }
 0x10a   : > { %v1015_v3 = vadd.f32 %v1514_v32, %v919_v55  ;;  %v1031_v4 = vadd.f32 %v1546_v33, %v935_v56  ;;  %v920_v5 = vadd.f32 %v1725_v63, %v1995_v36  ;;  %v936_v6 = vadd.f32 %v1741_v0, %v1995_v36  ;;  %v687_v7 = vpop.f32.mrb[3].mxu0  ;;  %v751_v8 = vpop.f32.mrb[3].mxu1  ;;  %v2047_v63 = vld [vmem:[%s1973_s8 + $0x78] sm:$0xff]  }
 0x10b   : > { %v1013_v9 = vadd.f32 %v1510_v34, %v917_v61  ;;  %v1029_v10 = vadd.f32 %v1542_v35, %v933_v62  ;;  %v918_v11 = vadd.f32 %v1995_v36, %v687_v7  ;;  %v934_v12 = vadd.f32 %v1995_v36, %v751_v8  ;;  %v2044_v62 = vld [vmem:[%s1973_s8 + $0x38] sm:$0xff]   ;;  %v2058_v8 = vld [vmem:[%s1973_s8 + $0x30] sm:$0xff]  }
 0x10c   : > { %v1016_v13 = vadd.f32 %v1515_v37, %v920_v5  ;;  %v1032_v14 = vadd.f32 %v1547_v38, %v936_v6  ;;  %v1047_v21 = vmax.f32 %v1015_v3, 0.0  ;;  %v1063_v22 = vmax.f32 %v1031_v4, 0.0 }
 0x10d   : > { %v1014_v17 = vadd.f32 %v1511_v39, %v918_v11  ;;  %v1030_v18 = vadd.f32 %v1543_v40, %v934_v12  ;;  %v1045_v25 = vmax.f32 %v1013_v9, 0.0  ;;  %v1061_v26 = vmax.f32 %v1029_v10, 0.0  ;;  %v2061_v9 = vld [vmem:[%s1973_s8 + $0x70] sm:$0xff]  }
 0x10e   : > { %v1048_v23 = vmax.f32 %v1016_v13, 0.0  ;;  %v1064_v24 = vmax.f32 %v1032_v14, 0.0  ;;  %v1538_v14 = vunpack.c.l.bf16 %v2044_v62 }
 0x10f   : > { %v1046_v27 = vmax.f32 %v1014_v17, 0.0  ;;  %v1062_v32 = vmax.f32 %v1030_v18, 0.0  ;;  %v1728_v33 = vpop.f32.mrb[4].mxu0  ;;  %v1744_v34 = vpop.f32.mrb[4].mxu1  ;;  %v1570_v17 = vunpack.c.l.bf16 %v2047_v63  ;;  %v1534_v18 = vunpack.c.l.bf16 %v2058_v8 }
 0x110   : > { %v1580_v35 = vpack.c.bf16 %v1048_v23, %v1047_v21  ;;  %v1620_v37 = vpack.c.bf16 %v1064_v24, %v1063_v22  ;;  %v923_v38 = vadd.f32 %v1728_v33, %v1995_v36  ;;  %v939_v39 = vadd.f32 %v1744_v34, %v1995_v36  ;;  %v700_v40 = vpop.f32.mrb[5].mxu0  ;;  %v764_v49 = vpop.f32.mrb[5].mxu1 }
 0x111   : > { %v1575_v50 = vpack.c.bf16 %v1046_v27, %v1045_v25  ;;  %v1615_v55 = vpack.c.bf16 %v1062_v32, %v1061_v26  ;;  %v921_v56 = vadd.f32 %v1995_v36, %v700_v40  ;;  %v937_v57 = vadd.f32 %v1995_v36, %v764_v49  ;;  %v1729_v58 = vpop.f32.mrb[6].mxu0  ;;  %v1745_v61 = vpop.f32.mrb[6].mxu1 }
 0x112   : > { %1667 = vst [vmem:[%s2037_s14 + $0x8] sm:$0xff] %v1580_v35   ;;  %1675 = vst [vmem:[%s2037_s14 + $0x48] sm:$0xff] %v1620_v37   ;;  %v1019_v0 = vadd.f32 %v1522_v43, %v923_v38  ;;  %v1035_v3 = vadd.f32 %v1554_v44, %v939_v39  ;;  %v924_v4 = vadd.f32 %v1729_v58, %v1995_v36  ;;  %v703_v6 = vpop.f32.mrb[7].mxu0  ;;  %v767_v7 = vpop.f32.mrb[7].mxu1  ;;  %v1566_v21 = vunpack.c.l.bf16 %v2061_v9 }
 0x113   : > { %v940_v5 = vadd.f32 %v1745_v61, %v1995_v36  ;;  %1576 = vst [vmem:[%s2037_s14] sm:$0xff] %v1575_v50   ;;  %1674 = vst [vmem:[%s2037_s14 + $0x40] sm:$0xff] %v1615_v55   ;;  %v1017_v10 = vadd.f32 %v1518_v45, %v921_v56  ;;  %v1033_v43 = vadd.f32 %v1550_v46, %v937_v57 }
 0x114   : > { %v922_v44 = vadd.f32 %v1995_v36, %v703_v6  ;;  %v938_v11 = vadd.f32 %v1995_v36, %v767_v7  ;;  %v1020_v12 = vadd.f32 %v1523_v51, %v924_v4  ;;  %v1051_v22 = vmax.f32 %v1019_v0, 0.0 }
 0x115   : > { %v1036_v13 = vadd.f32 %v1555_v52, %v940_v5  ;;  %v1067_v28 = vmax.f32 %v1035_v3, 0.0  ;;  %v1049_v29 = vmax.f32 %v1017_v10, 0.0  ;;  %v1065_v52 = vmax.f32 %v1033_v43, 0.0 }
 0x116   : > { %v1018_v45 = vadd.f32 %v1519_v53, %v922_v44  ;;  %v1034_v46 = vadd.f32 %v1551_v54, %v938_v11  ;;  %v1052_v51 = vmax.f32 %v1020_v12, 0.0  ;;  %v1539_v5 = vunpack.c.h.bf16 %v2044_v62 }
 0x117   : > { %v1068_v23 = vmax.f32 %v1036_v13, 0.0  ;;  %v1732_v26 = vpop.f32.mrb[8].mxu0  ;;  %v1748_v30 = vpop.f32.mrb[8].mxu1  ;;  %v1571_v6 = vunpack.c.h.bf16 %v2047_v63  ;;  %v1535_v7 = vunpack.c.h.bf16 %v2058_v8  ;;  %v1567_v10 = vunpack.c.h.bf16 %v2061_v9 }
 0x118   : > { %v1050_v24 = vmax.f32 %v1018_v45, 0.0  ;;  %v1066_v25 = vmax.f32 %v1034_v46, 0.0  ;;  %v1590_v53 = vpack.c.bf16 %v1052_v51, %v1051_v22  ;;  %v927_v31 = vadd.f32 %v1732_v26, %v1995_v36  ;;  %v716_v32 = vpop.f32.mrb[9].mxu0  ;;  %v780_v33 = vpop.f32.mrb[9].mxu1 }
 0x119   : > { %v1630_v27 = vpack.c.bf16 %v1068_v23, %v1067_v28  ;;  %v943_v54 = vadd.f32 %v1748_v30, %v1995_v36  ;;  %v925_v37 = vadd.f32 %v1995_v36, %v716_v32  ;;  %v941_v38 = vadd.f32 %v1995_v36, %v780_v33  ;;  %v1733_v39 = vpop.f32.mrb[10].mxu0  ;;  %v1749_v40 = vpop.f32.mrb[10].mxu1 }
 0x11a   : > { %v1585_v34 = vpack.c.bf16 %v1050_v24, %v1049_v29  ;;  %v1625_v35 = vpack.c.bf16 %v1066_v25, %v1065_v52  ;;  %1669 = vst [vmem:[%s2037_s14 + $0x18] sm:$0xff] %v1590_v53   ;;  %v1023_v49 = vadd.f32 %v1530_v59, %v927_v31  ;;  %v928_v55 = vadd.f32 %v1733_v39, %v1995_v36  ;;  %v719_v57 = vpop.f32.mrb[11].mxu0  ;;  %v783_v58 = vpop.f32.mrb[11].mxu1 }
 0x11b   : > { %1677 = vst [vmem:[%s2037_s14 + $0x58] sm:$0xff] %v1630_v27   ;;  %v1039_v50 = vadd.f32 %v1562_v60, %v943_v54  ;;  %v944_v56 = vadd.f32 %v1749_v40, %v1995_v36  ;;  %v1021_v61 = vadd.f32 %v1526_v1, %v925_v37  ;;  %v1037_v0 = vadd.f32 %v1558_v2, %v941_v38 }
 0x11c   : > { %1668 = vst [vmem:[%s2037_s14 + $0x10] sm:$0xff] %v1585_v34   ;;  %1676 = vst [vmem:[%s2037_s14 + $0x50] sm:$0xff] %v1625_v35   ;;  %v926_v3 = vadd.f32 %v1995_v36, %v719_v57  ;;  %v942_v59 = vadd.f32 %v1995_v36, %v783_v58  ;;  %v1024_v60 = vadd.f32 %v1531_v15, %v928_v55  ;;  %v1055_v43 = vmax.f32 %v1023_v49, 0.0 }
 0x11d   : > { %v1040_v4 = vadd.f32 %v1563_v16, %v944_v56  ;;  %v1071_v41 = vmax.f32 %v1039_v50, 0.0  ;;  %v1053_v42 = vmax.f32 %v1021_v61, 0.0  ;;  %v1069_v16 = vmax.f32 %v1037_v0, 0.0 }
 0x11e   : > { %v1022_v1 = vadd.f32 %v1527_v19, %v926_v3  ;;  %v1038_v2 = vadd.f32 %v1559_v20, %v942_v59  ;;  %v1056_v15 = vmax.f32 %v1024_v60, 0.0 }
 0x11f   : > { %v1072_v44 = vmax.f32 %v1040_v4, 0.0  ;;  %v1736_v13 = vpop.f32.mrb[12].mxu0  ;;  %v1752_v47 = vpop.f32.mrb[12].mxu1 }
 0x120   : > { %v1054_v11 = vmax.f32 %v1022_v1, 0.0  ;;  %v1070_v12 = vmax.f32 %v1038_v2, 0.0  ;;  %v1600_v19 = vpack.c.bf16 %v1056_v15, %v1055_v43  ;;  %v931_v48 = vadd.f32 %v1736_v13, %v1995_v36  ;;  %v732_v46 = vpop.f32.mrb[13].mxu0  ;;  %v796_v22 = vpop.f32.mrb[13].mxu1 }
 0x121   : > { %v1640_v45 = vpack.c.bf16 %v1072_v44, %v1071_v41  ;;  %v947_v20 = vadd.f32 %v1752_v47, %v1995_v36  ;;  %v929_v23 = vadd.f32 %v1995_v36, %v732_v46  ;;  %v945_v29 = vadd.f32 %v1995_v36, %v796_v22  ;;  %v1737_v52 = vpop.f32.mrb[14].mxu0  ;;  %v1753_v24 = vpop.f32.mrb[14].mxu1 }
 0x122   : > { %v1595_v28 = vpack.c.bf16 %v1054_v11, %v1053_v42  ;;  %v1635_v51 = vpack.c.bf16 %v1070_v12, %v1069_v16  ;;  %1671 = vst [vmem:[%s2037_s14 + $0x28] sm:$0xff] %v1600_v19   ;;  %v1027_v25 = vadd.f32 %v1538_v14, %v931_v48  ;;  %v932_v30 = vadd.f32 %v1737_v52, %v1995_v36  ;;  %v735_v27 = vpop.f32.mrb[15].mxu0  ;;  %v799_v31 = vpop.f32.mrb[15].mxu1 }
 0x123   : > { %1679 = vst [vmem:[%s2037_s14 + $0x68] sm:$0xff] %v1640_v45   ;;  %v1043_v26 = vadd.f32 %v1570_v17, %v947_v20  ;;  %v948_v53 = vadd.f32 %v1753_v24, %v1995_v36  ;;  %v1025_v54 = vadd.f32 %v1534_v18, %v929_v23  ;;  %v1041_v32 = vadd.f32 %v1566_v21, %v945_v29 }
 0x124   : > { %1670 = vst [vmem:[%s2037_s14 + $0x20] sm:$0xff] %v1595_v28   ;;  %1678 = vst [vmem:[%s2037_s14 + $0x60] sm:$0xff] %v1635_v51   ;;  %v930_v62 = vadd.f32 %v1995_v36, %v735_v27  ;;  %v946_v14 = vadd.f32 %v1995_v36, %v799_v31  ;;  %v1028_v63 = vadd.f32 %v1539_v5, %v932_v30  ;;  %v1059_v35 = vmax.f32 %v1027_v25, 0.0 }
 0x125   : > { %v1044_v17 = vadd.f32 %v1571_v6, %v948_v53  ;;  %v1075_v37 = vmax.f32 %v1043_v26, 0.0  ;;  %v1057_v18 = vmax.f32 %v1025_v54, 0.0  ;;  %v1073_v39 = vmax.f32 %v1041_v32, 0.0 }
 0x126   : > { %v1026_v33 = vadd.f32 %v1535_v7, %v930_v62  ;;  %v1042_v34 = vadd.f32 %v1567_v10, %v946_v14  ;;  %v1060_v38 = vmax.f32 %v1028_v63, 0.0 }
 0x127   : > { %v1076_v8 = vmax.f32 %v1044_v17, 0.0 }
 0x128   : > { %v1058_v9 = vmax.f32 %v1026_v33, 0.0  ;;  %v1074_v21 = vmax.f32 %v1042_v34, 0.0  ;;  %v1610_v40 = vpack.c.bf16 %v1060_v38, %v1059_v35 }
 0x129   : > { %v1650_v49 = vpack.c.bf16 %v1076_v8, %v1075_v37 }
 0x12a   : > { %v1605_v50 = vpack.c.bf16 %v1058_v9, %v1057_v18  ;;  %v1645_v36 = vpack.c.bf16 %v1074_v21, %v1073_v39  ;;  %1673 = vst [vmem:[%s2037_s14 + $0x38] sm:$0xff] %v1610_v40  }
 0x12b   : > { %1681 = vst [vmem:[%s2037_s14 + $0x78] sm:$0xff] %v1650_v49  }
 0x12c   : > { %1672 = vst [vmem:[%s2037_s14 + $0x30] sm:$0xff] %v1605_v50   ;;  %1680 = vst [vmem:[%s2037_s14 + $0x70] sm:$0xff] %v1645_v36  }
 0x12d PF: > { %s14_s19 = sadd.s32 1, %s1872_s19   ;;  %s2159_s15 = smov %s1864_s17 }
 0x12e   : > { %p11_p7 = scmp.ge.s32.totalorder %s14_s19, 6   ;;  %s2160_s16 = smov %s1868_s18 }
 0x12f   : > { %s2161_s17 = smov %s2164_s20  ;;  %s2162_s18 = smov %s2168_s21 }
 0x130   :  { %13 = sbr.rel (!%p11_p7) target bundleno = 3 (0x3), region = 83 }

// kernel: _forward_impl.121
= control target key start
LH: loop header
LB: loop body
LE: loop exit
PB: predicated region body
PF: predicated region fallthrough
CT: control target
= control target key end

     0   :  { %s1595_s12 = smov 0   ;;  %s1597_s13 = smov 0   ;;  %s1723_s0 = inlined_call_operand.vmem [shape: bf16[2,128,384], index: 0, kind: input, shape index: {}]   ;;  %s1724_s1 = inlined_call_operand.vmem [shape: bf16[2,384,128], index: 1, kind: input, shape index: {}]   ;;  %s1725_s2 = inlined_call_operand.vmem [shape: f32[2,1,128], index: 2, kind: input, shape index: {}]   ;;  %s1726_s3 = inlined_call_operand.vmem [shape: bf16[2,128,128], index: 3, kind: output, shape index: {}]  }
   0x1   :  { %s1599_s14 = smov 0  }
   0x2 LB: > { %s39_s15 = sadd.s32 1, %s1569_s13  ;;  %p1222_p0 = scmp.ge.s32.totalorder %s1573_s14, 1  ;;  %s1573_s14 = sphi %s1599_s14, %s13_s14   ;;  %s1569_s13 = sphi %s1597_s13, %s1728_s13   ;;  %s1565_s12 = sphi %s1595_s12, %s1727_s12  }
   0x3   : > { %p41_p1 = scmp.ge.s32.totalorder %s39_s15, 2  ;;  %p217_p2 = scmp.lt.s32.totalorder %s1573_s14, 3 }
   0x5   : > { %s1730_s15 = smov (%p41_p1, %s39_s15), 0  ;;  %p218_p3 = pnand %p1222_p0, %p217_p2 }
   0x6   : > { %p277_p4 = scmp.lt.s32.totalorder (!%p218_p3), %s1565_s12, 1 }
   0x7   : > { %221 = sbr.rel (%p218_p3) target bundleno = 333 (0x14d), region = 32 }
   0xe   : > { %s1732_s12 = smov (!%p277_p4, %s1565_s12), 1 }
   0xf   : > { %s1470_s16 = smul.u32 192, %s1732_s12  ;;  %s309_s25 = scalar_lea.vmem %s1725_s2, %s1732_s12 }
  0x10   : > { %v1682_v55 = vld [vmem:[%s309_s25] ss:$0 sm:$0xff]  ;;  %s1294_s26 = sshll.u32 %s1732_s12, 6 }
  0x11   : > { %s1621_s19 = scalar_lea.vmem %s1724_s1, %s1470_s16  ;;  %s1649_s22 = scalar_lea.vmem %s1723_s0, %s1470_s16 }
  0x12   : > { %v1495_v0 = vld [vmem:[%s1621_s19 + $0x40] sm:$0xff]   ;;  %v1498_v3 = vld [vmem:[%s1621_s19 + $0x48] sm:$0xff]   ;;  %v1501_v6 = vld [vmem:[%s1621_s19 + $0x50] sm:$0xff]   ;;  %s1690_s29 = scalar_lea.vmem %s1726_s3, %s1294_s26 }
  0x13   : > { %v1496_v1 = vld [vmem:[%s1621_s19] sm:$0xff]   ;;  %1358 = vmatprep.subr.bf16.mxu0 %v1495_v0  ;;  %v1499_v4 = vld [vmem:[%s1621_s19 + $0x8] sm:$0xff]   ;;  %v1502_v7 = vld [vmem:[%s1621_s19 + $0x10] sm:$0xff]  }
  0x14   : > { %v1497_v2 = vld [vmem:[%s1621_s19 + $0x80] sm:$0xff]   ;;  %1359 = vmatpush3.bf16.msra.mxu0 %v1496_v1  ;;  %v1500_v5 = vld [vmem:[%s1621_s19 + $0x88] sm:$0xff]   ;;  %v1503_v8 = vld [vmem:[%s1621_s19 + $0x90] sm:$0xff]  }
  0x15   : > { %1438 = vmatprep.subr.bf16.mxu1 %v1497_v2  ;;  %1360 = vmatprep.subr.bf16.mxu0 %v1498_v3  ;;  %v1504_v9 = vld [vmem:[%s1621_s19 + $0x58] sm:$0xff]   ;;  %v1507_v12 = vld [vmem:[%s1621_s19 + $0x60] sm:$0xff]   ;;  %v1510_v15 = vld [vmem:[%s1621_s19 + $0x68] sm:$0xff]  }
  0x16   : > { %1439 = vmatpush3.bf16.msra.mxu1 %v1497_v2  ;;  %v1505_v10 = vld [vmem:[%s1621_s19 + $0x18] sm:$0xff]   ;;  %v1509_v13 = vld [vmem:[%s1621_s19 + $0xa0] sm:$0xff]   ;;  %v1512_v16 = vld [vmem:[%s1621_s19 + $0xa8] sm:$0xff]  }
  0x17   : > { %1440 = vmatprep.subr.bf16.mxu1 %v1500_v5  ;;  %v1506_v11 = vld [vmem:[%s1621_s19 + $0x98] sm:$0xff]   ;;  %v1508_v14 = vld [vmem:[%s1621_s19 + $0x20] sm:$0xff]   ;;  %v1511_v17 = vld [vmem:[%s1621_s19 + $0x28] sm:$0xff]  }
  0x18   : > { %1361 = vmatpush3.bf16.msra.mxu0 %v1499_v4  ;;  %v1513_v18 = vld [vmem:[%s1621_s19 + $0x70] sm:$0xff]   ;;  %v1516_v21 = vld [vmem:[%s1621_s19 + $0x78] sm:$0xff]   ;;  %v1519_v26 = vld [vmem:[%s1649_s22] ss:$12 sps:$4 sm:$0xff]  }
  0x19   : > { %1362 = vmatprep.subr.bf16.mxu0 %v1501_v6  ;;  %v1514_v19 = vld [vmem:[%s1621_s19 + $0x30] sm:$0xff]   ;;  %v1518_v22 = vld [vmem:[%s1621_s19 + $0xb8] sm:$0xff]   ;;  %v1523_v28 = vld [vmem:[%s1649_s22 + $0x20] ss:$12 sps:$4 sm:$0xff]  }
  0x1a   : > { %1441 = vmatpush3.bf16.msra.mxu1 %v1500_v5  ;;  %v1515_v20 = vld [vmem:[%s1621_s19 + $0xb0] sm:$0xff]   ;;  %v1517_v25 = vld [vmem:[%s1621_s19 + $0x38] sm:$0xff]   ;;  %v1539_v36 = vld [vmem:[%s1649_s22 + $0x80] ss:$12 sps:$4 sm:$0xff]  }
  0x1b   : > { %1442 = vmatprep.subr.bf16.mxu1 %v1503_v8  ;;  %v1521_v23 = vld [vmem:[%s1649_s22 + $0x4] ss:$12 sps:$4 sm:$0xff]   ;;  %v1522_v24 = vld [vmem:[%s1649_s22 + $0x8] ss:$12 sps:$4 sm:$0xff]   ;;  %v1532_v35 = vld [vmem:[%s1649_s22 + $0x4c] ss:$12 sps:$4 sm:$0xff]  }
  0x1c   : > { %1363 = vmatpush3.bf16.msra.mxu0 %v1502_v7  ;;  %744 = vmatprep.mubr.bf16.mxu0 %v1521_v23  ;;  %v1524_v27 = vld [vmem:[%s1649_s22 + $0x1c] ss:$12 sps:$4 sm:$0xff]   ;;  %v1530_v29 = vld [vmem:[%s1649_s22 + $0x38] ss:$12 sps:$4 sm:$0xff]   ;;  %v1527_v31 = vld [vmem:[%s1649_s22 + $0x34] ss:$12 sps:$4 sm:$0xff]  }
  0x1d   : > { %1364 = vmatprep.subr.bf16.mxu0 %v1504_v9  ;;  %1454 = vmatprep.mubr.bf16.mxu1 %v1522_v24  ;;  %v1526_v30 = vld [vmem:[%s1649_s22 + $0x18] ss:$12 sps:$4 sm:$0xff]   ;;  %v1531_v32 = vld [vmem:[%s1649_s22 + $0x50] ss:$12 sps:$4 sm:$0xff]   ;;  %v1538_v33 = vld [vmem:[%s1649_s22 + $0x68] ss:$12 sps:$4 sm:$0xff]  }
  0x1e   : > { %1443 = vmatpush3.bf16.msra.mxu1 %v1503_v8  ;;  %v1529_v34 = vld [vmem:[%s1649_s22 + $0x30] ss:$12 sps:$4 sm:$0xff]   ;;  %v1546_v37 = vld [vmem:[%s1649_s22 + $0x98] ss:$12 sps:$4 sm:$0xff]   ;;  %v1534_v38 = vld [vmem:[%s1649_s22 + $0x48] ss:$12 sps:$4 sm:$0xff]  }
  0x1f   : > { %1444 = vmatprep.subr.bf16.mxu1 %v1506_v11  ;;  %v1535_v39 = vld [vmem:[%s1649_s22 + $0x64] ss:$12 sps:$4 sm:$0xff]   ;;  %v1537_v41 = vld [vmem:[%s1649_s22 + $0x60] ss:$12 sps:$4 sm:$0xff]   ;;  %v1540_v42 = vld [vmem:[%s1649_s22 + $0x7c] ss:$12 sps:$4 sm:$0xff]  }
  0x20   : > { %1365 = vmatpush3.bf16.msra.mxu0 %v1505_v10  ;;  %v1547_v40 = vld [vmem:[%s1649_s22 + $0xb0] ss:$12 sps:$4 sm:$0xff]   ;;  %v1542_v43 = vld [vmem:[%s1649_s22 + $0x78] ss:$12 sps:$4 sm:$0xff]   ;;  %v1543_v44 = vld [vmem:[%s1649_s22 + $0x94] ss:$12 sps:$4 sm:$0xff]  }
  0x21   : > { %1366 = vmatprep.subr.bf16.mxu0 %v1507_v12  ;;  %v1545_v45 = vld [vmem:[%s1649_s22 + $0x90] ss:$12 sps:$4 sm:$0xff]   ;;  %v1548_v46 = vld [vmem:[%s1649_s22 + $0xac] ss:$12 sps:$4 sm:$0xff]   ;;  %v1550_v47 = vld [vmem:[%s1649_s22 + $0xa8] ss:$12 sps:$4 sm:$0xff]  }
  0x22   : > { %1445 = vmatpush3.bf16.msra.mxu1 %v1506_v11 }
  0x23   : > { %1446 = vmatprep.subr.bf16.mxu1 %v1509_v13 }
  0x24   : > { %1367 = vmatpush3.bf16.msra.mxu0 %v1508_v14 }
  0x25   : > { %1368 = vmatprep.subr.bf16.mxu0 %v1510_v15 }
  0x26   : > { %1447 = vmatpush3.bf16.msra.mxu1 %v1509_v13 }
  0x27   : > { %1448 = vmatprep.subr.bf16.mxu1 %v1512_v16 }
  0x28   : > { %1369 = vmatpush3.bf16.msra.mxu0 %v1511_v17 }
  0x29   : > { %1370 = vmatprep.subr.bf16.mxu0 %v1513_v18 }
  0x2a   : > { %1449 = vmatpush3.bf16.msra.mxu1 %v1512_v16 }
  0x2b   : > { %1450 = vmatprep.subr.bf16.mxu1 %v1515_v20 }
  0x2c   : > { %1371 = vmatpush3.bf16.msra.mxu0 %v1514_v19 }
  0x2d   : > { %1372 = vmatprep.subr.bf16.mxu0 %v1516_v21 }
  0x2e   : > { %1451 = vmatpush3.bf16.msra.mxu1 %v1515_v20 }
  0x2f   : > { %1452 = vmatprep.subr.bf16.mxu1 %v1518_v22 }
  0x30   : > { %1373 = vmatpush3.bf16.msra.mxu0 %v1517_v25 }
  0x32   : > { %1453 = vmatpush3.bf16.msra.mxu1 %v1518_v22 }
  0x33   : > { %745 = vmatmul.mubr.bf16.vlgmr.msra.gmra.mrb[0].mxu0 %v1519_v26 }
  0x34   : > { %752 = vmatprep.mubr.bf16.mxu0 %v1524_v27 }
  0x35   : > { %1455 = vmatmul.mubr.bf16.vlgmr.msra.gmra.mrb[0].mxu1 %v1523_v28 }
  0x36   : > { %1458 = vmatprep.mubr.bf16.mxu1 %v1530_v29 }
  0x3b   : > { %753 = vmatmul.mubr.bf16.gmra.mrb[4].mxu0 %v1526_v30 }
  0x3c   : > { %760 = vmatprep.mubr.bf16.mxu0 %v1527_v31 }
  0x3d   : > { %1459 = vmatmul.mubr.bf16.gmra.mrb[4].mxu1 %v1531_v32 }
  0x3e   : > { %1462 = vmatprep.mubr.bf16.mxu1 %v1538_v33 }
  0x43   : > { %761 = vmatmul.mubr.bf16.gmra.mrb[8].mxu0 %v1529_v34 }
  0x44   : > { %768 = vmatprep.mubr.bf16.mxu0 %v1532_v35 }
  0x45   : > { %1463 = vmatmul.mubr.bf16.gmra.mrb[8].mxu1 %v1539_v36 }
  0x46   : > { %1466 = vmatprep.mubr.bf16.mxu1 %v1546_v37 }
  0x4b   : > { %769 = vmatmul.mubr.bf16.gmra.mrb[12].mxu0 %v1534_v38 }
  0x4c   : > { %776 = vmatprep.mubr.bf16.mxu0 %v1535_v39 }
  0x4d   : > { %1467 = vmatmul.mubr.bf16.gmra.mrb[12].mxu1 %v1547_v40 }
  0x53   : > { %777 = vmatmul.mubr.bf16.gmra.mrb[16].mxu0 %v1537_v41 }
  0x54   : > { %784 = vmatprep.mubr.bf16.mxu0 %v1540_v42 }
  0x5b   : > { %785 = vmatmul.mubr.bf16.gmra.mrb[20].mxu0 %v1542_v43 }
  0x5c   : > { %792 = vmatprep.mubr.bf16.mxu0 %v1543_v44 }
  0x63   : > { %793 = vmatmul.mubr.bf16.gmra.mrb[24].mxu0 %v1545_v45 }
  0x64   : > { %800 = vmatprep.mubr.bf16.mxu0 %v1548_v46 }
  0x6b   : > { %801 = vmatmul.mubr.bf16.gmra.mrb[28].mxu0 %v1550_v47 }
 0x106   : > { %v1374_v48 = vpop.f32.mrb[0].mxu0 }
 0x107   : > { %v1375_v49 = vpop.f32.mrb[1].mxu0 }
 0x108   : > { %v1376_v50 = vadd.f32 %v1375_v49, %v1374_v48  ;;  %v1377_v51 = vpop.f32.mrb[2].mxu0  ;;  %v1456_v52 = vpop.f32.mrb[0].mxu1 }
 0x109   : > { %v1378_v53 = vpop.f32.mrb[3].mxu0  ;;  %v843_v54 = vpop.f32.mrb[1].mxu1 }
 0x10a   : > { %v1379_v56 = vadd.f32 %v1378_v53, %v1377_v51  ;;  %v844_v57 = vadd.f32 %v1376_v50, %v843_v54  ;;  %v1457_v58 = vpop.f32.mrb[2].mxu1 }
 0x10b   : > { %v846_v59 = vpop.f32.mrb[3].mxu1 }
 0x10c   : > { %v964_v60 = vadd.f32 %v1682_v55, %v844_v57  ;;  %v847_v61 = vadd.f32 %v1379_v56, %v846_v59 }
 0x10e   : > { %v965_v62 = vadd.f32 %v1682_v55, %v847_v61  ;;  %v1380_v63 = vpop.f32.mrb[4].mxu0  ;;  %v980_v1 = vmax.f32 %v964_v60, 0.0 }
 0x10f   : > { %v1381_v0 = vpop.f32.mrb[5].mxu0 }
 0x110   : > { %v981_v2 = vmax.f32 %v965_v62, 0.0  ;;  %v1382_v3 = vadd.f32 %v1381_v0, %v1380_v63  ;;  %v1383_v4 = vpop.f32.mrb[6].mxu0  ;;  %v1460_v5 = vpop.f32.mrb[4].mxu1 }
 0x111   : > { %v1384_v6 = vpop.f32.mrb[7].mxu0  ;;  %v859_v7 = vpop.f32.mrb[5].mxu1 }
 0x112   : > { %v1314_v8 = vpack.c.bf16 %v981_v2, %v980_v1  ;;  %v852_v9 = vadd.f32 %v1456_v52, %v1382_v3  ;;  %v1385_v10 = vadd.f32 %v1384_v6, %v1383_v4  ;;  %v1461_v11 = vpop.f32.mrb[6].mxu1 }
 0x113   : > { %v862_v12 = vpop.f32.mrb[7].mxu1 }
 0x114   : > { %1315 = vst [vmem:[%s1690_s29] sm:$0xff] %v1314_v8   ;;  %v966_v13 = vadd.f32 %v1682_v55, %v852_v9  ;;  %v855_v14 = vadd.f32 %v1457_v58, %v1385_v10 }
 0x116   : > { %v967_v15 = vadd.f32 %v1682_v55, %v855_v14  ;;  %v1386_v16 = vpop.f32.mrb[8].mxu0  ;;  %v982_v18 = vmax.f32 %v966_v13, 0.0 }
 0x117   : > { %v1387_v17 = vpop.f32.mrb[9].mxu0 }
 0x118   : > { %v983_v19 = vmax.f32 %v967_v15, 0.0  ;;  %v1388_v20 = vadd.f32 %v1387_v17, %v1386_v16  ;;  %v1389_v21 = vpop.f32.mrb[10].mxu0  ;;  %v1464_v22 = vpop.f32.mrb[8].mxu1 }
 0x119   : > { %v1390_v23 = vpop.f32.mrb[11].mxu0  ;;  %v875_v24 = vpop.f32.mrb[9].mxu1 }
 0x11a   : > { %v1319_v25 = vpack.c.bf16 %v983_v19, %v982_v18  ;;  %v1391_v26 = vadd.f32 %v1390_v23, %v1389_v21  ;;  %v860_v27 = vadd.f32 %v1388_v20, %v859_v7  ;;  %v1465_v28 = vpop.f32.mrb[10].mxu1 }
 0x11b   : > { %v878_v29 = vpop.f32.mrb[11].mxu1 }
 0x11c   : > { %1351 = vst [vmem:[%s1690_s29 + $0x8] sm:$0xff] %v1319_v25   ;;  %v968_v30 = vadd.f32 %v1682_v55, %v860_v27  ;;  %v863_v31 = vadd.f32 %v1391_v26, %v862_v12 }
 0x11e   : > { %v969_v32 = vadd.f32 %v1682_v55, %v863_v31  ;;  %v1392_v33 = vpop.f32.mrb[12].mxu0  ;;  %v984_v35 = vmax.f32 %v968_v30, 0.0 }
 0x11f   : > { %v1393_v34 = vpop.f32.mrb[13].mxu0 }
 0x120   : > { %v985_v36 = vmax.f32 %v969_v32, 0.0  ;;  %v1394_v37 = vadd.f32 %v1393_v34, %v1392_v33  ;;  %v1395_v38 = vpop.f32.mrb[14].mxu0  ;;  %v1468_v39 = vpop.f32.mrb[12].mxu1 }
 0x121   : > { %v1396_v40 = vpop.f32.mrb[15].mxu0  ;;  %v891_v41 = vpop.f32.mrb[13].mxu1 }
 0x122   : > { %v1324_v42 = vpack.c.bf16 %v985_v36, %v984_v35  ;;  %v868_v43 = vadd.f32 %v1460_v5, %v1394_v37  ;;  %v1397_v44 = vadd.f32 %v1396_v40, %v1395_v38  ;;  %v1469_v45 = vpop.f32.mrb[14].mxu1 }
 0x123   : > { %v894_v46 = vpop.f32.mrb[15].mxu1 }
 0x124   : > { %1352 = vst [vmem:[%s1690_s29 + $0x10] sm:$0xff] %v1324_v42   ;;  %v970_v47 = vadd.f32 %v1682_v55, %v868_v43  ;;  %v871_v48 = vadd.f32 %v1461_v11, %v1397_v44 }
 0x126   : > { %v971_v49 = vadd.f32 %v1682_v55, %v871_v48  ;;  %v1398_v50 = vpop.f32.mrb[16].mxu0  ;;  %v986_v52 = vmax.f32 %v970_v47, 0.0 }
 0x127   : > { %v1399_v51 = vpop.f32.mrb[17].mxu0 }
 0x128   : > { %v987_v53 = vmax.f32 %v971_v49, 0.0  ;;  %v1400_v54 = vadd.f32 %v1399_v51, %v1398_v50  ;;  %v1401_v56 = vpop.f32.mrb[18].mxu0 }
 0x129   : > { %v1402_v57 = vpop.f32.mrb[19].mxu0 }
 0x12a   : > { %v1329_v58 = vpack.c.bf16 %v987_v53, %v986_v52  ;;  %v1403_v59 = vadd.f32 %v1402_v57, %v1401_v56  ;;  %v876_v60 = vadd.f32 %v1400_v54, %v875_v24 }
 0x12c   : > { %1353 = vst [vmem:[%s1690_s29 + $0x18] sm:$0xff] %v1329_v58   ;;  %v972_v61 = vadd.f32 %v1682_v55, %v876_v60  ;;  %v879_v62 = vadd.f32 %v1403_v59, %v878_v29 }
 0x12e   : > { %v973_v63 = vadd.f32 %v1682_v55, %v879_v62  ;;  %v1404_v0 = vpop.f32.mrb[20].mxu0  ;;  %v988_v2 = vmax.f32 %v972_v61, 0.0 }
 0x12f   : > { %v1405_v1 = vpop.f32.mrb[21].mxu0 }
 0x130   : > { %v989_v3 = vmax.f32 %v973_v63, 0.0  ;;  %v1406_v4 = vadd.f32 %v1405_v1, %v1404_v0  ;;  %v1407_v5 = vpop.f32.mrb[22].mxu0 }
 0x131   : > { %v1408_v6 = vpop.f32.mrb[23].mxu0 }
 0x132   : > { %v1334_v7 = vpack.c.bf16 %v989_v3, %v988_v2  ;;  %v884_v8 = vadd.f32 %v1464_v22, %v1406_v4  ;;  %v1409_v9 = vadd.f32 %v1408_v6, %v1407_v5 }
 0x134   : > { %1354 = vst [vmem:[%s1690_s29 + $0x20] sm:$0xff] %v1334_v7   ;;  %v974_v10 = vadd.f32 %v1682_v55, %v884_v8  ;;  %v887_v11 = vadd.f32 %v1465_v28, %v1409_v9 }
 0x136   : > { %v975_v12 = vadd.f32 %v1682_v55, %v887_v11  ;;  %v1410_v13 = vpop.f32.mrb[24].mxu0  ;;  %v990_v15 = vmax.f32 %v974_v10, 0.0 }
 0x137   : > { %v1411_v14 = vpop.f32.mrb[25].mxu0 }
 0x138   : > { %v991_v16 = vmax.f32 %v975_v12, 0.0  ;;  %v1412_v17 = vadd.f32 %v1411_v14, %v1410_v13  ;;  %v1413_v18 = vpop.f32.mrb[26].mxu0 }
 0x139   : > { %v1414_v19 = vpop.f32.mrb[27].mxu0 }
 0x13a   : > { %v1339_v20 = vpack.c.bf16 %v991_v16, %v990_v15  ;;  %v1415_v21 = vadd.f32 %v1414_v19, %v1413_v18  ;;  %v892_v23 = vadd.f32 %v1412_v17, %v891_v41 }
 0x13c   : > { %1355 = vst [vmem:[%s1690_s29 + $0x28] sm:$0xff] %v1339_v20   ;;  %v976_v22 = vadd.f32 %v1682_v55, %v892_v23  ;;  %v895_v24 = vadd.f32 %v1415_v21, %v894_v46 }
 0x13e   : > { %v977_v25 = vadd.f32 %v1682_v55, %v895_v24  ;;  %v1416_v26 = vpop.f32.mrb[28].mxu0  ;;  %v992_v28 = vmax.f32 %v976_v22, 0.0 }
 0x13f   : > { %v1417_v27 = vpop.f32.mrb[29].mxu0 }
 0x140   : > { %v993_v29 = vmax.f32 %v977_v25, 0.0  ;;  %v1418_v30 = vadd.f32 %v1417_v27, %v1416_v26  ;;  %v1419_v31 = vpop.f32.mrb[30].mxu0 }
 0x141   : > { %v1420_v32 = vpop.f32.mrb[31].mxu0 }
 0x142   : > { %v1344_v33 = vpack.c.bf16 %v993_v29, %v992_v28  ;;  %v900_v34 = vadd.f32 %v1468_v39, %v1418_v30  ;;  %v1421_v35 = vadd.f32 %v1420_v32, %v1419_v31 }
 0x144   : > { %1356 = vst [vmem:[%s1690_s29 + $0x30] sm:$0xff] %v1344_v33   ;;  %v978_v36 = vadd.f32 %v1682_v55, %v900_v34  ;;  %v903_v37 = vadd.f32 %v1469_v45, %v1421_v35 }
 0x146   : > { %v979_v38 = vadd.f32 %v1682_v55, %v903_v37  ;;  %v994_v40 = vmax.f32 %v978_v36, 0.0 }
 0x148   : > { %v995_v41 = vmax.f32 %v979_v38, 0.0 }
 0x14a   : > { %v1349_v42 = vpack.c.bf16 %v995_v41, %v994_v40 }
 0x14c   : > { %1357 = vst [vmem:[%s1690_s29 + $0x38] sm:$0xff] %v1349_v42  }
 0x14d PF: > { %s13_s14 = sadd.s32 1, %s1573_s14   ;;  %s1727_s12 = smov %s1569_s13 }
 0x14e   : > { %p10_p5 = scmp.ge.s32.totalorder %s13_s14, 4   ;;  %s1728_s13 = smov %s1730_s15 }
 0x150   :  { %12 = sbr.rel (!%p10_p5) target bundleno = 2 (0x2), region = 76 }

// kernel: _forward_impl.122
= control target key start
LH: loop header
LB: loop body
LE: loop exit
PB: predicated region body
PF: predicated region fallthrough
CT: control target
= control target key end

     0   :  { %s1130_s12 = smov 0   ;;  %s1132_s13 = smov 0   ;;  %s1208_s0 = inlined_call_operand.vmem [shape: bf16[2,128,128], index: 0, kind: input, shape index: {}]   ;;  %s1209_s1 = inlined_call_operand.vmem [shape: bf16[2,128,128], index: 1, kind: input, shape index: {}]   ;;  %s1210_s2 = inlined_call_operand.vmem [shape: f32[2,1,128], index: 2, kind: input, shape index: {}]   ;;  %s1211_s3 = inlined_call_operand.vmem [shape: bf16[2,128,128], index: 3, kind: output, shape index: {}]  }
   0x1   :  { %s1134_s14 = smov 0  }
   0x2 LB: > { %s39_s15 = sadd.s32 1, %s1104_s13  ;;  %p874_p0 = scmp.ge.s32.totalorder %s1108_s14, 1  ;;  %s1108_s14 = sphi %s1134_s14, %s13_s14   ;;  %s1104_s13 = sphi %s1132_s13, %s1213_s13   ;;  %s1100_s12 = sphi %s1130_s12, %s1212_s12  }
   0x3   : > { %p41_p1 = scmp.ge.s32.totalorder %s39_s15, 2  ;;  %p214_p2 = scmp.lt.s32.totalorder %s1108_s14, 3 }
   0x5   : > { %s1215_s15 = smov (%p41_p1, %s39_s15), 0  ;;  %p215_p3 = pnand %p874_p0, %p214_p2 }
   0x6   : > { %p271_p4 = scmp.lt.s32.totalorder (!%p215_p3), %s1100_s12, 1 }
   0x7   : > { %218 = sbr.rel (%p215_p3) target bundleno = 278 (0x116), region = 32 }
   0xe   : > { %s1217_s12 = smov (!%p271_p4, %s1100_s12), 1 }
   0xf   : > { %s1151_s16 = sshll.u32 %s1217_s12, 6  ;;  %s301_s25 = scalar_lea.vmem %s1210_s2, %s1217_s12 }
  0x10   : > { %s1157_s19 = scalar_lea.vmem %s1209_s1, %s1151_s16  ;;  %s1166_s22 = scalar_lea.vmem %s1208_s0, %s1151_s16  ;;  %v897_v16 = vld [vmem:[%s301_s25] ss:$0 sm:$0xff] }
  0x11   : > { %v1070_v0 = vld [vmem:[%s1157_s19] sm:$0xff]   ;;  %v1071_v1 = vld [vmem:[%s1157_s19 + $0x8] sm:$0xff]   ;;  %v1072_v2 = vld [vmem:[%s1157_s19 + $0x10] sm:$0xff]   ;;  %s1189_s28 = scalar_lea.vmem %s1211_s3, %s1151_s16 }
  0x12   : > { %998 = vmatprep.subr.bf16.mxu0 %v1070_v0  ;;  %1030 = vmatprep.subr.bf16.mxu1 %v1070_v0  ;;  %v1073_v3 = vld [vmem:[%s1157_s19 + $0x18] sm:$0xff]   ;;  %v1078_v4 = vld [vmem:[%s1166_s22] sm:$0xff]   ;;  %v1075_v7 = vld [vmem:[%s1157_s19 + $0x28] sm:$0xff]  }
  0x13   : > { %999 = vmatpush3.bf16.msra.mxu0 %v1070_v0  ;;  %1038 = vmatpush3.bf16.msra.mxu1 %v1070_v0  ;;  %v1079_v5 = vld [vmem:[%s1166_s22 + $0x20] sm:$0xff]   ;;  %v1076_v8 = vld [vmem:[%s1157_s19 + $0x30] sm:$0xff]   ;;  %v1077_v9 = vld [vmem:[%s1157_s19 + $0x38] sm:$0xff]  }
  0x14   : > { %1000 = vmatprep.subr.bf16.mxu0 %v1071_v1  ;;  %1031 = vmatprep.subr.bf16.mxu1 %v1071_v1  ;;  %v1074_v6 = vld [vmem:[%s1157_s19 + $0x20] sm:$0xff]   ;;  %v1080_v10 = vld [vmem:[%s1166_s22 + $0x8] sm:$0xff]   ;;  %v1082_v12 = vld [vmem:[%s1166_s22 + $0x10] sm:$0xff]  }
  0x15   : > { %1014 = vmatprep.mubr.bf16.mxu0 %v1078_v4  ;;  %1022 = vmatprep.mubr.bf16.mxu1 %v1079_v5  ;;  %v1081_v11 = vld [vmem:[%s1166_s22 + $0x28] sm:$0xff]   ;;  %v1083_v13 = vld [vmem:[%s1166_s22 + $0x30] sm:$0xff]   ;;  %v1084_v14 = vld [vmem:[%s1166_s22 + $0x18] sm:$0xff]  }
  0x16   : > { %v1085_v15 = vld [vmem:[%s1166_s22 + $0x38] sm:$0xff]  }
  0x17   : > { %1001 = vmatpush3.bf16.msra.mxu0 %v1071_v1  ;;  %1039 = vmatpush3.bf16.msra.mxu1 %v1071_v1 }
  0x18   : > { %1002 = vmatprep.subr.bf16.mxu0 %v1072_v2  ;;  %1032 = vmatprep.subr.bf16.mxu1 %v1072_v2 }
  0x1b   : > { %1003 = vmatpush3.bf16.msra.mxu0 %v1072_v2  ;;  %1040 = vmatpush3.bf16.msra.mxu1 %v1072_v2 }
  0x1c   : > { %1004 = vmatprep.subr.bf16.mxu0 %v1073_v3  ;;  %1033 = vmatprep.subr.bf16.mxu1 %v1073_v3 }
  0x1f   : > { %1005 = vmatpush3.bf16.msra.mxu0 %v1073_v3  ;;  %1041 = vmatpush3.bf16.msra.mxu1 %v1073_v3 }
  0x20   : > { %1006 = vmatprep.subr.bf16.mxu0 %v1074_v6  ;;  %1034 = vmatprep.subr.bf16.mxu1 %v1074_v6 }
  0x23   : > { %1007 = vmatpush3.bf16.msra.mxu0 %v1074_v6  ;;  %1042 = vmatpush3.bf16.msra.mxu1 %v1074_v6 }
  0x24   : > { %1008 = vmatprep.subr.bf16.mxu0 %v1075_v7  ;;  %1035 = vmatprep.subr.bf16.mxu1 %v1075_v7 }
  0x27   : > { %1009 = vmatpush3.bf16.msra.mxu0 %v1075_v7  ;;  %1043 = vmatpush3.bf16.msra.mxu1 %v1075_v7 }
  0x28   : > { %1010 = vmatprep.subr.bf16.mxu0 %v1076_v8  ;;  %1036 = vmatprep.subr.bf16.mxu1 %v1076_v8 }
  0x2b   : > { %1011 = vmatpush3.bf16.msra.mxu0 %v1076_v8  ;;  %1044 = vmatpush3.bf16.msra.mxu1 %v1076_v8 }
  0x2c   : > { %1012 = vmatprep.subr.bf16.mxu0 %v1077_v9  ;;  %1037 = vmatprep.subr.bf16.mxu1 %v1077_v9 }
  0x2f   : > { %1013 = vmatpush3.bf16.msra.mxu0 %v1077_v9  ;;  %1045 = vmatpush3.bf16.msra.mxu1 %v1077_v9 }
  0x32   : > { %1015 = vmatmul.mubr.bf16.vlgmr.msra.gmra.mrb[0].mxu0 %v1080_v10  ;;  %1023 = vmatmul.mubr.bf16.vlgmr.msra.gmra.mrb[0].mxu1 %v1081_v11 }
  0x33   : > { %1018 = vmatprep.mubr.bf16.mxu0 %v1082_v12  ;;  %1026 = vmatprep.mubr.bf16.mxu1 %v1083_v13 }
  0x3a   : > { %1019 = vmatmul.mubr.bf16.gmra.mrb[4].mxu0 %v1084_v14  ;;  %1027 = vmatmul.mubr.bf16.gmra.mrb[4].mxu1 %v1085_v15 }
 0x105   : > { %v1016_v17 = vpop.f32.mrb[0].mxu0  ;;  %v1024_v18 = vpop.f32.mrb[0].mxu1 }
 0x106   : > { %v637_v19 = vadd.f32 %v1016_v17, %v897_v16  ;;  %v645_v20 = vadd.f32 %v1024_v18, %v897_v16  ;;  %v514_v21 = vpop.f32.mrb[1].mxu0  ;;  %v546_v22 = vpop.f32.mrb[1].mxu1 }
 0x107   : > { %v635_v23 = vadd.f32 %v897_v16, %v514_v21  ;;  %v643_v24 = vadd.f32 %v897_v16, %v546_v22  ;;  %v1017_v25 = vpop.f32.mrb[2].mxu0  ;;  %v1025_v26 = vpop.f32.mrb[2].mxu1 }
 0x108   : > { %v638_v27 = vadd.f32 %v1017_v25, %v897_v16  ;;  %v646_v28 = vadd.f32 %v1025_v26, %v897_v16  ;;  %v517_v29 = vpop.f32.mrb[3].mxu0  ;;  %v549_v30 = vpop.f32.mrb[3].mxu1 }
 0x109   : > { %v636_v31 = vadd.f32 %v897_v16, %v517_v29  ;;  %v644_v32 = vadd.f32 %v897_v16, %v549_v30 }
 0x10a   : > { %v943_v33 = vpack.c.bf16 %v638_v27, %v637_v19  ;;  %v963_v34 = vpack.c.bf16 %v646_v28, %v645_v20 }
 0x10b   : > { %v938_v35 = vpack.c.bf16 %v636_v31, %v635_v23  ;;  %v958_v36 = vpack.c.bf16 %v644_v32, %v643_v24 }
 0x10c   : > { %975 = vst [vmem:[%s1189_s28 + $0x8] sm:$0xff] %v943_v33   ;;  %979 = vst [vmem:[%s1189_s28 + $0x28] sm:$0xff] %v963_v34  }
 0x10d   : > { %939 = vst [vmem:[%s1189_s28] sm:$0xff] %v938_v35   ;;  %978 = vst [vmem:[%s1189_s28 + $0x20] sm:$0xff] %v958_v36   ;;  %v1020_v37 = vpop.f32.mrb[4].mxu0  ;;  %v1028_v38 = vpop.f32.mrb[4].mxu1 }
 0x10e   : > { %v641_v39 = vadd.f32 %v1020_v37, %v897_v16  ;;  %v649_v40 = vadd.f32 %v1028_v38, %v897_v16  ;;  %v530_v41 = vpop.f32.mrb[5].mxu0  ;;  %v562_v42 = vpop.f32.mrb[5].mxu1 }
 0x10f   : > { %v639_v43 = vadd.f32 %v897_v16, %v530_v41  ;;  %v647_v44 = vadd.f32 %v897_v16, %v562_v42  ;;  %v1021_v45 = vpop.f32.mrb[6].mxu0  ;;  %v1029_v46 = vpop.f32.mrb[6].mxu1 }
 0x110   : > { %v642_v47 = vadd.f32 %v1021_v45, %v897_v16  ;;  %v650_v48 = vadd.f32 %v1029_v46, %v897_v16  ;;  %v533_v49 = vpop.f32.mrb[7].mxu0  ;;  %v565_v50 = vpop.f32.mrb[7].mxu1 }
 0x111   : > { %v640_v51 = vadd.f32 %v897_v16, %v533_v49  ;;  %v648_v52 = vadd.f32 %v897_v16, %v565_v50 }
 0x112   : > { %v953_v53 = vpack.c.bf16 %v642_v47, %v641_v39  ;;  %v973_v54 = vpack.c.bf16 %v650_v48, %v649_v40 }
 0x113   : > { %v948_v55 = vpack.c.bf16 %v640_v51, %v639_v43  ;;  %v968_v56 = vpack.c.bf16 %v648_v52, %v647_v44 }
 0x114   : > { %977 = vst [vmem:[%s1189_s28 + $0x18] sm:$0xff] %v953_v53   ;;  %981 = vst [vmem:[%s1189_s28 + $0x38] sm:$0xff] %v973_v54  }
 0x115   : > { %976 = vst [vmem:[%s1189_s28 + $0x10] sm:$0xff] %v948_v55   ;;  %980 = vst [vmem:[%s1189_s28 + $0x30] sm:$0xff] %v968_v56  }
 0x116 PF: > { %s13_s14 = sadd.s32 1, %s1108_s14   ;;  %s1212_s12 = smov %s1104_s13 }
 0x117   : > { %p10_p5 = scmp.ge.s32.totalorder %s13_s14, 4   ;;  %s1213_s13 = smov %s1215_s15 }
 0x119   :  { %12 = sbr.rel (!%p10_p5) target bundleno = 2 (0x2), region = 76 }

// kernel: _forward_impl.123
= control target key start
LH: loop header
LB: loop body
LE: loop exit
PB: predicated region body
PF: predicated region fallthrough
CT: control target
= control target key end

     0   :  { %s1336_s15 = smov 0   ;;  %s1338_s16 = smov 0   ;;  %s1452_s0 = inlined_call_operand.vmem [shape: bf16[2,128,128], index: 0, kind: input, shape index: {}]   ;;  %s1453_s1 = inlined_call_operand.vmem [shape: bf16[2,128,128], index: 1, kind: input, shape index: {}]   ;;  %s1454_s2 = inlined_call_operand.vmem [shape: f32[2,1,128], index: 2, kind: input, shape index: {}]   ;;  %s1455_s3 = inlined_call_operand.vmem [shape: bf16[2,128,128], index: 3, kind: input, shape index: {}]   ;;  %s1456_s4 = inlined_call_operand.vmem [shape: bf16[2,128,128], index: 4, kind: output, shape index: {}]  }
   0x1   :  { %s1340_s17 = smov 0  }
   0x2 LB: > { %s40_s18 = sadd.s32 1, %s1305_s16  ;;  %p1033_p0 = scmp.ge.s32.totalorder %s1309_s17, 1  ;;  %s1309_s17 = sphi %s1340_s17, %s14_s17   ;;  %s1305_s16 = sphi %s1338_s16, %s1458_s16   ;;  %s1301_s15 = sphi %s1336_s15, %s1457_s15  }
   0x3   : > { %p42_p1 = scmp.ge.s32.totalorder %s40_s18, 2  ;;  %p261_p2 = scmp.lt.s32.totalorder %s1309_s17, 3 }
   0x5   : > { %s1460_s18 = smov (%p42_p1, %s40_s18), 0  ;;  %p262_p3 = pnand %p1033_p0, %p261_p2 }
   0x6   : > { %p332_p4 = scmp.lt.s32.totalorder (!%p262_p3), %s1301_s15, 1 }
   0x7   : > { %265 = sbr.rel (%p262_p3) target bundleno = 283 (0x11b), region = 36 }
   0xe   : > { %s1462_s15 = smov (!%p332_p4, %s1301_s15), 1 }
   0xf   : > { %s1357_s19 = sshll.u32 %s1462_s15, 6  ;;  %s362_s5 = scalar_lea.vmem %s1454_s2, %s1462_s15 }
  0x10   : > { %s1363_s22 = scalar_lea.vmem %s1453_s1, %s1357_s19  ;;  %s1372_s25 = scalar_lea.vmem %s1452_s0, %s1357_s19  ;;  %v1395_v20 = vld [vmem:[%s362_s5] ss:$0 sm:$0xff] }
  0x11   : > { %v1271_v0 = vld [vmem:[%s1363_s22] sm:$0xff]   ;;  %v1272_v1 = vld [vmem:[%s1363_s22 + $0x8] sm:$0xff]   ;;  %v1273_v2 = vld [vmem:[%s1363_s22 + $0x10] sm:$0xff]   ;;  %s374_s28 = scalar_lea.vmem %s1455_s3, %s1357_s19  ;;  %s1425_s8 = scalar_lea.vmem %s1456_s4, %s1357_s19 }
  0x12   : > { %1199 = vmatprep.subr.bf16.mxu0 %v1271_v0  ;;  %1231 = vmatprep.subr.bf16.mxu1 %v1271_v0  ;;  %v1274_v3 = vld [vmem:[%s1363_s22 + $0x18] sm:$0xff]   ;;  %v1279_v4 = vld [vmem:[%s1372_s25] sm:$0xff]   ;;  %v1276_v7 = vld [vmem:[%s1363_s22 + $0x28] sm:$0xff]  }
  0x13   : > { %1200 = vmatpush3.bf16.msra.mxu0 %v1271_v0  ;;  %1239 = vmatpush3.bf16.msra.mxu1 %v1271_v0  ;;  %v1280_v5 = vld [vmem:[%s1372_s25 + $0x20] sm:$0xff]   ;;  %v1277_v8 = vld [vmem:[%s1363_s22 + $0x30] sm:$0xff]   ;;  %v1278_v9 = vld [vmem:[%s1363_s22 + $0x38] sm:$0xff]  }
  0x14   : > { %1201 = vmatprep.subr.bf16.mxu0 %v1272_v1  ;;  %1232 = vmatprep.subr.bf16.mxu1 %v1272_v1  ;;  %v1275_v6 = vld [vmem:[%s1363_s22 + $0x20] sm:$0xff]   ;;  %v1281_v10 = vld [vmem:[%s1372_s25 + $0x8] sm:$0xff]   ;;  %v1283_v12 = vld [vmem:[%s1372_s25 + $0x10] sm:$0xff]  }
  0x15   : > { %1215 = vmatprep.mubr.bf16.mxu0 %v1279_v4  ;;  %1223 = vmatprep.mubr.bf16.mxu1 %v1280_v5  ;;  %v1282_v11 = vld [vmem:[%s1372_s25 + $0x28] sm:$0xff]   ;;  %v1284_v13 = vld [vmem:[%s1372_s25 + $0x30] sm:$0xff]   ;;  %v1285_v14 = vld [vmem:[%s1372_s25 + $0x18] sm:$0xff]  }
  0x16   : > { %v1286_v15 = vld [vmem:[%s1372_s25 + $0x38] sm:$0xff]   ;;  %v1169_v16 = vld [vmem:[%s374_s28 + $0x8] sm:$0xff]   ;;  %v1098_v18 = vld [vmem:[%s374_s28] sm:$0xff]  }
  0x17   : > { %1202 = vmatpush3.bf16.msra.mxu0 %v1272_v1  ;;  %1240 = vmatpush3.bf16.msra.mxu1 %v1272_v1  ;;  %v1173_v17 = vld [vmem:[%s374_s28 + $0x28] sm:$0xff]   ;;  %v1172_v19 = vld [vmem:[%s374_s28 + $0x20] sm:$0xff]   ;;  %v1397_v21 = vld [vmem:[%s374_s28 + $0x18] sm:$0xff]   ;;  %v1103_v23 = vunpack.c.l.bf16 %v1169_v16  ;;  %v1099_v25 = vunpack.c.l.bf16 %v1098_v18  ;;  %v1104_v31 = vunpack.c.h.bf16 %v1169_v16  ;;  %v1100_v33 = vunpack.c.h.bf16 %v1098_v18 }
  0x18   : > { %1203 = vmatprep.subr.bf16.mxu0 %v1273_v2  ;;  %1233 = vmatprep.subr.bf16.mxu1 %v1273_v2  ;;  %v1399_v22 = vld [vmem:[%s374_s28 + $0x38] sm:$0xff]   ;;  %v1119_v24 = vunpack.c.l.bf16 %v1173_v17  ;;  %v1115_v26 = vunpack.c.l.bf16 %v1172_v19  ;;  %v1401_v27 = vld [vmem:[%s374_s28 + $0x10] sm:$0xff]   ;;  %v1120_v32 = vunpack.c.h.bf16 %v1173_v17  ;;  %v1116_v34 = vunpack.c.h.bf16 %v1172_v19 }
  0x19   : > { %v1403_v28 = vld [vmem:[%s374_s28 + $0x30] sm:$0xff]   ;;  %v1111_v39 = vunpack.c.l.bf16 %v1397_v21  ;;  %v1127_v40 = vunpack.c.l.bf16 %v1399_v22  ;;  %v1107_v45 = vunpack.c.l.bf16 %v1401_v27  ;;  %v1112_v59 = vunpack.c.h.bf16 %v1397_v21 }
  0x1a   : > { %v1123_v46 = vunpack.c.l.bf16 %v1403_v28  ;;  %v1128_v60 = vunpack.c.h.bf16 %v1399_v22  ;;  %v1108_v63 = vunpack.c.h.bf16 %v1401_v27  ;;  %v1124_v0 = vunpack.c.h.bf16 %v1403_v28 }
  0x1b   : > { %1204 = vmatpush3.bf16.msra.mxu0 %v1273_v2  ;;  %1241 = vmatpush3.bf16.msra.mxu1 %v1273_v2 }
  0x1c   : > { %1205 = vmatprep.subr.bf16.mxu0 %v1274_v3  ;;  %1234 = vmatprep.subr.bf16.mxu1 %v1274_v3 }
  0x1f   : > { %1206 = vmatpush3.bf16.msra.mxu0 %v1274_v3  ;;  %1242 = vmatpush3.bf16.msra.mxu1 %v1274_v3 }
  0x20   : > { %1207 = vmatprep.subr.bf16.mxu0 %v1275_v6  ;;  %1235 = vmatprep.subr.bf16.mxu1 %v1275_v6 }
  0x23   : > { %1208 = vmatpush3.bf16.msra.mxu0 %v1275_v6  ;;  %1243 = vmatpush3.bf16.msra.mxu1 %v1275_v6 }
  0x24   : > { %1209 = vmatprep.subr.bf16.mxu0 %v1276_v7  ;;  %1236 = vmatprep.subr.bf16.mxu1 %v1276_v7 }
  0x27   : > { %1210 = vmatpush3.bf16.msra.mxu0 %v1276_v7  ;;  %1244 = vmatpush3.bf16.msra.mxu1 %v1276_v7 }
  0x28   : > { %1211 = vmatprep.subr.bf16.mxu0 %v1277_v8  ;;  %1237 = vmatprep.subr.bf16.mxu1 %v1277_v8 }
  0x2b   : > { %1212 = vmatpush3.bf16.msra.mxu0 %v1277_v8  ;;  %1245 = vmatpush3.bf16.msra.mxu1 %v1277_v8 }
  0x2c   : > { %1213 = vmatprep.subr.bf16.mxu0 %v1278_v9  ;;  %1238 = vmatprep.subr.bf16.mxu1 %v1278_v9 }
  0x2f   : > { %1214 = vmatpush3.bf16.msra.mxu0 %v1278_v9  ;;  %1246 = vmatpush3.bf16.msra.mxu1 %v1278_v9 }
  0x32   : > { %1216 = vmatmul.mubr.bf16.vlgmr.msra.gmra.mrb[0].mxu0 %v1281_v10  ;;  %1224 = vmatmul.mubr.bf16.vlgmr.msra.gmra.mrb[0].mxu1 %v1282_v11 }
  0x33   : > { %1219 = vmatprep.mubr.bf16.mxu0 %v1283_v12  ;;  %1227 = vmatprep.mubr.bf16.mxu1 %v1284_v13 }
  0x3a   : > { %1220 = vmatmul.mubr.bf16.gmra.mrb[4].mxu0 %v1285_v14  ;;  %1228 = vmatmul.mubr.bf16.gmra.mrb[4].mxu1 %v1286_v15 }
 0x105   : > { %v1217_v29 = vpop.f32.mrb[0].mxu0  ;;  %v1225_v30 = vpop.f32.mrb[0].mxu1 }
 0x106   : > { %v711_v35 = vadd.f32 %v1217_v29, %v1395_v20  ;;  %v719_v36 = vadd.f32 %v1225_v30, %v1395_v20  ;;  %v588_v37 = vpop.f32.mrb[1].mxu0  ;;  %v620_v38 = vpop.f32.mrb[1].mxu1 }
 0x107   : > { %v709_v41 = vadd.f32 %v1395_v20, %v588_v37  ;;  %v717_v42 = vadd.f32 %v1395_v20, %v620_v38  ;;  %v1218_v43 = vpop.f32.mrb[2].mxu0  ;;  %v1226_v44 = vpop.f32.mrb[2].mxu1 }
 0x108   : > { %v759_v47 = vadd.f32 %v1103_v23, %v711_v35  ;;  %v767_v48 = vadd.f32 %v1119_v24, %v719_v36  ;;  %v712_v49 = vadd.f32 %v1218_v43, %v1395_v20  ;;  %v720_v50 = vadd.f32 %v1226_v44, %v1395_v20  ;;  %v591_v51 = vpop.f32.mrb[3].mxu0  ;;  %v623_v52 = vpop.f32.mrb[3].mxu1 }
 0x109   : > { %v757_v53 = vadd.f32 %v1099_v25, %v709_v41  ;;  %v765_v54 = vadd.f32 %v1115_v26, %v717_v42  ;;  %v710_v55 = vadd.f32 %v1395_v20, %v591_v51  ;;  %v718_v56 = vadd.f32 %v1395_v20, %v623_v52 }
 0x10a   : > { %v760_v57 = vadd.f32 %v1104_v31, %v712_v49  ;;  %v768_v58 = vadd.f32 %v1120_v32, %v720_v50  ;;  %v775_v1 = vmax.f32 %v759_v47, 0.0  ;;  %v783_v2 = vmax.f32 %v767_v48, 0.0 }
 0x10b   : > { %v758_v61 = vadd.f32 %v1100_v33, %v710_v55  ;;  %v766_v62 = vadd.f32 %v1116_v34, %v718_v56  ;;  %v773_v5 = vmax.f32 %v757_v53, 0.0  ;;  %v781_v6 = vmax.f32 %v765_v54, 0.0 }
 0x10c   : > { %v776_v3 = vmax.f32 %v760_v57, 0.0  ;;  %v784_v4 = vmax.f32 %v768_v58, 0.0 }
 0x10d   : > { %v774_v7 = vmax.f32 %v758_v61, 0.0  ;;  %v782_v8 = vmax.f32 %v766_v62, 0.0  ;;  %v1221_v9 = vpop.f32.mrb[4].mxu0  ;;  %v1229_v10 = vpop.f32.mrb[4].mxu1 }
 0x10e   : > { %v1137_v11 = vpack.c.bf16 %v776_v3, %v775_v1  ;;  %v1157_v12 = vpack.c.bf16 %v784_v4, %v783_v2  ;;  %v715_v13 = vadd.f32 %v1221_v9, %v1395_v20  ;;  %v723_v14 = vadd.f32 %v1229_v10, %v1395_v20  ;;  %v604_v15 = vpop.f32.mrb[5].mxu0  ;;  %v636_v16 = vpop.f32.mrb[5].mxu1 }
 0x10f   : > { %v1132_v17 = vpack.c.bf16 %v774_v7, %v773_v5  ;;  %v1152_v18 = vpack.c.bf16 %v782_v8, %v781_v6  ;;  %v713_v19 = vadd.f32 %v1395_v20, %v604_v15  ;;  %v721_v21 = vadd.f32 %v1395_v20, %v636_v16  ;;  %v1222_v22 = vpop.f32.mrb[6].mxu0  ;;  %v1230_v23 = vpop.f32.mrb[6].mxu1 }
 0x110   : > { %1176 = vst [vmem:[%s1425_s8 + $0x8] sm:$0xff] %v1137_v11   ;;  %1180 = vst [vmem:[%s1425_s8 + $0x28] sm:$0xff] %v1157_v12   ;;  %v763_v24 = vadd.f32 %v1111_v39, %v715_v13  ;;  %v771_v25 = vadd.f32 %v1127_v40, %v723_v14  ;;  %v716_v26 = vadd.f32 %v1222_v22, %v1395_v20  ;;  %v607_v28 = vpop.f32.mrb[7].mxu0  ;;  %v639_v29 = vpop.f32.mrb[7].mxu1 }
 0x111   : > { %v724_v27 = vadd.f32 %v1230_v23, %v1395_v20  ;;  %1133 = vst [vmem:[%s1425_s8] sm:$0xff] %v1132_v17   ;;  %1179 = vst [vmem:[%s1425_s8 + $0x20] sm:$0xff] %v1152_v18   ;;  %v761_v30 = vadd.f32 %v1107_v45, %v713_v19  ;;  %v769_v31 = vadd.f32 %v1123_v46, %v721_v21 }
 0x112   : > { %v714_v32 = vadd.f32 %v1395_v20, %v607_v28  ;;  %v722_v33 = vadd.f32 %v1395_v20, %v639_v29  ;;  %v764_v34 = vadd.f32 %v1112_v59, %v716_v26  ;;  %v779_v38 = vmax.f32 %v763_v24, 0.0 }
 0x113   : > { %v772_v35 = vadd.f32 %v1128_v60, %v724_v27  ;;  %v787_v39 = vmax.f32 %v771_v25, 0.0  ;;  %v777_v42 = vmax.f32 %v761_v30, 0.0  ;;  %v785_v43 = vmax.f32 %v769_v31, 0.0 }
 0x114   : > { %v762_v36 = vadd.f32 %v1108_v63, %v714_v32  ;;  %v770_v37 = vadd.f32 %v1124_v0, %v722_v33  ;;  %v780_v40 = vmax.f32 %v764_v34, 0.0 }
 0x115   : > { %v788_v41 = vmax.f32 %v772_v35, 0.0 }
 0x116   : > { %v778_v44 = vmax.f32 %v762_v36, 0.0  ;;  %v786_v45 = vmax.f32 %v770_v37, 0.0  ;;  %v1147_v46 = vpack.c.bf16 %v780_v40, %v779_v38 }
 0x117   : > { %v1167_v47 = vpack.c.bf16 %v788_v41, %v787_v39 }
 0x118   : > { %v1142_v48 = vpack.c.bf16 %v778_v44, %v777_v42  ;;  %v1162_v20 = vpack.c.bf16 %v786_v45, %v785_v43  ;;  %1178 = vst [vmem:[%s1425_s8 + $0x18] sm:$0xff] %v1147_v46  }
 0x119   : > { %1182 = vst [vmem:[%s1425_s8 + $0x38] sm:$0xff] %v1167_v47  }
 0x11a   : > { %1177 = vst [vmem:[%s1425_s8 + $0x10] sm:$0xff] %v1142_v48   ;;  %1181 = vst [vmem:[%s1425_s8 + $0x30] sm:$0xff] %v1162_v20  }
 0x11b PF: > { %s14_s17 = sadd.s32 1, %s1309_s17   ;;  %s1457_s15 = smov %s1305_s16 }
 0x11c   : > { %p11_p5 = scmp.ge.s32.totalorder %s14_s17, 4   ;;  %s1458_s16 = smov %s1460_s18 }
 0x11e   :  { %13 = sbr.rel (!%p11_p5) target bundleno = 2 (0x2), region = 83 }

// kernel: _forward_impl.124
= control target key start
LH: loop header
LB: loop body
LE: loop exit
PB: predicated region body
PF: predicated region fallthrough
CT: control target
= control target key end

     0   :  { %s1146_s12 = smov 0   ;;  %s1148_s13 = smov 0   ;;  %s1224_s0 = inlined_call_operand.vmem [shape: bf16[2,128,128], index: 0, kind: input, shape index: {}]   ;;  %s1225_s1 = inlined_call_operand.vmem [shape: bf16[2,128,128], index: 1, kind: input, shape index: {}]   ;;  %s1226_s2 = inlined_call_operand.vmem [shape: f32[2,1,128], index: 2, kind: input, shape index: {}]   ;;  %s1227_s3 = inlined_call_operand.vmem [shape: bf16[2,128,128], index: 3, kind: output, shape index: {}]  }
   0x1   :  { %s1150_s14 = smov 0  }
   0x2 LB: > { %s39_s15 = sadd.s32 1, %s1120_s13  ;;  %p890_p0 = scmp.ge.s32.totalorder %s1124_s14, 1  ;;  %s1124_s14 = sphi %s1150_s14, %s13_s14   ;;  %s1120_s13 = sphi %s1148_s13, %s1229_s13   ;;  %s1116_s12 = sphi %s1146_s12, %s1228_s12  }
   0x3   : > { %p41_p1 = scmp.ge.s32.totalorder %s39_s15, 2  ;;  %p214_p2 = scmp.lt.s32.totalorder %s1124_s14, 3 }
   0x5   : > { %s1231_s15 = smov (%p41_p1, %s39_s15), 0  ;;  %p215_p3 = pnand %p890_p0, %p214_p2 }
   0x6   : > { %p271_p4 = scmp.lt.s32.totalorder (!%p215_p3), %s1116_s12, 1 }
   0x7   : > { %218 = sbr.rel (%p215_p3) target bundleno = 280 (0x118), region = 32 }
   0xe   : > { %s1233_s12 = smov (!%p271_p4, %s1116_s12), 1 }
   0xf   : > { %s1167_s16 = sshll.u32 %s1233_s12, 6  ;;  %s301_s25 = scalar_lea.vmem %s1226_s2, %s1233_s12 }
  0x10   : > { %s1173_s19 = scalar_lea.vmem %s1225_s1, %s1167_s16  ;;  %s1182_s22 = scalar_lea.vmem %s1224_s0, %s1167_s16  ;;  %v913_v16 = vld [vmem:[%s301_s25] ss:$0 sm:$0xff] }
  0x11   : > { %v1086_v0 = vld [vmem:[%s1173_s19] sm:$0xff]   ;;  %v1087_v1 = vld [vmem:[%s1173_s19 + $0x8] sm:$0xff]   ;;  %v1088_v2 = vld [vmem:[%s1173_s19 + $0x10] sm:$0xff]   ;;  %s1205_s28 = scalar_lea.vmem %s1227_s3, %s1167_s16 }
  0x12   : > { %1014 = vmatprep.subr.bf16.mxu0 %v1086_v0  ;;  %1046 = vmatprep.subr.bf16.mxu1 %v1086_v0  ;;  %v1089_v3 = vld [vmem:[%s1173_s19 + $0x18] sm:$0xff]   ;;  %v1094_v4 = vld [vmem:[%s1182_s22] sm:$0xff]   ;;  %v1091_v7 = vld [vmem:[%s1173_s19 + $0x28] sm:$0xff]  }
  0x13   : > { %1015 = vmatpush3.bf16.msra.mxu0 %v1086_v0  ;;  %1054 = vmatpush3.bf16.msra.mxu1 %v1086_v0  ;;  %v1095_v5 = vld [vmem:[%s1182_s22 + $0x20] sm:$0xff]   ;;  %v1092_v8 = vld [vmem:[%s1173_s19 + $0x30] sm:$0xff]   ;;  %v1093_v9 = vld [vmem:[%s1173_s19 + $0x38] sm:$0xff]  }
  0x14   : > { %1016 = vmatprep.subr.bf16.mxu0 %v1087_v1  ;;  %1047 = vmatprep.subr.bf16.mxu1 %v1087_v1  ;;  %v1090_v6 = vld [vmem:[%s1173_s19 + $0x20] sm:$0xff]   ;;  %v1096_v10 = vld [vmem:[%s1182_s22 + $0x8] sm:$0xff]   ;;  %v1098_v12 = vld [vmem:[%s1182_s22 + $0x10] sm:$0xff]  }
  0x15   : > { %1030 = vmatprep.mubr.bf16.mxu0 %v1094_v4  ;;  %1038 = vmatprep.mubr.bf16.mxu1 %v1095_v5  ;;  %v1097_v11 = vld [vmem:[%s1182_s22 + $0x28] sm:$0xff]   ;;  %v1099_v13 = vld [vmem:[%s1182_s22 + $0x30] sm:$0xff]   ;;  %v1100_v14 = vld [vmem:[%s1182_s22 + $0x18] sm:$0xff]  }
  0x16   : > { %v1101_v15 = vld [vmem:[%s1182_s22 + $0x38] sm:$0xff]  }
  0x17   : > { %1017 = vmatpush3.bf16.msra.mxu0 %v1087_v1  ;;  %1055 = vmatpush3.bf16.msra.mxu1 %v1087_v1 }
  0x18   : > { %1018 = vmatprep.subr.bf16.mxu0 %v1088_v2  ;;  %1048 = vmatprep.subr.bf16.mxu1 %v1088_v2 }
  0x1b   : > { %1019 = vmatpush3.bf16.msra.mxu0 %v1088_v2  ;;  %1056 = vmatpush3.bf16.msra.mxu1 %v1088_v2 }
  0x1c   : > { %1020 = vmatprep.subr.bf16.mxu0 %v1089_v3  ;;  %1049 = vmatprep.subr.bf16.mxu1 %v1089_v3 }
  0x1f   : > { %1021 = vmatpush3.bf16.msra.mxu0 %v1089_v3  ;;  %1057 = vmatpush3.bf16.msra.mxu1 %v1089_v3 }
  0x20   : > { %1022 = vmatprep.subr.bf16.mxu0 %v1090_v6  ;;  %1050 = vmatprep.subr.bf16.mxu1 %v1090_v6 }
  0x23   : > { %1023 = vmatpush3.bf16.msra.mxu0 %v1090_v6  ;;  %1058 = vmatpush3.bf16.msra.mxu1 %v1090_v6 }
  0x24   : > { %1024 = vmatprep.subr.bf16.mxu0 %v1091_v7  ;;  %1051 = vmatprep.subr.bf16.mxu1 %v1091_v7 }
  0x27   : > { %1025 = vmatpush3.bf16.msra.mxu0 %v1091_v7  ;;  %1059 = vmatpush3.bf16.msra.mxu1 %v1091_v7 }
  0x28   : > { %1026 = vmatprep.subr.bf16.mxu0 %v1092_v8  ;;  %1052 = vmatprep.subr.bf16.mxu1 %v1092_v8 }
  0x2b   : > { %1027 = vmatpush3.bf16.msra.mxu0 %v1092_v8  ;;  %1060 = vmatpush3.bf16.msra.mxu1 %v1092_v8 }
  0x2c   : > { %1028 = vmatprep.subr.bf16.mxu0 %v1093_v9  ;;  %1053 = vmatprep.subr.bf16.mxu1 %v1093_v9 }
  0x2f   : > { %1029 = vmatpush3.bf16.msra.mxu0 %v1093_v9  ;;  %1061 = vmatpush3.bf16.msra.mxu1 %v1093_v9 }
  0x32   : > { %1031 = vmatmul.mubr.bf16.vlgmr.msra.gmra.mrb[0].mxu0 %v1096_v10  ;;  %1039 = vmatmul.mubr.bf16.vlgmr.msra.gmra.mrb[0].mxu1 %v1097_v11 }
  0x33   : > { %1034 = vmatprep.mubr.bf16.mxu0 %v1098_v12  ;;  %1042 = vmatprep.mubr.bf16.mxu1 %v1099_v13 }
  0x3a   : > { %1035 = vmatmul.mubr.bf16.gmra.mrb[4].mxu0 %v1100_v14  ;;  %1043 = vmatmul.mubr.bf16.gmra.mrb[4].mxu1 %v1101_v15 }
 0x105   : > { %v1032_v17 = vpop.f32.mrb[0].mxu0  ;;  %v1040_v18 = vpop.f32.mrb[0].mxu1 }
 0x106   : > { %v637_v19 = vadd.f32 %v1032_v17, %v913_v16  ;;  %v645_v20 = vadd.f32 %v1040_v18, %v913_v16  ;;  %v514_v21 = vpop.f32.mrb[1].mxu0  ;;  %v546_v22 = vpop.f32.mrb[1].mxu1 }
 0x107   : > { %v635_v23 = vadd.f32 %v913_v16, %v514_v21  ;;  %v643_v24 = vadd.f32 %v913_v16, %v546_v22  ;;  %v1033_v25 = vpop.f32.mrb[2].mxu0  ;;  %v1041_v26 = vpop.f32.mrb[2].mxu1 }
 0x108   : > { %v638_v27 = vadd.f32 %v1033_v25, %v913_v16  ;;  %v646_v28 = vadd.f32 %v1041_v26, %v913_v16  ;;  %v517_v29 = vpop.f32.mrb[3].mxu0  ;;  %v549_v30 = vpop.f32.mrb[3].mxu1  ;;  %v653_v33 = vmax.f32 %v637_v19, 0.0  ;;  %v661_v34 = vmax.f32 %v645_v20, 0.0 }
 0x109   : > { %v636_v31 = vadd.f32 %v913_v16, %v517_v29  ;;  %v644_v32 = vadd.f32 %v913_v16, %v549_v30  ;;  %v651_v37 = vmax.f32 %v635_v23, 0.0  ;;  %v659_v38 = vmax.f32 %v643_v24, 0.0 }
 0x10a   : > { %v654_v35 = vmax.f32 %v638_v27, 0.0  ;;  %v662_v36 = vmax.f32 %v646_v28, 0.0 }
 0x10b   : > { %v652_v39 = vmax.f32 %v636_v31, 0.0  ;;  %v660_v40 = vmax.f32 %v644_v32, 0.0 }
 0x10c   : > { %v959_v41 = vpack.c.bf16 %v654_v35, %v653_v33  ;;  %v979_v42 = vpack.c.bf16 %v662_v36, %v661_v34 }
 0x10d   : > { %v954_v43 = vpack.c.bf16 %v652_v39, %v651_v37  ;;  %v974_v44 = vpack.c.bf16 %v660_v40, %v659_v38  ;;  %v1036_v45 = vpop.f32.mrb[4].mxu0  ;;  %v1044_v46 = vpop.f32.mrb[4].mxu1 }
 0x10e   : > { %991 = vst [vmem:[%s1205_s28 + $0x8] sm:$0xff] %v959_v41   ;;  %995 = vst [vmem:[%s1205_s28 + $0x28] sm:$0xff] %v979_v42   ;;  %v641_v47 = vadd.f32 %v1036_v45, %v913_v16  ;;  %v649_v48 = vadd.f32 %v1044_v46, %v913_v16  ;;  %v530_v49 = vpop.f32.mrb[5].mxu0  ;;  %v562_v50 = vpop.f32.mrb[5].mxu1 }
 0x10f   : > { %955 = vst [vmem:[%s1205_s28] sm:$0xff] %v954_v43   ;;  %994 = vst [vmem:[%s1205_s28 + $0x20] sm:$0xff] %v974_v44   ;;  %v639_v51 = vadd.f32 %v913_v16, %v530_v49  ;;  %v647_v52 = vadd.f32 %v913_v16, %v562_v50  ;;  %v1037_v53 = vpop.f32.mrb[6].mxu0  ;;  %v1045_v54 = vpop.f32.mrb[6].mxu1 }
 0x110   : > { %v642_v55 = vadd.f32 %v1037_v53, %v913_v16  ;;  %v650_v56 = vadd.f32 %v1045_v54, %v913_v16  ;;  %v533_v57 = vpop.f32.mrb[7].mxu0  ;;  %v565_v58 = vpop.f32.mrb[7].mxu1  ;;  %v657_v61 = vmax.f32 %v641_v47, 0.0  ;;  %v665_v62 = vmax.f32 %v649_v48, 0.0 }
 0x111   : > { %v640_v59 = vadd.f32 %v913_v16, %v533_v57  ;;  %v648_v60 = vadd.f32 %v913_v16, %v565_v58  ;;  %v655_v1 = vmax.f32 %v639_v51, 0.0  ;;  %v663_v2 = vmax.f32 %v647_v52, 0.0 }
 0x112   : > { %v658_v63 = vmax.f32 %v642_v55, 0.0  ;;  %v666_v0 = vmax.f32 %v650_v56, 0.0 }
 0x113   : > { %v656_v3 = vmax.f32 %v640_v59, 0.0  ;;  %v664_v4 = vmax.f32 %v648_v60, 0.0 }
 0x114   : > { %v969_v5 = vpack.c.bf16 %v658_v63, %v657_v61  ;;  %v989_v6 = vpack.c.bf16 %v666_v0, %v665_v62 }
 0x115   : > { %v964_v7 = vpack.c.bf16 %v656_v3, %v655_v1  ;;  %v984_v8 = vpack.c.bf16 %v664_v4, %v663_v2 }
 0x116   : > { %993 = vst [vmem:[%s1205_s28 + $0x18] sm:$0xff] %v969_v5   ;;  %997 = vst [vmem:[%s1205_s28 + $0x38] sm:$0xff] %v989_v6  }
 0x117   : > { %992 = vst [vmem:[%s1205_s28 + $0x10] sm:$0xff] %v964_v7   ;;  %996 = vst [vmem:[%s1205_s28 + $0x30] sm:$0xff] %v984_v8  }
 0x118 PF: > { %s13_s14 = sadd.s32 1, %s1124_s14   ;;  %s1228_s12 = smov %s1120_s13 }
 0x119   : > { %p10_p5 = scmp.ge.s32.totalorder %s13_s14, 4   ;;  %s1229_s13 = smov %s1231_s15 }
 0x11b   :  { %12 = sbr.rel (!%p10_p5) target bundleno = 2 (0x2), region = 76 }

// kernel: _forward_impl.134
= control target key start
LH: loop header
LB: loop body
LE: loop exit
PB: predicated region body
PF: predicated region fallthrough
CT: control target
= control target key end

     0   :  { %s1351_s12 = smov 0   ;;  %s1353_s13 = smov 0   ;;  %s1450_s0 = inlined_call_operand.vmem [shape: bf16[2,32,640], index: 0, kind: input, shape index: {}]   ;;  %s1451_s1 = inlined_call_operand.vmem [shape: bf16[2,640,128], index: 1, kind: input, shape index: {}]   ;;  %s1452_s2 = inlined_call_operand.vmem [shape: f32[2,1,128], index: 2, kind: input, shape index: {}]   ;;  %s1453_s3 = inlined_call_operand.vmem [shape: bf16[2,32,128], index: 3, kind: output, shape index: {}]  }
   0x1   :  { %s1355_s14 = smov 0  }
   0x2 LB: > { %s39_s15 = sadd.s32 1, %s1325_s13  ;;  %p1063_p0 = scmp.ge.s32.totalorder %s1329_s14, 1  ;;  %s1329_s14 = sphi %s1355_s14, %s13_s14   ;;  %s1325_s13 = sphi %s1353_s13, %s1455_s13   ;;  %s1321_s12 = sphi %s1351_s12, %s1454_s12  }
   0x3   : > { %p41_p1 = scmp.ge.s32.totalorder %s39_s15, 2  ;;  %p217_p2 = scmp.lt.s32.totalorder %s1329_s14, 3 }
   0x5   : > { %s1457_s15 = smov (%p41_p1, %s39_s15), 0  ;;  %p218_p3 = pnand %p1063_p0, %p217_p2 }
   0x6   : > { %p277_p4 = scmp.lt.s32.totalorder (!%p218_p3), %s1321_s12, 1 }
   0x7   : > { %221 = sbr.rel (%p218_p3) target bundleno = 308 (0x134), region = 32 }
   0xe   : > { %s1459_s12 = smov (!%p277_p4, %s1321_s12), 1 }
   0xf   : > { %s1228_s16 = smul.u32 320, %s1459_s12  ;;  %s309_s26 = scalar_lea.vmem %s1452_s2, %s1459_s12 }
  0x10   : > { %s1227_s20 = smul.u32 80, %s1459_s12  ;;  %s1125_s27 = sshll.u32 %s1459_s12, 4 }
  0x11   : > { %s1375_s19 = scalar_lea.vmem %s1451_s1, %s1228_s16  ;;  %s321_s30 = scalar_lea.vmem %s1453_s3, %s1125_s27 }
  0x12   : > { %v1253_v0 = vld [vmem:[%s1375_s19 + $0x40] sm:$0xff]   ;;  %v1257_v4 = vld [vmem:[%s1375_s19 + $0x48] sm:$0xff]   ;;  %v1261_v8 = vld [vmem:[%s1375_s19 + $0x50] sm:$0xff]   ;;  %s1411_s23 = scalar_lea.vmem %s1450_s0, %s1227_s20 }
  0x13   : > { %v1254_v1 = vld [vmem:[%s1375_s19 + $0xc0] sm:$0xff]   ;;  %1141 = vmatprep.subr.bf16.mxu0 %v1253_v0  ;;  %v1258_v5 = vld [vmem:[%s1375_s19 + $0xc8] sm:$0xff]   ;;  %v1262_v9 = vld [vmem:[%s1375_s19 + $0xd0] sm:$0xff]  }
  0x14   : > { %v1255_v2 = vld [vmem:[%s1375_s19] sm:$0xff]   ;;  %1169 = vmatprep.subr.bf16.mxu1 %v1254_v1  ;;  %v1259_v6 = vld [vmem:[%s1375_s19 + $0x8] sm:$0xff]   ;;  %v1263_v10 = vld [vmem:[%s1375_s19 + $0x10] sm:$0xff]  }
  0x15   : > { %v1256_v3 = vld [vmem:[%s1375_s19 + $0x80] sm:$0xff]   ;;  %1142 = vmatpush3.bf16.msra.mxu0 %v1255_v2  ;;  %v1260_v7 = vld [vmem:[%s1375_s19 + $0x88] sm:$0xff]   ;;  %v1264_v11 = vld [vmem:[%s1375_s19 + $0x90] sm:$0xff]  }
  0x16   : > { %1170 = vmatpush3.bf16.msra.mxu1 %v1256_v3  ;;  %1143 = vmatprep.subr.bf16.mxu0 %v1257_v4  ;;  %v1265_v12 = vld [vmem:[%s1375_s19 + $0x58] sm:$0xff]   ;;  %v1269_v16 = vld [vmem:[%s1375_s19 + $0x60] sm:$0xff]   ;;  %v1273_v20 = vld [vmem:[%s1375_s19 + $0x68] sm:$0xff]  }
  0x17   : > { %1171 = vmatprep.subr.bf16.mxu1 %v1258_v5  ;;  %v1266_v13 = vld [vmem:[%s1375_s19 + $0xd8] sm:$0xff]   ;;  %v1270_v17 = vld [vmem:[%s1375_s19 + $0xe0] sm:$0xff]   ;;  %v1274_v21 = vld [vmem:[%s1375_s19 + $0xe8] sm:$0xff]  }
  0x18   : > { %v1267_v14 = vld [vmem:[%s1375_s19 + $0x18] sm:$0xff]   ;;  %v1271_v18 = vld [vmem:[%s1375_s19 + $0x20] sm:$0xff]   ;;  %v1275_v22 = vld [vmem:[%s1375_s19 + $0x28] sm:$0xff]  }
  0x19   : > { %1144 = vmatpush3.bf16.msra.mxu0 %v1259_v6  ;;  %v1268_v15 = vld [vmem:[%s1375_s19 + $0x98] sm:$0xff]   ;;  %v1272_v19 = vld [vmem:[%s1375_s19 + $0xa0] sm:$0xff]   ;;  %v1276_v23 = vld [vmem:[%s1375_s19 + $0xa8] sm:$0xff]  }
  0x1a   : > { %1172 = vmatpush3.bf16.msra.mxu1 %v1260_v7  ;;  %1145 = vmatprep.subr.bf16.mxu0 %v1261_v8  ;;  %v1277_v24 = vld [vmem:[%s1375_s19 + $0x70] sm:$0xff]   ;;  %v1281_v28 = vld [vmem:[%s1375_s19 + $0x78] sm:$0xff]   ;;  %v1290_v35 = vld [vmem:[%s1411_s23 + $0xc] ss:$20 sps:$4 sm:$0xff]  }
  0x1b   : > { %1173 = vmatprep.subr.bf16.mxu1 %v1262_v9  ;;  %v1278_v25 = vld [vmem:[%s1375_s19 + $0xf0] sm:$0xff]   ;;  %v1282_v29 = vld [vmem:[%s1375_s19 + $0xf8] sm:$0xff]   ;;  %v1291_v36 = vld [vmem:[%s1375_s19 + $0x100] sm:$0xff]   ;;  %801 = vmatprep.mubr.bf16.mxu1 %v1290_v35 }
  0x1c   : > { %v1279_v26 = vld [vmem:[%s1375_s19 + $0x30] sm:$0xff]   ;;  %v1283_v30 = vld [vmem:[%s1375_s19 + $0x38] sm:$0xff]   ;;  %v1292_v37 = vld [vmem:[%s1375_s19 + $0x108] sm:$0xff]  }
  0x1d   : > { %1146 = vmatpush3.bf16.msra.mxu0 %v1263_v10  ;;  %v1280_v27 = vld [vmem:[%s1375_s19 + $0xb0] sm:$0xff]   ;;  %v1284_v31 = vld [vmem:[%s1375_s19 + $0xb8] sm:$0xff]   ;;  %v1296_v39 = vld [vmem:[%s1411_s23 + $0x2c] ss:$20 sps:$4 sm:$0xff]  }
  0x1e   : > { %1174 = vmatpush3.bf16.msra.mxu1 %v1264_v11  ;;  %1147 = vmatprep.subr.bf16.mxu0 %v1265_v12  ;;  %v1285_v32 = vld [vmem:[%s1411_s23] ss:$20 sps:$4 sm:$0xff]   ;;  %v1287_v33 = vld [vmem:[%s1411_s23 + $0x4] ss:$20 sps:$4 sm:$0xff]   ;;  %v1288_v34 = vld [vmem:[%s1411_s23 + $0x8] ss:$20 sps:$4 sm:$0xff]  }
  0x1f   : > { %1175 = vmatprep.subr.bf16.mxu1 %v1266_v13  ;;  %752 = vmatprep.mubr.bf16.mxu0 %v1287_v33  ;;  %v1293_v38 = vld [vmem:[%s1375_s19 + $0x110] sm:$0xff]   ;;  %v1294_v41 = vld [vmem:[%s1375_s19 + $0x118] sm:$0xff]   ;;  %v1295_v45 = vld [vmem:[%s1375_s19 + $0x120] sm:$0xff]  }
  0x20   : > { %v1298_v40 = vld [vmem:[%s1411_s23 + $0x34] ss:$20 sps:$4 sm:$0xff]   ;;  %v1302_v43 = vld [vmem:[%s1411_s23 + $0x30] ss:$20 sps:$4 sm:$0xff]   ;;  %v1304_v48 = vld [vmem:[%s1375_s19 + $0x138] sm:$0xff]  }
  0x21   : > { %1148 = vmatpush3.bf16.msra.mxu0 %v1267_v14  ;;  %v1301_v42 = vld [vmem:[%s1411_s23 + $0x28] ss:$20 sps:$4 sm:$0xff]   ;;  %v1305_v44 = vld [vmem:[%s1411_s23 + $0x10] ss:$20 sps:$4 sm:$0xff]   ;;  %v1306_v49 = vld [vmem:[%s1411_s23 + $0x38] ss:$20 sps:$4 sm:$0xff]  }
  0x22   : > { %1176 = vmatpush3.bf16.msra.mxu1 %v1268_v15  ;;  %1149 = vmatprep.subr.bf16.mxu0 %v1269_v16  ;;  %v1300_v46 = vld [vmem:[%s1375_s19 + $0x128] sm:$0xff]   ;;  %v1303_v47 = vld [vmem:[%s1375_s19 + $0x130] sm:$0xff]   ;;  %v1118_v15 = vld [vmem:[%s309_s26] ss:$0 sm:$0xff] }
  0x23   : > { %1177 = vmatprep.subr.bf16.mxu1 %v1270_v17 }
  0x25   : > { %1150 = vmatpush3.bf16.msra.mxu0 %v1271_v18 }
  0x26   : > { %1178 = vmatpush3.bf16.msra.mxu1 %v1272_v19  ;;  %1151 = vmatprep.subr.bf16.mxu0 %v1273_v20 }
  0x27   : > { %1179 = vmatprep.subr.bf16.mxu1 %v1274_v21 }
  0x29   : > { %1152 = vmatpush3.bf16.msra.mxu0 %v1275_v22 }
  0x2a   : > { %1180 = vmatpush3.bf16.msra.mxu1 %v1276_v23  ;;  %1153 = vmatprep.subr.bf16.mxu0 %v1277_v24 }
  0x2b   : > { %1181 = vmatprep.subr.bf16.mxu1 %v1278_v25 }
  0x2d   : > { %1154 = vmatpush3.bf16.msra.mxu0 %v1279_v26 }
  0x2e   : > { %1182 = vmatpush3.bf16.msra.mxu1 %v1280_v27  ;;  %1155 = vmatprep.subr.bf16.mxu0 %v1281_v28 }
  0x2f   : > { %1183 = vmatprep.subr.bf16.mxu1 %v1282_v29 }
  0x31   : > { %1156 = vmatpush3.bf16.msra.mxu0 %v1283_v30 }
  0x32   : > { %1184 = vmatpush3.bf16.msra.mxu1 %v1284_v31  ;;  %1207 = vmatprep.subr.bf16.mxu0 %v1291_v36 }
  0x34   : > { %753 = vmatmul.mubr.bf16.vlgmr.msra.gmra.mrb[0].mxu0 %v1285_v32 }
  0x35   : > { %802 = vmatmul.mubr.bf16.vlgmr.msra.gmra.mrb[0].mxu1 %v1288_v34  ;;  %1208 = vmatpush3.bf16.msra.mxu0 %v1291_v36 }
  0x36   : > { %1209 = vmatprep.subr.bf16.mxu0 %v1292_v37  ;;  %760 = vmatprep.mubr.bf16.mxu0 %v1296_v39 }
  0x37   : > { %809 = vmatprep.mubr.bf16.mxu1 %v1298_v40 }
  0x39   : > { %1210 = vmatpush3.bf16.msra.mxu0 %v1292_v37 }
  0x3a   : > { %1211 = vmatprep.subr.bf16.mxu0 %v1293_v38 }
  0x3c   : > { %761 = vmatmul.mubr.bf16.gmra.mrb[4].mxu0 %v1301_v42 }
  0x3d   : > { %810 = vmatmul.mubr.bf16.gmra.mrb[4].mxu1 %v1302_v43  ;;  %1212 = vmatpush3.bf16.msra.mxu0 %v1293_v38 }
  0x3e   : > { %1213 = vmatprep.subr.bf16.mxu0 %v1294_v41  ;;  %1223 = vmatprep.mubr.bf16.mxu0 %v1305_v44 }
  0x41   : > { %1214 = vmatpush3.bf16.msra.mxu0 %v1294_v41 }
  0x42   : > { %1215 = vmatprep.subr.bf16.mxu0 %v1295_v45 }
  0x45   : > { %1216 = vmatpush3.bf16.msra.mxu0 %v1295_v45 }
  0x46   : > { %1217 = vmatprep.subr.bf16.mxu0 %v1300_v46 }
  0x49   : > { %1218 = vmatpush3.bf16.msra.mxu0 %v1300_v46 }
  0x4a   : > { %1219 = vmatprep.subr.bf16.mxu0 %v1303_v47 }
  0x4d   : > { %1220 = vmatpush3.bf16.msra.mxu0 %v1303_v47 }
  0x4e   : > { %1221 = vmatprep.subr.bf16.mxu0 %v1304_v48 }
  0x51   : > { %1222 = vmatpush3.bf16.msra.mxu0 %v1304_v48 }
  0x54   : > { %1224 = vmatmul.mubr.bf16.vlgmr.msra.gmra.mrb[8].mxu0 %v1306_v49 }
 0x107   : > { %v1157_v50 = vpop.f32.mrb[0].mxu0 }
 0x108   : > { %v1185_v51 = vpop.f32.mrb[0].mxu1  ;;  %v1158_v52 = vpop.f32.mrb[1].mxu0 }
 0x109   : > { %v1159_v53 = vadd.f32 %v1158_v52, %v1157_v50  ;;  %v1186_v54 = vpop.f32.mrb[1].mxu1  ;;  %v1160_v55 = vpop.f32.mrb[2].mxu0 }
 0x10a   : > { %v1187_v56 = vadd.f32 %v1186_v54, %v1185_v51  ;;  %v1188_v57 = vpop.f32.mrb[2].mxu1  ;;  %v1161_v58 = vpop.f32.mrb[3].mxu0 }
 0x10b   : > { %v1162_v59 = vadd.f32 %v1161_v58, %v1160_v55  ;;  %v1189_v60 = vpop.f32.mrb[3].mxu1 }
 0x10c   : > { %v1190_v61 = vadd.f32 %v1189_v60, %v1188_v57  ;;  %v804_v62 = vadd.f32 %v1187_v56, %v1159_v53 }
 0x10e   : > { %v807_v63 = vadd.f32 %v1190_v61, %v1162_v59 }
 0x10f   : > { %v1163_v0 = vpop.f32.mrb[4].mxu0 }
 0x110   : > { %v1191_v1 = vpop.f32.mrb[4].mxu1  ;;  %v1164_v2 = vpop.f32.mrb[5].mxu0 }
 0x111   : > { %v1165_v3 = vadd.f32 %v1164_v2, %v1163_v0  ;;  %v1192_v4 = vpop.f32.mrb[5].mxu1  ;;  %v1166_v5 = vpop.f32.mrb[6].mxu0 }
 0x112   : > { %v1193_v6 = vadd.f32 %v1192_v4, %v1191_v1  ;;  %v1194_v7 = vpop.f32.mrb[6].mxu1  ;;  %v1167_v8 = vpop.f32.mrb[7].mxu0 }
 0x113   : > { %v1168_v9 = vadd.f32 %v1167_v8, %v1166_v5  ;;  %v1195_v10 = vpop.f32.mrb[7].mxu1 }
 0x114   : > { %v1196_v11 = vadd.f32 %v1195_v10, %v1194_v7  ;;  %v812_v12 = vadd.f32 %v1193_v6, %v1165_v3 }
 0x116   : > { %v815_v13 = vadd.f32 %v1196_v11, %v1168_v9 }
 0x127   : > { %v1225_v14 = vpop.f32.mrb[8].mxu0 }
 0x128   : > { %v861_v16 = vadd.f32 %v1225_v14, %v812_v12  ;;  %v852_v17 = vpop.f32.mrb[9].mxu0 }
 0x129   : > { %v853_v18 = vadd.f32 %v852_v17, %v804_v62  ;;  %v1226_v19 = vpop.f32.mrb[10].mxu0 }
 0x12a   : > { %v891_v20 = vadd.f32 %v1118_v15, %v861_v16  ;;  %v864_v21 = vadd.f32 %v1226_v19, %v815_v13  ;;  %v855_v22 = vpop.f32.mrb[11].mxu0 }
 0x12b   : > { %v889_v23 = vadd.f32 %v1118_v15, %v853_v18  ;;  %v856_v24 = vadd.f32 %v855_v22, %v807_v63 }
 0x12c   : > { %v892_v25 = vadd.f32 %v1118_v15, %v864_v21  ;;  %v895_v27 = vmax.f32 %v891_v20, 0.0 }
 0x12d   : > { %v890_v26 = vadd.f32 %v1118_v15, %v856_v24  ;;  %v893_v29 = vmax.f32 %v889_v23, 0.0 }
 0x12e   : > { %v896_v28 = vmax.f32 %v892_v25, 0.0 }
 0x12f   : > { %v894_v30 = vmax.f32 %v890_v26, 0.0 }
 0x130   : > { %v1138_v31 = vpack.c.bf16 %v896_v28, %v895_v27 }
 0x131   : > { %v1133_v32 = vpack.c.bf16 %v894_v30, %v893_v29 }
 0x132   : > { %1140 = vst [vmem:[%s321_s30 + $0x8] sm:$0xff] %v1138_v31  }
 0x133   : > { %1134 = vst [vmem:[%s321_s30] sm:$0xff] %v1133_v32  }
 0x134 PF: > { %s13_s14 = sadd.s32 1, %s1329_s14   ;;  %s1454_s12 = smov %s1325_s13 }
 0x135   : > { %p10_p5 = scmp.ge.s32.totalorder %s13_s14, 4   ;;  %s1455_s13 = smov %s1457_s15 }
 0x137   :  { %12 = sbr.rel (!%p10_p5) target bundleno = 2 (0x2), region = 76 }

// kernel: _forward_impl.135
= control target key start
LH: loop header
LB: loop body
LE: loop exit
PB: predicated region body
PF: predicated region fallthrough
CT: control target
= control target key end

     0   :  { %s906_s12 = smov 0   ;;  %s908_s13 = smov 0   ;;  %s973_s0 = inlined_call_operand.vmem [shape: bf16[2,32,128], index: 0, kind: input, shape index: {}]   ;;  %s974_s1 = inlined_call_operand.vmem [shape: bf16[2,128,256], index: 1, kind: input, shape index: {}]   ;;  %s975_s2 = inlined_call_operand.vmem [shape: f32[2,1,256], index: 2, kind: input, shape index: {}]   ;;  %s976_s3 = inlined_call_operand.vmem [shape: bf16[2,32,256], index: 3, kind: output, shape index: {}]  }
   0x1   :  { %s910_s14 = smov 0  }
   0x2 LB: > { %s39_s15 = sadd.s32 1, %s879_s13  ;;  %p755_p0 = scmp.ge.s32.totalorder %s883_s14, 1  ;;  %s883_s14 = sphi %s910_s14, %s13_s14   ;;  %s879_s13 = sphi %s908_s13, %s978_s13   ;;  %s875_s12 = sphi %s906_s12, %s977_s12  }
   0x3   : > { %p41_p1 = scmp.ge.s32.totalorder %s39_s15, 2  ;;  %p220_p2 = scmp.lt.s32.totalorder %s883_s14, 3 }
   0x5   : > { %s980_s15 = smov (%p41_p1, %s39_s15), 0  ;;  %p221_p3 = pnand %p755_p0, %p220_p2 }
   0x6   : > { %p283_p4 = scmp.lt.s32.totalorder (!%p221_p3), %s875_s12, 1  ;;  %v885_v0 = vmov (!%p221_p3), 0   ;;  %v551_v19 = vlaneseq (!%p221_p3) }
   0x7   : > { %224 = sbr.rel (%p221_p3) target bundleno = 270 (0x10e), region = 32  ;;  %501 = vmatprep.mubr.bf16.mxu0 (!%p221_p3), %v885_v0  ;;  %511 = vmatprep.mubr.bf16.mxu1 (!%p221_p3), %v885_v0 }
   0x8   : > { %v552_v20 = vshrl.u32 (!%p221_p3), %v551_v19, 7 }
   0xa   : > { %v553_v21 = vsub.s32 (!%p221_p3), 0, %v552_v20  ;;  %v557_v23 = vsub.s32 (!%p221_p3), 1, %v552_v20 }
   0xe   : > { %s982_s12 = smov (!%p283_p4, %s875_s12), 1 }
   0xf   : > { %s788_s16 = sshll.u32 %s982_s12, 7  ;;  %s787_s20 = sshll.u32 %s982_s12, 4 }
  0x10   : > { %s930_s19 = scalar_lea.vmem %s974_s1, %s788_s16  ;;  %s943_s23 = scalar_lea.vmem %s973_s0, %s787_s20 }
  0x11   : > { %v835_v1 = vld [vmem:[%s930_s19 + $0x4] ss:$8 sps:$4 sm:$0xff]   ;;  %v837_v2 = vld [vmem:[%s930_s19] ss:$8 sps:$4 sm:$0xff]   ;;  %v838_v3 = vld [vmem:[%s930_s19 + $0x14] ss:$8 sps:$4 sm:$0xff]  }
  0x12   : > { %469 = vmatprep.subr.bf16.mxu0 %v835_v1  ;;  %794 = vmatprep.subr.bf16.mxu1 %v835_v1  ;;  %v840_v4 = vld [vmem:[%s930_s19 + $0x10] ss:$8 sps:$4 sm:$0xff]   ;;  %v841_v5 = vld [vmem:[%s930_s19 + $0x24] ss:$8 sps:$4 sm:$0xff]   ;;  %v843_v6 = vld [vmem:[%s930_s19 + $0x20] ss:$8 sps:$4 sm:$0xff]  }
  0x13   : > { %470 = vmatpush1.bf16.msra.mxu0 %v837_v2  ;;  %802 = vmatpush1.bf16.msra.mxu1 %v837_v2  ;;  %v844_v7 = vld [vmem:[%s930_s19 + $0x34] ss:$8 sps:$4 sm:$0xff]   ;;  %v846_v8 = vld [vmem:[%s930_s19 + $0x30] ss:$8 sps:$4 sm:$0xff]   ;;  %v847_v9 = vld [vmem:[%s930_s19 + $0x44] ss:$8 sps:$4 sm:$0xff]  }
  0x14   : > { %471 = vmatprep.subr.bf16.mxu0 %v838_v3  ;;  %795 = vmatprep.subr.bf16.mxu1 %v838_v3  ;;  %v849_v10 = vld [vmem:[%s930_s19 + $0x40] ss:$8 sps:$4 sm:$0xff]   ;;  %v850_v11 = vld [vmem:[%s930_s19 + $0x54] ss:$8 sps:$4 sm:$0xff]   ;;  %v852_v12 = vld [vmem:[%s930_s19 + $0x50] ss:$8 sps:$4 sm:$0xff]  }
  0x15   : > { %v853_v13 = vld [vmem:[%s930_s19 + $0x64] ss:$8 sps:$4 sm:$0xff]   ;;  %v855_v14 = vld [vmem:[%s930_s19 + $0x60] ss:$8 sps:$4 sm:$0xff]   ;;  %v856_v15 = vld [vmem:[%s930_s19 + $0x74] ss:$8 sps:$4 sm:$0xff]  }
  0x16   : > { %v858_v16 = vld [vmem:[%s930_s19 + $0x70] ss:$8 sps:$4 sm:$0xff]   ;;  %v859_v17 = vld [vmem:[%s943_s23] sm:$0xff]   ;;  %v860_v18 = vld [vmem:[%s943_s23 + $0x8] sm:$0xff]   ;;  %s760_s24 = sshll.u32 %s982_s12, 1  ;;  %s789_s28 = sshll.u32 %s982_s12, 5 }
  0x17   : > { %472 = vmatpush1.bf16.msra.mxu0 %v840_v4  ;;  %803 = vmatpush1.bf16.msra.mxu1 %v840_v4  ;;  %s318_s27 = scalar_lea.vmem %s975_s2, %s760_s24  ;;  %s333_s4 = scalar_lea.vmem %s976_s3, %s789_s28 }
  0x18   : > { %473 = vmatprep.subr.bf16.mxu0 %v841_v5  ;;  %796 = vmatprep.subr.bf16.mxu1 %v841_v5  ;;  %v549_v22 = vld [vmem:[%s318_s27] sm:$0x3] }
  0x19   : > { %v554_v24 = vrot.slane %v549_v22, %v553_v21  ;;  %v558_v25 = vrot.slane %v549_v22, %v557_v23 }
  0x1b   : > { %474 = vmatpush1.bf16.msra.mxu0 %v843_v6  ;;  %804 = vmatpush1.bf16.msra.mxu1 %v843_v6 }
  0x1c   : > { %475 = vmatprep.subr.bf16.mxu0 %v844_v7  ;;  %797 = vmatprep.subr.bf16.mxu1 %v844_v7 }
  0x1f   : > { %476 = vmatpush1.bf16.msra.mxu0 %v846_v8  ;;  %805 = vmatpush1.bf16.msra.mxu1 %v846_v8 }
  0x20   : > { %477 = vmatprep.subr.bf16.mxu0 %v847_v9  ;;  %798 = vmatprep.subr.bf16.mxu1 %v847_v9 }
  0x23   : > { %478 = vmatpush1.bf16.msra.mxu0 %v849_v10  ;;  %806 = vmatpush1.bf16.msra.mxu1 %v849_v10 }
  0x24   : > { %479 = vmatprep.subr.bf16.mxu0 %v850_v11  ;;  %799 = vmatprep.subr.bf16.mxu1 %v850_v11 }
  0x27   : > { %480 = vmatpush1.bf16.msra.mxu0 %v852_v12  ;;  %807 = vmatpush1.bf16.msra.mxu1 %v852_v12 }
  0x28   : > { %481 = vmatprep.subr.bf16.mxu0 %v853_v13  ;;  %800 = vmatprep.subr.bf16.mxu1 %v853_v13 }
  0x2b   : > { %482 = vmatpush1.bf16.msra.mxu0 %v855_v14  ;;  %808 = vmatpush1.bf16.msra.mxu1 %v855_v14 }
  0x2c   : > { %483 = vmatprep.subr.bf16.mxu0 %v856_v15  ;;  %801 = vmatprep.subr.bf16.mxu1 %v856_v15 }
  0x2f   : > { %484 = vmatpush1.bf16.msra.mxu0 %v858_v16  ;;  %809 = vmatpush1.bf16.msra.mxu1 %v858_v16 }
  0x32   : > { %502 = vmatmul.mubr.bf16.vlgmr.msra.gmra.mrb[0].mxu0 %v859_v17  ;;  %512 = vmatmul.mubr.bf16.vlgmr.msra.gmra.mrb[0].mxu1 %v860_v18 }
 0x105   : > { %v503_v26 = vpop.f32.mrb[0].mxu0  ;;  %v513_v27 = vpop.f32.mrb[0].mxu1 }
 0x106   : > { %v561_v28 = vadd.f32 %v554_v24, %v503_v26  ;;  %v565_v29 = vadd.f32 %v554_v24, %v513_v27  ;;  %v505_v30 = vpop.f32.mrb[1].mxu0  ;;  %v515_v31 = vpop.f32.mrb[1].mxu1 }
 0x107   : > { %v562_v32 = vadd.f32 %v558_v25, %v505_v30  ;;  %v566_v33 = vadd.f32 %v558_v25, %v515_v31  ;;  %v507_v34 = vpop.f32.mrb[2].mxu0  ;;  %v517_v35 = vpop.f32.mrb[2].mxu1 }
 0x108   : > { %v563_v36 = vadd.f32 %v554_v24, %v507_v34  ;;  %v567_v37 = vadd.f32 %v554_v24, %v517_v35  ;;  %v509_v38 = vpop.f32.mrb[3].mxu0  ;;  %v519_v39 = vpop.f32.mrb[3].mxu1 }
 0x109   : > { %v790_v40 = vpack.c.bf16 %v562_v32, %v561_v28  ;;  %v792_v41 = vpack.c.bf16 %v566_v33, %v565_v29  ;;  %v564_v42 = vadd.f32 %v558_v25, %v509_v38  ;;  %v568_v43 = vadd.f32 %v558_v25, %v519_v39 }
 0x10b   : > { %593 = vst [vmem:[%s333_s4] sm:$0xff] %v790_v40  ;;  %595 = vst [vmem:[%s333_s4 + $0x10] sm:$0xff] %v792_v41  ;;  %v791_v44 = vpack.c.bf16 %v564_v42, %v563_v36  ;;  %v793_v45 = vpack.c.bf16 %v568_v43, %v567_v37 }
 0x10d   : > { %594 = vst [vmem:[%s333_s4 + $0x8] sm:$0xff] %v791_v44  ;;  %596 = vst [vmem:[%s333_s4 + $0x18] sm:$0xff] %v793_v45 }
 0x10e PF: > { %s13_s14 = sadd.s32 1, %s883_s14   ;;  %s977_s12 = smov %s879_s13 }
 0x10f   : > { %p10_p5 = scmp.ge.s32.totalorder %s13_s14, 4   ;;  %s978_s13 = smov %s980_s15 }
 0x111   :  { %12 = sbr.rel (!%p10_p5) target bundleno = 2 (0x2), region = 76 }

// kernel: _forward_impl.136
= control target key start
LH: loop header
LB: loop body
LE: loop exit
PB: predicated region body
PF: predicated region fallthrough
CT: control target
= control target key end

     0   :  { %s1048_s15 = smov 0   ;;  %s1050_s16 = smov 0   ;;  %s1122_s0 = inlined_call_operand.vmem [shape: bf16[2,32,128], index: 0, kind: input, shape index: {}]   ;;  %s1123_s1 = inlined_call_operand.vmem [shape: bf16[2,128,256], index: 1, kind: input, shape index: {}]   ;;  %s1124_s2 = inlined_call_operand.vmem [shape: f32[2,1,256], index: 2, kind: input, shape index: {}]   ;;  %s1125_s3 = inlined_call_operand.vmem [shape: bf16[2,32,256], index: 3, kind: input, shape index: {}]   ;;  %s1126_s4 = inlined_call_operand.vmem [shape: bf16[2,32,256], index: 4, kind: output, shape index: {}]  }
   0x1   :  { %s1052_s17 = smov 0  }
   0x2 LB: > { %s40_s18 = sadd.s32 1, %s1016_s16  ;;  %p889_p0 = scmp.ge.s32.totalorder %s1020_s17, 1  ;;  %s1020_s17 = sphi %s1052_s17, %s14_s17   ;;  %s1016_s16 = sphi %s1050_s16, %s1128_s16   ;;  %s1012_s15 = sphi %s1048_s15, %s1127_s15  }
   0x3   : > { %p42_p1 = scmp.ge.s32.totalorder %s40_s18, 2  ;;  %p270_p2 = scmp.lt.s32.totalorder %s1020_s17, 3 }
   0x5   : > { %s1130_s18 = smov (%p42_p1, %s40_s18), 0  ;;  %p271_p3 = pnand %p889_p0, %p270_p2 }
   0x6   : > { %p349_p4 = scmp.lt.s32.totalorder (!%p271_p3), %s1012_s15, 1  ;;  %v1022_v0 = vmov (!%p271_p3), 0   ;;  %v633_v19 = vlaneseq (!%p271_p3) }
   0x7   : > { %274 = sbr.rel (%p271_p3) target bundleno = 274 (0x112), region = 36  ;;  %583 = vmatprep.mubr.bf16.mxu0 (!%p271_p3), %v1022_v0  ;;  %593 = vmatprep.mubr.bf16.mxu1 (!%p271_p3), %v1022_v0 }
   0x8   : > { %v634_v20 = vshrl.u32 (!%p271_p3), %v633_v19, 7 }
   0xa   : > { %v635_v21 = vsub.s32 (!%p271_p3), 0, %v634_v20  ;;  %v639_v23 = vsub.s32 (!%p271_p3), 1, %v634_v20 }
   0xe   : > { %s1132_s15 = smov (!%p349_p4, %s1012_s15), 1 }
   0xf   : > { %s924_s19 = sshll.u32 %s1132_s15, 7  ;;  %s923_s23 = sshll.u32 %s1132_s15, 4 }
  0x10   : > { %s1072_s22 = scalar_lea.vmem %s1123_s1, %s924_s19  ;;  %s1085_s26 = scalar_lea.vmem %s1122_s0, %s923_s23 }
  0x11   : > { %v972_v1 = vld [vmem:[%s1072_s22 + $0x4] ss:$8 sps:$4 sm:$0xff]   ;;  %v974_v2 = vld [vmem:[%s1072_s22] ss:$8 sps:$4 sm:$0xff]   ;;  %v975_v3 = vld [vmem:[%s1072_s22 + $0x14] ss:$8 sps:$4 sm:$0xff]  }
  0x12   : > { %551 = vmatprep.subr.bf16.mxu0 %v972_v1  ;;  %931 = vmatprep.subr.bf16.mxu1 %v972_v1  ;;  %v977_v4 = vld [vmem:[%s1072_s22 + $0x10] ss:$8 sps:$4 sm:$0xff]   ;;  %v978_v5 = vld [vmem:[%s1072_s22 + $0x24] ss:$8 sps:$4 sm:$0xff]   ;;  %v980_v6 = vld [vmem:[%s1072_s22 + $0x20] ss:$8 sps:$4 sm:$0xff]  }
  0x13   : > { %552 = vmatpush1.bf16.msra.mxu0 %v974_v2  ;;  %939 = vmatpush1.bf16.msra.mxu1 %v974_v2  ;;  %v981_v7 = vld [vmem:[%s1072_s22 + $0x34] ss:$8 sps:$4 sm:$0xff]   ;;  %v983_v8 = vld [vmem:[%s1072_s22 + $0x30] ss:$8 sps:$4 sm:$0xff]   ;;  %v984_v9 = vld [vmem:[%s1072_s22 + $0x44] ss:$8 sps:$4 sm:$0xff]  }
  0x14   : > { %553 = vmatprep.subr.bf16.mxu0 %v975_v3  ;;  %932 = vmatprep.subr.bf16.mxu1 %v975_v3  ;;  %v986_v10 = vld [vmem:[%s1072_s22 + $0x40] ss:$8 sps:$4 sm:$0xff]   ;;  %v987_v11 = vld [vmem:[%s1072_s22 + $0x54] ss:$8 sps:$4 sm:$0xff]   ;;  %v989_v12 = vld [vmem:[%s1072_s22 + $0x50] ss:$8 sps:$4 sm:$0xff]  }
  0x15   : > { %v990_v13 = vld [vmem:[%s1072_s22 + $0x64] ss:$8 sps:$4 sm:$0xff]   ;;  %v992_v14 = vld [vmem:[%s1072_s22 + $0x60] ss:$8 sps:$4 sm:$0xff]   ;;  %v993_v15 = vld [vmem:[%s1072_s22 + $0x74] ss:$8 sps:$4 sm:$0xff]  }
  0x16   : > { %v995_v16 = vld [vmem:[%s1072_s22 + $0x70] ss:$8 sps:$4 sm:$0xff]   ;;  %v996_v17 = vld [vmem:[%s1085_s26] sm:$0xff]   ;;  %v997_v18 = vld [vmem:[%s1085_s26 + $0x8] sm:$0xff]   ;;  %s894_s27 = sshll.u32 %s1132_s15, 1  ;;  %s925_s28 = sshll.u32 %s1132_s15, 5 }
  0x17   : > { %554 = vmatpush1.bf16.msra.mxu0 %v977_v4  ;;  %940 = vmatpush1.bf16.msra.mxu1 %v977_v4  ;;  %s384_s5 = scalar_lea.vmem %s1124_s2, %s894_s27  ;;  %s399_s8 = scalar_lea.vmem %s1125_s3, %s925_s28 }
  0x18   : > { %555 = vmatprep.subr.bf16.mxu0 %v978_v5  ;;  %933 = vmatprep.subr.bf16.mxu1 %v978_v5  ;;  %v631_v22 = vld [vmem:[%s384_s5] sm:$0x3]  ;;  %v653_v25 = vld [vmem:[%s399_s8 + $0x10] sm:$0xff]  ;;  %v652_v28 = vld [vmem:[%s399_s8 + $0x8] sm:$0xff]  ;;  %s415_s11 = scalar_lea.vmem %s1126_s4, %s925_s28 }
  0x19   : > { %v651_v24 = vld [vmem:[%s399_s8] sm:$0xff]  ;;  %v636_v26 = vrot.slane %v631_v22, %v635_v21  ;;  %v640_v27 = vrot.slane %v631_v22, %v639_v23  ;;  %v654_v29 = vld [vmem:[%s399_s8 + $0x18] sm:$0xff]  ;;  %v659_v31 = vunpack.c.l.bf16 %v653_v25  ;;  %v660_v35 = vunpack.c.h.bf16 %v653_v25 }
  0x1a   : > { %v655_v30 = vunpack.c.l.bf16 %v651_v24  ;;  %v656_v34 = vunpack.c.h.bf16 %v651_v24  ;;  %v657_v40 = vunpack.c.l.bf16 %v652_v28  ;;  %v661_v41 = vunpack.c.l.bf16 %v654_v29 }
  0x1b   : > { %556 = vmatpush1.bf16.msra.mxu0 %v980_v6  ;;  %941 = vmatpush1.bf16.msra.mxu1 %v980_v6  ;;  %v658_v46 = vunpack.c.h.bf16 %v652_v28  ;;  %v662_v47 = vunpack.c.h.bf16 %v654_v29 }
  0x1c   : > { %557 = vmatprep.subr.bf16.mxu0 %v981_v7  ;;  %934 = vmatprep.subr.bf16.mxu1 %v981_v7 }
  0x1f   : > { %558 = vmatpush1.bf16.msra.mxu0 %v983_v8  ;;  %942 = vmatpush1.bf16.msra.mxu1 %v983_v8 }
  0x20   : > { %559 = vmatprep.subr.bf16.mxu0 %v984_v9  ;;  %935 = vmatprep.subr.bf16.mxu1 %v984_v9 }
  0x23   : > { %560 = vmatpush1.bf16.msra.mxu0 %v986_v10  ;;  %943 = vmatpush1.bf16.msra.mxu1 %v986_v10 }
  0x24   : > { %561 = vmatprep.subr.bf16.mxu0 %v987_v11  ;;  %936 = vmatprep.subr.bf16.mxu1 %v987_v11 }
  0x27   : > { %562 = vmatpush1.bf16.msra.mxu0 %v989_v12  ;;  %944 = vmatpush1.bf16.msra.mxu1 %v989_v12 }
  0x28   : > { %563 = vmatprep.subr.bf16.mxu0 %v990_v13  ;;  %937 = vmatprep.subr.bf16.mxu1 %v990_v13 }
  0x2b   : > { %564 = vmatpush1.bf16.msra.mxu0 %v992_v14  ;;  %945 = vmatpush1.bf16.msra.mxu1 %v992_v14 }
  0x2c   : > { %565 = vmatprep.subr.bf16.mxu0 %v993_v15  ;;  %938 = vmatprep.subr.bf16.mxu1 %v993_v15 }
  0x2f   : > { %566 = vmatpush1.bf16.msra.mxu0 %v995_v16  ;;  %946 = vmatpush1.bf16.msra.mxu1 %v995_v16 }
  0x32   : > { %584 = vmatmul.mubr.bf16.vlgmr.msra.gmra.mrb[0].mxu0 %v996_v17  ;;  %594 = vmatmul.mubr.bf16.vlgmr.msra.gmra.mrb[0].mxu1 %v997_v18 }
 0x105   : > { %v585_v32 = vpop.f32.mrb[0].mxu0  ;;  %v595_v33 = vpop.f32.mrb[0].mxu1 }
 0x106   : > { %v643_v36 = vadd.f32 %v636_v26, %v585_v32  ;;  %v647_v37 = vadd.f32 %v636_v26, %v595_v33  ;;  %v587_v38 = vpop.f32.mrb[1].mxu0  ;;  %v597_v39 = vpop.f32.mrb[1].mxu1 }
 0x107   : > { %v644_v42 = vadd.f32 %v640_v27, %v587_v38  ;;  %v648_v43 = vadd.f32 %v640_v27, %v597_v39  ;;  %v589_v44 = vpop.f32.mrb[2].mxu0  ;;  %v599_v45 = vpop.f32.mrb[2].mxu1 }
 0x108   : > { %v663_v48 = vadd.f32 %v655_v30, %v643_v36  ;;  %v667_v49 = vadd.f32 %v659_v31, %v647_v37  ;;  %v645_v50 = vadd.f32 %v636_v26, %v589_v44  ;;  %v649_v51 = vadd.f32 %v636_v26, %v599_v45  ;;  %v591_v52 = vpop.f32.mrb[3].mxu0  ;;  %v601_v53 = vpop.f32.mrb[3].mxu1 }
 0x109   : > { %v664_v54 = vadd.f32 %v656_v34, %v644_v42  ;;  %v668_v55 = vadd.f32 %v660_v35, %v648_v43  ;;  %v646_v56 = vadd.f32 %v640_v27, %v591_v52  ;;  %v650_v57 = vadd.f32 %v640_v27, %v601_v53 }
 0x10a   : > { %v671_v58 = vmax.f32 %v663_v48, 0.0  ;;  %v675_v59 = vmax.f32 %v667_v49, 0.0  ;;  %v665_v60 = vadd.f32 %v657_v40, %v645_v50  ;;  %v669_v61 = vadd.f32 %v661_v41, %v649_v51 }
 0x10b   : > { %v672_v62 = vmax.f32 %v664_v54, 0.0  ;;  %v676_v63 = vmax.f32 %v668_v55, 0.0  ;;  %v666_v0 = vadd.f32 %v658_v46, %v646_v56  ;;  %v670_v1 = vadd.f32 %v662_v47, %v650_v57 }
 0x10c   : > { %v673_v2 = vmax.f32 %v665_v60, 0.0  ;;  %v677_v3 = vmax.f32 %v669_v61, 0.0 }
 0x10d   : > { %v927_v4 = vpack.c.bf16 %v672_v62, %v671_v58  ;;  %v929_v5 = vpack.c.bf16 %v676_v63, %v675_v59  ;;  %v674_v6 = vmax.f32 %v666_v0, 0.0  ;;  %v678_v7 = vmax.f32 %v670_v1, 0.0 }
 0x10f   : > { %703 = vst [vmem:[%s415_s11] sm:$0xff] %v927_v4  ;;  %705 = vst [vmem:[%s415_s11 + $0x10] sm:$0xff] %v929_v5  ;;  %v928_v8 = vpack.c.bf16 %v674_v6, %v673_v2  ;;  %v930_v9 = vpack.c.bf16 %v678_v7, %v677_v3 }
 0x111   : > { %704 = vst [vmem:[%s415_s11 + $0x8] sm:$0xff] %v928_v8  ;;  %706 = vst [vmem:[%s415_s11 + $0x18] sm:$0xff] %v930_v9 }
 0x112 PF: > { %s14_s17 = sadd.s32 1, %s1020_s17   ;;  %s1127_s15 = smov %s1016_s16 }
 0x113   : > { %p11_p5 = scmp.ge.s32.totalorder %s14_s17, 4   ;;  %s1128_s16 = smov %s1130_s18 }
 0x115   :  { %13 = sbr.rel (!%p11_p5) target bundleno = 2 (0x2), region = 83 }

// kernel: _forward_impl.137
= control target key start
LH: loop header
LB: loop body
LE: loop exit
PB: predicated region body
PF: predicated region fallthrough
CT: control target
= control target key end

     0   :  { %s919_s12 = smov 0   ;;  %s921_s13 = smov 0   ;;  %s982_s0 = inlined_call_operand.vmem [shape: bf16[2,32,256], index: 0, kind: input, shape index: {}]   ;;  %s983_s1 = inlined_call_operand.vmem [shape: bf16[2,256,128], index: 1, kind: input, shape index: {}]   ;;  %s984_s2 = inlined_call_operand.vmem [shape: f32[2,1,128], index: 2, kind: input, shape index: {}]   ;;  %s985_s3 = inlined_call_operand.vmem [shape: bf16[2,32,128], index: 3, kind: output, shape index: {}]  }
   0x1   :  { %s923_s14 = smov 0  }
   0x2 LB: > { %s39_s15 = sadd.s32 1, %s893_s13  ;;  %p733_p0 = scmp.ge.s32.totalorder %s897_s14, 1  ;;  %s897_s14 = sphi %s923_s14, %s13_s14   ;;  %s893_s13 = sphi %s921_s13, %s987_s13   ;;  %s889_s12 = sphi %s919_s12, %s986_s12  }
   0x3   : > { %p41_p1 = scmp.ge.s32.totalorder %s39_s15, 2  ;;  %p217_p2 = scmp.lt.s32.totalorder %s897_s14, 3 }
   0x5   : > { %s989_s15 = smov (%p41_p1, %s39_s15), 0  ;;  %p218_p3 = pnand %p733_p0, %p217_p2 }
   0x6   : > { %p277_p4 = scmp.lt.s32.totalorder (!%p218_p3), %s889_s12, 1 }
   0x7   : > { %221 = sbr.rel (%p218_p3) target bundleno = 274 (0x112), region = 32 }
   0xe   : > { %s991_s12 = smov (!%p277_p4, %s889_s12), 1 }
   0xf   : > { %s768_s16 = sshll.u32 %s991_s12, 7  ;;  %s767_s20 = sshll.u32 %s991_s12, 5 }
  0x10   : > { %s943_s19 = scalar_lea.vmem %s983_s1, %s768_s16  ;;  %s288_s23 = scalar_lea.vmem %s982_s0, %s767_s20 }
  0x11   : > { %v853_v0 = vld [vmem:[%s943_s19 + $0x40] sm:$0xff]   ;;  %v855_v2 = vld [vmem:[%s943_s19 + $0x48] sm:$0xff]   ;;  %v857_v4 = vld [vmem:[%s943_s19 + $0x50] sm:$0xff]   ;;  %s309_s26 = scalar_lea.vmem %s984_s2, %s991_s12  ;;  %s769_s27 = sshll.u32 %s991_s12, 4 }
  0x12   : > { %v854_v1 = vld [vmem:[%s943_s19] sm:$0xff]   ;;  %785 = vmatprep.subr.bf16.mxu0 %v853_v0  ;;  %813 = vmatprep.subr.bf16.mxu1 %v853_v0  ;;  %v856_v3 = vld [vmem:[%s943_s19 + $0x8] sm:$0xff]   ;;  %v858_v5 = vld [vmem:[%s943_s19 + $0x10] sm:$0xff]   ;;  %s321_s30 = scalar_lea.vmem %s985_s3, %s769_s27 }
  0x13   : > { %786 = vmatpush3.bf16.msra.mxu0 %v854_v1  ;;  %821 = vmatpush3.bf16.msra.mxu1 %v854_v1  ;;  %v859_v6 = vld [vmem:[%s943_s19 + $0x58] sm:$0xff]   ;;  %v861_v8 = vld [vmem:[%s943_s19 + $0x60] sm:$0xff]   ;;  %v863_v10 = vld [vmem:[%s943_s19 + $0x68] sm:$0xff]  }
  0x14   : > { %787 = vmatprep.subr.bf16.mxu0 %v855_v2  ;;  %814 = vmatprep.subr.bf16.mxu1 %v855_v2  ;;  %v860_v7 = vld [vmem:[%s943_s19 + $0x18] sm:$0xff]   ;;  %v862_v9 = vld [vmem:[%s943_s19 + $0x20] sm:$0xff]   ;;  %v864_v13 = vld [vmem:[%s943_s19 + $0x28] sm:$0xff]  }
  0x15   : > { %v871_v11 = vld [vmem:[%s288_s23 + $0x4] ss:$8 sps:$4 sm:$0xff]   ;;  %v874_v12 = vld [vmem:[%s288_s23 + $0x14] ss:$8 sps:$4 sm:$0xff]   ;;  %v869_v18 = vld [vmem:[%s288_s23] ss:$8 sps:$4 sm:$0xff]  }
  0x16   : > { %v865_v14 = vld [vmem:[%s943_s19 + $0x70] sm:$0xff]   ;;  %520 = vmatprep.mubr.bf16.mxu0 %v871_v11  ;;  %528 = vmatprep.mubr.bf16.mxu1 %v874_v12  ;;  %v867_v16 = vld [vmem:[%s943_s19 + $0x78] sm:$0xff]   ;;  %v760_v23 = vld [vmem:[%s309_s26] ss:$0 sm:$0xff] }
  0x17   : > { %788 = vmatpush3.bf16.msra.mxu0 %v856_v3  ;;  %822 = vmatpush3.bf16.msra.mxu1 %v856_v3  ;;  %v866_v15 = vld [vmem:[%s943_s19 + $0x30] sm:$0xff]   ;;  %v868_v17 = vld [vmem:[%s943_s19 + $0x38] sm:$0xff]  }
  0x18   : > { %789 = vmatprep.subr.bf16.mxu0 %v857_v4  ;;  %815 = vmatprep.subr.bf16.mxu1 %v857_v4  ;;  %v872_v19 = vld [vmem:[%s288_s23 + $0x10] ss:$8 sps:$4 sm:$0xff]  }
  0x1b   : > { %790 = vmatpush3.bf16.msra.mxu0 %v858_v5  ;;  %823 = vmatpush3.bf16.msra.mxu1 %v858_v5 }
  0x1c   : > { %791 = vmatprep.subr.bf16.mxu0 %v859_v6  ;;  %816 = vmatprep.subr.bf16.mxu1 %v859_v6 }
  0x1f   : > { %792 = vmatpush3.bf16.msra.mxu0 %v860_v7  ;;  %824 = vmatpush3.bf16.msra.mxu1 %v860_v7 }
  0x20   : > { %793 = vmatprep.subr.bf16.mxu0 %v861_v8  ;;  %817 = vmatprep.subr.bf16.mxu1 %v861_v8 }
  0x23   : > { %794 = vmatpush3.bf16.msra.mxu0 %v862_v9  ;;  %825 = vmatpush3.bf16.msra.mxu1 %v862_v9 }
  0x24   : > { %795 = vmatprep.subr.bf16.mxu0 %v863_v10  ;;  %818 = vmatprep.subr.bf16.mxu1 %v863_v10 }
  0x27   : > { %796 = vmatpush3.bf16.msra.mxu0 %v864_v13  ;;  %826 = vmatpush3.bf16.msra.mxu1 %v864_v13 }
  0x28   : > { %797 = vmatprep.subr.bf16.mxu0 %v865_v14  ;;  %819 = vmatprep.subr.bf16.mxu1 %v865_v14 }
  0x2b   : > { %798 = vmatpush3.bf16.msra.mxu0 %v866_v15  ;;  %827 = vmatpush3.bf16.msra.mxu1 %v866_v15 }
  0x2c   : > { %799 = vmatprep.subr.bf16.mxu0 %v867_v16  ;;  %820 = vmatprep.subr.bf16.mxu1 %v867_v16 }
  0x2f   : > { %800 = vmatpush3.bf16.msra.mxu0 %v868_v17  ;;  %828 = vmatpush3.bf16.msra.mxu1 %v868_v17 }
  0x32   : > { %521 = vmatmul.mubr.bf16.vlgmr.msra.gmra.mrb[0].mxu0 %v869_v18  ;;  %529 = vmatmul.mubr.bf16.vlgmr.msra.gmra.mrb[0].mxu1 %v872_v19 }
 0x105   : > { %v801_v20 = vpop.f32.mrb[0].mxu0  ;;  %v807_v21 = vpop.f32.mrb[0].mxu1 }
 0x106   : > { %v802_v22 = vpop.f32.mrb[1].mxu0  ;;  %v808_v24 = vpop.f32.mrb[1].mxu1 }
 0x107   : > { %v803_v25 = vadd.f32 %v802_v22, %v801_v20  ;;  %v809_v26 = vadd.f32 %v808_v24, %v807_v21  ;;  %v804_v27 = vpop.f32.mrb[2].mxu0  ;;  %v810_v28 = vpop.f32.mrb[2].mxu1 }
 0x108   : > { %v805_v29 = vpop.f32.mrb[3].mxu0  ;;  %v811_v30 = vpop.f32.mrb[3].mxu1 }
 0x109   : > { %v559_v31 = vadd.f32 %v803_v25, %v760_v23  ;;  %v561_v32 = vadd.f32 %v809_v26, %v760_v23  ;;  %v806_v33 = vadd.f32 %v805_v29, %v804_v27  ;;  %v812_v34 = vadd.f32 %v811_v30, %v810_v28 }
 0x10b   : > { %v560_v35 = vadd.f32 %v806_v33, %v760_v23  ;;  %v562_v36 = vadd.f32 %v812_v34, %v760_v23  ;;  %v563_v37 = vmax.f32 %v559_v31, 0.0  ;;  %v565_v38 = vmax.f32 %v561_v32, 0.0 }
 0x10d   : > { %v564_v39 = vmax.f32 %v560_v35, 0.0  ;;  %v566_v40 = vmax.f32 %v562_v36, 0.0 }
 0x10f   : > { %v777_v41 = vpack.c.bf16 %v564_v39, %v563_v37  ;;  %v782_v42 = vpack.c.bf16 %v566_v40, %v565_v38 }
 0x111   : > { %778 = vst [vmem:[%s321_s30] sm:$0xff] %v777_v41   ;;  %784 = vst [vmem:[%s321_s30 + $0x8] sm:$0xff] %v782_v42  }
 0x112 PF: > { %s13_s14 = sadd.s32 1, %s897_s14   ;;  %s986_s12 = smov %s893_s13 }
 0x113   : > { %p10_p5 = scmp.ge.s32.totalorder %s13_s14, 4   ;;  %s987_s13 = smov %s989_s15 }
 0x115   :  { %12 = sbr.rel (!%p10_p5) target bundleno = 2 (0x2), region = 76 }

// kernel: _forward_impl.205
= control target key start
LH: loop header
LB: loop body
LE: loop exit
PB: predicated region body
PF: predicated region fallthrough
CT: control target
= control target key end

     0   :  { %s1346_s12 = smov 0   ;;  %s1348_s13 = smov 0   ;;  %s1461_s0 = inlined_call_operand.vmem [shape: bf16[2,16,256], index: 0, kind: input, shape index: {}]   ;;  %s1462_s1 = inlined_call_operand.vmem [shape: bf16[2,256,512], index: 1, kind: input, shape index: {}]   ;;  %s1463_s2 = inlined_call_operand.vmem [shape: f32[2,1,512], index: 2, kind: input, shape index: {}]   ;;  %s1464_s3 = inlined_call_operand.vmem [shape: bf16[2,16,512], index: 3, kind: output, shape index: {}]  }
   0x1   :  { %s1350_s14 = smov 0  }
   0x2 LB: > { %s39_s15 = sadd.s32 1, %s1320_s13  ;;  %p1092_p0 = scmp.ge.s32.totalorder %s1324_s14, 1  ;;  %s1324_s14 = sphi %s1350_s14, %s13_s14   ;;  %s1320_s13 = sphi %s1348_s13, %s1466_s13   ;;  %s1316_s12 = sphi %s1346_s12, %s1465_s12  }
   0x3   : > { %p41_p1 = scmp.ge.s32.totalorder %s39_s15, 2  ;;  %p223_p2 = scmp.lt.s32.totalorder %s1324_s14, 3 }
   0x5   : > { %s1468_s15 = smov (%p41_p1, %s39_s15), 0  ;;  %p224_p3 = pnand %p1092_p0, %p223_p2 }
   0x6   : > { %p289_p4 = scmp.lt.s32.totalorder (!%p224_p3), %s1316_s12, 1 }
   0x7   : > { %227 = sbr.rel (%p224_p3) target bundleno = 302 (0x12e), region = 32 }
   0xe   : > { %s1470_s12 = smov (!%p289_p4, %s1316_s12), 1 }
   0xf   : > { %s1173_s16 = sshll.u32 %s1470_s12, 9  ;;  %s1172_s20 = sshll.u32 %s1470_s12, 4 }
  0x10   : > { %s1370_s19 = scalar_lea.vmem %s1462_s1, %s1173_s16  ;;  %s1421_s23 = scalar_lea.vmem %s1461_s0, %s1172_s20 }
  0x11   : > { %v1203_v0 = vld [vmem:[%s1370_s19 + $0x4] ss:$16 sps:$4 sm:$0xff]   ;;  %v1205_v1 = vld [vmem:[%s1370_s19 + $0xc] ss:$16 sps:$4 sm:$0xff]   ;;  %v1207_v2 = vld [vmem:[%s1370_s19] ss:$16 sps:$4 sm:$0xff]  }
  0x12   : > { %760 = vmatprep.subr.bf16.mxu0 %v1203_v0  ;;  %v1208_v3 = vld [vmem:[%s1370_s19 + $0x8] ss:$16 sps:$4 sm:$0xff]   ;;  %803 = vmatprep.subr.bf16.mxu1 %v1205_v1  ;;  %v1209_v4 = vld [vmem:[%s1370_s19 + $0x24] ss:$16 sps:$4 sm:$0xff]   ;;  %v1211_v5 = vld [vmem:[%s1370_s19 + $0x2c] ss:$16 sps:$4 sm:$0xff]  }
  0x13   : > { %761 = vmatpush1.bf16.msra.mxu0 %v1207_v2  ;;  %804 = vmatpush1.bf16.msra.mxu1 %v1208_v3  ;;  %v1213_v6 = vld [vmem:[%s1370_s19 + $0x20] ss:$16 sps:$4 sm:$0xff]   ;;  %v1214_v7 = vld [vmem:[%s1370_s19 + $0x28] ss:$16 sps:$4 sm:$0xff]   ;;  %v1215_v8 = vld [vmem:[%s1370_s19 + $0x44] ss:$16 sps:$4 sm:$0xff]   ;;  %v875_v2 = vlaneseq }
  0x14   : > { %762 = vmatprep.subr.bf16.mxu0 %v1209_v4  ;;  %805 = vmatprep.subr.bf16.mxu1 %v1211_v5  ;;  %v1217_v9 = vld [vmem:[%s1370_s19 + $0x4c] ss:$16 sps:$4 sm:$0xff]   ;;  %v1219_v10 = vld [vmem:[%s1370_s19 + $0x40] ss:$16 sps:$4 sm:$0xff]   ;;  %v1220_v11 = vld [vmem:[%s1370_s19 + $0x48] ss:$16 sps:$4 sm:$0xff]  }
  0x15   : > { %v1221_v12 = vld [vmem:[%s1370_s19 + $0x64] ss:$16 sps:$4 sm:$0xff]   ;;  %v1223_v13 = vld [vmem:[%s1370_s19 + $0x6c] ss:$16 sps:$4 sm:$0xff]   ;;  %v1225_v14 = vld [vmem:[%s1370_s19 + $0x60] ss:$16 sps:$4 sm:$0xff]  }
  0x16   : > { %v1226_v15 = vld [vmem:[%s1370_s19 + $0x68] ss:$16 sps:$4 sm:$0xff]   ;;  %v1227_v16 = vld [vmem:[%s1370_s19 + $0x84] ss:$16 sps:$4 sm:$0xff]   ;;  %v1229_v17 = vld [vmem:[%s1370_s19 + $0x8c] ss:$16 sps:$4 sm:$0xff]  }
  0x17   : > { %763 = vmatpush1.bf16.msra.mxu0 %v1213_v6  ;;  %806 = vmatpush1.bf16.msra.mxu1 %v1214_v7  ;;  %v1231_v18 = vld [vmem:[%s1370_s19 + $0x80] ss:$16 sps:$4 sm:$0xff]   ;;  %v1232_v19 = vld [vmem:[%s1370_s19 + $0x88] ss:$16 sps:$4 sm:$0xff]   ;;  %v1233_v20 = vld [vmem:[%s1370_s19 + $0xa4] ss:$16 sps:$4 sm:$0xff]  }
  0x18   : > { %764 = vmatprep.subr.bf16.mxu0 %v1215_v8  ;;  %807 = vmatprep.subr.bf16.mxu1 %v1217_v9  ;;  %v1235_v21 = vld [vmem:[%s1370_s19 + $0xac] ss:$16 sps:$4 sm:$0xff]   ;;  %v1237_v22 = vld [vmem:[%s1370_s19 + $0xa0] ss:$16 sps:$4 sm:$0xff]   ;;  %v1238_v23 = vld [vmem:[%s1370_s19 + $0xa8] ss:$16 sps:$4 sm:$0xff]  }
  0x19   : > { %v1239_v24 = vld [vmem:[%s1370_s19 + $0xc4] ss:$16 sps:$4 sm:$0xff]   ;;  %v1241_v25 = vld [vmem:[%s1370_s19 + $0xcc] ss:$16 sps:$4 sm:$0xff]   ;;  %v1243_v26 = vld [vmem:[%s1370_s19 + $0xc0] ss:$16 sps:$4 sm:$0xff]  }
  0x1a   : > { %v1244_v27 = vld [vmem:[%s1370_s19 + $0xc8] ss:$16 sps:$4 sm:$0xff]   ;;  %v1245_v28 = vld [vmem:[%s1370_s19 + $0xe4] ss:$16 sps:$4 sm:$0xff]   ;;  %v1247_v29 = vld [vmem:[%s1370_s19 + $0xec] ss:$16 sps:$4 sm:$0xff]  }
  0x1b   : > { %765 = vmatpush1.bf16.msra.mxu0 %v1219_v10  ;;  %808 = vmatpush1.bf16.msra.mxu1 %v1220_v11  ;;  %v1249_v30 = vld [vmem:[%s1370_s19 + $0xe0] ss:$16 sps:$4 sm:$0xff]   ;;  %v1250_v31 = vld [vmem:[%s1370_s19 + $0xe8] ss:$16 sps:$4 sm:$0xff]   ;;  %v1251_v32 = vld [vmem:[%s1370_s19 + $0x104] ss:$16 sps:$4 sm:$0xff]  }
  0x1c   : > { %766 = vmatprep.subr.bf16.mxu0 %v1221_v12  ;;  %809 = vmatprep.subr.bf16.mxu1 %v1223_v13  ;;  %v1253_v33 = vld [vmem:[%s1370_s19 + $0x10c] ss:$16 sps:$4 sm:$0xff]   ;;  %v1255_v34 = vld [vmem:[%s1370_s19 + $0x100] ss:$16 sps:$4 sm:$0xff]   ;;  %v1256_v35 = vld [vmem:[%s1370_s19 + $0x108] ss:$16 sps:$4 sm:$0xff]  }
  0x1d   : > { %v1257_v36 = vld [vmem:[%s1370_s19 + $0x124] ss:$16 sps:$4 sm:$0xff]   ;;  %v1259_v37 = vld [vmem:[%s1370_s19 + $0x12c] ss:$16 sps:$4 sm:$0xff]   ;;  %v1261_v38 = vld [vmem:[%s1370_s19 + $0x120] ss:$16 sps:$4 sm:$0xff]  }
  0x1e   : > { %v1262_v39 = vld [vmem:[%s1370_s19 + $0x128] ss:$16 sps:$4 sm:$0xff]   ;;  %v1263_v40 = vld [vmem:[%s1370_s19 + $0x144] ss:$16 sps:$4 sm:$0xff]   ;;  %v1265_v41 = vld [vmem:[%s1370_s19 + $0x14c] ss:$16 sps:$4 sm:$0xff]  }
  0x1f   : > { %767 = vmatpush1.bf16.msra.mxu0 %v1225_v14  ;;  %810 = vmatpush1.bf16.msra.mxu1 %v1226_v15  ;;  %v1267_v42 = vld [vmem:[%s1370_s19 + $0x140] ss:$16 sps:$4 sm:$0xff]   ;;  %v1268_v43 = vld [vmem:[%s1370_s19 + $0x148] ss:$16 sps:$4 sm:$0xff]   ;;  %v1269_v44 = vld [vmem:[%s1370_s19 + $0x164] ss:$16 sps:$4 sm:$0xff]  }
  0x20   : > { %768 = vmatprep.subr.bf16.mxu0 %v1227_v16  ;;  %811 = vmatprep.subr.bf16.mxu1 %v1229_v17  ;;  %v1271_v45 = vld [vmem:[%s1370_s19 + $0x16c] ss:$16 sps:$4 sm:$0xff]   ;;  %v1273_v47 = vld [vmem:[%s1370_s19 + $0x160] ss:$16 sps:$4 sm:$0xff]   ;;  %v1274_v48 = vld [vmem:[%s1370_s19 + $0x168] ss:$16 sps:$4 sm:$0xff]  }
  0x21   : > { %v1301_v46 = vld [vmem:[%s1421_s23 + $0x4] ss:$8 sps:$4 sm:$0xff]   ;;  %v1279_v51 = vld [vmem:[%s1370_s19 + $0x180] ss:$16 sps:$4 sm:$0xff]   ;;  %v1280_v52 = vld [vmem:[%s1370_s19 + $0x188] ss:$16 sps:$4 sm:$0xff]  }
  0x22   : > { %v1275_v49 = vld [vmem:[%s1370_s19 + $0x184] ss:$16 sps:$4 sm:$0xff]   ;;  %v1277_v50 = vld [vmem:[%s1370_s19 + $0x18c] ss:$16 sps:$4 sm:$0xff]   ;;  %792 = vmatprep.mubr.bf16.mxu0 %v1301_v46  ;;  %835 = vmatprep.mubr.bf16.mxu1 %v1301_v46  ;;  %v1285_v55 = vld [vmem:[%s1370_s19 + $0x1a0] ss:$16 sps:$4 sm:$0xff]  }
  0x23   : > { %769 = vmatpush1.bf16.msra.mxu0 %v1231_v18  ;;  %812 = vmatpush1.bf16.msra.mxu1 %v1232_v19  ;;  %v1281_v53 = vld [vmem:[%s1370_s19 + $0x1a4] ss:$16 sps:$4 sm:$0xff]   ;;  %v1283_v54 = vld [vmem:[%s1370_s19 + $0x1ac] ss:$16 sps:$4 sm:$0xff]   ;;  %v1286_v56 = vld [vmem:[%s1370_s19 + $0x1a8] ss:$16 sps:$4 sm:$0xff]  }
  0x24   : > { %770 = vmatprep.subr.bf16.mxu0 %v1233_v20  ;;  %813 = vmatprep.subr.bf16.mxu1 %v1235_v21  ;;  %v1287_v57 = vld [vmem:[%s1370_s19 + $0x1c4] ss:$16 sps:$4 sm:$0xff]   ;;  %v1289_v58 = vld [vmem:[%s1370_s19 + $0x1cc] ss:$16 sps:$4 sm:$0xff]   ;;  %v1291_v59 = vld [vmem:[%s1370_s19 + $0x1c0] ss:$16 sps:$4 sm:$0xff]  }
  0x25   : > { %v1292_v60 = vld [vmem:[%s1370_s19 + $0x1c8] ss:$16 sps:$4 sm:$0xff]   ;;  %v1293_v61 = vld [vmem:[%s1370_s19 + $0x1e4] ss:$16 sps:$4 sm:$0xff]   ;;  %v1295_v62 = vld [vmem:[%s1370_s19 + $0x1ec] ss:$16 sps:$4 sm:$0xff]  }
  0x26   : > { %v1297_v63 = vld [vmem:[%s1370_s19 + $0x1e0] ss:$16 sps:$4 sm:$0xff]   ;;  %v1298_v0 = vld [vmem:[%s1370_s19 + $0x1e8] ss:$16 sps:$4 sm:$0xff]   ;;  %s1097_s24 = sshll.u32 %s1470_s12, 2  ;;  %v876_v3 = vshrl.u32 %v875_v2, 7 }
  0x27   : > { %771 = vmatpush1.bf16.msra.mxu0 %v1237_v22  ;;  %814 = vmatpush1.bf16.msra.mxu1 %v1238_v23  ;;  %v1299_v1 = vld [vmem:[%s1421_s23] ss:$8 sps:$4 sm:$0xff]   ;;  %s326_s27 = scalar_lea.vmem %s1463_s2, %s1097_s24  ;;  %s1174_s28 = sshll.u32 %s1470_s12, 5 }
  0x28   : > { %772 = vmatprep.subr.bf16.mxu0 %v1239_v24  ;;  %815 = vmatprep.subr.bf16.mxu1 %v1241_v25  ;;  %v877_v4 = vsub.s32 0, %v876_v3  ;;  %v885_v5 = vsub.s32 2, %v876_v3  ;;  %v873_v6 = vld [vmem:[%s326_s27] sm:$0xf]  ;;  %v881_v7 = vsub.s32 1, %v876_v3  ;;  %v889_v8 = vsub.s32 3, %v876_v3  ;;  %s341_s4 = scalar_lea.vmem %s1464_s3, %s1174_s28 }
  0x2a   : > { %v878_v9 = vrot.slane %v873_v6, %v877_v4  ;;  %v886_v10 = vrot.slane %v873_v6, %v885_v5  ;;  %v882_v11 = vrot.slane %v873_v6, %v881_v7  ;;  %v890_v12 = vrot.slane %v873_v6, %v889_v8 }
  0x2b   : > { %773 = vmatpush1.bf16.msra.mxu0 %v1243_v26  ;;  %816 = vmatpush1.bf16.msra.mxu1 %v1244_v27 }
  0x2c   : > { %774 = vmatprep.subr.bf16.mxu0 %v1245_v28  ;;  %817 = vmatprep.subr.bf16.mxu1 %v1247_v29 }
  0x2f   : > { %775 = vmatpush1.bf16.msra.mxu0 %v1249_v30  ;;  %818 = vmatpush1.bf16.msra.mxu1 %v1250_v31 }
  0x30   : > { %776 = vmatprep.subr.bf16.mxu0 %v1251_v32  ;;  %819 = vmatprep.subr.bf16.mxu1 %v1253_v33 }
  0x33   : > { %777 = vmatpush1.bf16.msra.mxu0 %v1255_v34  ;;  %820 = vmatpush1.bf16.msra.mxu1 %v1256_v35 }
  0x34   : > { %778 = vmatprep.subr.bf16.mxu0 %v1257_v36  ;;  %821 = vmatprep.subr.bf16.mxu1 %v1259_v37 }
  0x37   : > { %779 = vmatpush1.bf16.msra.mxu0 %v1261_v38  ;;  %822 = vmatpush1.bf16.msra.mxu1 %v1262_v39 }
  0x38   : > { %780 = vmatprep.subr.bf16.mxu0 %v1263_v40  ;;  %823 = vmatprep.subr.bf16.mxu1 %v1265_v41 }
  0x3b   : > { %781 = vmatpush1.bf16.msra.mxu0 %v1267_v42  ;;  %824 = vmatpush1.bf16.msra.mxu1 %v1268_v43 }
  0x3c   : > { %782 = vmatprep.subr.bf16.mxu0 %v1269_v44  ;;  %825 = vmatprep.subr.bf16.mxu1 %v1271_v45 }
  0x3f   : > { %783 = vmatpush1.bf16.msra.mxu0 %v1273_v47  ;;  %826 = vmatpush1.bf16.msra.mxu1 %v1274_v48 }
  0x40   : > { %784 = vmatprep.subr.bf16.mxu0 %v1275_v49  ;;  %827 = vmatprep.subr.bf16.mxu1 %v1277_v50 }
  0x43   : > { %785 = vmatpush1.bf16.msra.mxu0 %v1279_v51  ;;  %828 = vmatpush1.bf16.msra.mxu1 %v1280_v52 }
  0x44   : > { %786 = vmatprep.subr.bf16.mxu0 %v1281_v53  ;;  %829 = vmatprep.subr.bf16.mxu1 %v1283_v54 }
  0x47   : > { %787 = vmatpush1.bf16.msra.mxu0 %v1285_v55  ;;  %830 = vmatpush1.bf16.msra.mxu1 %v1286_v56 }
  0x48   : > { %788 = vmatprep.subr.bf16.mxu0 %v1287_v57  ;;  %831 = vmatprep.subr.bf16.mxu1 %v1289_v58 }
  0x4b   : > { %789 = vmatpush1.bf16.msra.mxu0 %v1291_v59  ;;  %832 = vmatpush1.bf16.msra.mxu1 %v1292_v60 }
  0x4c   : > { %790 = vmatprep.subr.bf16.mxu0 %v1293_v61  ;;  %833 = vmatprep.subr.bf16.mxu1 %v1295_v62 }
  0x4f   : > { %791 = vmatpush1.bf16.msra.mxu0 %v1297_v63  ;;  %834 = vmatpush1.bf16.msra.mxu1 %v1298_v0 }
  0x52   : > { %793 = vmatmul.mubr.bf16.vlgmr.msra.gmra.mrb[0].mxu0 %v1299_v1  ;;  %836 = vmatmul.mubr.bf16.vlgmr.msra.gmra.mrb[0].mxu1 %v1299_v1 }
 0x125   : > { %v794_v13 = vpop.f32.mrb[0].mxu0  ;;  %v837_v14 = vpop.f32.mrb[0].mxu1 }
 0x126   : > { %v895_v15 = vadd.f32 %v878_v9, %v794_v13  ;;  %v897_v16 = vadd.f32 %v886_v10, %v837_v14  ;;  %v796_v17 = vpop.f32.mrb[1].mxu0  ;;  %v839_v18 = vpop.f32.mrb[1].mxu1 }
 0x127   : > { %v896_v19 = vadd.f32 %v882_v11, %v796_v17  ;;  %v898_v20 = vadd.f32 %v890_v12, %v839_v18  ;;  %v798_v21 = vpop.f32.mrb[2].mxu0  ;;  %v841_v22 = vpop.f32.mrb[2].mxu1 }
 0x128   : > { %v899_v23 = vadd.f32 %v878_v9, %v798_v21  ;;  %v901_v24 = vadd.f32 %v886_v10, %v841_v22  ;;  %v800_v25 = vpop.f32.mrb[3].mxu0  ;;  %v843_v26 = vpop.f32.mrb[3].mxu1 }
 0x129   : > { %v1175_v27 = vpack.c.bf16 %v896_v19, %v895_v15  ;;  %v1176_v28 = vpack.c.bf16 %v898_v20, %v897_v16  ;;  %v900_v29 = vadd.f32 %v882_v11, %v800_v25  ;;  %v902_v30 = vadd.f32 %v890_v12, %v843_v26 }
 0x12b   : > { %927 = vst [vmem:[%s341_s4] sm:$0xff] %v1175_v27  ;;  %928 = vst [vmem:[%s341_s4 + $0x8] sm:$0xff] %v1176_v28  ;;  %v1177_v31 = vpack.c.bf16 %v900_v29, %v899_v23  ;;  %v1178_v32 = vpack.c.bf16 %v902_v30, %v901_v24 }
 0x12d   : > { %929 = vst [vmem:[%s341_s4 + $0x10] sm:$0xff] %v1177_v31  ;;  %930 = vst [vmem:[%s341_s4 + $0x18] sm:$0xff] %v1178_v32 }
 0x12e PF: > { %s13_s14 = sadd.s32 1, %s1324_s14   ;;  %s1465_s12 = smov %s1320_s13 }
 0x12f   : > { %p10_p5 = scmp.ge.s32.totalorder %s13_s14, 4   ;;  %s1466_s13 = smov %s1468_s15 }
 0x131   :  { %12 = sbr.rel (!%p10_p5) target bundleno = 2 (0x2), region = 76 }

// kernel: _forward_impl.204
= control target key start
LH: loop header
LB: loop body
LE: loop exit
PB: predicated region body
PF: predicated region fallthrough
CT: control target
= control target key end

     0   :  { %s1720_s12 = smov 0   ;;  %s1722_s13 = smov 0   ;;  %s1850_s0 = inlined_call_operand.vmem [shape: bf16[2,16,1152], index: 0, kind: input, shape index: {}]   ;;  %s1851_s1 = inlined_call_operand.vmem [shape: bf16[2,1152,128], index: 1, kind: input, shape index: {}]   ;;  %s1852_s2 = inlined_call_operand.vmem [shape: f32[2,1,128], index: 2, kind: input, shape index: {}]   ;;  %s1853_s3 = inlined_call_operand.vmem [shape: bf16[2,16,128], index: 3, kind: output, shape index: {}]  }
   0x1   :  { %s1724_s14 = smov 0  }
   0x2 LB: > { %s39_s15 = sadd.s32 1, %s1692_s13  ;;  %p1345_p0 = scmp.ge.s32.totalorder %s1696_s14, 1  ;;  %s1696_s14 = sphi %s1724_s14, %s13_s14   ;;  %s1692_s13 = sphi %s1722_s13, %s1855_s13   ;;  %s1688_s12 = sphi %s1720_s12, %s1854_s12  }
   0x3   : > { %p41_p1 = scmp.ge.s32.totalorder %s39_s15, 2  ;;  %p217_p2 = scmp.lt.s32.totalorder %s1696_s14, 3 }
   0x5   : > { %s1857_s15 = smov (%p41_p1, %s39_s15), 0  ;;  %p218_p3 = pnand %p1345_p0, %p217_p2 }
   0x6   : > { %p277_p4 = scmp.lt.s32.totalorder (!%p218_p3), %s1688_s12, 1  ;;  %vm1699_vm0 = vmmov (!%p218_p3), 0  }
   0x7   : > { %221 = sbr.rel (%p218_p3) target bundleno = 339 (0x153), region = 32 }
   0xe   : > { %s1859_s12 = smov (!%p277_p4, %s1688_s12), 1 }
   0xf   : > { %s1562_s16 = smul.u32 576, %s1859_s12  ;;  %s309_s26 = scalar_lea.vmem %s1852_s2, %s1859_s12 }
  0x10   : > { %s1561_s20 = smul.u32 72, %s1859_s12  ;;  %s1436_s27 = sshll.u32 %s1859_s12, 3 }
  0x11   : > { %s1744_s19 = scalar_lea.vmem %s1851_s1, %s1562_s16  ;;  %s321_s30 = scalar_lea.vmem %s1853_s3, %s1436_s27 }
  0x12   : > { %v1589_v0 = vld [vmem:[%s1744_s19 + $0x40] sm:$0xff]   ;;  %v1593_v4 = vld [vmem:[%s1744_s19 + $0x48] sm:$0xff]   ;;  %v1597_v8 = vld [vmem:[%s1744_s19 + $0x50] sm:$0xff]   ;;  %s1780_s23 = scalar_lea.vmem %s1850_s0, %s1561_s20 }
  0x13   : > { %v1590_v1 = vld [vmem:[%s1744_s19 + $0xc0] sm:$0xff]   ;;  %1444 = vmatprep.subr.bf16.mxu0 %v1589_v0  ;;  %v1594_v5 = vld [vmem:[%s1744_s19 + $0xc8] sm:$0xff]   ;;  %v1598_v9 = vld [vmem:[%s1744_s19 + $0xd0] sm:$0xff]  }
  0x14   : > { %v1591_v2 = vld [vmem:[%s1744_s19] sm:$0xff]   ;;  %1466 = vmatprep.subr.bf16.mxu1 %v1590_v1  ;;  %v1595_v6 = vld [vmem:[%s1744_s19 + $0x8] sm:$0xff]   ;;  %v1599_v10 = vld [vmem:[%s1744_s19 + $0x10] sm:$0xff]  }
  0x15   : > { %v1592_v3 = vld [vmem:[%s1744_s19 + $0x80] sm:$0xff]   ;;  %1445 = vmatpush3.bf16.msra.mxu0 %v1591_v2  ;;  %v1596_v7 = vld [vmem:[%s1744_s19 + $0x88] sm:$0xff]   ;;  %v1600_v11 = vld [vmem:[%s1744_s19 + $0x90] sm:$0xff]  }
  0x16   : > { %1467 = vmatpush3.bf16.msra.mxu1 %v1592_v3  ;;  %1446 = vmatprep.subr.bf16.mxu0 %v1593_v4  ;;  %v1601_v12 = vld [vmem:[%s1744_s19 + $0x58] sm:$0xff]   ;;  %v1605_v16 = vld [vmem:[%s1744_s19 + $0x60] sm:$0xff]   ;;  %v1609_v20 = vld [vmem:[%s1744_s19 + $0x68] sm:$0xff]  }
  0x17   : > { %1468 = vmatprep.subr.bf16.mxu1 %v1594_v5  ;;  %v1602_v13 = vld [vmem:[%s1744_s19 + $0xd8] sm:$0xff]   ;;  %v1606_v17 = vld [vmem:[%s1744_s19 + $0xe0] sm:$0xff]   ;;  %v1610_v21 = vld [vmem:[%s1744_s19 + $0xe8] sm:$0xff]  }
  0x18   : > { %v1603_v14 = vld [vmem:[%s1744_s19 + $0x18] sm:$0xff]   ;;  %v1607_v18 = vld [vmem:[%s1744_s19 + $0x20] sm:$0xff]   ;;  %v1611_v22 = vld [vmem:[%s1744_s19 + $0x28] sm:$0xff]  }
  0x19   : > { %1447 = vmatpush3.bf16.msra.mxu0 %v1595_v6  ;;  %v1604_v15 = vld [vmem:[%s1744_s19 + $0x98] sm:$0xff]   ;;  %v1608_v19 = vld [vmem:[%s1744_s19 + $0xa0] sm:$0xff]   ;;  %v1612_v23 = vld [vmem:[%s1744_s19 + $0xa8] sm:$0xff]   ;;  %v1698_v6 = vmov 0.0  }
  0x1a   : > { %1469 = vmatpush3.bf16.msra.mxu1 %v1596_v7  ;;  %1448 = vmatprep.subr.bf16.mxu0 %v1597_v8  ;;  %v1613_v24 = vld [vmem:[%s1744_s19 + $0x70] sm:$0xff]   ;;  %v1617_v28 = vld [vmem:[%s1744_s19 + $0x78] sm:$0xff]   ;;  %v1621_v32 = vld [vmem:[%s1780_s23] ss:$36 sps:$4 sm:$0xff]  }
  0x1b   : > { %1470 = vmatprep.subr.bf16.mxu1 %v1598_v9  ;;  %v1614_v25 = vld [vmem:[%s1744_s19 + $0xf0] sm:$0xff]   ;;  %v1618_v29 = vld [vmem:[%s1744_s19 + $0xf8] sm:$0xff]   ;;  %v1623_v33 = vld [vmem:[%s1780_s23 + $0x4] ss:$36 sps:$4 sm:$0xff]  }
  0x1c   : > { %v1615_v26 = vld [vmem:[%s1744_s19 + $0x30] sm:$0xff]   ;;  %v1619_v30 = vld [vmem:[%s1744_s19 + $0x38] sm:$0xff]   ;;  %v1624_v34 = vld [vmem:[%s1780_s23 + $0x8] ss:$36 sps:$4 sm:$0xff]   ;;  %996 = vmatprep.mubr.bf16.mxu0 %v1623_v33 }
  0x1d   : > { %1449 = vmatpush3.bf16.msra.mxu0 %v1599_v10  ;;  %v1616_v27 = vld [vmem:[%s1744_s19 + $0xb0] sm:$0xff]   ;;  %v1620_v31 = vld [vmem:[%s1744_s19 + $0xb8] sm:$0xff]   ;;  %v1627_v36 = vld [vmem:[%s1744_s19 + $0x140] sm:$0xff]  }
  0x1e   : > { %1471 = vmatpush3.bf16.msra.mxu1 %v1600_v11  ;;  %1450 = vmatprep.subr.bf16.mxu0 %v1601_v12  ;;  %v1626_v35 = vld [vmem:[%s1780_s23 + $0xc] ss:$36 sps:$4 sm:$0xff]   ;;  %v1628_v37 = vld [vmem:[%s1744_s19 + $0x100] sm:$0xff]   ;;  %v1639_v48 = vld [vmem:[%s1744_s19 + $0x158] sm:$0xff]  }
  0x1f   : > { %1472 = vmatprep.subr.bf16.mxu1 %v1602_v13  ;;  %1037 = vmatprep.mubr.bf16.mxu1 %v1626_v35  ;;  %v1629_v38 = vld [vmem:[%s1744_s19 + $0x1c0] sm:$0xff]   ;;  %v1631_v40 = vld [vmem:[%s1744_s19 + $0x148] sm:$0xff]   ;;  %v1635_v44 = vld [vmem:[%s1744_s19 + $0x150] sm:$0xff]  }
  0x20   : > { %v1630_v39 = vld [vmem:[%s1744_s19 + $0x180] sm:$0xff]   ;;  %v1632_v41 = vld [vmem:[%s1744_s19 + $0x108] sm:$0xff]   ;;  %v1636_v45 = vld [vmem:[%s1744_s19 + $0x110] sm:$0xff]  }
  0x21   : > { %1451 = vmatpush3.bf16.msra.mxu0 %v1603_v14  ;;  %v1633_v42 = vld [vmem:[%s1744_s19 + $0x1c8] sm:$0xff]   ;;  %v1637_v46 = vld [vmem:[%s1744_s19 + $0x1d0] sm:$0xff]   ;;  %v1640_v49 = vld [vmem:[%s1744_s19 + $0x118] sm:$0xff]  }
  0x22   : > { %1473 = vmatpush3.bf16.msra.mxu1 %v1604_v15  ;;  %1452 = vmatprep.subr.bf16.mxu0 %v1605_v16  ;;  %v1634_v43 = vld [vmem:[%s1744_s19 + $0x188] sm:$0xff]   ;;  %v1638_v47 = vld [vmem:[%s1744_s19 + $0x190] sm:$0xff]   ;;  %v1641_v50 = vld [vmem:[%s1744_s19 + $0x1d8] sm:$0xff]  }
  0x23   : > { %1474 = vmatprep.subr.bf16.mxu1 %v1606_v17  ;;  %v1642_v51 = vld [vmem:[%s1744_s19 + $0x198] sm:$0xff]   ;;  %v1643_v52 = vld [vmem:[%s1744_s19 + $0x160] sm:$0xff]   ;;  %v1647_v56 = vld [vmem:[%s1744_s19 + $0x168] sm:$0xff]  }
  0x24   : > { %v1644_v53 = vld [vmem:[%s1744_s19 + $0x120] sm:$0xff]   ;;  %v1648_v57 = vld [vmem:[%s1744_s19 + $0x128] sm:$0xff]   ;;  %v1651_v60 = vld [vmem:[%s1744_s19 + $0x170] sm:$0xff]  }
  0x25   : > { %1453 = vmatpush3.bf16.msra.mxu0 %v1607_v18  ;;  %v1645_v54 = vld [vmem:[%s1744_s19 + $0x1e0] sm:$0xff]   ;;  %v1649_v58 = vld [vmem:[%s1744_s19 + $0x1e8] sm:$0xff]   ;;  %v1652_v61 = vld [vmem:[%s1744_s19 + $0x130] sm:$0xff]  }
  0x26   : > { %1475 = vmatpush3.bf16.msra.mxu1 %v1608_v19  ;;  %1454 = vmatprep.subr.bf16.mxu0 %v1609_v20  ;;  %v1646_v55 = vld [vmem:[%s1744_s19 + $0x1a0] sm:$0xff]   ;;  %v1650_v59 = vld [vmem:[%s1744_s19 + $0x1a8] sm:$0xff]   ;;  %v1653_v62 = vld [vmem:[%s1744_s19 + $0x1f0] sm:$0xff]  }
  0x27   : > { %1476 = vmatprep.subr.bf16.mxu1 %v1610_v21  ;;  %v1654_v63 = vld [vmem:[%s1744_s19 + $0x1b0] sm:$0xff]   ;;  %v1655_v0 = vld [vmem:[%s1744_s19 + $0x178] sm:$0xff]   ;;  %v1665_v9 = vld [vmem:[%s1744_s19 + $0x200] sm:$0xff]  }
  0x28   : > { %v1656_v1 = vld [vmem:[%s1744_s19 + $0x138] sm:$0xff]   ;;  %v1658_v3 = vld [vmem:[%s1780_s23 + $0x10] ss:$36 sps:$4 sm:$0xff]   ;;  %v1666_v10 = vld [vmem:[%s1744_s19 + $0x208] sm:$0xff]  }
  0x29   : > { %1455 = vmatpush3.bf16.msra.mxu0 %v1611_v22  ;;  %v1657_v2 = vld [vmem:[%s1744_s19 + $0x1f8] sm:$0xff]   ;;  %v1667_v11 = vld [vmem:[%s1744_s19 + $0x210] sm:$0xff]   ;;  %v1669_v13 = vld [vmem:[%s1744_s19 + $0x220] sm:$0xff]  }
  0x2a   : > { %1477 = vmatpush3.bf16.msra.mxu1 %v1612_v23  ;;  %1456 = vmatprep.subr.bf16.mxu0 %v1613_v24  ;;  %v1660_v4 = vld [vmem:[%s1780_s23 + $0x14] ss:$36 sps:$4 sm:$0xff]   ;;  %v1664_v8 = vld [vmem:[%s1780_s23 + $0x1c] ss:$36 sps:$4 sm:$0xff]   ;;  %v1670_v14 = vld [vmem:[%s1744_s19 + $0x228] sm:$0xff]  }
  0x2b   : > { %1478 = vmatprep.subr.bf16.mxu1 %v1614_v25  ;;  %v1661_v5 = vld [vmem:[%s1744_s19 + $0x1b8] sm:$0xff]   ;;  %v1671_v15 = vld [vmem:[%s1744_s19 + $0x230] sm:$0xff]   ;;  %v1673_v17 = vld [vmem:[%s1780_s23 + $0x20] ss:$36 sps:$4 sm:$0xff]  }
  0x2c   : > { %v1662_v7 = vld [vmem:[%s1780_s23 + $0x18] ss:$36 sps:$4 sm:$0xff]  }
  0x2d   : > { %1457 = vmatpush3.bf16.msra.mxu0 %v1615_v26  ;;  %v1668_v12 = vld [vmem:[%s1744_s19 + $0x218] sm:$0xff]  }
  0x2e   : > { %1479 = vmatpush3.bf16.msra.mxu1 %v1616_v27  ;;  %1458 = vmatprep.subr.bf16.mxu0 %v1617_v28  ;;  %v1672_v16 = vld [vmem:[%s1744_s19 + $0x238] sm:$0xff]  }
  0x2f   : > { %1480 = vmatprep.subr.bf16.mxu1 %v1618_v29 }
  0x31   : > { %1459 = vmatpush3.bf16.msra.mxu0 %v1619_v30 }
  0x32   : > { %1481 = vmatpush3.bf16.msra.mxu1 %v1620_v31  ;;  %1488 = vmatprep.subr.bf16.mxu0 %v1627_v36 }
  0x33   : > { %1510 = vmatprep.subr.bf16.mxu1 %v1629_v38 }
  0x34   : > { %997 = vmatmul.mubr.bf16.vlgmr.msra.gmra.mrb[0].mxu0 %v1621_v32 }
  0x35   : > { %1038 = vmatmul.mubr.bf16.vlgmr.msra.gmra.mrb[0].mxu1 %v1624_v34  ;;  %1489 = vmatpush3.bf16.msra.mxu0 %v1628_v37 }
  0x36   : > { %1511 = vmatpush3.bf16.msra.mxu1 %v1630_v39  ;;  %1490 = vmatprep.subr.bf16.mxu0 %v1631_v40 }
  0x37   : > { %1512 = vmatprep.subr.bf16.mxu1 %v1633_v42  ;;  %1078 = vmatprep.mubr.bf16.mxu0 %v1660_v4 }
  0x38   : > { %1119 = vmatprep.mubr.bf16.mxu1 %v1664_v8 }
  0x39   : > { %1491 = vmatpush3.bf16.msra.mxu0 %v1632_v41 }
  0x3a   : > { %1513 = vmatpush3.bf16.msra.mxu1 %v1634_v43  ;;  %1492 = vmatprep.subr.bf16.mxu0 %v1635_v44 }
  0x3b   : > { %1514 = vmatprep.subr.bf16.mxu1 %v1637_v46 }
  0x3d   : > { %1493 = vmatpush3.bf16.msra.mxu0 %v1636_v45 }
  0x3e   : > { %1515 = vmatpush3.bf16.msra.mxu1 %v1638_v47  ;;  %1494 = vmatprep.subr.bf16.mxu0 %v1639_v48 }
  0x3f   : > { %1516 = vmatprep.subr.bf16.mxu1 %v1641_v50 }
  0x41   : > { %1495 = vmatpush3.bf16.msra.mxu0 %v1640_v49  ;;  %v1431_v49 = vld [vmem:[%s309_s26] ss:$0 sm:$0xff] }
  0x42   : > { %1517 = vmatpush3.bf16.msra.mxu1 %v1642_v51  ;;  %1496 = vmatprep.subr.bf16.mxu0 %v1643_v52 }
  0x43   : > { %1518 = vmatprep.subr.bf16.mxu1 %v1645_v54 }
  0x45   : > { %1497 = vmatpush3.bf16.msra.mxu0 %v1644_v53 }
  0x46   : > { %1519 = vmatpush3.bf16.msra.mxu1 %v1646_v55  ;;  %1498 = vmatprep.subr.bf16.mxu0 %v1647_v56 }
  0x47   : > { %1520 = vmatprep.subr.bf16.mxu1 %v1649_v58 }
  0x49   : > { %1499 = vmatpush3.bf16.msra.mxu0 %v1648_v57 }
  0x4a   : > { %1521 = vmatpush3.bf16.msra.mxu1 %v1650_v59  ;;  %1500 = vmatprep.subr.bf16.mxu0 %v1651_v60 }
  0x4b   : > { %1522 = vmatprep.subr.bf16.mxu1 %v1653_v62 }
  0x4d   : > { %1501 = vmatpush3.bf16.msra.mxu0 %v1652_v61 }
  0x4e   : > { %1523 = vmatpush3.bf16.msra.mxu1 %v1654_v63  ;;  %1502 = vmatprep.subr.bf16.mxu0 %v1655_v0 }
  0x4f   : > { %1524 = vmatprep.subr.bf16.mxu1 %v1657_v2 }
  0x51   : > { %1503 = vmatpush3.bf16.msra.mxu0 %v1656_v1 }
  0x52   : > { %1541 = vmatprep.subr.bf16.mxu0 %v1698_v6  ;;  %1525 = vmatpush3.bf16.msra.mxu1 %v1661_v5 }
  0x54   : > { %1079 = vmatmul.mubr.bf16.vlgmr.msra.gmra.mrb[4].mxu0 %v1658_v3 }
  0x55   : > { %1557 = vmatprep.mubr.msk.bf16.mxu0 %vm1699_vm0, %v1698_v6  ;;  %1542 = vmatpush3.bf16.msra.mxu0 %v1665_v9 }
  0x56   : > { %1120 = vmatmul.mubr.bf16.vlgmr.msra.gmra.mrb[4].mxu1 %v1662_v7  ;;  %1543 = vmatprep.subr.bf16.mxu0 %v1698_v6 }
  0x59   : > { %1544 = vmatpush3.bf16.msra.mxu0 %v1666_v10 }
  0x5a   : > { %1545 = vmatprep.subr.bf16.mxu0 %v1698_v6 }
  0x5d   : > { %1546 = vmatpush3.bf16.msra.mxu0 %v1667_v11 }
  0x5e   : > { %1547 = vmatprep.subr.bf16.mxu0 %v1698_v6 }
  0x61   : > { %1548 = vmatpush3.bf16.msra.mxu0 %v1668_v12 }
  0x62   : > { %1549 = vmatprep.subr.bf16.mxu0 %v1698_v6 }
  0x65   : > { %1550 = vmatpush3.bf16.msra.mxu0 %v1669_v13 }
  0x66   : > { %1551 = vmatprep.subr.bf16.mxu0 %v1698_v6 }
  0x69   : > { %1552 = vmatpush3.bf16.msra.mxu0 %v1670_v14 }
  0x6a   : > { %1553 = vmatprep.subr.bf16.mxu0 %v1698_v6 }
  0x6d   : > { %1554 = vmatpush3.bf16.msra.mxu0 %v1671_v15 }
  0x6e   : > { %1555 = vmatprep.subr.bf16.mxu0 %v1698_v6 }
  0x71   : > { %1556 = vmatpush3.bf16.msra.mxu0 %v1672_v16 }
  0x74   : > { %1558 = vmatmul.mubr.bf16.vlgmr.msra.gmra.mrb[8].mxu0 %v1673_v17 }
 0x107   : > { %v1460_v18 = vpop.f32.mrb[0].mxu0 }
 0x108   : > { %v1482_v19 = vpop.f32.mrb[0].mxu1  ;;  %v1461_v20 = vpop.f32.mrb[1].mxu0 }
 0x109   : > { %v1462_v21 = vadd.f32 %v1461_v20, %v1460_v18  ;;  %v1483_v22 = vpop.f32.mrb[1].mxu1  ;;  %v1463_v23 = vpop.f32.mrb[2].mxu0 }
 0x10a   : > { %v1484_v24 = vadd.f32 %v1483_v22, %v1482_v19  ;;  %v1485_v25 = vpop.f32.mrb[2].mxu1  ;;  %v1464_v26 = vpop.f32.mrb[3].mxu0 }
 0x10b   : > { %v1465_v27 = vadd.f32 %v1464_v26, %v1463_v23  ;;  %v1486_v28 = vpop.f32.mrb[3].mxu1 }
 0x10c   : > { %v1040_v29 = vadd.f32 %v1484_v24, %v1462_v21  ;;  %v1487_v30 = vadd.f32 %v1486_v28, %v1485_v25 }
 0x10e   : > { %v1043_v31 = vadd.f32 %v1487_v30, %v1465_v27 }
 0x127   : > { %v1504_v32 = vpop.f32.mrb[4].mxu0 }
 0x128   : > { %v1505_v33 = vpop.f32.mrb[5].mxu0 }
 0x129   : > { %v1506_v34 = vadd.f32 %v1505_v33, %v1504_v32  ;;  %v1507_v35 = vpop.f32.mrb[6].mxu0  ;;  %v1526_v36 = vpop.f32.mrb[4].mxu1 }
 0x12a   : > { %v1508_v37 = vpop.f32.mrb[7].mxu0  ;;  %v1527_v40 = vpop.f32.mrb[5].mxu1 }
 0x12b   : > { %v1081_v38 = vadd.f32 %v1506_v34, %v1040_v29  ;;  %v1509_v39 = vadd.f32 %v1508_v37, %v1507_v35  ;;  %v1528_v41 = vadd.f32 %v1527_v40, %v1526_v36  ;;  %v1529_v42 = vpop.f32.mrb[6].mxu1 }
 0x12c   : > { %v1530_v44 = vpop.f32.mrb[7].mxu1 }
 0x12d   : > { %v1084_v43 = vadd.f32 %v1509_v39, %v1043_v31  ;;  %v1531_v45 = vadd.f32 %v1530_v44, %v1529_v42  ;;  %v1122_v46 = vadd.f32 %v1528_v41, %v1081_v38 }
 0x12f   : > { %v1125_v47 = vadd.f32 %v1531_v45, %v1084_v43 }
 0x147   : > { %v1162_v48 = vpop.f32.mrb[8].mxu0 }
 0x148   : > { %v1163_v50 = vadd.f32 %v1162_v48, %v1122_v46  ;;  %v1559_v51 = vpop.f32.mrb[9].mxu0 }
 0x149   : > { %v1165_v52 = vpop.f32.mrb[10].mxu0 }
 0x14a   : > { %v1185_v53 = vadd.f32 %v1431_v49, %v1163_v50  ;;  %v1166_v54 = vadd.f32 %v1165_v52, %v1125_v47  ;;  %v1560_v55 = vpop.f32.mrb[11].mxu0 }
 0x14c   : > { %v1186_v56 = vadd.f32 %v1431_v49, %v1166_v54  ;;  %v1187_v57 = vmax.f32 %v1185_v53, 0.0 }
 0x14e   : > { %v1188_v58 = vmax.f32 %v1186_v56, 0.0 }
 0x150   : > { %v1442_v59 = vpack.c.bf16 %v1188_v58, %v1187_v57 }
 0x152   : > { %1443 = vst [vmem:[%s321_s30] sm:$0xff] %v1442_v59  }
 0x153 PF: > { %s13_s14 = sadd.s32 1, %s1696_s14   ;;  %s1854_s12 = smov %s1692_s13 }
 0x154   : > { %p10_p5 = scmp.ge.s32.totalorder %s13_s14, 4   ;;  %s1855_s13 = smov %s1857_s15 }
 0x156   :  { %12 = sbr.rel (!%p10_p5) target bundleno = 2 (0x2), region = 76 }

// kernel: _forward_impl.206
= control target key start
LH: loop header
LB: loop body
LE: loop exit
PB: predicated region body
PF: predicated region fallthrough
CT: control target
= control target key end

     0   :  { %s1201_s15 = smov 0   ;;  %s1203_s16 = smov 0   ;;  %s1287_s0 = inlined_call_operand.vmem [shape: bf16[2,16,128], index: 0, kind: input, shape index: {}]   ;;  %s1288_s1 = inlined_call_operand.vmem [shape: bf16[2,128,512], index: 1, kind: input, shape index: {}]   ;;  %s1289_s2 = inlined_call_operand.vmem [shape: f32[2,1,512], index: 2, kind: input, shape index: {}]   ;;  %s1290_s3 = inlined_call_operand.vmem [shape: bf16[2,16,512], index: 3, kind: input, shape index: {}]   ;;  %s1291_s4 = inlined_call_operand.vmem [shape: bf16[2,16,512], index: 4, kind: output, shape index: {}]  }
   0x1   :  { %s1205_s17 = smov 0  }
   0x2 LB: > { %s40_s18 = sadd.s32 1, %s1169_s16  ;;  %p1020_p0 = scmp.ge.s32.totalorder %s1173_s17, 1  ;;  %s1173_s17 = sphi %s1205_s17, %s14_s17   ;;  %s1169_s16 = sphi %s1203_s16, %s1293_s16   ;;  %s1165_s15 = sphi %s1201_s15, %s1292_s15  }
   0x3   : > { %p42_p1 = scmp.ge.s32.totalorder %s40_s18, 2  ;;  %p270_p2 = scmp.lt.s32.totalorder %s1173_s17, 3 }
   0x5   : > { %s1295_s18 = smov (%p42_p1, %s40_s18), 0  ;;  %p271_p3 = pnand %p1020_p0, %p270_p2 }
   0x6   : > { %p349_p4 = scmp.lt.s32.totalorder (!%p271_p3), %s1165_s15, 1  ;;  %v1175_v0 = vmov (!%p271_p3), 0   ;;  %v754_v34 = vlaneseq (!%p271_p3) }
   0x7   : > { %274 = sbr.rel (%p271_p3) target bundleno = 274 (0x112), region = 36  ;;  %671 = vmatprep.mubr.bf16.mxu0 (!%p271_p3), %v1175_v0  ;;  %714 = vmatprep.mubr.bf16.mxu1 (!%p271_p3), %v1175_v0 }
   0x8   : > { %v755_v35 = vshrl.u32 (!%p271_p3), %v754_v34, 7 }
   0xa   : > { %v756_v36 = vsub.s32 (!%p271_p3), 0, %v755_v35  ;;  %v764_v37 = vsub.s32 (!%p271_p3), 2, %v755_v35  ;;  %v760_v39 = vsub.s32 (!%p271_p3), 1, %v755_v35  ;;  %v768_v40 = vsub.s32 (!%p271_p3), 3, %v755_v35 }
   0xe   : > { %s1297_s15 = smov (!%p349_p4, %s1165_s15), 1 }
   0xf   : > { %s1070_s19 = sshll.u32 %s1297_s15, 8  ;;  %s1069_s23 = sshll.u32 %s1297_s15, 3 }
  0x10   : > { %s1225_s22 = scalar_lea.vmem %s1288_s1, %s1070_s19  ;;  %s359_s26 = scalar_lea.vmem %s1287_s0, %s1069_s23 }
  0x11   : > { %v1102_v1 = vld [vmem:[%s1225_s22 + $0x4] ss:$16 sps:$4 sm:$0xff]   ;;  %v1104_v2 = vld [vmem:[%s1225_s22 + $0xc] ss:$16 sps:$4 sm:$0xff]   ;;  %v1106_v3 = vld [vmem:[%s1225_s22] ss:$16 sps:$4 sm:$0xff]  }
  0x12   : > { %639 = vmatprep.subr.bf16.mxu0 %v1102_v1  ;;  %v1107_v4 = vld [vmem:[%s1225_s22 + $0x8] ss:$16 sps:$4 sm:$0xff]   ;;  %682 = vmatprep.subr.bf16.mxu1 %v1104_v2  ;;  %v1108_v5 = vld [vmem:[%s1225_s22 + $0x24] ss:$16 sps:$4 sm:$0xff]   ;;  %v1110_v6 = vld [vmem:[%s1225_s22 + $0x2c] ss:$16 sps:$4 sm:$0xff]  }
  0x13   : > { %640 = vmatpush1.bf16.msra.mxu0 %v1106_v3  ;;  %683 = vmatpush1.bf16.msra.mxu1 %v1107_v4  ;;  %v1112_v7 = vld [vmem:[%s1225_s22 + $0x20] ss:$16 sps:$4 sm:$0xff]   ;;  %v1113_v8 = vld [vmem:[%s1225_s22 + $0x28] ss:$16 sps:$4 sm:$0xff]   ;;  %v1114_v9 = vld [vmem:[%s1225_s22 + $0x44] ss:$16 sps:$4 sm:$0xff]  }
  0x14   : > { %641 = vmatprep.subr.bf16.mxu0 %v1108_v5  ;;  %684 = vmatprep.subr.bf16.mxu1 %v1110_v6  ;;  %v1116_v10 = vld [vmem:[%s1225_s22 + $0x4c] ss:$16 sps:$4 sm:$0xff]   ;;  %v1118_v11 = vld [vmem:[%s1225_s22 + $0x40] ss:$16 sps:$4 sm:$0xff]   ;;  %v1119_v12 = vld [vmem:[%s1225_s22 + $0x48] ss:$16 sps:$4 sm:$0xff]  }
  0x15   : > { %v1120_v13 = vld [vmem:[%s1225_s22 + $0x64] ss:$16 sps:$4 sm:$0xff]   ;;  %v1122_v14 = vld [vmem:[%s1225_s22 + $0x6c] ss:$16 sps:$4 sm:$0xff]   ;;  %v1124_v15 = vld [vmem:[%s1225_s22 + $0x60] ss:$16 sps:$4 sm:$0xff]  }
  0x16   : > { %v1125_v16 = vld [vmem:[%s1225_s22 + $0x68] ss:$16 sps:$4 sm:$0xff]   ;;  %v1126_v17 = vld [vmem:[%s1225_s22 + $0x84] ss:$16 sps:$4 sm:$0xff]   ;;  %v1128_v18 = vld [vmem:[%s1225_s22 + $0x8c] ss:$16 sps:$4 sm:$0xff]  }
  0x17   : > { %642 = vmatpush1.bf16.msra.mxu0 %v1112_v7  ;;  %685 = vmatpush1.bf16.msra.mxu1 %v1113_v8  ;;  %v1130_v19 = vld [vmem:[%s1225_s22 + $0x80] ss:$16 sps:$4 sm:$0xff]   ;;  %v1131_v20 = vld [vmem:[%s1225_s22 + $0x88] ss:$16 sps:$4 sm:$0xff]   ;;  %v1132_v21 = vld [vmem:[%s1225_s22 + $0xa4] ss:$16 sps:$4 sm:$0xff]  }
  0x18   : > { %643 = vmatprep.subr.bf16.mxu0 %v1114_v9  ;;  %686 = vmatprep.subr.bf16.mxu1 %v1116_v10  ;;  %v1134_v22 = vld [vmem:[%s1225_s22 + $0xac] ss:$16 sps:$4 sm:$0xff]   ;;  %v1136_v23 = vld [vmem:[%s1225_s22 + $0xa0] ss:$16 sps:$4 sm:$0xff]   ;;  %v1137_v24 = vld [vmem:[%s1225_s22 + $0xa8] ss:$16 sps:$4 sm:$0xff]  }
  0x19   : > { %v1138_v25 = vld [vmem:[%s1225_s22 + $0xc4] ss:$16 sps:$4 sm:$0xff]   ;;  %v1140_v26 = vld [vmem:[%s1225_s22 + $0xcc] ss:$16 sps:$4 sm:$0xff]   ;;  %v1142_v27 = vld [vmem:[%s1225_s22 + $0xc0] ss:$16 sps:$4 sm:$0xff]  }
  0x1a   : > { %v1143_v28 = vld [vmem:[%s1225_s22 + $0xc8] ss:$16 sps:$4 sm:$0xff]   ;;  %v1144_v29 = vld [vmem:[%s1225_s22 + $0xe4] ss:$16 sps:$4 sm:$0xff]   ;;  %v1146_v30 = vld [vmem:[%s1225_s22 + $0xec] ss:$16 sps:$4 sm:$0xff]  }
  0x1b   : > { %644 = vmatpush1.bf16.msra.mxu0 %v1118_v11  ;;  %687 = vmatpush1.bf16.msra.mxu1 %v1119_v12  ;;  %v1148_v31 = vld [vmem:[%s1225_s22 + $0xe0] ss:$16 sps:$4 sm:$0xff]   ;;  %v1149_v32 = vld [vmem:[%s1225_s22 + $0xe8] ss:$16 sps:$4 sm:$0xff]   ;;  %s1025_s27 = sshll.u32 %s1297_s15, 2  ;;  %s1071_s28 = sshll.u32 %s1297_s15, 5 }
  0x1c   : > { %645 = vmatprep.subr.bf16.mxu0 %v1120_v13  ;;  %688 = vmatprep.subr.bf16.mxu1 %v1122_v14  ;;  %v1150_v33 = vld [vmem:[%s359_s26] sm:$0xff]   ;;  %s384_s5 = scalar_lea.vmem %s1289_s2, %s1025_s27  ;;  %s399_s8 = scalar_lea.vmem %s1290_s3, %s1071_s28 }
  0x1d   : > { %v752_v38 = vld [vmem:[%s384_s5] sm:$0xf]  ;;  %v783_v42 = vld [vmem:[%s399_s8 + $0x8] sm:$0xff]  ;;  %v784_v47 = vld [vmem:[%s399_s8 + $0x10] sm:$0xff]  ;;  %s415_s11 = scalar_lea.vmem %s1291_s4, %s1071_s28 }
  0x1e   : > { %v782_v41 = vld [vmem:[%s399_s8] sm:$0xff]  ;;  %v757_v43 = vrot.slane %v752_v38, %v756_v36  ;;  %v765_v44 = vrot.slane %v752_v38, %v764_v37  ;;  %v761_v45 = vrot.slane %v752_v38, %v760_v39  ;;  %v769_v46 = vrot.slane %v752_v38, %v768_v40  ;;  %v785_v48 = vld [vmem:[%s399_s8 + $0x18] sm:$0xff] }
  0x1f   : > { %646 = vmatpush1.bf16.msra.mxu0 %v1124_v15  ;;  %689 = vmatpush1.bf16.msra.mxu1 %v1125_v16  ;;  %v786_v49 = vunpack.c.l.bf16 %v782_v41  ;;  %v788_v50 = vunpack.c.l.bf16 %v783_v42  ;;  %v787_v53 = vunpack.c.h.bf16 %v782_v41  ;;  %v789_v54 = vunpack.c.h.bf16 %v783_v42 }
  0x20   : > { %647 = vmatprep.subr.bf16.mxu0 %v1126_v17  ;;  %690 = vmatprep.subr.bf16.mxu1 %v1128_v18  ;;  %v790_v59 = vunpack.c.l.bf16 %v784_v47  ;;  %v792_v60 = vunpack.c.l.bf16 %v785_v48  ;;  %v791_v1 = vunpack.c.h.bf16 %v784_v47  ;;  %v793_v2 = vunpack.c.h.bf16 %v785_v48 }
  0x23   : > { %648 = vmatpush1.bf16.msra.mxu0 %v1130_v19  ;;  %691 = vmatpush1.bf16.msra.mxu1 %v1131_v20 }
  0x24   : > { %649 = vmatprep.subr.bf16.mxu0 %v1132_v21  ;;  %692 = vmatprep.subr.bf16.mxu1 %v1134_v22 }
  0x27   : > { %650 = vmatpush1.bf16.msra.mxu0 %v1136_v23  ;;  %693 = vmatpush1.bf16.msra.mxu1 %v1137_v24 }
  0x28   : > { %651 = vmatprep.subr.bf16.mxu0 %v1138_v25  ;;  %694 = vmatprep.subr.bf16.mxu1 %v1140_v26 }
  0x2b   : > { %652 = vmatpush1.bf16.msra.mxu0 %v1142_v27  ;;  %695 = vmatpush1.bf16.msra.mxu1 %v1143_v28 }
  0x2c   : > { %653 = vmatprep.subr.bf16.mxu0 %v1144_v29  ;;  %696 = vmatprep.subr.bf16.mxu1 %v1146_v30 }
  0x2f   : > { %654 = vmatpush1.bf16.msra.mxu0 %v1148_v31  ;;  %697 = vmatpush1.bf16.msra.mxu1 %v1149_v32 }
  0x32   : > { %672 = vmatmul.mubr.bf16.vlgmr.msra.gmra.mrb[0].mxu0 %v1150_v33  ;;  %715 = vmatmul.mubr.bf16.vlgmr.msra.gmra.mrb[0].mxu1 %v1150_v33 }
 0x105   : > { %v673_v51 = vpop.f32.mrb[0].mxu0  ;;  %v716_v52 = vpop.f32.mrb[0].mxu1 }
 0x106   : > { %v774_v55 = vadd.f32 %v757_v43, %v673_v51  ;;  %v776_v56 = vadd.f32 %v765_v44, %v716_v52  ;;  %v675_v57 = vpop.f32.mrb[1].mxu0  ;;  %v718_v58 = vpop.f32.mrb[1].mxu1 }
 0x107   : > { %v775_v61 = vadd.f32 %v761_v45, %v675_v57  ;;  %v777_v62 = vadd.f32 %v769_v46, %v718_v58  ;;  %v677_v63 = vpop.f32.mrb[2].mxu0  ;;  %v720_v0 = vpop.f32.mrb[2].mxu1 }
 0x108   : > { %v794_v3 = vadd.f32 %v786_v49, %v774_v55  ;;  %v796_v4 = vadd.f32 %v788_v50, %v776_v56  ;;  %v778_v5 = vadd.f32 %v757_v43, %v677_v63  ;;  %v780_v6 = vadd.f32 %v765_v44, %v720_v0  ;;  %v679_v7 = vpop.f32.mrb[3].mxu0  ;;  %v722_v8 = vpop.f32.mrb[3].mxu1 }
 0x109   : > { %v795_v9 = vadd.f32 %v787_v53, %v775_v61  ;;  %v797_v10 = vadd.f32 %v789_v54, %v777_v62  ;;  %v779_v11 = vadd.f32 %v761_v45, %v679_v7  ;;  %v781_v12 = vadd.f32 %v769_v46, %v722_v8 }
 0x10a   : > { %v802_v13 = vmax.f32 %v794_v3, 0.0  ;;  %v804_v14 = vmax.f32 %v796_v4, 0.0  ;;  %v798_v15 = vadd.f32 %v790_v59, %v778_v5  ;;  %v800_v16 = vadd.f32 %v792_v60, %v780_v6 }
 0x10b   : > { %v803_v17 = vmax.f32 %v795_v9, 0.0  ;;  %v805_v18 = vmax.f32 %v797_v10, 0.0  ;;  %v799_v19 = vadd.f32 %v791_v1, %v779_v11  ;;  %v801_v20 = vadd.f32 %v793_v2, %v781_v12 }
 0x10c   : > { %v806_v21 = vmax.f32 %v798_v15, 0.0  ;;  %v808_v22 = vmax.f32 %v800_v16, 0.0 }
 0x10d   : > { %v1073_v23 = vpack.c.bf16 %v803_v17, %v802_v13  ;;  %v1074_v24 = vpack.c.bf16 %v805_v18, %v804_v14  ;;  %v807_v25 = vmax.f32 %v799_v19, 0.0  ;;  %v809_v26 = vmax.f32 %v801_v20, 0.0 }
 0x10f   : > { %834 = vst [vmem:[%s415_s11] sm:$0xff] %v1073_v23  ;;  %835 = vst [vmem:[%s415_s11 + $0x8] sm:$0xff] %v1074_v24  ;;  %v1075_v27 = vpack.c.bf16 %v807_v25, %v806_v21  ;;  %v1076_v28 = vpack.c.bf16 %v809_v26, %v808_v22 }
 0x111   : > { %836 = vst [vmem:[%s415_s11 + $0x10] sm:$0xff] %v1075_v27  ;;  %837 = vst [vmem:[%s415_s11 + $0x18] sm:$0xff] %v1076_v28 }
 0x112 PF: > { %s14_s17 = sadd.s32 1, %s1173_s17   ;;  %s1292_s15 = smov %s1169_s16 }
 0x113   : > { %p11_p5 = scmp.ge.s32.totalorder %s14_s17, 4   ;;  %s1293_s16 = smov %s1295_s18 }
 0x115   :  { %13 = sbr.rel (!%p11_p5) target bundleno = 2 (0x2), region = 83 }

// kernel: _forward_impl.207
= control target key start
LH: loop header
LB: loop body
LE: loop exit
PB: predicated region body
PF: predicated region fallthrough
CT: control target
= control target key end

     0   :  { %s1078_s12 = smov 0   ;;  %s1080_s13 = smov 0   ;;  %s1157_s0 = inlined_call_operand.vmem [shape: bf16[2,16,512], index: 0, kind: input, shape index: {}]   ;;  %s1158_s1 = inlined_call_operand.vmem [shape: bf16[2,512,128], index: 1, kind: input, shape index: {}]   ;;  %s1159_s2 = inlined_call_operand.vmem [shape: f32[2,1,128], index: 2, kind: input, shape index: {}]   ;;  %s1160_s3 = inlined_call_operand.vmem [shape: bf16[2,16,128], index: 3, kind: output, shape index: {}]  }
   0x1   :  { %s1082_s14 = smov 0  }
   0x2 LB: > { %s39_s15 = sadd.s32 1, %s1052_s13  ;;  %p870_p0 = scmp.ge.s32.totalorder %s1056_s14, 1  ;;  %s1056_s14 = sphi %s1082_s14, %s13_s14   ;;  %s1052_s13 = sphi %s1080_s13, %s1162_s13   ;;  %s1048_s12 = sphi %s1078_s12, %s1161_s12  }
   0x3   : > { %p41_p1 = scmp.ge.s32.totalorder %s39_s15, 2  ;;  %p217_p2 = scmp.lt.s32.totalorder %s1056_s14, 3 }
   0x5   : > { %s1164_s15 = smov (%p41_p1, %s39_s15), 0  ;;  %p218_p3 = pnand %p870_p0, %p217_p2 }
   0x6   : > { %p277_p4 = scmp.lt.s32.totalorder (!%p218_p3), %s1048_s12, 1 }
   0x7   : > { %221 = sbr.rel (%p218_p3) target bundleno = 278 (0x116), region = 32 }
   0xe   : > { %s1166_s12 = smov (!%p277_p4, %s1048_s12), 1 }
   0xf   : > { %s919_s16 = sshll.u32 %s1166_s12, 8  ;;  %s918_s20 = sshll.u32 %s1166_s12, 5 }
  0x10   : > { %s1102_s19 = scalar_lea.vmem %s1158_s1, %s919_s16  ;;  %s288_s23 = scalar_lea.vmem %s1157_s0, %s918_s20 }
  0x11   : > { %v996_v0 = vld [vmem:[%s1102_s19 + $0x40] sm:$0xff]   ;;  %v1000_v4 = vld [vmem:[%s1102_s19 + $0x48] sm:$0xff]   ;;  %v1004_v8 = vld [vmem:[%s1102_s19 + $0x50] sm:$0xff]   ;;  %s309_s26 = scalar_lea.vmem %s1159_s2, %s1166_s12  ;;  %s920_s27 = sshll.u32 %s1166_s12, 3 }
  0x12   : > { %v997_v1 = vld [vmem:[%s1102_s19 + $0xc0] sm:$0xff]   ;;  %928 = vmatprep.subr.bf16.mxu0 %v996_v0  ;;  %v1001_v5 = vld [vmem:[%s1102_s19 + $0xc8] sm:$0xff]   ;;  %v1005_v9 = vld [vmem:[%s1102_s19 + $0xd0] sm:$0xff]   ;;  %s321_s30 = scalar_lea.vmem %s1160_s3, %s920_s27 }
  0x13   : > { %v998_v2 = vld [vmem:[%s1102_s19] sm:$0xff]   ;;  %950 = vmatprep.subr.bf16.mxu1 %v997_v1  ;;  %v1002_v6 = vld [vmem:[%s1102_s19 + $0x8] sm:$0xff]   ;;  %v1006_v10 = vld [vmem:[%s1102_s19 + $0x10] sm:$0xff]  }
  0x14   : > { %v999_v3 = vld [vmem:[%s1102_s19 + $0x80] sm:$0xff]   ;;  %929 = vmatpush3.bf16.msra.mxu0 %v998_v2  ;;  %v1003_v7 = vld [vmem:[%s1102_s19 + $0x88] sm:$0xff]   ;;  %v1007_v11 = vld [vmem:[%s1102_s19 + $0x90] sm:$0xff]  }
  0x15   : > { %951 = vmatpush3.bf16.msra.mxu1 %v999_v3  ;;  %930 = vmatprep.subr.bf16.mxu0 %v1000_v4  ;;  %v1008_v12 = vld [vmem:[%s1102_s19 + $0x58] sm:$0xff]   ;;  %v1012_v16 = vld [vmem:[%s1102_s19 + $0x60] sm:$0xff]   ;;  %v1016_v20 = vld [vmem:[%s1102_s19 + $0x68] sm:$0xff]  }
  0x16   : > { %952 = vmatprep.subr.bf16.mxu1 %v1001_v5  ;;  %v1009_v13 = vld [vmem:[%s1102_s19 + $0xd8] sm:$0xff]   ;;  %v1013_v17 = vld [vmem:[%s1102_s19 + $0xe0] sm:$0xff]   ;;  %v1017_v21 = vld [vmem:[%s1102_s19 + $0xe8] sm:$0xff]  }
  0x17   : > { %v1010_v14 = vld [vmem:[%s1102_s19 + $0x18] sm:$0xff]   ;;  %v1014_v18 = vld [vmem:[%s1102_s19 + $0x20] sm:$0xff]   ;;  %v1018_v22 = vld [vmem:[%s1102_s19 + $0x28] sm:$0xff]  }
  0x18   : > { %931 = vmatpush3.bf16.msra.mxu0 %v1002_v6  ;;  %v1011_v15 = vld [vmem:[%s1102_s19 + $0x98] sm:$0xff]   ;;  %v1015_v19 = vld [vmem:[%s1102_s19 + $0xa0] sm:$0xff]   ;;  %v1019_v23 = vld [vmem:[%s1102_s19 + $0xa8] sm:$0xff]  }
  0x19   : > { %953 = vmatpush3.bf16.msra.mxu1 %v1003_v7  ;;  %932 = vmatprep.subr.bf16.mxu0 %v1004_v8  ;;  %v1020_v24 = vld [vmem:[%s1102_s19 + $0x70] sm:$0xff]   ;;  %v1024_v28 = vld [vmem:[%s1102_s19 + $0x78] sm:$0xff]   ;;  %v913_v45 = vld [vmem:[%s309_s26] ss:$0 sm:$0xff] }
  0x1a   : > { %954 = vmatprep.subr.bf16.mxu1 %v1005_v9  ;;  %v1021_v25 = vld [vmem:[%s1102_s19 + $0xf0] sm:$0xff]   ;;  %v1025_v29 = vld [vmem:[%s1102_s19 + $0xf8] sm:$0xff]  }
  0x1b   : > { %v1022_v26 = vld [vmem:[%s1102_s19 + $0x30] sm:$0xff]   ;;  %v1026_v30 = vld [vmem:[%s1102_s19 + $0x38] sm:$0xff]  }
  0x1c   : > { %933 = vmatpush3.bf16.msra.mxu0 %v1006_v10  ;;  %v1023_v27 = vld [vmem:[%s1102_s19 + $0xb0] sm:$0xff]   ;;  %v1027_v31 = vld [vmem:[%s1102_s19 + $0xb8] sm:$0xff]  }
  0x1d   : > { %955 = vmatpush3.bf16.msra.mxu1 %v1007_v11  ;;  %934 = vmatprep.subr.bf16.mxu0 %v1008_v12  ;;  %v1028_v32 = vld [vmem:[%s288_s23] ss:$16 sps:$4 sm:$0xff]   ;;  %v1030_v33 = vld [vmem:[%s288_s23 + $0x4] ss:$16 sps:$4 sm:$0xff]   ;;  %v1031_v34 = vld [vmem:[%s288_s23 + $0x8] ss:$16 sps:$4 sm:$0xff]  }
  0x1e   : > { %956 = vmatprep.subr.bf16.mxu1 %v1009_v13  ;;  %v1033_v35 = vld [vmem:[%s288_s23 + $0xc] ss:$16 sps:$4 sm:$0xff]   ;;  %644 = vmatprep.mubr.bf16.mxu0 %v1030_v33 }
  0x1f   : > { %685 = vmatprep.mubr.bf16.mxu1 %v1033_v35 }
  0x20   : > { %935 = vmatpush3.bf16.msra.mxu0 %v1010_v14 }
  0x21   : > { %957 = vmatpush3.bf16.msra.mxu1 %v1011_v15  ;;  %936 = vmatprep.subr.bf16.mxu0 %v1012_v16 }
  0x22   : > { %958 = vmatprep.subr.bf16.mxu1 %v1013_v17 }
  0x24   : > { %937 = vmatpush3.bf16.msra.mxu0 %v1014_v18 }
  0x25   : > { %959 = vmatpush3.bf16.msra.mxu1 %v1015_v19  ;;  %938 = vmatprep.subr.bf16.mxu0 %v1016_v20 }
  0x26   : > { %960 = vmatprep.subr.bf16.mxu1 %v1017_v21 }
  0x28   : > { %939 = vmatpush3.bf16.msra.mxu0 %v1018_v22 }
  0x29   : > { %961 = vmatpush3.bf16.msra.mxu1 %v1019_v23  ;;  %940 = vmatprep.subr.bf16.mxu0 %v1020_v24 }
  0x2a   : > { %962 = vmatprep.subr.bf16.mxu1 %v1021_v25 }
  0x2c   : > { %941 = vmatpush3.bf16.msra.mxu0 %v1022_v26 }
  0x2d   : > { %963 = vmatpush3.bf16.msra.mxu1 %v1023_v27  ;;  %942 = vmatprep.subr.bf16.mxu0 %v1024_v28 }
  0x2e   : > { %964 = vmatprep.subr.bf16.mxu1 %v1025_v29 }
  0x30   : > { %943 = vmatpush3.bf16.msra.mxu0 %v1026_v30 }
  0x31   : > { %965 = vmatpush3.bf16.msra.mxu1 %v1027_v31 }
  0x33   : > { %645 = vmatmul.mubr.bf16.vlgmr.msra.gmra.mrb[0].mxu0 %v1028_v32 }
  0x34   : > { %686 = vmatmul.mubr.bf16.vlgmr.msra.gmra.mrb[0].mxu1 %v1031_v34 }
 0x106   : > { %v944_v36 = vpop.f32.mrb[0].mxu0 }
 0x107   : > { %v966_v37 = vpop.f32.mrb[0].mxu1  ;;  %v945_v38 = vpop.f32.mrb[1].mxu0 }
 0x108   : > { %v946_v39 = vadd.f32 %v945_v38, %v944_v36  ;;  %v967_v40 = vpop.f32.mrb[1].mxu1  ;;  %v947_v41 = vpop.f32.mrb[2].mxu0 }
 0x109   : > { %v968_v42 = vadd.f32 %v967_v40, %v966_v37  ;;  %v969_v43 = vpop.f32.mrb[2].mxu1  ;;  %v948_v44 = vpop.f32.mrb[3].mxu0 }
 0x10a   : > { %v949_v46 = vadd.f32 %v948_v44, %v947_v41  ;;  %v970_v47 = vpop.f32.mrb[3].mxu1 }
 0x10b   : > { %v688_v48 = vadd.f32 %v968_v42, %v946_v39  ;;  %v971_v49 = vadd.f32 %v970_v47, %v969_v43 }
 0x10d   : > { %v710_v50 = vadd.f32 %v913_v45, %v688_v48  ;;  %v691_v51 = vadd.f32 %v971_v49, %v949_v46 }
 0x10f   : > { %v711_v52 = vadd.f32 %v913_v45, %v691_v51  ;;  %v712_v53 = vmax.f32 %v710_v50, 0.0 }
 0x111   : > { %v713_v54 = vmax.f32 %v711_v52, 0.0 }
 0x113   : > { %v926_v55 = vpack.c.bf16 %v713_v54, %v712_v53 }
 0x115   : > { %927 = vst [vmem:[%s321_s30] sm:$0xff] %v926_v55  }
 0x116 PF: > { %s13_s14 = sadd.s32 1, %s1056_s14   ;;  %s1161_s12 = smov %s1052_s13 }
 0x117   : > { %p10_p5 = scmp.ge.s32.totalorder %s13_s14, 4   ;;  %s1162_s13 = smov %s1164_s15 }
 0x119   :  { %12 = sbr.rel (!%p10_p5) target bundleno = 2 (0x2), region = 76 }

// kernel: squeeze.9
= control target key start
LH: loop header
LB: loop body
LE: loop exit
PB: predicated region body
PF: predicated region fallthrough
CT: control target
= control target key end

     0   :  { %v171_v9 = vmov 0.0   ;;  %s212_s0 = inlined_call_operand.vmem [shape: bf16[1,8,512], index: 0, kind: input, shape index: {}]   ;;  %s213_s1 = inlined_call_operand.vmem [shape: bf16[2,4,512], index: 1, kind: output, shape index: {}]  }
   0x1   :  { %v169_v0 = vld [vmem:[%s212_s0 + $0x8] sm:$0xff]   ;;  %v166_v1 = vld [vmem:[%s212_s0] sm:$0xff]  }
   0x2   :  { %v163_v2 = vunpack.c.l.bf16 %v169_v0  ;;  %v164_v3 = vunpack.c.h.bf16 %v169_v0  ;;  %v167_v4 = vunpack.c.l.bf16 %v166_v1  ;;  %v168_v5 = vunpack.c.h.bf16 %v166_v1 }
   0x4   :  { %66 = vst [vmem:[#allocation0] sm:$0xf] %v167_v4   ;;  %68 = vst [vmem:[#allocation0 + $0x1c] sm:$0xf0] %v167_v4  }
   0x5   :  { %72 = vst [vmem:[#allocation0 + $0x8] sm:$0xf] %v168_v5   ;;  %74 = vst [vmem:[#allocation0 + $0x24] sm:$0xf0] %v168_v5  }
   0x6   :  { %78 = vst [vmem:[#allocation0 + $0x10] sm:$0xf] %v163_v2   ;;  %80 = vst [vmem:[#allocation0 + $0x2c] sm:$0xf0] %v163_v2  }
   0x7   :  { %84 = vst [vmem:[#allocation0 + $0x18] sm:$0xf] %v164_v3   ;;  %86 = vst [vmem:[#allocation0 + $0x34] sm:$0xf0] %v164_v3  }
   0xb   :  { %v91_v6 = vld [vmem:[#allocation0] sm:$0xf] }
   0xc   :  { %v96_v7 = vld [vmem:[#allocation0 + $0x8] sm:$0xf]  ;;  %v92_v10 = vpack.c.bf16 %v171_v9, %v91_v6  ;;  %v116_v14 = vld [vmem:[#allocation0 + $0x20] sm:$0xf] }
   0xd   :  { %v102_v8 = vld [vmem:[#allocation0 + $0x10] sm:$0xf]  ;;  %v97_v11 = vpack.c.bf16 %v171_v9, %v96_v7  ;;  %v123_v15 = vld [vmem:[#allocation0 + $0x28] sm:$0xf]  ;;  %v117_v17 = vpack.c.bf16 %v171_v9, %v116_v14 }
   0xe   :  { %v103_v12 = vpack.c.bf16 %v171_v9, %v102_v8  ;;  %v109_v13 = vld [vmem:[#allocation0 + $0x18] sm:$0xf]  ;;  %v124_v18 = vpack.c.bf16 %v171_v9, %v123_v15  ;;  %v130_v19 = vld [vmem:[#allocation0 + $0x30] sm:$0xf]  ;;  %94 = vst [vmem:[%s213_s1] sm:$0x3] %v92_v10 }
   0xf   :  { %v110_v16 = vpack.c.bf16 %v171_v9, %v109_v13  ;;  %v137_v20 = vld [vmem:[#allocation0 + $0x38] sm:$0xf]  ;;  %154 = vst [vmem:[%s213_s1 + $0x2] sm:$0x3] %v97_v11  ;;  %v131_v21 = vpack.c.bf16 %v171_v9, %v130_v19  ;;  %157 = vst [vmem:[%s213_s1 + $0x8] sm:$0x3] %v117_v17 }
  0x10   :  { %155 = vst [vmem:[%s213_s1 + $0x4] sm:$0x3] %v103_v12  ;;  %v138_v22 = vpack.c.bf16 %v171_v9, %v137_v20  ;;  %158 = vst [vmem:[%s213_s1 + $0xa] sm:$0x3] %v124_v18 }
  0x11   :  { %156 = vst [vmem:[%s213_s1 + $0x6] sm:$0x3] %v110_v16  ;;  %159 = vst [vmem:[%s213_s1 + $0xc] sm:$0x3] %v131_v21 }
  0x12   :  { %160 = vst [vmem:[%s213_s1 + $0xe] sm:$0x3] %v138_v22 }

// kernel: _forward_impl.213
= control target key start
LH: loop header
LB: loop body
LE: loop exit
PB: predicated region body
PF: predicated region fallthrough
CT: control target
= control target key end

     0   :  { %v107_v0 = vlaneseq  ;;  %vm28_vm0 = vcmask 1043456   ;;  %v267_v3 = vmov 1983009808   ;;  %vm141_vm1 = vcmask 1041409   ;;  %s377_s0 = inlined_call_operand.vmem [shape: bf16[2,4,512], index: 0, kind: input, shape index: {}]   ;;  %s378_s1 = inlined_call_operand.vmem [shape: f32[2,512], index: 1, kind: output, shape index: {0}]   ;;  %s379_s2 = inlined_call_operand.vmem [shape: f32[2,512], index: 2, kind: output, shape index: {1}]  }
   0x1   :  { %v10_v1 = vld [vmem:[%s377_s0] sm:$0xff]  ;;  %v11_v2 = vld [vmem:[%s377_s0 + $0x8] sm:$0xff]  ;;  %v289_v4 = vunpack.c.l.s4 %v267_v3  ;;  %vm143_vm2 = vcmask 1043459   ;;  %vm145_vm3 = vcmask 1045509   ;;  %vm147_vm4 = vcmask 1047559  }
   0x2   :  { %v291_v5 = vunpack.c.l.bf16 %v10_v1  ;;  %v293_v6 = vunpack.c.h.bf16 %v10_v1  ;;  %v295_v7 = vunpack.c.l.bf16 %v11_v2  ;;  %v297_v8 = vunpack.c.h.bf16 %v11_v2 }
   0x3   :  { %v106_v9 = vunpack.c.0.s8 %v289_v4  ;;  %v300_v10 = vshrl.u32 %v107_v0, 7 }
   0x4   :  { %v304_v11 = vcombine.high %v291_v5, %v291_v5  ;;  %v308_v12 = vcombine.high %v293_v6, %v293_v6  ;;  %v312_v13 = vcombine.high %v295_v7, %v295_v7  ;;  %v316_v14 = vcombine.high %v297_v8, %v297_v8 }
   0x5   :  { %v29_v15 = vsel %vm28_vm0, %v291_v5, 0.0  ;;  %v43_v16 = vsel %vm28_vm0, %v293_v6, 0.0  ;;  %v57_v17 = vsel %vm28_vm0, %v295_v7, 0.0  ;;  %v71_v18 = vsel %vm28_vm0, %v297_v8, 0.0 }
   0x6   :  { %v30_v19 = vrot.slane %v29_v15, 4  ;;  %v36_v20 = vsel %vm28_vm0, %v304_v11, 0.0  ;;  %v44_v21 = vrot.slane %v43_v16, 4  ;;  %v50_v22 = vsel %vm28_vm0, %v308_v12, 0.0 }
   0x7   :  { %v37_v23 = vrot.slane %v36_v20, 4  ;;  %v51_v24 = vrot.slane %v50_v22, 4  ;;  %v58_v25 = vrot.slane %v57_v17, 4  ;;  %v64_v26 = vsel %vm28_vm0, %v312_v13, 0.0 }
   0x8   :  { %v31_v27 = vadd.f32 %v30_v19, %v29_v15  ;;  %v45_v28 = vadd.f32 %v44_v21, %v43_v16  ;;  %v65_v29 = vrot.slane %v64_v26, 4  ;;  %v72_v30 = vrot.slane %v71_v18, 4 }
   0x9   :  { %v38_v31 = vadd.f32 %v37_v23, %v36_v20  ;;  %v52_v32 = vadd.f32 %v51_v24, %v50_v22  ;;  %v59_v33 = vadd.f32 %v58_v25, %v57_v17  ;;  %v78_v34 = vsel %vm28_vm0, %v316_v14, 0.0 }
   0xa   :  { %v32_v35 = vrot.slane %v31_v27, 2  ;;  %v46_v36 = vrot.slane %v45_v28, 2  ;;  %v66_v37 = vadd.f32 %v65_v29, %v64_v26  ;;  %v73_v38 = vadd.f32 %v72_v30, %v71_v18 }
   0xb   :  { %v39_v39 = vrot.slane %v38_v31, 2  ;;  %v53_v40 = vrot.slane %v52_v32, 2  ;;  %v60_v41 = vrot.slane %v59_v33, 2  ;;  %v79_v42 = vrot.slane %v78_v34, 4 }
   0xc   :  { %v33_v43 = vadd.f32 %v32_v35, %v31_v27  ;;  %v47_v44 = vadd.f32 %v46_v36, %v45_v28  ;;  %v67_v45 = vrot.slane %v66_v37, 2  ;;  %v74_v46 = vrot.slane %v73_v38, 2 }
   0xd   :  { %v40_v47 = vadd.f32 %v39_v39, %v38_v31  ;;  %v54_v48 = vadd.f32 %v53_v40, %v52_v32  ;;  %v61_v49 = vadd.f32 %v60_v41, %v59_v33  ;;  %v80_v50 = vadd.f32 %v79_v42, %v78_v34 }
   0xe   :  { %v34_v51 = vrot.slane %v33_v43, 1  ;;  %v48_v52 = vrot.slane %v47_v44, 1  ;;  %v68_v53 = vadd.f32 %v67_v45, %v66_v37  ;;  %v75_v54 = vadd.f32 %v74_v46, %v73_v38 }
   0xf   :  { %v41_v55 = vrot.slane %v40_v47, 1  ;;  %v55_v56 = vrot.slane %v54_v48, 1  ;;  %v62_v57 = vrot.slane %v61_v49, 1  ;;  %v81_v58 = vrot.slane %v80_v50, 2 }
  0x10   :  { %v35_v59 = vadd.f32 %v34_v51, %v33_v43  ;;  %v49_v60 = vadd.f32 %v48_v52, %v47_v44  ;;  %v69_v61 = vrot.slane %v68_v53, 1  ;;  %v76_v62 = vrot.slane %v75_v54, 1 }
  0x11   :  { %v42_v63 = vadd.f32 %v41_v55, %v40_v47  ;;  %v56_v0 = vadd.f32 %v55_v56, %v54_v48  ;;  %v63_v1 = vadd.f32 %v62_v57, %v61_v49  ;;  %v82_v2 = vadd.f32 %v81_v58, %v80_v50 }
  0x12   :  { %v70_v3 = vadd.f32 %v69_v61, %v68_v53  ;;  %v77_v15 = vadd.f32 %v76_v62, %v75_v54  ;;  %v86_v16 = vmul.f32 0.25, %v35_v59  ;;  %v88_v17 = vmul.f32 0.25, %v49_v60 }
  0x13   :  { %v83_v18 = vrot.slane %v82_v2, 1  ;;  %v87_v19 = vmul.f32 0.25, %v42_v63  ;;  %v89_v20 = vmul.f32 0.25, %v56_v0  ;;  %v90_v21 = vmul.f32 0.25, %v63_v1 }
  0x14   :  { %v91_v22 = vmul.f32 0.25, %v70_v3  ;;  %v92_v23 = vmul.f32 0.25, %v77_v15  ;;  %v337_v24 = vsub.s32 %v106_v9, %v300_v10  ;;  %v151_v25 = vsel %vm28_vm0, %v291_v5, -inf }
  0x15   :  { %v84_v26 = vadd.f32 %v83_v18, %v82_v2  ;;  %v102_v27 = vcombine.low %v86_v16, %v87_v19  ;;  %v103_v28 = vcombine.low %v88_v17, %v89_v20  ;;  %v152_v29 = vrot.slane %v151_v25, 4 }
  0x16   :  { %v119_v30 = vcombine.low %v90_v21, %v91_v22  ;;  %v158_v31 = vsel %vm28_vm0, %v304_v11, -inf  ;;  %v165_v32 = vsel %vm28_vm0, %v293_v6, -inf  ;;  %v172_v33 = vsel %vm28_vm0, %v308_v12, -inf }
  0x17   :  { %v93_v4 = vmul.f32 0.25, %v84_v26  ;;  %v110_v9 = vrot.slane %v102_v27, %v337_v24  ;;  %v153_v10 = vmax.f32 %v151_v25, %v152_v29  ;;  %v117_v5 = vrot.slane %v103_v28, %v337_v24 }
  0x18   :  { %v159_v34 = vrot.slane %v158_v31, 4  ;;  %v166_v35 = vrot.slane %v165_v32, 4  ;;  %v173_v36 = vrot.slane %v172_v33, 4  ;;  %v127_v38 = vrot.slane %v119_v30, %v337_v24 }
  0x19   :  { %v120_v37 = vcombine.low %v92_v23, %v93_v4  ;;  %v154_v11 = vrot.slane %v153_v10, 2  ;;  %v179_v6 = vsel %vm28_vm0, %v295_v7, -inf  ;;  %v186_v43 = vsel %vm28_vm0, %v312_v13, -inf }
  0x1a   :  { %v160_v39 = vmax.f32 %v158_v31, %v159_v34  ;;  %v167_v40 = vmax.f32 %v165_v32, %v166_v35  ;;  %v174_v12 = vmax.f32 %v172_v33, %v173_v36  ;;  %v180_v41 = vrot.slane %v179_v6, 4 }
  0x1b   :  { %v134_v42 = vrot.slane %v120_v37, %v337_v24  ;;  %v193_v44 = vsel %vm28_vm0, %v297_v8, -inf  ;;  %v118_v49 = vcombine.low %v110_v9, %v117_v5  ;;  %v187_v7 = vrot.slane %v186_v43, 4 }
  0x1c   :  { %v161_v45 = vrot.slane %v160_v39, 2  ;;  %v168_v46 = vrot.slane %v167_v40, 2  ;;  %v175_v47 = vrot.slane %v174_v12, 2  ;;  %v181_v48 = vmax.f32 %v179_v6, %v180_v41 }
  0x1d   :  { %v135_v50 = vcombine.low %v127_v38, %v134_v42  ;;  %v194_v51 = vrot.slane %v193_v44, 4  ;;  %v155_v52 = vmax.f32 %v153_v10, %v154_v11  ;;  %v188_v58 = vmax.f32 %v186_v43, %v187_v7 }
  0x1e   :  { %v162_v53 = vmax.f32 %v160_v39, %v161_v45  ;;  %v169_v54 = vmax.f32 %v167_v40, %v168_v46  ;;  %v182_v55 = vrot.slane %v181_v48, 2  ;;  %v176_v57 = vmax.f32 %v174_v12, %v175_v47 }
  0x1f   :  { %v140_v56 = vrot.slane %v135_v50, 7  ;;  %v195_v59 = vmax.f32 %v193_v44, %v194_v51  ;;  %v189_v60 = vrot.slane %v188_v58, 2  ;;  %v200_v62 = vsel %vm28_vm0, %v316_v14, -inf }
  0x20   :  { %v183_v13 = vmax.f32 %v181_v48, %v182_v55  ;;  %v156_v0 = vrot.slane %v155_v52, 1  ;;  %v163_v1 = vrot.slane %v162_v53, 1  ;;  %v170_v3 = vrot.slane %v169_v54, 1 }
  0x21   :  { %v142_v8 = vsel %vm141_vm1, %v140_v56, %v118_v49  ;;  %v196_v61 = vrot.slane %v195_v59, 2  ;;  %v177_v15 = vrot.slane %v176_v57, 1  ;;  %v190_v16 = vmax.f32 %v188_v58, %v189_v60 }
  0x22   :  { %v144_v63 = vsel %vm143_vm2, %v140_v56, %v142_v8  ;;  %v184_v18 = vrot.slane %v183_v13, 1  ;;  %v201_v20 = vrot.slane %v200_v62, 4  ;;  %v157_v22 = vmax.f32 %v155_v52, %v156_v0 }
  0x23   :  { %v146_v2 = vsel %vm145_vm3, %v140_v56, %v144_v63  ;;  %v197_v19 = vmax.f32 %v195_v59, %v196_v61  ;;  %v191_v21 = vrot.slane %v190_v16, 1  ;;  %v164_v23 = vmax.f32 %v162_v53, %v163_v1 }
  0x24   :  { %v148_v17 = vsel %vm147_vm4, %v140_v56, %v146_v2  ;;  %v202_v14 = vmax.f32 %v200_v62, %v201_v20  ;;  %v171_v25 = vmax.f32 %v169_v54, %v170_v3  ;;  %v178_v26 = vmax.f32 %v176_v57, %v177_v15 }
  0x25   :  { %150 = vst [vmem:[%s378_s1] sm:$0xff] %v148_v17  ;;  %v185_v27 = vmax.f32 %v183_v13, %v184_v18  ;;  %v192_v28 = vmax.f32 %v190_v16, %v191_v21  ;;  %v198_v29 = vrot.slane %v197_v19, 1  ;;  %v215_v32 = vcombine.low %v157_v22, %v164_v23 }
  0x26   :  { %v203_v30 = vrot.slane %v202_v14, 2  ;;  %v216_v9 = vcombine.low %v171_v25, %v178_v26 }
  0x27   :  { %v199_v33 = vmax.f32 %v197_v19, %v198_v29  ;;  %v232_v10 = vcombine.low %v185_v27, %v192_v28  ;;  %v223_v34 = vrot.slane %v215_v32, %v337_v24 }
  0x28   :  { %v204_v31 = vmax.f32 %v202_v14, %v203_v30  ;;  %v230_v35 = vrot.slane %v216_v9, %v337_v24 }
  0x29   :  { %v240_v37 = vrot.slane %v232_v10, %v337_v24 }
  0x2a   :  { %v205_v4 = vrot.slane %v204_v31, 1  ;;  %v231_v11 = vcombine.low %v223_v34, %v230_v35 }
  0x2c   :  { %v206_v5 = vmax.f32 %v204_v31, %v205_v4 }
  0x2e   :  { %v233_v36 = vcombine.low %v199_v33, %v206_v5 }
  0x30   :  { %v247_v38 = vrot.slane %v233_v36, %v337_v24 }
  0x32   :  { %v248_v6 = vcombine.low %v240_v37, %v247_v38 }
  0x34   :  { %v251_v39 = vrot.slane %v248_v6, 7 }
  0x36   :  { %v252_v40 = vsel %vm141_vm1, %v251_v39, %v231_v11 }
  0x37   :  { %v253_v12 = vsel %vm143_vm2, %v251_v39, %v252_v40 }
  0x38   :  { %v254_v41 = vsel %vm145_vm3, %v251_v39, %v253_v12 }
  0x39   :  { %v255_v42 = vsel %vm147_vm4, %v251_v39, %v254_v41 }
  0x3a   :  { %257 = vst [vmem:[%s379_s2] sm:$0xff] %v255_v42 }

// kernel: _forward_impl.215
= control target key start
LH: loop header
LB: loop body
LE: loop exit
PB: predicated region body
PF: predicated region fallthrough
CT: control target
= control target key end

     0   :  { %v214_v4 = vmov 1966171168   ;;  %v31_v6 = vlaneseq  ;;  %v215_v16 = vmov 1983009808   ;;  %vm146_vm0 = vcmask 1043456   ;;  %s284_s1 = inlined_call_operand.vmem [shape: f32[2,512], index: 1, kind: input, shape index: {}]   ;;  %s285_s0 = inlined_call_operand.vmem [shape: bf16[2,4,512], index: 0, kind: input, shape index: {}]   ;;  %s286_s2 = inlined_call_operand.vmem [shape: bf16[2,4,512], index: 2, kind: output, shape index: {0}]   ;;  %s287_s4 = inlined_call_operand.vmem [shape: f32[2,4,1], index: 4, kind: output, shape index: {2}]   ;;  %s288_s3 = inlined_call_operand.vmem [shape: f32[2,4,1], index: 3, kind: output, shape index: {1}]  }
   0x1   :  { %v20_v0 = vld [vmem:[%s284_s1] sm:$0xff]  ;;  %v29_v5 = vunpack.c.l.s4 %v214_v4  ;;  %v111_v17 = vunpack.c.l.s4 %v215_v16  ;;  %v15_v21 = vld [vmem:[%s285_s0 + $0x8] sm:$0xff]  ;;  %vm168_vm1 = vcmask 3072  }
   0x2   :  { %v203_v1 = vmul.f32 -1.442695, %v20_v0  ;;  %v32_v8 = vshrl.u32 %v31_v6, 7  ;;  %v14_v10 = vld [vmem:[%s285_s0] sm:$0xff]  ;;  %v18_v30 = vunpack.c.l.bf16 %v15_v21  ;;  %v19_v31 = vunpack.c.h.bf16 %v15_v21 }
   0x3   :  { %v30_v7 = vunpack.c.0.s8 %v29_v5  ;;  %v16_v19 = vunpack.c.l.bf16 %v14_v10  ;;  %v17_v20 = vunpack.c.h.bf16 %v14_v10  ;;  %v112_v26 = vunpack.c.0.s8 %v111_v17 }
   0x4   :  { %210 = vpow2.f32 %v203_v1  ;;  %v38_v11 = vsub.s32 0, %v32_v8  ;;  %v42_v12 = vsub.s32 1, %v32_v8  ;;  %v46_v13 = vsub.s32 2, %v32_v8 }
   0x5   :  { %v33_v9 = vsub.s32 %v30_v7, %v32_v8  ;;  %v50_v14 = vsub.s32 3, %v32_v8  ;;  %v115_v38 = vsub.s32 %v112_v26, %v32_v8 }
   0xe   :  { %v211_v2 = vpop.eup %210 }
   0xf   :  { %v24_v3 = vadd.f32 1.0, %v211_v2 }
  0x11   :  { %212 = vrcp.f32 %v24_v3 }
  0x1b   :  { %v213_v15 = vpop.eup %212 }
  0x1c   :  { %v34_v18 = vrot.slane %v213_v15, %v33_v9 }
  0x1e   :  { %v39_v22 = vrot.slane %v34_v18, %v38_v11  ;;  %v43_v23 = vrot.slane %v34_v18, %v42_v12  ;;  %v47_v24 = vrot.slane %v34_v18, %v46_v13  ;;  %v51_v25 = vrot.slane %v34_v18, %v50_v14 }
  0x1f   :  { %v35_v27 = vcombine.high %v34_v18, %v34_v18 }
  0x20   :  { %v68_v28 = vcombine.low %v39_v22, %v43_v23  ;;  %v69_v29 = vcombine.low %v47_v24, %v51_v25 }
  0x21   :  { %v55_v32 = vrot.slane %v35_v27, %v38_v11  ;;  %v59_v33 = vrot.slane %v35_v27, %v42_v12  ;;  %v63_v34 = vrot.slane %v35_v27, %v46_v13  ;;  %v67_v35 = vrot.slane %v35_v27, %v50_v14 }
  0x22   :  { %v76_v36 = vmul.f32 %v68_v28, %v16_v19  ;;  %v77_v37 = vmul.f32 %v69_v29, %v17_v20 }
  0x23   :  { %v70_v39 = vcombine.low %v55_v32, %v59_v33  ;;  %v71_v40 = vcombine.low %v63_v34, %v67_v35 }
  0x24   :  { %v84_v41 = vcombine.high %v76_v36, %v76_v36  ;;  %v85_v42 = vcombine.high %v77_v37, %v77_v37  ;;  %v147_v43 = vsel %vm146_vm0, %v76_v36, 0.0  ;;  %v150_v44 = vsel %vm146_vm0, %v77_v37, 0.0 }
  0x25   :  { %v171_v45 = vsel %vm146_vm0, %v76_v36, -inf  ;;  %v173_v46 = vsel %vm146_vm0, %v77_v37, -inf  ;;  %v78_v47 = vmul.f32 %v70_v39, %v18_v30  ;;  %v79_v48 = vmul.f32 %v71_v40, %v19_v31 }
  0x26   :  { %v205_v49 = vpack.c.bf16 %v85_v42, %v77_v37  ;;  %v148_v50 = vsel %vm146_vm0, %v84_v41, 0.0  ;;  %v152_v51 = vsel %vm146_vm0, %v85_v42, 0.0  ;;  %v204_v52 = vpack.c.bf16 %v84_v41, %v76_v36 }
  0x27   :  { %v149_v53 = vadd.f32 %v148_v50, %v147_v43  ;;  %v172_v54 = vsel %vm146_vm0, %v84_v41, -inf  ;;  %v174_v55 = vmax.f32 %v171_v45, %v173_v46  ;;  %v175_v56 = vsel %vm146_vm0, %v85_v42, -inf }
  0x28   :  { %v123_v57 = vrot.slane %v205_v49, %v115_v38  ;;  %v116_v58 = vrot.slane %v204_v52, %v115_v38  ;;  %v176_v59 = vmax.f32 %v172_v54, %v175_v56  ;;  %v86_v60 = vcombine.high %v78_v47, %v78_v47 }
  0x29   :  { %v151_v61 = vadd.f32 %v150_v44, %v149_v53  ;;  %v87_v62 = vcombine.high %v79_v48, %v79_v48  ;;  %v156_v63 = vsel %vm146_vm0, %v78_v47, 0.0  ;;  %v159_v0 = vsel %vm146_vm0, %v79_v48, 0.0 }
  0x2a   :  { %v124_v1 = vcombine.low %v116_v58, %v123_v57  ;;  %v177_v2 = vmax.f32 %v174_v55, %v176_v59  ;;  %v206_v3 = vpack.c.bf16 %v86_v60, %v78_v47  ;;  %v157_v4 = vsel %vm146_vm0, %v86_v60, 0.0 }
  0x2b   :  { %v153_v5 = vadd.f32 %v152_v51, %v151_v61  ;;  %v207_v6 = vpack.c.bf16 %v87_v62, %v79_v48  ;;  %v158_v7 = vadd.f32 %v157_v4, %v156_v63  ;;  %v161_v8 = vsel %vm146_vm0, %v87_v62, 0.0 }
  0x2c   :  { %144 = vst [vmem:[%s286_s2] sm:$0xff] %v124_v1  ;;  %178 = vmax.xlane.f32.xlu1 %v177_v2  ;;  %v133_v9 = vrot.slane %v206_v3, %v115_v38  ;;  %v180_v10 = vsel %vm146_vm0, %v78_v47, -inf  ;;  %v181_v11 = vsel %vm146_vm0, %v86_v60, -inf  ;;  %v182_v12 = vsel %vm146_vm0, %v79_v48, -inf }
  0x2d   :  { %154 = vadd.xlane.f32.xlu0 %v153_v5  ;;  %v140_v13 = vrot.slane %v207_v6, %v115_v38  ;;  %v160_v14 = vadd.f32 %v159_v0, %v158_v7  ;;  %v183_v15 = vmax.f32 %v180_v10, %v182_v12  ;;  %v184_v16 = vsel %vm146_vm0, %v87_v62, -inf }
  0x2e   :  { %v185_v17 = vmax.f32 %v181_v11, %v184_v16 }
  0x2f   :  { %v141_v18 = vcombine.low %v133_v9, %v140_v13  ;;  %v162_v19 = vadd.f32 %v161_v8, %v160_v14 }
  0x30   :  { %v186_v20 = vmax.f32 %v183_v15, %v185_v17 }
  0x31   :  { %145 = vst [vmem:[%s286_s2 + $0x8] sm:$0xff] %v141_v18  ;;  %163 = vadd.xlane.f32.xlu0 %v162_v19 }
  0x32   :  { %187 = vmax.xlane.f32.xlu1 %v186_v20 }
  0xb9   :  { %v179_v21 = vpop.xlane.xlu1 %178 }
  0xba   :  { %v155_v22 = vpop.xlane.xlu0 %154  ;;  %189 = vst.msk [vmem:[%s287_s4] sm:$0xf] %vm168_vm1, %v179_v21 }
  0xbb   :  { %v166_v23 = vmul.f32 0.001953125, %v155_v22 }
  0xbd   :  { %169 = vst.msk [vmem:[%s288_s3] sm:$0xf] %vm168_vm1, %v166_v23 }
  0xbe   :  { %v164_v24 = vpop.xlane.xlu0 %163 }
  0xbf   :  { %v167_v25 = vmul.f32 0.001953125, %v164_v24  ;;  %v188_v26 = vpop.xlane.xlu1 %187 }
  0xc0   :  { %190 = vst.msk [vmem:[%s287_s4 + $0x4] sm:$0xf] %vm168_vm1, %v188_v26 }
  0xc1   :  { %170 = vst.msk [vmem:[%s288_s3 + $0x4] sm:$0xf] %vm168_vm1, %v167_v25 }

// kernel: _forward_impl.214
= control target key start
LH: loop header
LB: loop body
LE: loop exit
PB: predicated region body
PF: predicated region fallthrough
CT: control target
= control target key end

     0   :  { %s1065_s1 = inlined_call_operand.vmem [shape: f32[512,128], index: 1, kind: input, shape index: {}]   ;;  %s1066_s0 = inlined_call_operand.vmem [shape: f32[8,512], index: 0, kind: input, shape index: {}]   ;;  %s1067_s2 = inlined_call_operand.vmem [shape: f32[128,512], index: 2, kind: input, shape index: {}]   ;;  %s1068_s3 = inlined_call_operand.vmem [shape: f32[8,512], index: 3, kind: output, shape index: {}]  }
   0x1   :  { %v34_v0 = vld [vmem:[%s1065_s1 + $0x80] sm:$0xff]  ;;  %v35_v1 = vld [vmem:[%s1065_s1 + $0x88] sm:$0xff]  ;;  %v36_v11 = vld [vmem:[%s1065_s1 + $0x90] sm:$0xff] }
   0x2   :  { %v66_v2 = vld [vmem:[%s1065_s1 + $0x180] sm:$0xff]  ;;  %v507_v3 = vpack.c.bf16 %v35_v1, %v34_v0  ;;  %v67_v4 = vld [vmem:[%s1065_s1 + $0x188] sm:$0xff]  ;;  %v37_v13 = vld [vmem:[%s1065_s1 + $0x98] sm:$0xff] }
   0x3   :  { %v18_v5 = vld [vmem:[%s1065_s1] sm:$0xff]  ;;  %v19_v6 = vld [vmem:[%s1065_s1 + $0x8] sm:$0xff]  ;;  %v539_v7 = vpack.c.bf16 %v67_v4, %v66_v2  ;;  %v68_v14 = vld [vmem:[%s1065_s1 + $0x190] sm:$0xff]  ;;  %v511_v16 = vpack.c.bf16 %v37_v13, %v36_v11 }
   0x4   :  { %v509_v8 = vpack.c.bf16 %v19_v6, %v18_v5  ;;  %v50_v9 = vld [vmem:[%s1065_s1 + $0x100] sm:$0xff]  ;;  %v51_v10 = vld [vmem:[%s1065_s1 + $0x108] sm:$0xff]  ;;  %508 = vmatprep.subr.bf16.mxu0 %v507_v3  ;;  %v69_v15 = vld [vmem:[%s1065_s1 + $0x198] sm:$0xff] }
   0x5   :  { %v541_v12 = vpack.c.bf16 %v51_v10, %v50_v9  ;;  %540 = vmatprep.subr.bf16.mxu1 %v539_v7  ;;  %v543_v17 = vpack.c.bf16 %v69_v15, %v68_v14  ;;  %v20_v18 = vld [vmem:[%s1065_s1 + $0x10] sm:$0xff]  ;;  %v21_v19 = vld [vmem:[%s1065_s1 + $0x18] sm:$0xff]  ;;  %v38_v23 = vld [vmem:[%s1065_s1 + $0xa0] sm:$0xff] }
   0x6   :  { %510 = vmatpush3.bf16.msra.mxu0 %v509_v8  ;;  %v52_v20 = vld [vmem:[%s1065_s1 + $0x110] sm:$0xff]  ;;  %v513_v21 = vpack.c.bf16 %v21_v19, %v20_v18  ;;  %v53_v22 = vld [vmem:[%s1065_s1 + $0x118] sm:$0xff]  ;;  %v39_v24 = vld [vmem:[%s1065_s1 + $0xa8] sm:$0xff] }
   0x7   :  { %542 = vmatpush3.bf16.msra.mxu1 %v541_v12  ;;  %512 = vmatprep.subr.bf16.mxu0 %v511_v16  ;;  %v545_v25 = vpack.c.bf16 %v53_v22, %v52_v20  ;;  %v515_v26 = vpack.c.bf16 %v39_v24, %v38_v23  ;;  %v70_v27 = vld [vmem:[%s1065_s1 + $0x1a0] sm:$0xff]  ;;  %v71_v28 = vld [vmem:[%s1065_s1 + $0x1a8] sm:$0xff]  ;;  %v40_v35 = vld [vmem:[%s1065_s1 + $0xb0] sm:$0xff] }
   0x8   :  { %544 = vmatprep.subr.bf16.mxu1 %v543_v17  ;;  %v22_v29 = vld [vmem:[%s1065_s1 + $0x20] sm:$0xff]  ;;  %v547_v30 = vpack.c.bf16 %v71_v28, %v70_v27  ;;  %v23_v31 = vld [vmem:[%s1065_s1 + $0x28] sm:$0xff]  ;;  %v41_v36 = vld [vmem:[%s1065_s1 + $0xb8] sm:$0xff] }
   0x9   :  { %v54_v32 = vld [vmem:[%s1065_s1 + $0x120] sm:$0xff]  ;;  %v55_v33 = vld [vmem:[%s1065_s1 + $0x128] sm:$0xff]  ;;  %v517_v34 = vpack.c.bf16 %v23_v31, %v22_v29  ;;  %v72_v37 = vld [vmem:[%s1065_s1 + $0x1b0] sm:$0xff]  ;;  %v519_v39 = vpack.c.bf16 %v41_v36, %v40_v35 }
   0xa   :  { %514 = vmatpush3.bf16.msra.mxu0 %v513_v21  ;;  %v549_v38 = vpack.c.bf16 %v55_v33, %v54_v32  ;;  %v73_v40 = vld [vmem:[%s1065_s1 + $0x1b8] sm:$0xff]  ;;  %v24_v41 = vld [vmem:[%s1065_s1 + $0x30] sm:$0xff]  ;;  %v42_v46 = vld [vmem:[%s1065_s1 + $0xc0] sm:$0xff] }
   0xb   :  { %546 = vmatpush3.bf16.msra.mxu1 %v545_v25  ;;  %516 = vmatprep.subr.bf16.mxu0 %v515_v26  ;;  %v25_v42 = vld [vmem:[%s1065_s1 + $0x38] sm:$0xff]  ;;  %v551_v43 = vpack.c.bf16 %v73_v40, %v72_v37  ;;  %v56_v44 = vld [vmem:[%s1065_s1 + $0x130] sm:$0xff]  ;;  %v43_v47 = vld [vmem:[%s1065_s1 + $0xc8] sm:$0xff] }
   0xc   :  { %548 = vmatprep.subr.bf16.mxu1 %v547_v30  ;;  %v57_v45 = vld [vmem:[%s1065_s1 + $0x138] sm:$0xff]  ;;  %v74_v48 = vld [vmem:[%s1065_s1 + $0x1c0] sm:$0xff]  ;;  %v75_v49 = vld [vmem:[%s1065_s1 + $0x1c8] sm:$0xff]  ;;  %v521_v50 = vpack.c.bf16 %v25_v42, %v24_v41  ;;  %v523_v52 = vpack.c.bf16 %v43_v47, %v42_v46 }
   0xd   :  { %v553_v51 = vpack.c.bf16 %v57_v45, %v56_v44  ;;  %v26_v53 = vld [vmem:[%s1065_s1 + $0x40] sm:$0xff]  ;;  %v27_v54 = vld [vmem:[%s1065_s1 + $0x48] sm:$0xff]  ;;  %v555_v56 = vpack.c.bf16 %v75_v49, %v74_v48  ;;  %v44_v58 = vld [vmem:[%s1065_s1 + $0xd0] sm:$0xff] }
   0xe   :  { %518 = vmatpush3.bf16.msra.mxu0 %v517_v34  ;;  %v58_v55 = vld [vmem:[%s1065_s1 + $0x140] sm:$0xff]  ;;  %v59_v57 = vld [vmem:[%s1065_s1 + $0x148] sm:$0xff]  ;;  %v45_v59 = vld [vmem:[%s1065_s1 + $0xd8] sm:$0xff]  ;;  %v525_v62 = vpack.c.bf16 %v27_v54, %v26_v53 }
   0xf   :  { %550 = vmatpush3.bf16.msra.mxu1 %v549_v38  ;;  %520 = vmatprep.subr.bf16.mxu0 %v519_v39  ;;  %v76_v60 = vld [vmem:[%s1065_s1 + $0x1d0] sm:$0xff]  ;;  %v77_v61 = vld [vmem:[%s1065_s1 + $0x1d8] sm:$0xff]  ;;  %v557_v63 = vpack.c.bf16 %v59_v57, %v58_v55  ;;  %v527_v0 = vpack.c.bf16 %v45_v59, %v44_v58  ;;  %v46_v6 = vld [vmem:[%s1065_s1 + $0xe0] sm:$0xff] }
  0x10   :  { %552 = vmatprep.subr.bf16.mxu1 %v551_v43  ;;  %v28_v1 = vld [vmem:[%s1065_s1 + $0x50] sm:$0xff]  ;;  %v29_v2 = vld [vmem:[%s1065_s1 + $0x58] sm:$0xff]  ;;  %v559_v4 = vpack.c.bf16 %v77_v61, %v76_v60  ;;  %v47_v7 = vld [vmem:[%s1065_s1 + $0xe8] sm:$0xff] }
  0x11   :  { %v60_v3 = vld [vmem:[%s1065_s1 + $0x150] sm:$0xff]  ;;  %v61_v5 = vld [vmem:[%s1065_s1 + $0x158] sm:$0xff]  ;;  %v78_v8 = vld [vmem:[%s1065_s1 + $0x1e0] sm:$0xff]  ;;  %v529_v10 = vpack.c.bf16 %v29_v2, %v28_v1  ;;  %v531_v14 = vpack.c.bf16 %v47_v7, %v46_v6 }
  0x12   :  { %522 = vmatpush3.bf16.msra.mxu0 %v521_v50  ;;  %v79_v9 = vld [vmem:[%s1065_s1 + $0x1e8] sm:$0xff]  ;;  %v30_v11 = vld [vmem:[%s1065_s1 + $0x60] sm:$0xff]  ;;  %v561_v13 = vpack.c.bf16 %v61_v5, %v60_v3  ;;  %v17_v17 = vld [vmem:[%s1066_s0 + $0x18] sm:$0xff] }
  0x13   :  { %554 = vmatpush3.bf16.msra.mxu1 %v553_v51  ;;  %524 = vmatprep.subr.bf16.mxu0 %v523_v52  ;;  %v31_v12 = vld [vmem:[%s1065_s1 + $0x68] sm:$0xff]  ;;  %v62_v15 = vld [vmem:[%s1065_s1 + $0x160] sm:$0xff]  ;;  %v563_v18 = vpack.c.bf16 %v79_v9, %v78_v8  ;;  %v48_v20 = vld [vmem:[%s1065_s1 + $0xf0] sm:$0xff] }
  0x14   :  { %556 = vmatprep.subr.bf16.mxu1 %v555_v56  ;;  %v15_v16 = vld [vmem:[%s1066_s0 + $0x8] sm:$0xff]  ;;  %v49_v21 = vld [vmem:[%s1065_s1 + $0xf8] sm:$0xff]  ;;  %v80_v22 = vld [vmem:[%s1065_s1 + $0x1f0] sm:$0xff]  ;;  %216 = vmatprep.mubr.f32.mxu1 %v17_v17  ;;  %v533_v24 = vpack.c.bf16 %v31_v12, %v30_v11 }
  0x15   :  { %v63_v19 = vld [vmem:[%s1065_s1 + $0x168] sm:$0xff]  ;;  %146 = vmatprep.mubr.f32.mxu0 %v15_v16  ;;  %v81_v23 = vld [vmem:[%s1065_s1 + $0x1f8] sm:$0xff]  ;;  %v535_v26 = vpack.c.bf16 %v49_v21, %v48_v20  ;;  %v32_v27 = vld [vmem:[%s1065_s1 + $0x70] sm:$0xff] }
  0x16   :  { %526 = vmatpush3.bf16.msra.mxu0 %v525_v62  ;;  %v565_v25 = vpack.c.bf16 %v63_v19, %v62_v15  ;;  %v33_v28 = vld [vmem:[%s1065_s1 + $0x78] sm:$0xff]  ;;  %v64_v29 = vld [vmem:[%s1065_s1 + $0x170] sm:$0xff]  ;;  %v567_v30 = vpack.c.bf16 %v81_v23, %v80_v22  ;;  %v224_v32 = vld [vmem:[%s1067_s2 + $0x8] sm:$0xff] }
  0x17   :  { %558 = vmatpush3.bf16.msra.mxu1 %v557_v63  ;;  %528 = vmatprep.subr.bf16.mxu0 %v527_v0  ;;  %v65_v31 = vld [vmem:[%s1065_s1 + $0x178] sm:$0xff]  ;;  %v228_v33 = vld [vmem:[%s1067_s2 + $0x28] sm:$0xff]  ;;  %v537_v36 = vpack.c.bf16 %v33_v28, %v32_v27  ;;  %v223_v39 = vld [vmem:[%s1067_s2] sm:$0xff] }
  0x18   :  { %560 = vmatprep.subr.bf16.mxu1 %v559_v4  ;;  %v226_v34 = vld [vmem:[%s1067_s2 + $0x18] sm:$0xff]  ;;  %v569_v37 = vpack.c.bf16 %v65_v31, %v64_v29  ;;  %v571_v38 = vpack.c.bf16 %v228_v33, %v224_v32  ;;  %v227_v40 = vld [vmem:[%s1067_s2 + $0x20] sm:$0xff]  ;;  %v225_v41 = vld [vmem:[%s1067_s2 + $0x10] sm:$0xff] }
  0x19   :  { %v230_v35 = vld [vmem:[%s1067_s2 + $0x38] sm:$0xff]  ;;  %v229_v43 = vld [vmem:[%s1067_s2 + $0x30] sm:$0xff]  ;;  %v232_v44 = vld [vmem:[%s1067_s2 + $0x48] sm:$0xff]  ;;  %v573_v50 = vpack.c.bf16 %v227_v40, %v223_v39 }
  0x1a   :  { %530 = vmatpush3.bf16.msra.mxu0 %v529_v10  ;;  %v603_v42 = vpack.c.bf16 %v230_v35, %v226_v34  ;;  %v236_v45 = vld [vmem:[%s1067_s2 + $0x68] sm:$0xff]  ;;  %v234_v46 = vld [vmem:[%s1067_s2 + $0x58] sm:$0xff]  ;;  %v14_v48 = vld [vmem:[%s1066_s0] sm:$0xff]  ;;  %v605_v51 = vpack.c.bf16 %v229_v43, %v225_v41 }
  0x1b   :  { %562 = vmatpush3.bf16.msra.mxu1 %v561_v13  ;;  %532 = vmatprep.subr.bf16.mxu0 %v531_v14  ;;  %v238_v47 = vld [vmem:[%s1067_s2 + $0x78] sm:$0xff]  ;;  %v16_v49 = vld [vmem:[%s1066_s0 + $0x10] sm:$0xff]  ;;  %v575_v52 = vpack.c.bf16 %v236_v45, %v232_v44  ;;  %v231_v53 = vld [vmem:[%s1067_s2 + $0x40] sm:$0xff] }
  0x1c   :  { %564 = vmatprep.subr.bf16.mxu1 %v563_v18  ;;  %v235_v54 = vld [vmem:[%s1067_s2 + $0x60] sm:$0xff]  ;;  %v233_v55 = vld [vmem:[%s1067_s2 + $0x50] sm:$0xff]  ;;  %v607_v56 = vpack.c.bf16 %v238_v47, %v234_v46  ;;  %v240_v58 = vld [vmem:[%s1067_s2 + $0x88] sm:$0xff] }
  0x1d   :  { %v237_v57 = vld [vmem:[%s1067_s2 + $0x70] sm:$0xff]  ;;  %v244_v59 = vld [vmem:[%s1067_s2 + $0xa8] sm:$0xff]  ;;  %v242_v60 = vld [vmem:[%s1067_s2 + $0x98] sm:$0xff]  ;;  %v577_v62 = vpack.c.bf16 %v235_v54, %v231_v53 }
  0x1e   :  { %534 = vmatpush3.bf16.msra.mxu0 %v533_v24  ;;  %v246_v61 = vld [vmem:[%s1067_s2 + $0xb8] sm:$0xff]  ;;  %v609_v63 = vpack.c.bf16 %v237_v57, %v233_v55  ;;  %v579_v0 = vpack.c.bf16 %v244_v59, %v240_v58  ;;  %v239_v1 = vld [vmem:[%s1067_s2 + $0x80] sm:$0xff]  ;;  %v241_v3 = vld [vmem:[%s1067_s2 + $0x90] sm:$0xff] }
  0x1f   :  { %566 = vmatpush3.bf16.msra.mxu1 %v565_v25  ;;  %536 = vmatprep.subr.bf16.mxu0 %v535_v26  ;;  %v243_v2 = vld [vmem:[%s1067_s2 + $0xa0] sm:$0xff]  ;;  %v611_v4 = vpack.c.bf16 %v246_v61, %v242_v60  ;;  %v245_v5 = vld [vmem:[%s1067_s2 + $0xb0] sm:$0xff]  ;;  %v248_v6 = vld [vmem:[%s1067_s2 + $0xc8] sm:$0xff] }
  0x20   :  { %568 = vmatprep.subr.bf16.mxu1 %v567_v30  ;;  %v252_v7 = vld [vmem:[%s1067_s2 + $0xe8] sm:$0xff]  ;;  %v250_v8 = vld [vmem:[%s1067_s2 + $0xd8] sm:$0xff]  ;;  %v581_v10 = vpack.c.bf16 %v243_v2, %v239_v1  ;;  %v613_v11 = vpack.c.bf16 %v245_v5, %v241_v3  ;;  %v247_v13 = vld [vmem:[%s1067_s2 + $0xc0] sm:$0xff] }
  0x21   :  { %v254_v9 = vld [vmem:[%s1067_s2 + $0xf8] sm:$0xff]  ;;  %v583_v12 = vpack.c.bf16 %v252_v7, %v248_v6  ;;  %v251_v14 = vld [vmem:[%s1067_s2 + $0xe0] sm:$0xff]  ;;  %v249_v15 = vld [vmem:[%s1067_s2 + $0xd0] sm:$0xff] }
  0x22   :  { %538 = vmatpush3.bf16.msra.mxu0 %v537_v36  ;;  %v615_v16 = vpack.c.bf16 %v254_v9, %v250_v8  ;;  %v253_v17 = vld [vmem:[%s1067_s2 + $0xf0] sm:$0xff]  ;;  %v256_v18 = vld [vmem:[%s1067_s2 + $0x108] sm:$0xff]  ;;  %v258_v20 = vld [vmem:[%s1067_s2 + $0x118] sm:$0xff]  ;;  %v585_v22 = vpack.c.bf16 %v251_v14, %v247_v13 }
  0x23   :  { %570 = vmatpush3.bf16.msra.mxu1 %v569_v37  ;;  %572 = vmatprep.subr.bf16.mxu0 %v571_v38  ;;  %v260_v19 = vld [vmem:[%s1067_s2 + $0x128] sm:$0xff]  ;;  %v262_v21 = vld [vmem:[%s1067_s2 + $0x138] sm:$0xff]  ;;  %v617_v23 = vpack.c.bf16 %v253_v17, %v249_v15  ;;  %v255_v25 = vld [vmem:[%s1067_s2 + $0x100] sm:$0xff] }
  0x24   :  { %604 = vmatprep.subr.bf16.mxu1 %v603_v42  ;;  %v587_v24 = vpack.c.bf16 %v260_v19, %v256_v18  ;;  %v259_v26 = vld [vmem:[%s1067_s2 + $0x120] sm:$0xff]  ;;  %v257_v27 = vld [vmem:[%s1067_s2 + $0x110] sm:$0xff]  ;;  %v619_v28 = vpack.c.bf16 %v262_v21, %v258_v20  ;;  %v264_v30 = vld [vmem:[%s1067_s2 + $0x148] sm:$0xff] }
  0x25   :  { %147 = vmatmul.mubr.f32.vlgmr.msra.gmra.mrb[0].mxu0 %v14_v48  ;;  %v261_v29 = vld [vmem:[%s1067_s2 + $0x130] sm:$0xff]  ;;  %v268_v31 = vld [vmem:[%s1067_s2 + $0x168] sm:$0xff]  ;;  %v266_v32 = vld [vmem:[%s1067_s2 + $0x158] sm:$0xff]  ;;  %v589_v34 = vpack.c.bf16 %v259_v26, %v255_v25 }
  0x26   :  { %217 = vmatmul.mubr.f32.vlgmr.msra.gmra.mrb[0].mxu1 %v16_v49  ;;  %574 = vmatpush1.bf16.msra.mxu0 %v573_v50  ;;  %v270_v33 = vld [vmem:[%s1067_s2 + $0x178] sm:$0xff]  ;;  %v621_v35 = vpack.c.bf16 %v261_v29, %v257_v27  ;;  %v591_v36 = vpack.c.bf16 %v268_v31, %v264_v30  ;;  %v263_v37 = vld [vmem:[%s1067_s2 + $0x140] sm:$0xff]  ;;  %v265_v40 = vld [vmem:[%s1067_s2 + $0x150] sm:$0xff] }
  0x27   :  { %606 = vmatpush1.bf16.msra.mxu1 %v605_v51  ;;  %576 = vmatprep.subr.bf16.mxu0 %v575_v52  ;;  %v267_v38 = vld [vmem:[%s1067_s2 + $0x160] sm:$0xff]  ;;  %v623_v39 = vpack.c.bf16 %v270_v33, %v266_v32  ;;  %v269_v41 = vld [vmem:[%s1067_s2 + $0x170] sm:$0xff]  ;;  %v272_v44 = vld [vmem:[%s1067_s2 + $0x188] sm:$0xff] }
  0x28   :  { %608 = vmatprep.subr.bf16.mxu1 %v607_v56  ;;  %v593_v42 = vpack.c.bf16 %v267_v38, %v263_v37  ;;  %v625_v43 = vpack.c.bf16 %v269_v41, %v265_v40  ;;  %v276_v45 = vld [vmem:[%s1067_s2 + $0x1a8] sm:$0xff]  ;;  %v274_v46 = vld [vmem:[%s1067_s2 + $0x198] sm:$0xff]  ;;  %v271_v49 = vld [vmem:[%s1067_s2 + $0x180] sm:$0xff] }
  0x29   :  { %v595_v47 = vpack.c.bf16 %v276_v45, %v272_v44  ;;  %v278_v48 = vld [vmem:[%s1067_s2 + $0x1b8] sm:$0xff]  ;;  %v275_v50 = vld [vmem:[%s1067_s2 + $0x1a0] sm:$0xff]  ;;  %v273_v53 = vld [vmem:[%s1067_s2 + $0x190] sm:$0xff] }
  0x2a   :  { %578 = vmatpush1.bf16.msra.mxu0 %v577_v62  ;;  %v627_v51 = vpack.c.bf16 %v278_v48, %v274_v46  ;;  %v597_v52 = vpack.c.bf16 %v275_v50, %v271_v49  ;;  %v277_v54 = vld [vmem:[%s1067_s2 + $0x1b0] sm:$0xff]  ;;  %v280_v56 = vld [vmem:[%s1067_s2 + $0x1c8] sm:$0xff]  ;;  %v282_v58 = vld [vmem:[%s1067_s2 + $0x1d8] sm:$0xff] }
  0x2b   :  { %610 = vmatpush1.bf16.msra.mxu1 %v609_v63  ;;  %580 = vmatprep.subr.bf16.mxu0 %v579_v0  ;;  %v629_v55 = vpack.c.bf16 %v277_v54, %v273_v53  ;;  %v284_v57 = vld [vmem:[%s1067_s2 + $0x1e8] sm:$0xff]  ;;  %v286_v60 = vld [vmem:[%s1067_s2 + $0x1f8] sm:$0xff]  ;;  %v279_v61 = vld [vmem:[%s1067_s2 + $0x1c0] sm:$0xff] }
  0x2c   :  { %612 = vmatprep.subr.bf16.mxu1 %v611_v4  ;;  %v599_v59 = vpack.c.bf16 %v284_v57, %v280_v56  ;;  %v283_v62 = vld [vmem:[%s1067_s2 + $0x1e0] sm:$0xff]  ;;  %v631_v63 = vpack.c.bf16 %v286_v60, %v282_v58  ;;  %v281_v1 = vld [vmem:[%s1067_s2 + $0x1d0] sm:$0xff]  ;;  %v636_v4 = vmov 0.0  }
  0x2d   :  { %v601_v0 = vpack.c.bf16 %v283_v62, %v279_v61  ;;  %v285_v2 = vld [vmem:[%s1067_s2 + $0x1f0] sm:$0xff]  ;;  %351 = vmatprep.mubr.f32.mxu0 %v636_v4  ;;  %422 = vmatprep.mubr.f32.mxu1 %v636_v4 }
  0x2e   :  { %582 = vmatpush1.bf16.msra.mxu0 %v581_v10  ;;  %v633_v3 = vpack.c.bf16 %v285_v2, %v281_v1 }
  0x2f   :  { %614 = vmatpush1.bf16.msra.mxu1 %v613_v11  ;;  %584 = vmatprep.subr.bf16.mxu0 %v583_v12 }
  0x30   :  { %616 = vmatprep.subr.bf16.mxu1 %v615_v16 }
  0x32   :  { %586 = vmatpush1.bf16.msra.mxu0 %v585_v22 }
  0x33   :  { %618 = vmatpush1.bf16.msra.mxu1 %v617_v23  ;;  %588 = vmatprep.subr.bf16.mxu0 %v587_v24 }
  0x34   :  { %620 = vmatprep.subr.bf16.mxu1 %v619_v28 }
  0x36   :  { %590 = vmatpush1.bf16.msra.mxu0 %v589_v34 }
  0x37   :  { %622 = vmatpush1.bf16.msra.mxu1 %v621_v35  ;;  %592 = vmatprep.subr.bf16.mxu0 %v591_v36 }
  0x38   :  { %624 = vmatprep.subr.bf16.mxu1 %v623_v39 }
  0x3a   :  { %594 = vmatpush1.bf16.msra.mxu0 %v593_v42 }
  0x3b   :  { %626 = vmatpush1.bf16.msra.mxu1 %v625_v43  ;;  %596 = vmatprep.subr.bf16.mxu0 %v595_v47 }
  0x3c   :  { %628 = vmatprep.subr.bf16.mxu1 %v627_v51 }
  0x3e   :  { %598 = vmatpush1.bf16.msra.mxu0 %v597_v52 }
  0x3f   :  { %630 = vmatpush1.bf16.msra.mxu1 %v629_v55  ;;  %600 = vmatprep.subr.bf16.mxu0 %v599_v59 }
  0x40   :  { %632 = vmatprep.subr.bf16.mxu1 %v631_v63 }
  0x42   :  { %602 = vmatpush1.bf16.msra.mxu0 %v601_v0 }
  0x43   :  { %634 = vmatpush1.bf16.msra.mxu1 %v633_v3 }
  0xf8   :  { %v469_v5 = vpop.f32.mrb[0].mxu0 }
  0xf9   :  { %v504_v6 = vpop.f32.mrb[0].mxu1  ;;  %v470_v7 = vpop.f32.mrb[1].mxu0 }
  0xfa   :  { %v471_v8 = vadd.f32 %v470_v7, %v469_v5  ;;  %v505_v9 = vpop.f32.mrb[1].mxu1 }
  0xfb   :  { %v506_v10 = vadd.f32 %v505_v9, %v504_v6 }
  0xfd   :  { %v219_v11 = vadd.f32 %v506_v10, %v471_v8 }
  0xff   :  { %v222_v12 = vmax.f32 %v219_v11, 0.0 }
 0x101   :  { %352 = vmatmul.mubr.f32.vlgmr.msra.gmra.mrb[2].mxu0 %v222_v12  ;;  %423 = vmatmul.mubr.f32.vlgmr.msra.gmra.mrb[2].mxu1 %v222_v12 }
 0x1d4   :  { %v353_v13 = vpop.f32.mrb[2].mxu0  ;;  %v424_v14 = vpop.f32.mrb[2].mxu1 }
 0x1d5   :  { %429 = vst [vmem:[%s1068_s3] sm:$0xff] %v353_v13  ;;  %431 = vst [vmem:[%s1068_s3 + $0x10] sm:$0xff] %v424_v14  ;;  %v355_v15 = vpop.f32.mrb[3].mxu0  ;;  %v426_v16 = vpop.f32.mrb[3].mxu1 }
 0x1d6   :  { %430 = vst [vmem:[%s1068_s3 + $0x8] sm:$0xff] %v355_v15  ;;  %432 = vst [vmem:[%s1068_s3 + $0x18] sm:$0xff] %v426_v16 }

// kernel: squeeze.10
= control target key start
LH: loop header
LB: loop body
LE: loop exit
PB: predicated region body
PF: predicated region fallthrough
CT: control target
= control target key end

     0   :  { %v418_v52 = vmov 0.0   ;;  %s501_s0 = inlined_call_operand.vmem [shape: bf16[1,2,2,2,512], index: 0, kind: input, shape index: {}]   ;;  %s502_s1 = inlined_call_operand.vmem [shape: bf16[2,4,512], index: 1, kind: output, shape index: {}]  }
   0x1   :  { %v395_v0 = vld [vmem:[%s501_s0 + $0xf] sm:$0x1]  ;;  %v396_v1 = vld [vmem:[%s501_s0 + $0xe] sm:$0x1]  ;;  %v397_v2 = vld [vmem:[%s501_s0 + $0xd] sm:$0x1] }
   0x2   :  { %v17_v3 = vunpack.c.l.bf16 %v395_v0  ;;  %v33_v4 = vunpack.c.l.bf16 %v396_v1  ;;  %v49_v5 = vunpack.c.l.bf16 %v397_v2  ;;  %v398_v6 = vld [vmem:[%s501_s0 + $0xc] sm:$0x1]  ;;  %v399_v7 = vld [vmem:[%s501_s0 + $0xb] sm:$0x1]  ;;  %v400_v8 = vld [vmem:[%s501_s0 + $0xa] sm:$0x1] }
   0x3   :  { %v65_v9 = vunpack.c.l.bf16 %v398_v6  ;;  %v81_v10 = vunpack.c.l.bf16 %v399_v7  ;;  %v97_v11 = vunpack.c.l.bf16 %v400_v8  ;;  %v401_v12 = vld [vmem:[%s501_s0 + $0x9] sm:$0x1]  ;;  %v402_v13 = vld [vmem:[%s501_s0 + $0x8] sm:$0x1]  ;;  %v403_v14 = vld [vmem:[%s501_s0 + $0x7] sm:$0x1] }
   0x4   :  { %20 = vst [vmem:[#allocation1 + $0x78] sm:$0x3] %v17_v3  ;;  %36 = vst [vmem:[#allocation1 + $0x70] sm:$0x3] %v33_v4  ;;  %v113_v15 = vunpack.c.l.bf16 %v401_v12  ;;  %v129_v16 = vunpack.c.l.bf16 %v402_v13  ;;  %v145_v17 = vunpack.c.l.bf16 %v403_v14  ;;  %v404_v18 = vld [vmem:[%s501_s0 + $0x6] sm:$0x1] }
   0x5   :  { %52 = vst [vmem:[#allocation1 + $0x68] sm:$0x3] %v49_v5  ;;  %v405_v19 = vld [vmem:[%s501_s0 + $0x5] sm:$0x1]  ;;  %v406_v20 = vld [vmem:[%s501_s0 + $0x4] sm:$0x1]  ;;  %v161_v21 = vunpack.c.l.bf16 %v404_v18 }
   0x6   :  { %68 = vst [vmem:[#allocation1 + $0x60] sm:$0x3] %v65_v9  ;;  %84 = vst [vmem:[#allocation1 + $0x58] sm:$0x3] %v81_v10  ;;  %v177_v22 = vunpack.c.l.bf16 %v405_v19  ;;  %v193_v23 = vunpack.c.l.bf16 %v406_v20  ;;  %v407_v24 = vld [vmem:[%s501_s0 + $0x3] sm:$0x1] }
   0x7   :  { %100 = vst [vmem:[#allocation1 + $0x50] sm:$0x3] %v97_v11  ;;  %v408_v25 = vld [vmem:[%s501_s0 + $0x2] sm:$0x1]  ;;  %v409_v26 = vld [vmem:[%s501_s0 + $0x1] sm:$0x1]  ;;  %v209_v27 = vunpack.c.l.bf16 %v407_v24 }
   0x8   :  { %116 = vst [vmem:[#allocation1 + $0x48] sm:$0x3] %v113_v15  ;;  %132 = vst [vmem:[#allocation1 + $0x40] sm:$0x3] %v129_v16  ;;  %v225_v28 = vunpack.c.l.bf16 %v408_v25  ;;  %v240_v29 = vunpack.c.l.bf16 %v409_v26  ;;  %v253_v30 = vld [vmem:[%s501_s0] sm:$0x1] }
   0x9   :  { %148 = vst [vmem:[#allocation1 + $0x38] sm:$0x3] %v145_v17  ;;  %164 = vst [vmem:[#allocation1 + $0x30] sm:$0x3] %v161_v21  ;;  %v254_v31 = vunpack.c.l.bf16 %v253_v30 }
   0xa   :  { %180 = vst [vmem:[#allocation1 + $0x28] sm:$0x3] %v177_v22  ;;  %196 = vst [vmem:[#allocation1 + $0x20] sm:$0x3] %v193_v23 }
   0xb   :  { %212 = vst [vmem:[#allocation1 + $0x18] sm:$0x3] %v209_v27  ;;  %228 = vst [vmem:[#allocation1 + $0x10] sm:$0x3] %v225_v28  ;;  %v312_v33 = vld [vmem:[#allocation1 + $0x70] sm:$0x3]  }
   0xc   :  { %243 = vst [vmem:[#allocation1 + $0x8] sm:$0x3] %v240_v29  ;;  %256 = vst [vmem:[#allocation1] sm:$0x3] %v254_v31  ;;  %v308_v32 = vld [vmem:[#allocation1 + $0x68] sm:$0x3]  }
   0xd   :  { %v316_v34 = vld [vmem:[#allocation1 + $0x78] sm:$0x3]   ;;  %v304_v37 = vld [vmem:[#allocation1 + $0x60] sm:$0x3]   ;;  %310 = vst [vmem:[#allocation0 + $0x2a] sm:$0x3] %v308_v32  }
   0xe   :  { %v296_v35 = vld [vmem:[#allocation1 + $0x50] sm:$0x3]   ;;  %v300_v36 = vld [vmem:[#allocation1 + $0x58] sm:$0x3]   ;;  %314 = vst [vmem:[#allocation0 + $0x32] sm:$0x3] %v312_v33  }
   0xf   :  { %318 = vst [vmem:[#allocation0 + $0x3a] sm:$0x3] %v316_v34   ;;  %v288_v39 = vld [vmem:[#allocation1 + $0x40] sm:$0x3]   ;;  %v292_v40 = vld [vmem:[#allocation1 + $0x48] sm:$0x3]  }
  0x10   :  { %v284_v38 = vld [vmem:[#allocation1 + $0x38] sm:$0x3]   ;;  %298 = vst [vmem:[#allocation0 + $0x30] sm:$0x3] %v296_v35   ;;  %302 = vst [vmem:[#allocation0 + $0x38] sm:$0x3] %v300_v36  }
  0x11   :  { %306 = vst [vmem:[#allocation0 + $0x22] sm:$0x3] %v304_v37   ;;  %v272_v41 = vld [vmem:[#allocation1 + $0x20] sm:$0x3]   ;;  %v276_v42 = vld [vmem:[#allocation1 + $0x28] sm:$0x3]  }
  0x12   :  { %v280_v43 = vld [vmem:[#allocation1 + $0x30] sm:$0x3]   ;;  %286 = vst [vmem:[#allocation0 + $0x1a] sm:$0x3] %v284_v38   ;;  %290 = vst [vmem:[#allocation0 + $0x20] sm:$0x3] %v288_v39  }
  0x13   :  { %294 = vst [vmem:[#allocation0 + $0x28] sm:$0x3] %v292_v40   ;;  %v260_v44 = vld [vmem:[#allocation1 + $0x8] sm:$0x3]   ;;  %v264_v45 = vld [vmem:[#allocation1 + $0x10] sm:$0x3]  }
  0x14   :  { %v268_v46 = vld [vmem:[#allocation1 + $0x18] sm:$0x3]   ;;  %274 = vst [vmem:[#allocation0 + $0x2] sm:$0x3] %v272_v41   ;;  %278 = vst [vmem:[#allocation0 + $0xa] sm:$0x3] %v276_v42  }
  0x15   :  { %282 = vst [vmem:[#allocation0 + $0x12] sm:$0x3] %v280_v43   ;;  %v257_v47 = vld [vmem:[#allocation1] sm:$0x3]   ;;  %262 = vst [vmem:[#allocation0 + $0x8] sm:$0x3] %v260_v44  }
  0x16   :  { %266 = vst [vmem:[#allocation0 + $0x10] sm:$0x3] %v264_v45   ;;  %270 = vst [vmem:[#allocation0 + $0x18] sm:$0x3] %v268_v46  }
  0x17   :  { %258 = vst [vmem:[#allocation0] sm:$0x3] %v257_v47   ;;  %v362_v48 = vld [vmem:[#allocation0 + $0x30] sm:$0xf]  ;;  %v369_v49 = vld [vmem:[#allocation0 + $0x38] sm:$0xf] }
  0x18   :  { %v363_v53 = vpack.c.bf16 %v418_v52, %v362_v48  ;;  %v370_v54 = vpack.c.bf16 %v418_v52, %v369_v49 }
  0x19   :  { %v348_v50 = vld [vmem:[#allocation0 + $0x20] sm:$0xf] }
  0x1a   :  { %v355_v51 = vld [vmem:[#allocation0 + $0x28] sm:$0xf]  ;;  %v349_v55 = vpack.c.bf16 %v418_v52, %v348_v50  ;;  %415 = vst [vmem:[%s502_s1 + $0xc] sm:$0x3] %v363_v53  ;;  %416 = vst [vmem:[%s502_s1 + $0xe] sm:$0x3] %v370_v54 }
  0x1b   :  { %v356_v56 = vpack.c.bf16 %v418_v52, %v355_v51 }
  0x1c   :  { %v328_v57 = vld [vmem:[#allocation0 + $0x8] sm:$0xf]  ;;  %413 = vst [vmem:[%s502_s1 + $0x8] sm:$0x3] %v349_v55 }
  0x1d   :  { %v334_v58 = vld [vmem:[#allocation0 + $0x10] sm:$0xf]  ;;  %v341_v59 = vld [vmem:[#allocation0 + $0x18] sm:$0xf]  ;;  %v329_v61 = vpack.c.bf16 %v418_v52, %v328_v57  ;;  %414 = vst [vmem:[%s502_s1 + $0xa] sm:$0x3] %v356_v56 }
  0x1e   :  { %v323_v60 = vld [vmem:[#allocation0] sm:$0xf]  ;;  %v335_v62 = vpack.c.bf16 %v418_v52, %v334_v58  ;;  %v342_v63 = vpack.c.bf16 %v418_v52, %v341_v59 }
  0x1f   :  { %v324_v0 = vpack.c.bf16 %v418_v52, %v323_v60  ;;  %410 = vst [vmem:[%s502_s1 + $0x2] sm:$0x3] %v329_v61 }
  0x20   :  { %411 = vst [vmem:[%s502_s1 + $0x4] sm:$0x3] %v335_v62  ;;  %412 = vst [vmem:[%s502_s1 + $0x6] sm:$0x3] %v342_v63 }
  0x21   :  { %326 = vst [vmem:[%s502_s1] sm:$0x3] %v324_v0 }

// kernel: _forward_impl.216
= control target key start
LH: loop header
LB: loop body
LE: loop exit
PB: predicated region body
PF: predicated region fallthrough
CT: control target
= control target key end

     0   :  { %v235_v0 = vmov 0   ;;  %v236_v11 = vmov 839922192   ;;  %v53_v13 = vlaneseq  ;;  %vm90_vm0 = vcmask 1043456   ;;  %s308_s1 = inlined_call_operand.vmem [shape: f32[2,4,1], index: 1, kind: input, shape index: {}]   ;;  %s309_s0 = inlined_call_operand.vmem [shape: bf16[2,4,512], index: 0, kind: input, shape index: {}]   ;;  %s310_s2 = inlined_call_operand.vmem [shape: bf16[2,4,512], index: 2, kind: input, shape index: {}]   ;;  %s311_s3 = inlined_call_operand.vmem [shape: f32[2,4,512], index: 3, kind: output, shape index: {0}]   ;;  %s312_s4 = inlined_call_operand.vmem [shape: f32[2,512], index: 4, kind: output, shape index: {1}]  }
   0x1   :  { %226 = vset.pattern.permute.xlu0 %v235_v0  ;;  %v29_v1 = vld [vmem:[%s308_s1 + $0x4] sm:$0xf]  ;;  %v28_v2 = vld [vmem:[%s308_s1] sm:$0xf]  ;;  %v51_v12 = vunpack.c.l.s4 %v236_v11  ;;  %v17_v16 = vld [vmem:[%s309_s0 + $0x8] sm:$0xff]  ;;  %vm203_vm1 = vcmask 1041409  }
   0x2   :  { %v222_v3 = vmul.f32 -1.442695, %v29_v1  ;;  %v221_v4 = vmul.f32 -1.442695, %v28_v2  ;;  %v269_v15 = vshrl.u32 %v53_v13, 7  ;;  %v23_v18 = vld [vmem:[%s310_s2 + $0x8] sm:$0xff]  ;;  %v20_v19 = vunpack.c.l.bf16 %v17_v16 }
   0x3   :  { %v52_v14 = vunpack.c.0.s8 %v51_v12  ;;  %v21_v20 = vunpack.c.h.bf16 %v17_v16  ;;  %v26_v22 = vunpack.c.l.bf16 %v23_v18  ;;  %v27_v23 = vunpack.c.h.bf16 %v23_v18  ;;  %v16_v25 = vld [vmem:[%s309_s0] sm:$0xff] }
   0x4   :  { %227 = vpow2.f32 %v222_v3  ;;  %v22_v28 = vld [vmem:[%s310_s2] sm:$0xff]  ;;  %v18_v30 = vunpack.c.l.bf16 %v16_v25  ;;  %v19_v31 = vunpack.c.h.bf16 %v16_v25  ;;  %v237_v35 = vmov 1983009808  }
   0x5   :  { %229 = vpow2.f32 %v221_v4  ;;  %v55_v17 = vsub.s32 %v52_v14, %v269_v15  ;;  %v167_v36 = vunpack.c.l.s4 %v237_v35  ;;  %v24_v37 = vunpack.c.l.bf16 %v22_v28 }
   0x6   :  { %v25_v38 = vunpack.c.h.bf16 %v22_v28  ;;  %vm205_vm2 = vcmask 1043459   ;;  %vm207_vm3 = vcmask 1045509   ;;  %vm209_vm4 = vcmask 1047559  }
   0x7   :  { %v168_v53 = vunpack.c.0.s8 %v167_v36 }
   0x9   :  { %v171_v25 = vsub.s32 %v168_v53, %v269_v15 }
   0xe   :  { %v228_v5 = vpop.eup %227 }
   0xf   :  { %v230_v6 = vpop.eup %229  ;;  %v37_v7 = vadd.f32 1.0, %v228_v5 }
  0x10   :  { %v36_v8 = vadd.f32 1.0, %v230_v6 }
  0x11   :  { %231 = vrcp.f32 %v37_v7 }
  0x12   :  { %233 = vrcp.f32 %v36_v8 }
  0x1b   :  { %v232_v9 = vpop.eup %231 }
  0x1c   :  { %48 = vperm.xlu0 %226, %v232_v9   ;;  %v234_v10 = vpop.eup %233 }
  0x20   :  { %44 = vperm.xlu0 %226, %v234_v10  }
  0x9b   :  { %v49_v21 = vpop.permute.xlu0 %48 }
  0x9c   :  { %v63_v24 = vrot.slane %v49_v21, %v55_v17 }
  0x9e   :  { %v68_v26 = vmul.f32 %v63_v24, %v20_v19  ;;  %v69_v27 = vmul.f32 %v63_v24, %v21_v20 }
  0x9f   :  { %v45_v29 = vpop.permute.xlu0 %44 }
  0xa0   :  { %v72_v32 = vadd.f32 %v68_v26, %v26_v22  ;;  %v73_v33 = vadd.f32 %v69_v27, %v27_v23  ;;  %v56_v34 = vrot.slane %v45_v29, %v55_v17 }
  0xa2   :  { %76 = vst [vmem:[%s311_s3 + $0x10] sm:$0xff] %v72_v32  ;;  %77 = vst [vmem:[%s311_s3 + $0x18] sm:$0xff] %v73_v33  ;;  %v84_v39 = vcombine.high %v72_v32, %v72_v32  ;;  %v85_v40 = vcombine.high %v73_v33, %v73_v33  ;;  %v119_v41 = vsel %vm90_vm0, %v72_v32, 0.0  ;;  %v133_v42 = vsel %vm90_vm0, %v73_v33, 0.0 }
  0xa3   :  { %v120_v43 = vrot.slane %v119_v41, 4  ;;  %v134_v44 = vrot.slane %v133_v42, 4  ;;  %v66_v45 = vmul.f32 %v56_v34, %v18_v30  ;;  %v67_v46 = vmul.f32 %v56_v34, %v19_v31 }
  0xa4   :  { %v126_v47 = vsel %vm90_vm0, %v84_v39, 0.0  ;;  %v140_v48 = vsel %vm90_vm0, %v85_v40, 0.0 }
  0xa5   :  { %v121_v49 = vadd.f32 %v120_v43, %v119_v41  ;;  %v127_v50 = vrot.slane %v126_v47, 4  ;;  %v135_v51 = vadd.f32 %v134_v44, %v133_v42  ;;  %v141_v52 = vrot.slane %v140_v48, 4 }
  0xa6   :  { %v70_v54 = vadd.f32 %v66_v45, %v24_v37  ;;  %v71_v55 = vadd.f32 %v67_v46, %v25_v38 }
  0xa7   :  { %v122_v56 = vrot.slane %v121_v49, 2  ;;  %v128_v57 = vadd.f32 %v127_v50, %v126_v47  ;;  %v136_v58 = vrot.slane %v135_v51, 2  ;;  %v142_v59 = vadd.f32 %v141_v52, %v140_v48 }
  0xa8   :  { %74 = vst [vmem:[%s311_s3] sm:$0xff] %v70_v54  ;;  %75 = vst [vmem:[%s311_s3 + $0x8] sm:$0xff] %v71_v55  ;;  %v82_v60 = vcombine.high %v70_v54, %v70_v54  ;;  %v83_v61 = vcombine.high %v71_v55, %v71_v55  ;;  %v91_v62 = vsel %vm90_vm0, %v70_v54, 0.0  ;;  %v105_v63 = vsel %vm90_vm0, %v71_v55, 0.0 }
  0xa9   :  { %v123_v0 = vadd.f32 %v122_v56, %v121_v49  ;;  %v129_v1 = vrot.slane %v128_v57, 2  ;;  %v137_v2 = vadd.f32 %v136_v58, %v135_v51  ;;  %v143_v3 = vrot.slane %v142_v59, 2 }
  0xaa   :  { %v92_v4 = vrot.slane %v91_v62, 4  ;;  %v98_v5 = vsel %vm90_vm0, %v82_v60, 0.0  ;;  %v106_v6 = vrot.slane %v105_v63, 4  ;;  %v112_v7 = vsel %vm90_vm0, %v83_v61, 0.0 }
  0xab   :  { %v124_v8 = vrot.slane %v123_v0, 1  ;;  %v130_v9 = vadd.f32 %v129_v1, %v128_v57  ;;  %v138_v10 = vrot.slane %v137_v2, 1  ;;  %v144_v11 = vadd.f32 %v143_v3, %v142_v59 }
  0xac   :  { %v93_v12 = vadd.f32 %v92_v4, %v91_v62  ;;  %v99_v13 = vrot.slane %v98_v5, 4  ;;  %v107_v14 = vadd.f32 %v106_v6, %v105_v63  ;;  %v113_v16 = vrot.slane %v112_v7, 4 }
  0xad   :  { %v125_v17 = vadd.f32 %v124_v8, %v123_v0  ;;  %v131_v18 = vrot.slane %v130_v9, 1  ;;  %v139_v19 = vadd.f32 %v138_v10, %v137_v2  ;;  %v145_v20 = vrot.slane %v144_v11, 1 }
  0xae   :  { %v94_v21 = vrot.slane %v93_v12, 2  ;;  %v100_v22 = vadd.f32 %v99_v13, %v98_v5  ;;  %v108_v23 = vrot.slane %v107_v14, 2  ;;  %v114_v24 = vadd.f32 %v113_v16, %v112_v7 }
  0xaf   :  { %v132_v26 = vadd.f32 %v131_v18, %v130_v9  ;;  %v146_v27 = vadd.f32 %v145_v20, %v144_v11  ;;  %v152_v32 = vmul.f32 0.25, %v125_v17  ;;  %v154_v34 = vmul.f32 0.25, %v139_v19 }
  0xb0   :  { %v95_v28 = vadd.f32 %v94_v21, %v93_v12  ;;  %v101_v29 = vrot.slane %v100_v22, 2  ;;  %v109_v30 = vadd.f32 %v108_v23, %v107_v14  ;;  %v115_v31 = vrot.slane %v114_v24, 2 }
  0xb1   :  { %v153_v33 = vmul.f32 0.25, %v132_v26  ;;  %v155_v35 = vmul.f32 0.25, %v146_v27 }
  0xb2   :  { %v96_v36 = vrot.slane %v95_v28, 1  ;;  %v102_v37 = vadd.f32 %v101_v29, %v100_v22  ;;  %v110_v38 = vrot.slane %v109_v30, 1  ;;  %v116_v39 = vadd.f32 %v115_v31, %v114_v24 }
  0xb3   :  { %v181_v40 = vcombine.low %v152_v32, %v153_v33  ;;  %v182_v41 = vcombine.low %v154_v34, %v155_v35 }
  0xb4   :  { %v97_v42 = vadd.f32 %v96_v36, %v95_v28  ;;  %v103_v43 = vrot.slane %v102_v37, 1  ;;  %v111_v44 = vadd.f32 %v110_v38, %v109_v30  ;;  %v117_v15 = vrot.slane %v116_v39, 1 }
  0xb5   :  { %v189_v45 = vrot.slane %v181_v40, %v171_v25  ;;  %v196_v46 = vrot.slane %v182_v41, %v171_v25 }
  0xb6   :  { %v104_v47 = vadd.f32 %v103_v43, %v102_v37  ;;  %v118_v48 = vadd.f32 %v117_v15, %v116_v39  ;;  %v148_v49 = vmul.f32 0.25, %v97_v42  ;;  %v150_v51 = vmul.f32 0.25, %v111_v44 }
  0xb7   :  { %v197_v53 = vcombine.low %v189_v45, %v196_v46 }
  0xb8   :  { %v149_v50 = vmul.f32 0.25, %v104_v47  ;;  %v151_v52 = vmul.f32 0.25, %v118_v48 }
  0xb9   :  { %v202_v58 = vrot.slane %v197_v53, 7 }
  0xba   :  { %v164_v54 = vcombine.low %v148_v49, %v149_v50  ;;  %v165_v55 = vcombine.low %v150_v51, %v151_v52 }
  0xbc   :  { %v172_v56 = vrot.slane %v164_v54, %v171_v25  ;;  %v179_v57 = vrot.slane %v165_v55, %v171_v25 }
  0xbe   :  { %v180_v59 = vcombine.low %v172_v56, %v179_v57 }
  0xc0   :  { %v204_v60 = vsel %vm203_vm1, %v202_v58, %v180_v59 }
  0xc1   :  { %v206_v61 = vsel %vm205_vm2, %v202_v58, %v204_v60 }
  0xc2   :  { %v208_v62 = vsel %vm207_vm3, %v202_v58, %v206_v61 }
  0xc3   :  { %v210_v63 = vsel %vm209_vm4, %v202_v58, %v208_v62 }
  0xc4   :  { %212 = vst [vmem:[%s312_s4] sm:$0xff] %v210_v63 }

// kernel: _forward_impl.217
= control target key start
LH: loop header
LB: loop body
LE: loop exit
PB: predicated region body
PF: predicated region fallthrough
CT: control target
= control target key end

     0   :  { %s665_s1 = inlined_call_operand.vmem [shape: bf16[1,512,128], index: 1, kind: input, shape index: {}]   ;;  %s666_s0 = inlined_call_operand.vmem [shape: bf16[1,16,512], index: 0, kind: input, shape index: {}]   ;;  %s667_s2 = inlined_call_operand.vmem [shape: f32[1,1,128], index: 2, kind: input, shape index: {}]   ;;  %s668_s3 = inlined_call_operand.vmem [shape: f32[1,16,128], index: 3, kind: output, shape index: {}]  }
   0x1   :  { %v490_v0 = vld [vmem:[%s665_s1 + $0x40] sm:$0xff]   ;;  %v494_v4 = vld [vmem:[%s665_s1 + $0x48] sm:$0xff]   ;;  %v498_v8 = vld [vmem:[%s665_s1 + $0x50] sm:$0xff]  }
   0x2   :  { %v491_v1 = vld [vmem:[%s665_s1 + $0xc0] sm:$0xff]   ;;  %446 = vmatprep.subr.bf16.mxu0 %v490_v0  ;;  %v495_v5 = vld [vmem:[%s665_s1 + $0xc8] sm:$0xff]   ;;  %v499_v9 = vld [vmem:[%s665_s1 + $0xd0] sm:$0xff]  }
   0x3   :  { %v492_v2 = vld [vmem:[%s665_s1] sm:$0xff]   ;;  %468 = vmatprep.subr.bf16.mxu1 %v491_v1  ;;  %v496_v6 = vld [vmem:[%s665_s1 + $0x8] sm:$0xff]   ;;  %v500_v10 = vld [vmem:[%s665_s1 + $0x10] sm:$0xff]  }
   0x4   :  { %v493_v3 = vld [vmem:[%s665_s1 + $0x80] sm:$0xff]   ;;  %447 = vmatpush3.bf16.msra.mxu0 %v492_v2  ;;  %v497_v7 = vld [vmem:[%s665_s1 + $0x88] sm:$0xff]   ;;  %v501_v11 = vld [vmem:[%s665_s1 + $0x90] sm:$0xff]  }
   0x5   :  { %469 = vmatpush3.bf16.msra.mxu1 %v493_v3  ;;  %448 = vmatprep.subr.bf16.mxu0 %v494_v4  ;;  %v502_v12 = vld [vmem:[%s665_s1 + $0x58] sm:$0xff]   ;;  %v506_v16 = vld [vmem:[%s665_s1 + $0x60] sm:$0xff]   ;;  %v510_v20 = vld [vmem:[%s665_s1 + $0x68] sm:$0xff]  }
   0x6   :  { %470 = vmatprep.subr.bf16.mxu1 %v495_v5  ;;  %v503_v13 = vld [vmem:[%s665_s1 + $0xd8] sm:$0xff]   ;;  %v507_v17 = vld [vmem:[%s665_s1 + $0xe0] sm:$0xff]   ;;  %v511_v21 = vld [vmem:[%s665_s1 + $0xe8] sm:$0xff]  }
   0x7   :  { %v504_v14 = vld [vmem:[%s665_s1 + $0x18] sm:$0xff]   ;;  %v508_v18 = vld [vmem:[%s665_s1 + $0x20] sm:$0xff]   ;;  %v512_v22 = vld [vmem:[%s665_s1 + $0x28] sm:$0xff]  }
   0x8   :  { %449 = vmatpush3.bf16.msra.mxu0 %v496_v6  ;;  %v505_v15 = vld [vmem:[%s665_s1 + $0x98] sm:$0xff]   ;;  %v509_v19 = vld [vmem:[%s665_s1 + $0xa0] sm:$0xff]   ;;  %v513_v23 = vld [vmem:[%s665_s1 + $0xa8] sm:$0xff]  }
   0x9   :  { %471 = vmatpush3.bf16.msra.mxu1 %v497_v7  ;;  %450 = vmatprep.subr.bf16.mxu0 %v498_v8  ;;  %v514_v24 = vld [vmem:[%s665_s1 + $0x70] sm:$0xff]   ;;  %v518_v28 = vld [vmem:[%s665_s1 + $0x78] sm:$0xff]   ;;  %v445_v45 = vld [vmem:[%s667_s2] ss:$0 sm:$0xff] }
   0xa   :  { %472 = vmatprep.subr.bf16.mxu1 %v499_v9  ;;  %v515_v25 = vld [vmem:[%s665_s1 + $0xf0] sm:$0xff]   ;;  %v519_v29 = vld [vmem:[%s665_s1 + $0xf8] sm:$0xff]  }
   0xb   :  { %v516_v26 = vld [vmem:[%s665_s1 + $0x30] sm:$0xff]   ;;  %v520_v30 = vld [vmem:[%s665_s1 + $0x38] sm:$0xff]  }
   0xc   :  { %451 = vmatpush3.bf16.msra.mxu0 %v500_v10  ;;  %v517_v27 = vld [vmem:[%s665_s1 + $0xb0] sm:$0xff]   ;;  %v521_v31 = vld [vmem:[%s665_s1 + $0xb8] sm:$0xff]  }
   0xd   :  { %473 = vmatpush3.bf16.msra.mxu1 %v501_v11  ;;  %452 = vmatprep.subr.bf16.mxu0 %v502_v12  ;;  %v522_v32 = vld [vmem:[%s666_s0] ss:$16 sps:$4 sm:$0xff]   ;;  %v524_v33 = vld [vmem:[%s666_s0 + $0x4] ss:$16 sps:$4 sm:$0xff]   ;;  %v525_v34 = vld [vmem:[%s666_s0 + $0x8] ss:$16 sps:$4 sm:$0xff]  }
   0xe   :  { %474 = vmatprep.subr.bf16.mxu1 %v503_v13  ;;  %v527_v35 = vld [vmem:[%s666_s0 + $0xc] ss:$16 sps:$4 sm:$0xff]   ;;  %335 = vmatprep.mubr.bf16.mxu0 %v524_v33 }
   0xf   :  { %376 = vmatprep.mubr.bf16.mxu1 %v527_v35 }
  0x10   :  { %453 = vmatpush3.bf16.msra.mxu0 %v504_v14 }
  0x11   :  { %475 = vmatpush3.bf16.msra.mxu1 %v505_v15  ;;  %454 = vmatprep.subr.bf16.mxu0 %v506_v16 }
  0x12   :  { %476 = vmatprep.subr.bf16.mxu1 %v507_v17 }
  0x14   :  { %455 = vmatpush3.bf16.msra.mxu0 %v508_v18 }
  0x15   :  { %477 = vmatpush3.bf16.msra.mxu1 %v509_v19  ;;  %456 = vmatprep.subr.bf16.mxu0 %v510_v20 }
  0x16   :  { %478 = vmatprep.subr.bf16.mxu1 %v511_v21 }
  0x18   :  { %457 = vmatpush3.bf16.msra.mxu0 %v512_v22 }
  0x19   :  { %479 = vmatpush3.bf16.msra.mxu1 %v513_v23  ;;  %458 = vmatprep.subr.bf16.mxu0 %v514_v24 }
  0x1a   :  { %480 = vmatprep.subr.bf16.mxu1 %v515_v25 }
  0x1c   :  { %459 = vmatpush3.bf16.msra.mxu0 %v516_v26 }
  0x1d   :  { %481 = vmatpush3.bf16.msra.mxu1 %v517_v27  ;;  %460 = vmatprep.subr.bf16.mxu0 %v518_v28 }
  0x1e   :  { %482 = vmatprep.subr.bf16.mxu1 %v519_v29 }
  0x20   :  { %461 = vmatpush3.bf16.msra.mxu0 %v520_v30 }
  0x21   :  { %483 = vmatpush3.bf16.msra.mxu1 %v521_v31 }
  0x23   :  { %336 = vmatmul.mubr.bf16.vlgmr.msra.gmra.mrb[0].mxu0 %v522_v32 }
  0x24   :  { %377 = vmatmul.mubr.bf16.vlgmr.msra.gmra.mrb[0].mxu1 %v525_v34 }
  0xf6   :  { %v462_v36 = vpop.f32.mrb[0].mxu0 }
  0xf7   :  { %v484_v37 = vpop.f32.mrb[0].mxu1  ;;  %v463_v38 = vpop.f32.mrb[1].mxu0 }
  0xf8   :  { %v464_v39 = vadd.f32 %v463_v38, %v462_v36  ;;  %v485_v40 = vpop.f32.mrb[1].mxu1  ;;  %v465_v41 = vpop.f32.mrb[2].mxu0 }
  0xf9   :  { %v486_v42 = vadd.f32 %v485_v40, %v484_v37  ;;  %v487_v43 = vpop.f32.mrb[2].mxu1  ;;  %v466_v44 = vpop.f32.mrb[3].mxu0 }
  0xfa   :  { %v467_v46 = vadd.f32 %v466_v44, %v465_v41  ;;  %v488_v47 = vpop.f32.mrb[3].mxu1 }
  0xfb   :  { %v379_v48 = vadd.f32 %v486_v42, %v464_v39  ;;  %v489_v49 = vadd.f32 %v488_v47, %v487_v43 }
  0xfd   :  { %v401_v50 = vadd.f32 %v445_v45, %v379_v48  ;;  %v382_v51 = vadd.f32 %v489_v49, %v467_v46 }
  0xff   :  { %403 = vst [vmem:[%s668_s3] sm:$0xff] %v401_v50  ;;  %v402_v52 = vadd.f32 %v445_v45, %v382_v51 }
 0x101   :  { %404 = vst [vmem:[%s668_s3 + $0x8] sm:$0xff] %v402_v52 }

</bundles_post_ra>
